<compile_context>
chip_gen: v7x
topology: tpu7x:2x2x1
jax: 0.10.0
libtpu: 0.0.40
codegen_flags: <defaults>
</compile_context>

<pallas_src>
import math

import numpy as np
import jax
import jax.numpy as jnp
from jax.experimental import pallas as pl
from jax.experimental.pallas import tpu as pltpu

# ----------------------------- hyper-parameters (small) -----------------------------
D_MODEL = 32
D_HIDDEN = 64
N_LAYERS = 2
N_HEADS = 4
HEAD_DIM = D_MODEL // N_HEADS
N_TOKENS = 28          # stand-in for len(MSA_ALPHABET)
PADDING_IDX = 1        # stand-in for MSA_ALPHABET.index(MSA_PAD)
MASK_IDX = 27          # stand-in for MSA_ALPHABET.index(MASK)
MAX_POSITIONS = 64
TIMESTEPS = 100
LOGIT_PAD = 128        # lane-dense logits (padded), sliced to N_TOKENS on the host side


# ----------------------------- in-kernel helpers -----------------------------
def _ln_affine(x, ln_ref, eps):
    """LayerNorm over the last axis; ln_ref is (2, D) = [gamma; beta]."""
    g = ln_ref[0:1, :]
    b = ln_ref[1:2, :]
    mean = jnp.mean(x, axis=-1, keepdims=True)
    cent = x - mean
    var = jnp.mean(cent * cent, axis=-1, keepdims=True)
    return cent * jax.lax.rsqrt(var + eps) * g + b


def _gelu_exact(x):
    """Exact (erf-based) GELU; erf via Abramowitz & Stegun 7.1.26 (|err| < 1.5e-7),
    built only from ops with guaranteed Mosaic lowerings (exp, abs, select)."""
    z = x * 0.7071067811865475
    a = jnp.abs(z)
    t = 1.0 / (1.0 + 0.3275911 * a)
    poly = t * (0.254829592 + t * (-0.284496736 + t * (1.421413741
               + t * (-1.453152027 + t * 1.061405429))))
    erf_abs = 1.0 - poly * jnp.exp(-a * a)
    erf = jnp.where(z >= 0.0, erf_abs, -erf_abs)
    return x * 0.5 * (1.0 + erf)


def _softmax_last(s):
    m = jnp.max(s, axis=-1, keepdims=True)
    p = jnp.exp(s - m)
    l = jnp.sum(p, axis=-1, keepdims=True)
    return p * pl.reciprocal(l, approx=True)   # divide moved to the otherwise-idle EUP


# ----------------------------- Pallas kernels -----------------------------
def _prep_kernel(x_ref, pad_ref, time_ref, qadd_ref, ln_ref, o_ref):
    """emb_layer_norm_before + padding zeroing + timestep encoding add + q[:,0,:,0]+=1."""
    x = _ln_affine(x_ref[...], ln_ref, 1e-5)
    x = x * (1.0 - pad_ref[...])
    x = x + time_ref[...]
    o_ref[...] = x + qadd_ref[...]


def _axial_layer_kernel(x_ref, qmask_ref, rowkm_ref, colkm_ref, pcb_ref, pbc_ref,
                        row_ln_ref, row_wqkv_ref, row_bqkv_ref, row_wo_ref, row_bo_ref,
                        col_ln_ref, col_wqkv_ref, col_bqkv_ref, col_wo_ref, col_bo_ref,
                        ffn_ln_ref, fc1_w_ref, fc1_b_ref, fc2_w_ref, fc2_b_ref,
                        o_ref,
                        rowq_st, rowk_st, rowv_st, rowctx_st,
                        colq_st, colk_st, colv_st, colctx3_st, colctx2_st):
    """One full AxialTransformerLayer for one batch element, fully VMEM-resident.

    x_ref is (R*C, D) with rows ordered (r, c); D = H*Dh stays fused on the lane axis.
    """
    Mb, D = x_ref.shape
    C = rowkm_ref.shape[-1]
    R = Mb // C
    H = N_HEADS
    Dh = D // H

    x = x_ref[...]

    # ---------------- tied row self-attention (pre-norm residual) ----------------
    h_ln = _ln_affine(x, row_ln_ref, 1e-12)
    qkv = jnp.dot(h_ln, row_wqkv_ref[...], preferred_element_type=jnp.float32) + row_bqkv_ref[...]
    scaling = (Dh ** -0.5) / math.sqrt(R)                       # tied-row scaling
    q = qkv[:, 0:D] * scaling
    q = q * (1.0 - qmask_ref[...])                              # zero padded query positions
    k = qkv[:, D:2 * D]
    v = qkv[:, 2 * D:3 * D]

    # Stage per-head operands as (H, C, R*Dh): the sum over rows falls out of a single
    # batched contraction with K = R*Dh instead of R tiny 8x8x8 matmuls.
    for h in range(H):
        hs = slice(h * Dh, (h + 1) * Dh)
        for r in range(R):
            rs = slice(r * C, (r + 1) * C)
            ds = slice(r * Dh, (r + 1) * Dh)
            rowq_st[h, :, ds] = q[rs, hs]
            rowk_st[h, :, ds] = k[rs, hs]
            rowv_st[h, :, ds] = v[rs, hs]

    q3 = rowq_st[...]
    k3 = rowk_st[...]
    v3 = rowv_st[...]
    scores = jnp.einsum('hck,hek->hce', q3, k3, preferred_element_type=jnp.float32)   # (H, C, C)
    # key mask from the first MSA row (padding is column-aligned across rows, ESM-style batching)
    scores = jnp.where(rowkm_ref[...] > 0.5, -10000.0, scores)
    probs = _softmax_last(scores)
    ctx = jnp.einsum('hce,hek->hck', probs, v3, preferred_element_type=jnp.float32)   # (H, C, R*Dh)
    for h in range(H):
        for r in range(R):
            rowctx_st[r * C:(r + 1) * C, h * Dh:(h + 1) * Dh] = ctx[h, :, r * Dh:(r + 1) * Dh]
    x = x + jnp.dot(rowctx_st[...], row_wo_ref[...],
                    preferred_element_type=jnp.float32) + row_bo_ref[...]

    # ---------------- column self-attention ----------------
    # TODO(synk): ESM's ColumnSelfAttention has a num_rows==1 fast path; not needed (R > 1 here).
    h_ln = _ln_affine(x, col_ln_ref, 1e-12)
    # reorder rows (r, c) -> (c, r) with a constant permutation matmul (kept on the MXU,
    # avoids wrapper-side transposes between pallas_calls)
    h_cr = jnp.dot(pcb_ref[...], h_ln, preferred_element_type=jnp.float32)
    qkv = jnp.dot(h_cr, col_wqkv_ref[...], preferred_element_type=jnp.float32) + col_bqkv_ref[...]
    q = qkv[:, 0:D] * (Dh ** -0.5)
    k = qkv[:, D:2 * D]
    v = qkv[:, 2 * D:3 * D]
    for c in range(C):
        rs = slice(c * R, (c + 1) * R)
        colq_st[c, :, :] = q[rs, :]
        colk_st[c, :, :] = k[rs, :]
        colv_st[c, :, :] = v[rs, :]
    q3 = colq_st[...]
    k3 = colk_st[...]
    v3 = colv_st[...]
    cmask = colkm_ref[...]                                       # (C, 1, R): 1.0 => padded key row
    for h in range(H):
        hs = slice(h * Dh, (h + 1) * Dh)
        s = jnp.einsum('crd,csd->crs', q3[:, :, hs], k3[:, :, hs],
                       preferred_element_type=jnp.float32)       # (C, R, R), batched over columns
        s = jnp.where(cmask > 0.5, -10000.0, s)
        p = _softmax_last(s)
        colctx3_st[:, :, hs] = jnp.einsum('crs,csd->crd', p, v3[:, :, hs],
                                          preferred_element_type=jnp.float32)
    ctx3 = colctx3_st[...]
    for c in range(C):
        colctx2_st[c * R:(c + 1) * R, :] = ctx3[c, :, :]
    attn_cr = jnp.dot(colctx2_st[...], col_wo_ref[...],
                      preferred_element_type=jnp.float32) + col_bo_ref[...]
    x = x + jnp.dot(pbc_ref[...], attn_cr, preferred_element_type=jnp.float32)   # back to (r, c)

    # ---------------- feed-forward ----------------
    h_ln = _ln_affine(x, ffn_ln_ref, 1e-12)
    h1 = _gelu_exact(jnp.dot(h_ln, fc1_w_ref[...],
                             preferred_element_type=jnp.float32) + fc1_b_ref[...])
    h2 = jnp.dot(h1, fc2_w_ref[...], preferred_element_type=jnp.float32) + fc2_b_ref[...]
    o_ref[...] = x + h2


def _lm_head_kernel(x_ref, ln_after_ref, dense_w_ref, dense_b_ref, lm_ln_ref,
                    dec_w_ref, dec_b_ref, o_ref):
    """emb_layer_norm_after + RobertaLMHead (dense -> gelu -> LN -> tied decoder),
    with a lane-dense (128-wide, zero-padded) logit output."""
    x = _ln_affine(x_ref[...], ln_after_ref, 1e-5)
    x = jnp.dot(x, dense_w_ref[...], preferred_element_type=jnp.float32) + dense_b_ref[...]
    x = _gelu_exact(x)
    x = _ln_affine(x, lm_ln_ref, 1e-12)
    o_ref[...] = jnp.dot(x, dec_w_ref[...], preferred_element_type=jnp.float32) + dec_b_ref[...]


# ----------------------------- pallas_call wrappers -----------------------------
def _prep_call(x, pad, time_b, qadd, ln_before):
    B, Mb, D = x.shape
    return pl.pallas_call(
        _prep_kernel,
        out_shape=jax.ShapeDtypeStruct((B, Mb, D), jnp.float32),
        grid=(B,),
        in_specs=[
            pl.BlockSpec((None, Mb, D), lambda b: (b, 0, 0)),
            pl.BlockSpec((None, Mb, 1), lambda b: (b, 0, 0)),
            pl.BlockSpec((None, 1, D), lambda b: (b, 0, 0)),
            pl.BlockSpec((Mb, D), lambda b: (0, 0)),
            pl.BlockSpec((2, D), lambda b: (0, 0)),
        ],
        out_specs=pl.BlockSpec((None, Mb, D), lambda b: (b, 0, 0)),
        compiler_params=pltpu.CompilerParams(dimension_semantics=("parallel",)),
    )(x, pad, time_b, qadd, ln_before)


def _axial_layer_call(x, qmask, rowkm, colkm, pcb, pbc, lp):
    B, Mb, D = x.shape
    C = rowkm.shape[-1]
    R = Mb // C
    H = N_HEADS
    Dh = D // H
    Hd = D_HIDDEN

    def bspec(shape):               # per-batch blocks
        return pl.BlockSpec(shape, lambda b: (0,) * (len(shape) - 1) if False else
                            tuple([b] + [0] * (len(shape) - 1)))

    def cspec(shape):               # shared (constant) blocks
        return pl.BlockSpec(shape, lambda b: (0,) * len(shape))

    in_specs = [
        bspec((None, Mb, D)),                 # x
        bspec((None, Mb, 1)),                 # padded-query mask
        bspec((None, 1, C)),                  # row-attn key mask
        bspec((None, C, 1, R)),               # col-attn key mask
        cspec((Mb, Mb)),                      # permutation (r,c) -> (c,r)
        cspec((Mb, Mb)),                      # permutation back
        cspec((2, D)), cspec((D, 3 * D)), cspec((1, 3 * D)), cspec((D, D)), cspec((1, D)),
        cspec((2, D)), cspec((D, 3 * D)), cspec((1, 3 * D)), cspec((D, D)), cspec((1, D)),
        cspec((2, D)), cspec((D, Hd)), cspec((1, Hd)), cspec((Hd, D)), cspec((1, D)),
    ]
    scratch = [
        pltpu.VMEM((H, C, R * Dh), jnp.float32),   # row-attn staged Q
        pltpu.VMEM((H, C, R * Dh), jnp.float32),   # row-attn staged K
        pltpu.VMEM((H, C, R * Dh), jnp.float32),   # row-attn staged V
        pltpu.VMEM((Mb, D), jnp.float32),          # row-attn context, (r,c) order
        pltpu.VMEM((C, R, D), jnp.float32),        # col-attn staged Q
        pltpu.VMEM((C, R, D), jnp.float32),        # col-attn staged K
        pltpu.VMEM((C, R, D), jnp.float32),        # col-attn staged V
        pltpu.VMEM((C, R, D), jnp.float32),        # col-attn context (per head slices)
        pltpu.VMEM((Mb, D), jnp.float32),          # col-attn context, (c,r) order
    ]
    return pl.pallas_call(
        _axial_layer_kernel,
        out_shape=jax.ShapeDtypeStruct((B, Mb, D), jnp.float32),
        grid=(B,),
        in_specs=in_specs,
        out_specs=pl.BlockSpec((None, Mb, D), lambda b: (b, 0, 0)),
        scratch_shapes=scratch,
        compiler_params=pltpu.CompilerParams(dimension_semantics=("parallel",)),
    )(x, qmask, rowkm, colkm, pcb, pbc,
      lp["row_ln"], lp["row_wqkv"], lp["row_bqkv"], lp["row_wo"], lp["row_bo"],
      lp["col_ln"], lp["col_wqkv"], lp["col_bqkv"], lp["col_wo"], lp["col_bo"],
      lp["ffn_ln"], lp["fc1_w"], lp["fc1_b"], lp["fc2_w"], lp["fc2_b"])


def _lm_head_call(x, ln_after, dense_w, dense_b, lm_ln, dec_w, dec_b):
    B, Mb, D = x.shape
    V = dec_w.shape[-1]
    return pl.pallas_call(
        _lm_head_kernel,
        out_shape=jax.ShapeDtypeStruct((B, Mb, V), jnp.float32),
        grid=(B,),
        in_specs=[
            pl.BlockSpec((None, Mb, D), lambda b: (b, 0, 0)),
            pl.BlockSpec((2, D), lambda b: (0, 0)),
            pl.BlockSpec((D, D), lambda b: (0, 0)),
            pl.BlockSpec((1, D), lambda b: (0, 0)),
            pl.BlockSpec((2, D), lambda b: (0, 0)),
            pl.BlockSpec((D, V), lambda b: (0, 0)),
            pl.BlockSpec((1, V), lambda b: (0, 0)),
        ],
        out_specs=pl.BlockSpec((None, Mb, V), lambda b: (b, 0, 0)),
        compiler_params=pltpu.CompilerParams(dimension_semantics=("parallel",)),
    )(x, ln_after, dense_w, dense_b, lm_ln, dec_w, dec_b)


# ----------------------------- model glue (all under jit) -----------------------------
def time_pe_table(d_model, length):
    """PositionalEncoding1D table."""
    pe = np.zeros((length, d_model), np.float32)
    position = np.arange(0, length)[:, None].astype(np.float32)
    div_term = np.exp(np.arange(0, d_model, 2, dtype=np.float32) * -(np.log(10000.0) / d_model))
    pe[:, 0::2] = np.sin(position * div_term)
    pe[:, 1::2] = np.cos(position * div_term)
    return jnp.asarray(pe)


def _perm_matrices(R, C):
    """Row-permutation matrices mapping (r, c)-ordered rows to (c, r)-order and back."""
    M = R * C
    p = np.zeros((M, M), np.float32)
    for r in range(R):
        for c in range(C):
            p[c * R + r, r * C + c] = 1.0
    return jnp.asarray(p), jnp.asarray(p.T)


@jax.jit
def msa_transformer_time_forward(params, tokens, timesteps):
    B, R, C = tokens.shape
    D = D_MODEL
    Mb = R * C
    padding_mask = (tokens == PADDING_IDX)                                 # (B, R, C)

    # token embedding + learned positional embedding (gathers stay in XLA, fused under jit)
    x = jnp.take(params["embed_tokens"], tokens, axis=0)                   # (B, R, C, D)
    flat = tokens.reshape(B * R, C)
    pm = (flat != PADDING_IDX).astype(jnp.int32)
    positions = jnp.cumsum(pm, axis=1) * pm + PADDING_IDX
    x = x + jnp.take(params["embed_positions"], positions, axis=0).reshape(B, R, C, D)

    x2 = x.reshape(B, Mb, D)                                               # rows ordered (r, c)
    padf = padding_mask.astype(jnp.float32).reshape(B, Mb, 1)
    time_b = jnp.take(params["time_pe"], timesteps, axis=0).reshape(B, 1, D)
    qadd = jnp.zeros((Mb, D), jnp.float32).at[0:C, 0].set(1.0)             # q[:, 0, :, 0] += 1

    # LN-before + padding zeroing + timestep add + q add (one fused kernel)
    x2 = _prep_call(x2, padf, time_b, qadd, params["ln_before"])

    # masks & permutations shared across layers
    rowkm = padding_mask[:, 0, :].astype(jnp.float32).reshape(B, 1, C)
    colkm = jnp.transpose(padding_mask, (0, 2, 1)).astype(jnp.float32).reshape(B, C, 1, R)
    pcb, pbc = _perm_matrices(R, C)

    # one fused pallas_call per axial transformer layer
    for lp in params["layers"]:
        x2 = _axial_layer_call(x2, padf, rowkm, colkm, pcb, pbc, lp)

    # LM head with weight tying; logits computed into a 128-wide lane-dense slab
    dec_w = jnp.zeros((D, LOGIT_PAD), jnp.float32).at[:, :N_TOKENS].set(params["embed_tokens"].T)
    dec_b = jnp.zeros((1, LOGIT_PAD), jnp.float32).at[0, :N_TOKENS].set(params["lm_bias"])
    logits = _lm_head_call(x2, params["ln_after"], params["lm_dense_w"], params["lm_dense_b"],
                           params["lm_ln"], dec_w, dec_b)
    return logits[:, :, :N_TOKENS].reshape(B, R, C, N_TOKENS)


# ----------------------------- deterministic parameter init -----------------------------
def init_params(key):
    kit = iter(jax.random.split(key, 16 + N_LAYERS * 16))

    def w(shape, scale=0.02):
        return scale * jax.random.normal(next(kit), shape, jnp.float32)

    def ln(d):
        return jnp.stack([jnp.ones((d,), jnp.float32), jnp.zeros((d,), jnp.float32)])  # (2, d)

    D, Hd = D_MODEL, D_HIDDEN
    embed_tokens = w((N_TOKENS, D)).at[MASK_IDX].set(0.0)        # nn.Embedding(padding_idx=mask_idx)
    embed_positions = w((MAX_POSITIONS + PADDING_IDX + 1, D)).at[PADDING_IDX].set(0.0)
    params = dict(
        embed_tokens=embed_tokens,
        embed_positions=embed_positions,
        time_pe=time_pe_table(D, TIMESTEPS),
        ln_before=ln(D),
        ln_after=ln(D),
        lm_dense_w=w((D, D)), lm_dense_b=jnp.zeros((1, D), jnp.float32),
        lm_ln=ln(D),
        lm_bias=jnp.zeros((N_TOKENS,), jnp.float32),
        layers=[],
    )
    for _ in range(N_LAYERS):
        lp = dict(
            row_ln=ln(D),
            row_wqkv=jnp.concatenate([w((D, D)), w((D, D)), w((D, D))], axis=1),
            row_bqkv=jnp.zeros((1, 3 * D), jnp.float32),
            row_wo=w((D, D)), row_bo=jnp.zeros((1, D), jnp.float32),
            col_ln=ln(D),
            col_wqkv=jnp.concatenate([w((D, D)), w((D, D)), w((D, D))], axis=1),
            col_bqkv=jnp.zeros((1, 3 * D), jnp.float32),
            col_wo=w((D, D)), col_bo=jnp.zeros((1, D), jnp.float32),
            ffn_ln=ln(D),
            fc1_w=w((D, Hd)), fc1_b=jnp.zeros((1, Hd), jnp.float32),
            fc2_w=w((Hd, D)), fc2_b=jnp.zeros((1, D), jnp.float32),
        )
        params["layers"].append(lp)
    return params


# ----------------------------- main -----------------------------
if __name__ == "__main__":
    key = jax.random.PRNGKey(0)
    pkey, tkey, skey = jax.random.split(key, 3)
    params = init_params(pkey)

    B, R, C = 2, 4, 8
    tokens = jax.random.randint(tkey, (B, R, C), 0, N_TOKENS, dtype=jnp.int32)
    tokens = jnp.where(tokens == PADDING_IDX, 0, tokens)    # remove accidental pads
    tokens = tokens.at[1, :, -2:].set(PADDING_IDX)           # pad last two columns of batch 1
    timesteps = jax.random.randint(skey, (B,), 0, TIMESTEPS, dtype=jnp.int32)

    logits = msa_transformer_time_forward(params, tokens, timesteps)
    logits = jax.block_until_ready(logits)

    assert logits.shape == (B, R, C, N_TOKENS), logits.shape
    assert bool(jnp.all(jnp.isfinite(logits)))
    print("KERNEL_OK")
</pallas_src>

<mosaic_0001>
module attributes {stable_mosaic.version = 11 : i64} {
  func.func @_lm_head_kernel(%arg0: i32, %arg1: memref<1x32x32xf32, #tpu.memory_space<vmem>>, %arg2: memref<2x32xf32, #tpu.memory_space<vmem>>, %arg3: memref<32x32xf32, #tpu.memory_space<vmem>>, %arg4: memref<1x32xf32, #tpu.memory_space<vmem>>, %arg5: memref<2x32xf32, #tpu.memory_space<vmem>>, %arg6: memref<32x128xf32, #tpu.memory_space<vmem>>, %arg7: memref<1x128xf32, #tpu.memory_space<vmem>>, %arg8: memref<1x32x128xf32, #tpu.memory_space<vmem>>) attributes {dimension_semantics = [#tpu.dimension_semantics<parallel>], iteration_bounds = array<i64: 2>, scalar_prefetch = 0 : i64, scratch_operands = 0 : i64, tpu.core_type = #tpu.core_type<tc>, window_params = [{transform_indices = @transform_0, window_bounds = array<i64: 1, 32, 32>}, {pipeline_mode = #tpu.pipeline_mode<synchronous>, transform_indices = @transform_1, window_bounds = array<i64: 2, 32>}, {pipeline_mode = #tpu.pipeline_mode<synchronous>, transform_indices = @transform_2, window_bounds = array<i64: 32, 32>}, {pipeline_mode = #tpu.pipeline_mode<synchronous>, transform_indices = @transform_3, window_bounds = array<i64: 1, 32>}, {pipeline_mode = #tpu.pipeline_mode<synchronous>, transform_indices = @transform_4, window_bounds = array<i64: 2, 32>}, {pipeline_mode = #tpu.pipeline_mode<synchronous>, transform_indices = @transform_5, window_bounds = array<i64: 32, 128>}, {pipeline_mode = #tpu.pipeline_mode<synchronous>, transform_indices = @transform_6, window_bounds = array<i64: 1, 128>}, {transform_indices = @transform_7, window_bounds = array<i64: 1, 32, 128>}]} {
    %c0 = arith.constant 0 : index
    %c0_0 = arith.constant 0 : index
    %c0_1 = arith.constant 0 : index
    %0 = vector.load %arg1[%c0, %c0_0, %c0_1] : memref<1x32x32xf32, #tpu.memory_space<vmem>>, vector<1x32x32xf32>
    %1 = vector.shape_cast %0 : vector<1x32x32xf32> to vector<32x32xf32>
    %c0_2 = arith.constant 0 : index
    %c0_3 = arith.constant 0 : index
    %2 = vector.load %arg2[%c0_2, %c0_3] : memref<2x32xf32, #tpu.memory_space<vmem>>, vector<1x32xf32>
    %c1 = arith.constant 1 : index
    %c0_4 = arith.constant 0 : index
    %3 = vector.load %arg2[%c1, %c0_4] : memref<2x32xf32, #tpu.memory_space<vmem>>, vector<1x32xf32>
    %cst = arith.constant dense<0.000000e+00> : vector<32xf32>
    %4 = vector.multi_reduction <add>, %1, %cst [1] : vector<32x32xf32> to vector<32xf32>
    %5 = vector.shape_cast %4 : vector<32xf32> to vector<32x1xf32>
    %cst_5 = arith.constant 3.200000e+01 : f32
    %6 = vector.broadcast %cst_5 : f32 to vector<32x1xf32>
    %7 = arith.divf %5, %6 : vector<32x1xf32>
    %8 = vector.broadcast %7 : vector<32x1xf32> to vector<32x32xf32>
    %9 = arith.subf %1, %8 : vector<32x32xf32>
    %10 = arith.mulf %9, %9 : vector<32x32xf32>
    %cst_6 = arith.constant dense<0.000000e+00> : vector<32xf32>
    %11 = vector.multi_reduction <add>, %10, %cst_6 [1] : vector<32x32xf32> to vector<32xf32>
    %12 = vector.shape_cast %11 : vector<32xf32> to vector<32x1xf32>
    %cst_7 = arith.constant 3.200000e+01 : f32
    %13 = vector.broadcast %cst_7 : f32 to vector<32x1xf32>
    %14 = arith.divf %12, %13 : vector<32x1xf32>
    %cst_8 = arith.constant 9.99999974E-6 : f32
    %15 = vector.broadcast %cst_8 : f32 to vector<32x1xf32>
    %16 = arith.addf %14, %15 : vector<32x1xf32>
    %17 = math.rsqrt %16 : vector<32x1xf32>
    %18 = vector.broadcast %17 : vector<32x1xf32> to vector<32x32xf32>
    %19 = arith.mulf %9, %18 : vector<32x32xf32>
    %20 = vector.broadcast %2 : vector<1x32xf32> to vector<32x32xf32>
    %21 = arith.mulf %19, %20 : vector<32x32xf32>
    %22 = vector.broadcast %3 : vector<1x32xf32> to vector<32x32xf32>
    %23 = arith.addf %21, %22 : vector<32x32xf32>
    %c0_9 = arith.constant 0 : index
    %c0_10 = arith.constant 0 : index
    %24 = vector.load %arg3[%c0_9, %c0_10] : memref<32x32xf32, #tpu.memory_space<vmem>>, vector<32x32xf32>
    %cst_11 = arith.constant dense<0.000000e+00> : vector<32x32xf32>
    %25 = tpu.matmul %23, %24, %cst_11 {dimension_numbers = #tpu.dot_dimension_numbers<[1], [0], [0], [1], [0, 0, 1, 1], [], []>} : vector<32x32xf32>, vector<32x32xf32>, vector<32x32xf32> -> vector<32x32xf32>
    %c0_12 = arith.constant 0 : index
    %c0_13 = arith.constant 0 : index
    %26 = vector.load %arg4[%c0_12, %c0_13] : memref<1x32xf32, #tpu.memory_space<vmem>>, vector<1x32xf32>
    %27 = vector.broadcast %26 : vector<1x32xf32> to vector<32x32xf32>
    %28 = arith.addf %25, %27 : vector<32x32xf32>
    %cst_14 = arith.constant 0.707106769 : f32
    %29 = vector.broadcast %cst_14 : f32 to vector<32x32xf32>
    %30 = arith.mulf %28, %29 : vector<32x32xf32>
    %31 = math.absf %30 : vector<32x32xf32>
    %cst_15 = arith.constant 0.327591091 : f32
    %32 = vector.broadcast %cst_15 : f32 to vector<32x32xf32>
    %33 = arith.mulf %32, %31 : vector<32x32xf32>
    %cst_16 = arith.constant 1.000000e+00 : f32
    %34 = vector.broadcast %cst_16 : f32 to vector<32x32xf32>
    %35 = arith.addf %34, %33 : vector<32x32xf32>
    %cst_17 = arith.constant 1.000000e+00 : f32
    %36 = vector.broadcast %cst_17 : f32 to vector<32x32xf32>
    %37 = arith.divf %36, %35 : vector<32x32xf32>
    %cst_18 = arith.constant 1.06140542 : f32
    %38 = vector.broadcast %cst_18 : f32 to vector<32x32xf32>
    %39 = arith.mulf %37, %38 : vector<32x32xf32>
    %cst_19 = arith.constant -1.45315206 : f32
    %40 = vector.broadcast %cst_19 : f32 to vector<32x32xf32>
    %41 = arith.addf %40, %39 : vector<32x32xf32>
    %42 = arith.mulf %37, %41 : vector<32x32xf32>
    %cst_20 = arith.constant 1.42141378 : f32
    %43 = vector.broadcast %cst_20 : f32 to vector<32x32xf32>
    %44 = arith.addf %43, %42 : vector<32x32xf32>
    %45 = arith.mulf %37, %44 : vector<32x32xf32>
    %cst_21 = arith.constant -0.284496725 : f32
    %46 = vector.broadcast %cst_21 : f32 to vector<32x32xf32>
    %47 = arith.addf %46, %45 : vector<32x32xf32>
    %48 = arith.mulf %37, %47 : vector<32x32xf32>
    %cst_22 = arith.constant 0.254829586 : f32
    %49 = vector.broadcast %cst_22 : f32 to vector<32x32xf32>
    %50 = arith.addf %49, %48 : vector<32x32xf32>
    %51 = arith.mulf %37, %50 : vector<32x32xf32>
    %cst_23 = arith.constant 0.000000e+00 : f32
    %52 = vector.broadcast %cst_23 : f32 to vector<32x32xf32>
    %53 = arith.subf %52, %31 : vector<32x32xf32>
    %54 = arith.mulf %53, %31 : vector<32x32xf32>
    %55 = math.exp %54 : vector<32x32xf32>
    %56 = arith.mulf %51, %55 : vector<32x32xf32>
    %cst_24 = arith.constant 1.000000e+00 : f32
    %57 = vector.broadcast %cst_24 : f32 to vector<32x32xf32>
    %58 = arith.subf %57, %56 : vector<32x32xf32>
    %cst_25 = arith.constant 0.000000e+00 : f32
    %59 = vector.broadcast %cst_25 : f32 to vector<32x32xf32>
    %60 = arith.cmpf oge, %30, %59 : vector<32x32xf32>
    %cst_26 = arith.constant 0.000000e+00 : f32
    %61 = vector.broadcast %cst_26 : f32 to vector<32x32xf32>
    %62 = arith.subf %61, %58 : vector<32x32xf32>
    %63 = arith.select %60, %58, %62 : vector<32x32xi1>, vector<32x32xf32>
    %cst_27 = arith.constant 5.000000e-01 : f32
    %64 = vector.broadcast %cst_27 : f32 to vector<32x32xf32>
    %65 = arith.mulf %28, %64 : vector<32x32xf32>
    %cst_28 = arith.constant 1.000000e+00 : f32
    %66 = vector.broadcast %cst_28 : f32 to vector<32x32xf32>
    %67 = arith.addf %66, %63 : vector<32x32xf32>
    %68 = arith.mulf %65, %67 : vector<32x32xf32>
    %c0_29 = arith.constant 0 : index
    %c0_30 = arith.constant 0 : index
    %69 = vector.load %arg5[%c0_29, %c0_30] : memref<2x32xf32, #tpu.memory_space<vmem>>, vector<1x32xf32>
    %c1_31 = arith.constant 1 : index
    %c0_32 = arith.constant 0 : index
    %70 = vector.load %arg5[%c1_31, %c0_32] : memref<2x32xf32, #tpu.memory_space<vmem>>, vector<1x32xf32>
    %cst_33 = arith.constant dense<0.000000e+00> : vector<32xf32>
    %71 = vector.multi_reduction <add>, %68, %cst_33 [1] : vector<32x32xf32> to vector<32xf32>
    %72 = vector.shape_cast %71 : vector<32xf32> to vector<32x1xf32>
    %cst_34 = arith.constant 3.200000e+01 : f32
    %73 = vector.broadcast %cst_34 : f32 to vector<32x1xf32>
    %74 = arith.divf %72, %73 : vector<32x1xf32>
    %75 = vector.broadcast %74 : vector<32x1xf32> to vector<32x32xf32>
    %76 = arith.subf %68, %75 : vector<32x32xf32>
    %77 = arith.mulf %76, %76 : vector<32x32xf32>
    %cst_35 = arith.constant dense<0.000000e+00> : vector<32xf32>
    %78 = vector.multi_reduction <add>, %77, %cst_35 [1] : vector<32x32xf32> to vector<32xf32>
    %79 = vector.shape_cast %78 : vector<32xf32> to vector<32x1xf32>
    %cst_36 = arith.constant 3.200000e+01 : f32
    %80 = vector.broadcast %cst_36 : f32 to vector<32x1xf32>
    %81 = arith.divf %79, %80 : vector<32x1xf32>
    %cst_37 = arith.constant 9.99999996E-13 : f32
    %82 = vector.broadcast %cst_37 : f32 to vector<32x1xf32>
    %83 = arith.addf %81, %82 : vector<32x1xf32>
    %84 = math.rsqrt %83 : vector<32x1xf32>
    %85 = vector.broadcast %84 : vector<32x1xf32> to vector<32x32xf32>
    %86 = arith.mulf %76, %85 : vector<32x32xf32>
    %87 = vector.broadcast %69 : vector<1x32xf32> to vector<32x32xf32>
    %88 = arith.mulf %86, %87 : vector<32x32xf32>
    %89 = vector.broadcast %70 : vector<1x32xf32> to vector<32x32xf32>
    %90 = arith.addf %88, %89 : vector<32x32xf32>
    %c0_38 = arith.constant 0 : index
    %c0_39 = arith.constant 0 : index
    %91 = vector.load %arg6[%c0_38, %c0_39] : memref<32x128xf32, #tpu.memory_space<vmem>>, vector<32x128xf32>
    %cst_40 = arith.constant dense<0.000000e+00> : vector<32x128xf32>
    %92 = tpu.matmul %90, %91, %cst_40 {dimension_numbers = #tpu.dot_dimension_numbers<[1], [0], [0], [1], [0, 0, 1, 1], [], []>} : vector<32x32xf32>, vector<32x128xf32>, vector<32x128xf32> -> vector<32x128xf32>
    %c0_41 = arith.constant 0 : index
    %c0_42 = arith.constant 0 : index
    %93 = vector.load %arg7[%c0_41, %c0_42] : memref<1x128xf32, #tpu.memory_space<vmem>>, vector<1x128xf32>
    %94 = vector.broadcast %93 : vector<1x128xf32> to vector<32x128xf32>
    %95 = arith.addf %92, %94 : vector<32x128xf32>
    %c0_43 = arith.constant 0 : index
    %c0_44 = arith.constant 0 : index
    %c0_45 = arith.constant 0 : index
    %96 = vector.load %arg8[%c0_43, %c0_44, %c0_45] : memref<1x32x128xf32, #tpu.memory_space<vmem>>, vector<1x32x128xf32>
    %97 = vector.shape_cast %96 : vector<1x32x128xf32> to vector<32x128xf32>
    %98 = vector.shape_cast %95 : vector<32x128xf32> to vector<1x32x128xf32>
    tpu.vector_store %arg8[%c0_43, %c0_44, %c0_45], %98 {strides = array<i32>} : memref<1x32x128xf32, #tpu.memory_space<vmem>>, vector<1x32x128xf32>,
    return
  }
  func.func @transform_0(%arg0: i32) -> (i32, i32, i32) {
    %c0_i32 = arith.constant 0 : i32
    %c0_i32_0 = arith.constant 0 : i32
    %c0_i32_1 = arith.constant 0 : i32
    return %arg0, %c0_i32, %c0_i32_0 : i32, i32, i32
  }
  func.func @transform_1(%arg0: i32) -> (i32, i32) {
    %c0_i32 = arith.constant 0 : i32
    %c0_i32_0 = arith.constant 0 : i32
    %c0_i32_1 = arith.constant 0 : i32
    return %c0_i32, %c0_i32_0 : i32, i32
  }
  func.func @transform_2(%arg0: i32) -> (i32, i32) {
    %c0_i32 = arith.constant 0 : i32
    %c0_i32_0 = arith.constant 0 : i32
    %c0_i32_1 = arith.constant 0 : i32
    return %c0_i32, %c0_i32_0 : i32, i32
  }
  func.func @transform_3(%arg0: i32) -> (i32, i32) {
    %c0_i32 = arith.constant 0 : i32
    %c0_i32_0 = arith.constant 0 : i32
    %c0_i32_1 = arith.constant 0 : i32
    return %c0_i32, %c0_i32_0 : i32, i32
  }
  func.func @transform_4(%arg0: i32) -> (i32, i32) {
    %c0_i32 = arith.constant 0 : i32
    %c0_i32_0 = arith.constant 0 : i32
    %c0_i32_1 = arith.constant 0 : i32
    return %c0_i32, %c0_i32_0 : i32, i32
  }
  func.func @transform_5(%arg0: i32) -> (i32, i32) {
    %c0_i32 = arith.constant 0 : i32
    %c0_i32_0 = arith.constant 0 : i32
    %c0_i32_1 = arith.constant 0 : i32
    return %c0_i32, %c0_i32_0 : i32, i32
  }
  func.func @transform_6(%arg0: i32) -> (i32, i32) {
    %c0_i32 = arith.constant 0 : i32
    %c0_i32_0 = arith.constant 0 : i32
    %c0_i32_1 = arith.constant 0 : i32
    return %c0_i32, %c0_i32_0 : i32, i32
  }
  func.func @transform_7(%arg0: i32) -> (i32, i32, i32) {
    %c0_i32 = arith.constant 0 : i32
    %c0_i32_0 = arith.constant 0 : i32
    %c0_i32_1 = arith.constant 0 : i32
    return %arg0, %c0_i32, %c0_i32_0 : i32, i32, i32
  }
}

module attributes {stable_mosaic.version = 11 : i64} {
  func.func @_prep_kernel(%arg0: i32, %arg1: memref<1x32x32xf32, #tpu.memory_space<vmem>>, %arg2: memref<1x32x1xf32, #tpu.memory_space<vmem>>, %arg3: memref<1x1x32xf32, #tpu.memory_space<vmem>>, %arg4: memref<32x32xf32, #tpu.memory_space<vmem>>, %arg5: memref<2x32xf32, #tpu.memory_space<vmem>>, %arg6: memref<1x32x32xf32, #tpu.memory_space<vmem>>) attributes {dimension_semantics = [#tpu.dimension_semantics<parallel>], iteration_bounds = array<i64: 2>, scalar_prefetch = 0 : i64, scratch_operands = 0 : i64, tpu.core_type = #tpu.core_type<tc>, window_params = [{transform_indices = @transform_0, window_bounds = array<i64: 1, 32, 32>}, {transform_indices = @transform_1, window_bounds = array<i64: 1, 32, 1>}, {transform_indices = @transform_2, window_bounds = array<i64: 1, 1, 32>}, {pipeline_mode = #tpu.pipeline_mode<synchronous>, transform_indices = @transform_3, window_bounds = array<i64: 32, 32>}, {pipeline_mode = #tpu.pipeline_mode<synchronous>, transform_indices = @transform_4, window_bounds = array<i64: 2, 32>}, {transform_indices = @transform_5, window_bounds = array<i64: 1, 32, 32>}]} {
    %c0 = arith.constant 0 : index
    %c0_0 = arith.constant 0 : index
    %c0_1 = arith.constant 0 : index
    %0 = vector.load %arg1[%c0, %c0_0, %c0_1] : memref<1x32x32xf32, #tpu.memory_space<vmem>>, vector<1x32x32xf32>
    %1 = vector.shape_cast %0 : vector<1x32x32xf32> to vector<32x32xf32>
    %c0_2 = arith.constant 0 : index
    %c0_3 = arith.constant 0 : index
    %2 = vector.load %arg5[%c0_2, %c0_3] : memref<2x32xf32, #tpu.memory_space<vmem>>, vector<1x32xf32>
    %c1 = arith.constant 1 : index
    %c0_4 = arith.constant 0 : index
    %3 = vector.load %arg5[%c1, %c0_4] : memref<2x32xf32, #tpu.memory_space<vmem>>, vector<1x32xf32>
    %cst = arith.constant dense<0.000000e+00> : vector<32xf32>
    %4 = vector.multi_reduction <add>, %1, %cst [1] : vector<32x32xf32> to vector<32xf32>
    %5 = vector.shape_cast %4 : vector<32xf32> to vector<32x1xf32>
    %cst_5 = arith.constant 3.200000e+01 : f32
    %6 = vector.broadcast %cst_5 : f32 to vector<32x1xf32>
    %7 = arith.divf %5, %6 : vector<32x1xf32>
    %8 = vector.broadcast %7 : vector<32x1xf32> to vector<32x32xf32>
    %9 = arith.subf %1, %8 : vector<32x32xf32>
    %10 = arith.mulf %9, %9 : vector<32x32xf32>
    %cst_6 = arith.constant dense<0.000000e+00> : vector<32xf32>
    %11 = vector.multi_reduction <add>, %10, %cst_6 [1] : vector<32x32xf32> to vector<32xf32>
    %12 = vector.shape_cast %11 : vector<32xf32> to vector<32x1xf32>
    %cst_7 = arith.constant 3.200000e+01 : f32
    %13 = vector.broadcast %cst_7 : f32 to vector<32x1xf32>
    %14 = arith.divf %12, %13 : vector<32x1xf32>
    %cst_8 = arith.constant 9.99999974E-6 : f32
    %15 = vector.broadcast %cst_8 : f32 to vector<32x1xf32>
    %16 = arith.addf %14, %15 : vector<32x1xf32>
    %17 = math.rsqrt %16 : vector<32x1xf32>
    %18 = vector.broadcast %17 : vector<32x1xf32> to vector<32x32xf32>
    %19 = arith.mulf %9, %18 : vector<32x32xf32>
    %20 = vector.broadcast %2 : vector<1x32xf32> to vector<32x32xf32>
    %21 = arith.mulf %19, %20 : vector<32x32xf32>
    %22 = vector.broadcast %3 : vector<1x32xf32> to vector<32x32xf32>
    %23 = arith.addf %21, %22 : vector<32x32xf32>
    %c0_9 = arith.constant 0 : index
    %c0_10 = arith.constant 0 : index
    %c0_11 = arith.constant 0 : index
    %24 = vector.load %arg2[%c0_9, %c0_10, %c0_11] : memref<1x32x1xf32, #tpu.memory_space<vmem>>, vector<1x32x1xf32>
    %25 = vector.shape_cast %24 : vector<1x32x1xf32> to vector<32x1xf32>
    %cst_12 = arith.constant 1.000000e+00 : f32
    %26 = vector.broadcast %cst_12 : f32 to vector<32x1xf32>
    %27 = arith.subf %26, %25 : vector<32x1xf32>
    %28 = vector.broadcast %27 : vector<32x1xf32> to vector<32x32xf32>
    %29 = arith.mulf %23, %28 : vector<32x32xf32>
    %c0_13 = arith.constant 0 : index
    %c0_14 = arith.constant 0 : index
    %c0_15 = arith.constant 0 : index
    %30 = vector.load %arg3[%c0_13, %c0_14, %c0_15] : memref<1x1x32xf32, #tpu.memory_space<vmem>>, vector<1x1x32xf32>
    %31 = vector.shape_cast %30 : vector<1x1x32xf32> to vector<1x32xf32>
    %32 = vector.broadcast %31 : vector<1x32xf32> to vector<32x32xf32>
    %33 = arith.addf %29, %32 : vector<32x32xf32>
    %c0_16 = arith.constant 0 : index
    %c0_17 = arith.constant 0 : index
    %34 = vector.load %arg4[%c0_16, %c0_17] : memref<32x32xf32, #tpu.memory_space<vmem>>, vector<32x32xf32>
    %35 = arith.addf %33, %34 : vector<32x32xf32>
    %c0_18 = arith.constant 0 : index
    %c0_19 = arith.constant 0 : index
    %c0_20 = arith.constant 0 : index
    %36 = vector.load %arg6[%c0_18, %c0_19, %c0_20] : memref<1x32x32xf32, #tpu.memory_space<vmem>>, vector<1x32x32xf32>
    %37 = vector.shape_cast %36 : vector<1x32x32xf32> to vector<32x32xf32>
    %38 = vector.shape_cast %35 : vector<32x32xf32> to vector<1x32x32xf32>
    tpu.vector_store %arg6[%c0_18, %c0_19, %c0_20], %38 {strides = array<i32>} : memref<1x32x32xf32, #tpu.memory_space<vmem>>, vector<1x32x32xf32>,
    return
  }
  func.func @transform_0(%arg0: i32) -> (i32, i32, i32) {
    %c0_i32 = arith.constant 0 : i32
    %c0_i32_0 = arith.constant 0 : i32
    %c0_i32_1 = arith.constant 0 : i32
    return %arg0, %c0_i32, %c0_i32_0 : i32, i32, i32
  }
  func.func @transform_1(%arg0: i32) -> (i32, i32, i32) {
    %c0_i32 = arith.constant 0 : i32
    %c0_i32_0 = arith.constant 0 : i32
    %c0_i32_1 = arith.constant 0 : i32
    return %arg0, %c0_i32, %c0_i32_0 : i32, i32, i32
  }
  func.func @transform_2(%arg0: i32) -> (i32, i32, i32) {
    %c0_i32 = arith.constant 0 : i32
    %c0_i32_0 = arith.constant 0 : i32
    %c0_i32_1 = arith.constant 0 : i32
    return %arg0, %c0_i32, %c0_i32_0 : i32, i32, i32
  }
  func.func @transform_3(%arg0: i32) -> (i32, i32) {
    %c0_i32 = arith.constant 0 : i32
    %c0_i32_0 = arith.constant 0 : i32
    %c0_i32_1 = arith.constant 0 : i32
    return %c0_i32, %c0_i32_0 : i32, i32
  }
  func.func @transform_4(%arg0: i32) -> (i32, i32) {
    %c0_i32 = arith.constant 0 : i32
    %c0_i32_0 = arith.constant 0 : i32
    %c0_i32_1 = arith.constant 0 : i32
    return %c0_i32, %c0_i32_0 : i32, i32
  }
  func.func @transform_5(%arg0: i32) -> (i32, i32, i32) {
    %c0_i32 = arith.constant 0 : i32
    %c0_i32_0 = arith.constant 0 : i32
    %c0_i32_1 = arith.constant 0 : i32
    return %arg0, %c0_i32, %c0_i32_0 : i32, i32, i32
  }
}

module attributes {stable_mosaic.version = 11 : i64} {
  func.func @_axial_layer_kernel(%arg0: i32, %arg1: memref<1x32x32xf32, #tpu.memory_space<vmem>>, %arg2: memref<1x32x1xf32, #tpu.memory_space<vmem>>, %arg3: memref<1x1x8xf32, #tpu.memory_space<vmem>>, %arg4: memref<1x8x1x4xf32, #tpu.memory_space<vmem>>, %arg5: memref<32x32xf32, #tpu.memory_space<vmem>>, %arg6: memref<32x32xf32, #tpu.memory_space<vmem>>, %arg7: memref<2x32xf32, #tpu.memory_space<vmem>>, %arg8: memref<32x96xf32, #tpu.memory_space<vmem>>, %arg9: memref<1x96xf32, #tpu.memory_space<vmem>>, %arg10: memref<32x32xf32, #tpu.memory_space<vmem>>, %arg11: memref<1x32xf32, #tpu.memory_space<vmem>>, %arg12: memref<2x32xf32, #tpu.memory_space<vmem>>, %arg13: memref<32x96xf32, #tpu.memory_space<vmem>>, %arg14: memref<1x96xf32, #tpu.memory_space<vmem>>, %arg15: memref<32x32xf32, #tpu.memory_space<vmem>>, %arg16: memref<1x32xf32, #tpu.memory_space<vmem>>, %arg17: memref<2x32xf32, #tpu.memory_space<vmem>>, %arg18: memref<32x64xf32, #tpu.memory_space<vmem>>, %arg19: memref<1x64xf32, #tpu.memory_space<vmem>>, %arg20: memref<64x32xf32, #tpu.memory_space<vmem>>, %arg21: memref<1x32xf32, #tpu.memory_space<vmem>>, %arg22: memref<1x32x32xf32, #tpu.memory_space<vmem>>, %arg23: memref<4x8x32xf32, #tpu.memory_space<vmem>>, %arg24: memref<4x8x32xf32, #tpu.memory_space<vmem>>, %arg25: memref<4x8x32xf32, #tpu.memory_space<vmem>>, %arg26: memref<32x32xf32, #tpu.memory_space<vmem>>, %arg27: memref<8x4x32xf32, #tpu.memory_space<vmem>>, %arg28: memref<8x4x32xf32, #tpu.memory_space<vmem>>, %arg29: memref<8x4x32xf32, #tpu.memory_space<vmem>>, %arg30: memref<8x4x32xf32, #tpu.memory_space<vmem>>, %arg31: memref<32x32xf32, #tpu.memory_space<vmem>>) attributes {dimension_semantics = [#tpu.dimension_semantics<parallel>], iteration_bounds = array<i64: 2>, scalar_prefetch = 0 : i64, scratch_operands = 9 : i64, tpu.core_type = #tpu.core_type<tc>, window_params = [{transform_indices = @transform_0, window_bounds = array<i64: 1, 32, 32>}, {transform_indices = @transform_1, window_bounds = array<i64: 1, 32, 1>}, {transform_indices = @transform_2, window_bounds = array<i64: 1, 1, 8>}, {transform_indices = @transform_3, window_bounds = array<i64: 1, 8, 1, 4>}, {pipeline_mode = #tpu.pipeline_mode<synchronous>, transform_indices = @transform_4, window_bounds = array<i64: 32, 32>}, {pipeline_mode = #tpu.pipeline_mode<synchronous>, transform_indices = @transform_5, window_bounds = array<i64: 32, 32>}, {pipeline_mode = #tpu.pipeline_mode<synchronous>, transform_indices = @transform_6, window_bounds = array<i64: 2, 32>}, {pipeline_mode = #tpu.pipeline_mode<synchronous>, transform_indices = @transform_7, window_bounds = array<i64: 32, 96>}, {pipeline_mode = #tpu.pipeline_mode<synchronous>, transform_indices = @transform_8, window_bounds = array<i64: 1, 96>}, {pipeline_mode = #tpu.pipeline_mode<synchronous>, transform_indices = @transform_9, window_bounds = array<i64: 32, 32>}, {pipeline_mode = #tpu.pipeline_mode<synchronous>, transform_indices = @transform_10, window_bounds = array<i64: 1, 32>}, {pipeline_mode = #tpu.pipeline_mode<synchronous>, transform_indices = @transform_11, window_bounds = array<i64: 2, 32>}, {pipeline_mode = #tpu.pipeline_mode<synchronous>, transform_indices = @transform_12, window_bounds = array<i64: 32, 96>}, {pipeline_mode = #tpu.pipeline_mode<synchronous>, transform_indices = @transform_13, window_bounds = array<i64: 1, 96>}, {pipeline_mode = #tpu.pipeline_mode<synchronous>, transform_indices = @transform_14, window_bounds = array<i64: 32, 32>}, {pipeline_mode = #tpu.pipeline_mode<synchronous>, transform_indices = @transform_15, window_bounds = array<i64: 1, 32>}, {pipeline_mode = #tpu.pipeline_mode<synchronous>, transform_indices = @transform_16, window_bounds = array<i64: 2, 32>}, {pipeline_mode = #tpu.pipeline_mode<synchronous>, transform_indices = @transform_17, window_bounds = array<i64: 32, 64>}, {pipeline_mode = #tpu.pipeline_mode<synchronous>, transform_indices = @transform_18, window_bounds = array<i64: 1, 64>}, {pipeline_mode = #tpu.pipeline_mode<synchronous>, transform_indices = @transform_19, window_bounds = array<i64: 64, 32>}, {pipeline_mode = #tpu.pipeline_mode<synchronous>, transform_indices = @transform_20, window_bounds = array<i64: 1, 32>}, {transform_indices = @transform_21, window_bounds = array<i64: 1, 32, 32>}]} {
    %c0 = arith.constant 0 : index
    %c0_0 = arith.constant 0 : index
    %c0_1 = arith.constant 0 : index
    %0 = vector.load %arg1[%c0, %c0_0, %c0_1] : memref<1x32x32xf32, #tpu.memory_space<vmem>>, vector<1x32x32xf32>
    %1 = vector.shape_cast %0 : vector<1x32x32xf32> to vector<32x32xf32>
    %c0_2 = arith.constant 0 : index
    %c0_3 = arith.constant 0 : index
    %2 = vector.load %arg7[%c0_2, %c0_3] : memref<2x32xf32, #tpu.memory_space<vmem>>, vector<1x32xf32>
    %c1 = arith.constant 1 : index
    %c0_4 = arith.constant 0 : index
    %3 = vector.load %arg7[%c1, %c0_4] : memref<2x32xf32, #tpu.memory_space<vmem>>, vector<1x32xf32>
    %cst = arith.constant dense<0.000000e+00> : vector<32xf32>
    %4 = vector.multi_reduction <add>, %1, %cst [1] : vector<32x32xf32> to vector<32xf32>
    %5 = vector.shape_cast %4 : vector<32xf32> to vector<32x1xf32>
    %cst_5 = arith.constant 3.200000e+01 : f32
    %6 = vector.broadcast %cst_5 : f32 to vector<32x1xf32>
    %7 = arith.divf %5, %6 : vector<32x1xf32>
    %8 = vector.broadcast %7 : vector<32x1xf32> to vector<32x32xf32>
    %9 = arith.subf %1, %8 : vector<32x32xf32>
    %10 = arith.mulf %9, %9 : vector<32x32xf32>
    %cst_6 = arith.constant dense<0.000000e+00> : vector<32xf32>
    %11 = vector.multi_reduction <add>, %10, %cst_6 [1] : vector<32x32xf32> to vector<32xf32>
    %12 = vector.shape_cast %11 : vector<32xf32> to vector<32x1xf32>
    %cst_7 = arith.constant 3.200000e+01 : f32
    %13 = vector.broadcast %cst_7 : f32 to vector<32x1xf32>
    %14 = arith.divf %12, %13 : vector<32x1xf32>
    %cst_8 = arith.constant 9.99999996E-13 : f32
    %15 = vector.broadcast %cst_8 : f32 to vector<32x1xf32>
    %16 = arith.addf %14, %15 : vector<32x1xf32>
    %17 = math.rsqrt %16 : vector<32x1xf32>
    %18 = vector.broadcast %17 : vector<32x1xf32> to vector<32x32xf32>
    %19 = arith.mulf %9, %18 : vector<32x32xf32>
    %20 = vector.broadcast %2 : vector<1x32xf32> to vector<32x32xf32>
    %21 = arith.mulf %19, %20 : vector<32x32xf32>
    %22 = vector.broadcast %3 : vector<1x32xf32> to vector<32x32xf32>
    %23 = arith.addf %21, %22 : vector<32x32xf32>
    %c0_9 = arith.constant 0 : index
    %c0_10 = arith.constant 0 : index
    %24 = vector.load %arg8[%c0_9, %c0_10] : memref<32x96xf32, #tpu.memory_space<vmem>>, vector<32x96xf32>
    %cst_11 = arith.constant dense<0.000000e+00> : vector<32x96xf32>
    %25 = tpu.matmul %23, %24, %cst_11 {dimension_numbers = #tpu.dot_dimension_numbers<[1], [0], [0], [1], [0, 0, 1, 1], [], []>} : vector<32x32xf32>, vector<32x96xf32>, vector<32x96xf32> -> vector<32x96xf32>
    %c0_12 = arith.constant 0 : index
    %c0_13 = arith.constant 0 : index
    %26 = vector.load %arg9[%c0_12, %c0_13] : memref<1x96xf32, #tpu.memory_space<vmem>>, vector<1x96xf32>
    %27 = vector.broadcast %26 : vector<1x96xf32> to vector<32x96xf32>
    %28 = arith.addf %25, %27 : vector<32x96xf32>
    %29 = vector.extract_strided_slice %28 {offsets = [0, 0], sizes = [32, 32], strides = [1, 1]} : vector<32x96xf32> to vector<32x32xf32>
    %cst_14 = arith.constant 0.176776692 : f32
    %30 = vector.broadcast %cst_14 : f32 to vector<32x32xf32>
    %31 = arith.mulf %29, %30 : vector<32x32xf32>
    %c0_15 = arith.constant 0 : index
    %c0_16 = arith.constant 0 : index
    %c0_17 = arith.constant 0 : index
    %32 = vector.load %arg2[%c0_15, %c0_16, %c0_17] : memref<1x32x1xf32, #tpu.memory_space<vmem>>, vector<1x32x1xf32>
    %33 = vector.shape_cast %32 : vector<1x32x1xf32> to vector<32x1xf32>
    %cst_18 = arith.constant 1.000000e+00 : f32
    %34 = vector.broadcast %cst_18 : f32 to vector<32x1xf32>
    %35 = arith.subf %34, %33 : vector<32x1xf32>
    %36 = vector.broadcast %35 : vector<32x1xf32> to vector<32x32xf32>
    %37 = arith.mulf %31, %36 : vector<32x32xf32>
    %38 = vector.extract_strided_slice %28 {offsets = [0, 32], sizes = [32, 32], strides = [1, 1]} : vector<32x96xf32> to vector<32x32xf32>
    %39 = vector.extract_strided_slice %28 {offsets = [0, 64], sizes = [32, 32], strides = [1, 1]} : vector<32x96xf32> to vector<32x32xf32>
    %40 = vector.extract_strided_slice %37 {offsets = [0, 0], sizes = [8, 8], strides = [1, 1]} : vector<32x32xf32> to vector<8x8xf32>
    %c0_19 = arith.constant 0 : index
    %c0_20 = arith.constant 0 : index
    %c0_21 = arith.constant 0 : index
    %41 = vector.load %arg23[%c0_19, %c0_20, %c0_21] : memref<4x8x32xf32, #tpu.memory_space<vmem>>, vector<1x8x8xf32>
    %42 = vector.shape_cast %41 : vector<1x8x8xf32> to vector<8x8xf32>
    %43 = vector.shape_cast %40 : vector<8x8xf32> to vector<1x8x8xf32>
    tpu.vector_store %arg23[%c0_19, %c0_20, %c0_21], %43 {strides = array<i32>} : memref<4x8x32xf32, #tpu.memory_space<vmem>>, vector<1x8x8xf32>,
    %44 = vector.extract_strided_slice %38 {offsets = [0, 0], sizes = [8, 8], strides = [1, 1]} : vector<32x32xf32> to vector<8x8xf32>
    %c0_22 = arith.constant 0 : index
    %c0_23 = arith.constant 0 : index
    %c0_24 = arith.constant 0 : index
    %45 = vector.load %arg24[%c0_22, %c0_23, %c0_24] : memref<4x8x32xf32, #tpu.memory_space<vmem>>, vector<1x8x8xf32>
    %46 = vector.shape_cast %45 : vector<1x8x8xf32> to vector<8x8xf32>
    %47 = vector.shape_cast %44 : vector<8x8xf32> to vector<1x8x8xf32>
    tpu.vector_store %arg24[%c0_22, %c0_23, %c0_24], %47 {strides = array<i32>} : memref<4x8x32xf32, #tpu.memory_space<vmem>>, vector<1x8x8xf32>,
    %48 = vector.extract_strided_slice %39 {offsets = [0, 0], sizes = [8, 8], strides = [1, 1]} : vector<32x32xf32> to vector<8x8xf32>
    %c0_25 = arith.constant 0 : index
    %c0_26 = arith.constant 0 : index
    %c0_27 = arith.constant 0 : index
    %49 = vector.load %arg25[%c0_25, %c0_26, %c0_27] : memref<4x8x32xf32, #tpu.memory_space<vmem>>, vector<1x8x8xf32>
    %50 = vector.shape_cast %49 : vector<1x8x8xf32> to vector<8x8xf32>
    %51 = vector.shape_cast %48 : vector<8x8xf32> to vector<1x8x8xf32>
    tpu.vector_store %arg25[%c0_25, %c0_26, %c0_27], %51 {strides = array<i32>} : memref<4x8x32xf32, #tpu.memory_space<vmem>>, vector<1x8x8xf32>,
    %52 = vector.extract_strided_slice %37 {offsets = [8, 0], sizes = [8, 8], strides = [1, 1]} : vector<32x32xf32> to vector<8x8xf32>
    %c0_28 = arith.constant 0 : index
    %c0_29 = arith.constant 0 : index
    %c8 = arith.constant 8 : index
    %53 = vector.load %arg23[%c0_28, %c0_29, %c8] : memref<4x8x32xf32, #tpu.memory_space<vmem>>, vector<1x8x8xf32>
    %54 = vector.shape_cast %53 : vector<1x8x8xf32> to vector<8x8xf32>
    %55 = vector.shape_cast %52 : vector<8x8xf32> to vector<1x8x8xf32>
    tpu.vector_store %arg23[%c0_28, %c0_29, %c8], %55 {strides = array<i32>} : memref<4x8x32xf32, #tpu.memory_space<vmem>>, vector<1x8x8xf32>,
    %56 = vector.extract_strided_slice %38 {offsets = [8, 0], sizes = [8, 8], strides = [1, 1]} : vector<32x32xf32> to vector<8x8xf32>
    %c0_30 = arith.constant 0 : index
    %c0_31 = arith.constant 0 : index
    %c8_32 = arith.constant 8 : index
    %57 = vector.load %arg24[%c0_30, %c0_31, %c8_32] : memref<4x8x32xf32, #tpu.memory_space<vmem>>, vector<1x8x8xf32>
    %58 = vector.shape_cast %57 : vector<1x8x8xf32> to vector<8x8xf32>
    %59 = vector.shape_cast %56 : vector<8x8xf32> to vector<1x8x8xf32>
    tpu.vector_store %arg24[%c0_30, %c0_31, %c8_32], %59 {strides = array<i32>} : memref<4x8x32xf32, #tpu.memory_space<vmem>>, vector<1x8x8xf32>,
    %60 = vector.extract_strided_slice %39 {offsets = [8, 0], sizes = [8, 8], strides = [1, 1]} : vector<32x32xf32> to vector<8x8xf32>
    %c0_33 = arith.constant 0 : index
    %c0_34 = arith.constant 0 : index
    %c8_35 = arith.constant 8 : index
    %61 = vector.load %arg25[%c0_33, %c0_34, %c8_35] : memref<4x8x32xf32, #tpu.memory_space<vmem>>, vector<1x8x8xf32>
    %62 = vector.shape_cast %61 : vector<1x8x8xf32> to vector<8x8xf32>
    %63 = vector.shape_cast %60 : vector<8x8xf32> to vector<1x8x8xf32>
    tpu.vector_store %arg25[%c0_33, %c0_34, %c8_35], %63 {strides = array<i32>} : memref<4x8x32xf32, #tpu.memory_space<vmem>>, vector<1x8x8xf32>,
    %64 = vector.extract_strided_slice %37 {offsets = [16, 0], sizes = [8, 8], strides = [1, 1]} : vector<32x32xf32> to vector<8x8xf32>
    %c0_36 = arith.constant 0 : index
    %c0_37 = arith.constant 0 : index
    %c16 = arith.constant 16 : index
    %65 = vector.load %arg23[%c0_36, %c0_37, %c16] : memref<4x8x32xf32, #tpu.memory_space<vmem>>, vector<1x8x8xf32>
    %66 = vector.shape_cast %65 : vector<1x8x8xf32> to vector<8x8xf32>
    %67 = vector.shape_cast %64 : vector<8x8xf32> to vector<1x8x8xf32>
    tpu.vector_store %arg23[%c0_36, %c0_37, %c16], %67 {strides = array<i32>} : memref<4x8x32xf32, #tpu.memory_space<vmem>>, vector<1x8x8xf32>,
    %68 = vector.extract_strided_slice %38 {offsets = [16, 0], sizes = [8, 8], strides = [1, 1]} : vector<32x32xf32> to vector<8x8xf32>
    %c0_38 = arith.constant 0 : index
    %c0_39 = arith.constant 0 : index
    %c16_40 = arith.constant 16 : index
    %69 = vector.load %arg24[%c0_38, %c0_39, %c16_40] : memref<4x8x32xf32, #tpu.memory_space<vmem>>, vector<1x8x8xf32>
    %70 = vector.shape_cast %69 : vector<1x8x8xf32> to vector<8x8xf32>
    %71 = vector.shape_cast %68 : vector<8x8xf32> to vector<1x8x8xf32>
    tpu.vector_store %arg24[%c0_38, %c0_39, %c16_40], %71 {strides = array<i32>} : memref<4x8x32xf32, #tpu.memory_space<vmem>>, vector<1x8x8xf32>,
    %72 = vector.extract_strided_slice %39 {offsets = [16, 0], sizes = [8, 8], strides = [1, 1]} : vector<32x32xf32> to vector<8x8xf32>
    %c0_41 = arith.constant 0 : index
    %c0_42 = arith.constant 0 : index
    %c16_43 = arith.constant 16 : index
    %73 = vector.load %arg25[%c0_41, %c0_42, %c16_43] : memref<4x8x32xf32, #tpu.memory_space<vmem>>, vector<1x8x8xf32>
    %74 = vector.shape_cast %73 : vector<1x8x8xf32> to vector<8x8xf32>
    %75 = vector.shape_cast %72 : vector<8x8xf32> to vector<1x8x8xf32>
    tpu.vector_store %arg25[%c0_41, %c0_42, %c16_43], %75 {strides = array<i32>} : memref<4x8x32xf32, #tpu.memory_space<vmem>>, vector<1x8x8xf32>,
    %76 = vector.extract_strided_slice %37 {offsets = [24, 0], sizes = [8, 8], strides = [1, 1]} : vector<32x32xf32> to vector<8x8xf32>
    %c0_44 = arith.constant 0 : index
    %c0_45 = arith.constant 0 : index
    %c24 = arith.constant 24 : index
    %77 = vector.load %arg23[%c0_44, %c0_45, %c24] : memref<4x8x32xf32, #tpu.memory_space<vmem>>, vector<1x8x8xf32>
    %78 = vector.shape_cast %77 : vector<1x8x8xf32> to vector<8x8xf32>
    %79 = vector.shape_cast %76 : vector<8x8xf32> to vector<1x8x8xf32>
    tpu.vector_store %arg23[%c0_44, %c0_45, %c24], %79 {strides = array<i32>} : memref<4x8x32xf32, #tpu.memory_space<vmem>>, vector<1x8x8xf32>,
    %80 = vector.extract_strided_slice %38 {offsets = [24, 0], sizes = [8, 8], strides = [1, 1]} : vector<32x32xf32> to vector<8x8xf32>
    %c0_46 = arith.constant 0 : index
    %c0_47 = arith.constant 0 : index
    %c24_48 = arith.constant 24 : index
    %81 = vector.load %arg24[%c0_46, %c0_47, %c24_48] : memref<4x8x32xf32, #tpu.memory_space<vmem>>, vector<1x8x8xf32>
    %82 = vector.shape_cast %81 : vector<1x8x8xf32> to vector<8x8xf32>
    %83 = vector.shape_cast %80 : vector<8x8xf32> to vector<1x8x8xf32>
    tpu.vector_store %arg24[%c0_46, %c0_47, %c24_48], %83 {strides = array<i32>} : memref<4x8x32xf32, #tpu.memory_space<vmem>>, vector<1x8x8xf32>,
    %84 = vector.extract_strided_slice %39 {offsets = [24, 0], sizes = [8, 8], strides = [1, 1]} : vector<32x32xf32> to vector<8x8xf32>
    %c0_49 = arith.constant 0 : index
    %c0_50 = arith.constant 0 : index
    %c24_51 = arith.constant 24 : index
    %85 = vector.load %arg25[%c0_49, %c0_50, %c24_51] : memref<4x8x32xf32, #tpu.memory_space<vmem>>, vector<1x8x8xf32>
    %86 = vector.shape_cast %85 : vector<1x8x8xf32> to vector<8x8xf32>
    %87 = vector.shape_cast %84 : vector<8x8xf32> to vector<1x8x8xf32>
    tpu.vector_store %arg25[%c0_49, %c0_50, %c24_51], %87 {strides = array<i32>} : memref<4x8x32xf32, #tpu.memory_space<vmem>>, vector<1x8x8xf32>,
    %88 = vector.extract_strided_slice %37 {offsets = [0, 8], sizes = [8, 8], strides = [1, 1]} : vector<32x32xf32> to vector<8x8xf32>
    %c1_52 = arith.constant 1 : index
    %c0_53 = arith.constant 0 : index
    %c0_54 = arith.constant 0 : index
    %89 = vector.load %arg23[%c1_52, %c0_53, %c0_54] : memref<4x8x32xf32, #tpu.memory_space<vmem>>, vector<1x8x8xf32>
    %90 = vector.shape_cast %89 : vector<1x8x8xf32> to vector<8x8xf32>
    %91 = vector.shape_cast %88 : vector<8x8xf32> to vector<1x8x8xf32>
    tpu.vector_store %arg23[%c1_52, %c0_53, %c0_54], %91 {strides = array<i32>} : memref<4x8x32xf32, #tpu.memory_space<vmem>>, vector<1x8x8xf32>,
    %92 = vector.extract_strided_slice %38 {offsets = [0, 8], sizes = [8, 8], strides = [1, 1]} : vector<32x32xf32> to vector<8x8xf32>
    %c1_55 = arith.constant 1 : index
    %c0_56 = arith.constant 0 : index
    %c0_57 = arith.constant 0 : index
    %93 = vector.load %arg24[%c1_55, %c0_56, %c0_57] : memref<4x8x32xf32, #tpu.memory_space<vmem>>, vector<1x8x8xf32>
    %94 = vector.shape_cast %93 : vector<1x8x8xf32> to vector<8x8xf32>
    %95 = vector.shape_cast %92 : vector<8x8xf32> to vector<1x8x8xf32>
    tpu.vector_store %arg24[%c1_55, %c0_56, %c0_57], %95 {strides = array<i32>} : memref<4x8x32xf32, #tpu.memory_space<vmem>>, vector<1x8x8xf32>,
    %96 = vector.extract_strided_slice %39 {offsets = [0, 8], sizes = [8, 8], strides = [1, 1]} : vector<32x32xf32> to vector<8x8xf32>
    %c1_58 = arith.constant 1 : index
    %c0_59 = arith.constant 0 : index
    %c0_60 = arith.constant 0 : index
    %97 = vector.load %arg25[%c1_58, %c0_59, %c0_60] : memref<4x8x32xf32, #tpu.memory_space<vmem>>, vector<1x8x8xf32>
    %98 = vector.shape_cast %97 : vector<1x8x8xf32> to vector<8x8xf32>
    %99 = vector.shape_cast %96 : vector<8x8xf32> to vector<1x8x8xf32>
    tpu.vector_store %arg25[%c1_58, %c0_59, %c0_60], %99 {strides = array<i32>} : memref<4x8x32xf32, #tpu.memory_space<vmem>>, vector<1x8x8xf32>,
    %100 = vector.extract_strided_slice %37 {offsets = [8, 8], sizes = [8, 8], strides = [1, 1]} : vector<32x32xf32> to vector<8x8xf32>
    %c1_61 = arith.constant 1 : index
    %c0_62 = arith.constant 0 : index
    %c8_63 = arith.constant 8 : index
    %101 = vector.load %arg23[%c1_61, %c0_62, %c8_63] : memref<4x8x32xf32, #tpu.memory_space<vmem>>, vector<1x8x8xf32>
    %102 = vector.shape_cast %101 : vector<1x8x8xf32> to vector<8x8xf32>
    %103 = vector.shape_cast %100 : vector<8x8xf32> to vector<1x8x8xf32>
    tpu.vector_store %arg23[%c1_61, %c0_62, %c8_63], %103 {strides = array<i32>} : memref<4x8x32xf32, #tpu.memory_space<vmem>>, vector<1x8x8xf32>,
    %104 = vector.extract_strided_slice %38 {offsets = [8, 8], sizes = [8, 8], strides = [1, 1]} : vector<32x32xf32> to vector<8x8xf32>
    %c1_64 = arith.constant 1 : index
    %c0_65 = arith.constant 0 : index
    %c8_66 = arith.constant 8 : index
    %105 = vector.load %arg24[%c1_64, %c0_65, %c8_66] : memref<4x8x32xf32, #tpu.memory_space<vmem>>, vector<1x8x8xf32>
    %106 = vector.shape_cast %105 : vector<1x8x8xf32> to vector<8x8xf32>
    %107 = vector.shape_cast %104 : vector<8x8xf32> to vector<1x8x8xf32>
    tpu.vector_store %arg24[%c1_64, %c0_65, %c8_66], %107 {strides = array<i32>} : memref<4x8x32xf32, #tpu.memory_space<vmem>>, vector<1x8x8xf32>,
    %108 = vector.extract_strided_slice %39 {offsets = [8, 8], sizes = [8, 8], strides = [1, 1]} : vector<32x32xf32> to vector<8x8xf32>
    %c1_67 = arith.constant 1 : index
    %c0_68 = arith.constant 0 : index
    %c8_69 = arith.constant 8 : index
    %109 = vector.load %arg25[%c1_67, %c0_68, %c8_69] : memref<4x8x32xf32, #tpu.memory_space<vmem>>, vector<1x8x8xf32>
    %110 = vector.shape_cast %109 : vector<1x8x8xf32> to vector<8x8xf32>
    %111 = vector.shape_cast %108 : vector<8x8xf32> to vector<1x8x8xf32>
    tpu.vector_store %arg25[%c1_67, %c0_68, %c8_69], %111 {strides = array<i32>} : memref<4x8x32xf32, #tpu.memory_space<vmem>>, vector<1x8x8xf32>,
    %112 = vector.extract_strided_slice %37 {offsets = [16, 8], sizes = [8, 8], strides = [1, 1]} : vector<32x32xf32> to vector<8x8xf32>
    %c1_70 = arith.constant 1 : index
    %c0_71 = arith.constant 0 : index
    %c16_72 = arith.constant 16 : index
    %113 = vector.load %arg23[%c1_70, %c0_71, %c16_72] : memref<4x8x32xf32, #tpu.memory_space<vmem>>, vector<1x8x8xf32>
    %114 = vector.shape_cast %113 : vector<1x8x8xf32> to vector<8x8xf32>
    %115 = vector.shape_cast %112 : vector<8x8xf32> to vector<1x8x8xf32>
    tpu.vector_store %arg23[%c1_70, %c0_71, %c16_72], %115 {strides = array<i32>} : memref<4x8x32xf32, #tpu.memory_space<vmem>>, vector<1x8x8xf32>,
    %116 = vector.extract_strided_slice %38 {offsets = [16, 8], sizes = [8, 8], strides = [1, 1]} : vector<32x32xf32> to vector<8x8xf32>
    %c1_73 = arith.constant 1 : index
    %c0_74 = arith.constant 0 : index
    %c16_75 = arith.constant 16 : index
    %117 = vector.load %arg24[%c1_73, %c0_74, %c16_75] : memref<4x8x32xf32, #tpu.memory_space<vmem>>, vector<1x8x8xf32>
    %118 = vector.shape_cast %117 : vector<1x8x8xf32> to vector<8x8xf32>
    %119 = vector.shape_cast %116 : vector<8x8xf32> to vector<1x8x8xf32>
    tpu.vector_store %arg24[%c1_73, %c0_74, %c16_75], %119 {strides = array<i32>} : memref<4x8x32xf32, #tpu.memory_space<vmem>>, vector<1x8x8xf32>,
    %120 = vector.extract_strided_slice %39 {offsets = [16, 8], sizes = [8, 8], strides = [1, 1]} : vector<32x32xf32> to vector<8x8xf32>
    %c1_76 = arith.constant 1 : index
    %c0_77 = arith.constant 0 : index
    %c16_78 = arith.constant 16 : index
    %121 = vector.load %arg25[%c1_76, %c0_77, %c16_78] : memref<4x8x32xf32, #tpu.memory_space<vmem>>, vector<1x8x8xf32>
    %122 = vector.shape_cast %121 : vector<1x8x8xf32> to vector<8x8xf32>
    %123 = vector.shape_cast %120 : vector<8x8xf32> to vector<1x8x8xf32>
    tpu.vector_store %arg25[%c1_76, %c0_77, %c16_78], %123 {strides = array<i32>} : memref<4x8x32xf32, #tpu.memory_space<vmem>>, vector<1x8x8xf32>,
    %124 = vector.extract_strided_slice %37 {offsets = [24, 8], sizes = [8, 8], strides = [1, 1]} : vector<32x32xf32> to vector<8x8xf32>
    %c1_79 = arith.constant 1 : index
    %c0_80 = arith.constant 0 : index
    %c24_81 = arith.constant 24 : index
    %125 = vector.load %arg23[%c1_79, %c0_80, %c24_81] : memref<4x8x32xf32, #tpu.memory_space<vmem>>, vector<1x8x8xf32>
    %126 = vector.shape_cast %125 : vector<1x8x8xf32> to vector<8x8xf32>
    %127 = vector.shape_cast %124 : vector<8x8xf32> to vector<1x8x8xf32>
    tpu.vector_store %arg23[%c1_79, %c0_80, %c24_81], %127 {strides = array<i32>} : memref<4x8x32xf32, #tpu.memory_space<vmem>>, vector<1x8x8xf32>,
    %128 = vector.extract_strided_slice %38 {offsets = [24, 8], sizes = [8, 8], strides = [1, 1]} : vector<32x32xf32> to vector<8x8xf32>
    %c1_82 = arith.constant 1 : index
    %c0_83 = arith.constant 0 : index
    %c24_84 = arith.constant 24 : index
    %129 = vector.load %arg24[%c1_82, %c0_83, %c24_84] : memref<4x8x32xf32, #tpu.memory_space<vmem>>, vector<1x8x8xf32>
    %130 = vector.shape_cast %129 : vector<1x8x8xf32> to vector<8x8xf32>
    %131 = vector.shape_cast %128 : vector<8x8xf32> to vector<1x8x8xf32>
    tpu.vector_store %arg24[%c1_82, %c0_83, %c24_84], %131 {strides = array<i32>} : memref<4x8x32xf32, #tpu.memory_space<vmem>>, vector<1x8x8xf32>,
    %132 = vector.extract_strided_slice %39 {offsets = [24, 8], sizes = [8, 8], strides = [1, 1]} : vector<32x32xf32> to vector<8x8xf32>
    %c1_85 = arith.constant 1 : index
    %c0_86 = arith.constant 0 : index
    %c24_87 = arith.constant 24 : index
    %133 = vector.load %arg25[%c1_85, %c0_86, %c24_87] : memref<4x8x32xf32, #tpu.memory_space<vmem>>, vector<1x8x8xf32>
    %134 = vector.shape_cast %133 : vector<1x8x8xf32> to vector<8x8xf32>
    %135 = vector.shape_cast %132 : vector<8x8xf32> to vector<1x8x8xf32>
    tpu.vector_store %arg25[%c1_85, %c0_86, %c24_87], %135 {strides = array<i32>} : memref<4x8x32xf32, #tpu.memory_space<vmem>>, vector<1x8x8xf32>,
    %136 = vector.extract_strided_slice %37 {offsets = [0, 16], sizes = [8, 8], strides = [1, 1]} : vector<32x32xf32> to vector<8x8xf32>
    %c2 = arith.constant 2 : index
    %c0_88 = arith.constant 0 : index
    %c0_89 = arith.constant 0 : index
    %137 = vector.load %arg23[%c2, %c0_88, %c0_89] : memref<4x8x32xf32, #tpu.memory_space<vmem>>, vector<1x8x8xf32>
    %138 = vector.shape_cast %137 : vector<1x8x8xf32> to vector<8x8xf32>
    %139 = vector.shape_cast %136 : vector<8x8xf32> to vector<1x8x8xf32>
    tpu.vector_store %arg23[%c2, %c0_88, %c0_89], %139 {strides = array<i32>} : memref<4x8x32xf32, #tpu.memory_space<vmem>>, vector<1x8x8xf32>,
    %140 = vector.extract_strided_slice %38 {offsets = [0, 16], sizes = [8, 8], strides = [1, 1]} : vector<32x32xf32> to vector<8x8xf32>
    %c2_90 = arith.constant 2 : index
    %c0_91 = arith.constant 0 : index
    %c0_92 = arith.constant 0 : index
    %141 = vector.load %arg24[%c2_90, %c0_91, %c0_92] : memref<4x8x32xf32, #tpu.memory_space<vmem>>, vector<1x8x8xf32>
    %142 = vector.shape_cast %141 : vector<1x8x8xf32> to vector<8x8xf32>
    %143 = vector.shape_cast %140 : vector<8x8xf32> to vector<1x8x8xf32>
    tpu.vector_store %arg24[%c2_90, %c0_91, %c0_92], %143 {strides = array<i32>} : memref<4x8x32xf32, #tpu.memory_space<vmem>>, vector<1x8x8xf32>,
    %144 = vector.extract_strided_slice %39 {offsets = [0, 16], sizes = [8, 8], strides = [1, 1]} : vector<32x32xf32> to vector<8x8xf32>
    %c2_93 = arith.constant 2 : index
    %c0_94 = arith.constant 0 : index
    %c0_95 = arith.constant 0 : index
    %145 = vector.load %arg25[%c2_93, %c0_94, %c0_95] : memref<4x8x32xf32, #tpu.memory_space<vmem>>, vector<1x8x8xf32>
    %146 = vector.shape_cast %145 : vector<1x8x8xf32> to vector<8x8xf32>
    %147 = vector.shape_cast %144 : vector<8x8xf32> to vector<1x8x8xf32>
    tpu.vector_store %arg25[%c2_93, %c0_94, %c0_95], %147 {strides = array<i32>} : memref<4x8x32xf32, #tpu.memory_space<vmem>>, vector<1x8x8xf32>,
    %148 = vector.extract_strided_slice %37 {offsets = [8, 16], sizes = [8, 8], strides = [1, 1]} : vector<32x32xf32> to vector<8x8xf32>
    %c2_96 = arith.constant 2 : index
    %c0_97 = arith.constant 0 : index
    %c8_98 = arith.constant 8 : index
    %149 = vector.load %arg23[%c2_96, %c0_97, %c8_98] : memref<4x8x32xf32, #tpu.memory_space<vmem>>, vector<1x8x8xf32>
    %150 = vector.shape_cast %149 : vector<1x8x8xf32> to vector<8x8xf32>
    %151 = vector.shape_cast %148 : vector<8x8xf32> to vector<1x8x8xf32>
    tpu.vector_store %arg23[%c2_96, %c0_97, %c8_98], %151 {strides = array<i32>} : memref<4x8x32xf32, #tpu.memory_space<vmem>>, vector<1x8x8xf32>,
    %152 = vector.extract_strided_slice %38 {offsets = [8, 16], sizes = [8, 8], strides = [1, 1]} : vector<32x32xf32> to vector<8x8xf32>
    %c2_99 = arith.constant 2 : index
    %c0_100 = arith.constant 0 : index
    %c8_101 = arith.constant 8 : index
    %153 = vector.load %arg24[%c2_99, %c0_100, %c8_101] : memref<4x8x32xf32, #tpu.memory_space<vmem>>, vector<1x8x8xf32>
    %154 = vector.shape_cast %153 : vector<1x8x8xf32> to vector<8x8xf32>
    %155 = vector.shape_cast %152 : vector<8x8xf32> to vector<1x8x8xf32>
    tpu.vector_store %arg24[%c2_99, %c0_100, %c8_101], %155 {strides = array<i32>} : memref<4x8x32xf32, #tpu.memory_space<vmem>>, vector<1x8x8xf32>,
    %156 = vector.extract_strided_slice %39 {offsets = [8, 16], sizes = [8, 8], strides = [1, 1]} : vector<32x32xf32> to vector<8x8xf32>
    %c2_102 = arith.constant 2 : index
    %c0_103 = arith.constant 0 : index
    %c8_104 = arith.constant 8 : index
    %157 = vector.load %arg25[%c2_102, %c0_103, %c8_104] : memref<4x8x32xf32, #tpu.memory_space<vmem>>, vector<1x8x8xf32>
    %158 = vector.shape_cast %157 : vector<1x8x8xf32> to vector<8x8xf32>
    %159 = vector.shape_cast %156 : vector<8x8xf32> to vector<1x8x8xf32>
    tpu.vector_store %arg25[%c2_102, %c0_103, %c8_104], %159 {strides = array<i32>} : memref<4x8x32xf32, #tpu.memory_space<vmem>>, vector<1x8x8xf32>,
    %160 = vector.extract_strided_slice %37 {offsets = [16, 16], sizes = [8, 8], strides = [1, 1]} : vector<32x32xf32> to vector<8x8xf32>
    %c2_105 = arith.constant 2 : index
    %c0_106 = arith.constant 0 : index
    %c16_107 = arith.constant 16 : index
    %161 = vector.load %arg23[%c2_105, %c0_106, %c16_107] : memref<4x8x32xf32, #tpu.memory_space<vmem>>, vector<1x8x8xf32>
    %162 = vector.shape_cast %161 : vector<1x8x8xf32> to vector<8x8xf32>
    %163 = vector.shape_cast %160 : vector<8x8xf32> to vector<1x8x8xf32>
    tpu.vector_store %arg23[%c2_105, %c0_106, %c16_107], %163 {strides = array<i32>} : memref<4x8x32xf32, #tpu.memory_space<vmem>>, vector<1x8x8xf32>,
    %164 = vector.extract_strided_slice %38 {offsets = [16, 16], sizes = [8, 8], strides = [1, 1]} : vector<32x32xf32> to vector<8x8xf32>
    %c2_108 = arith.constant 2 : index
    %c0_109 = arith.constant 0 : index
    %c16_110 = arith.constant 16 : index
    %165 = vector.load %arg24[%c2_108, %c0_109, %c16_110] : memref<4x8x32xf32, #tpu.memory_space<vmem>>, vector<1x8x8xf32>
    %166 = vector.shape_cast %165 : vector<1x8x8xf32> to vector<8x8xf32>
    %167 = vector.shape_cast %164 : vector<8x8xf32> to vector<1x8x8xf32>
    tpu.vector_store %arg24[%c2_108, %c0_109, %c16_110], %167 {strides = array<i32>} : memref<4x8x32xf32, #tpu.memory_space<vmem>>, vector<1x8x8xf32>,
    %168 = vector.extract_strided_slice %39 {offsets = [16, 16], sizes = [8, 8], strides = [1, 1]} : vector<32x32xf32> to vector<8x8xf32>
    %c2_111 = arith.constant 2 : index
    %c0_112 = arith.constant 0 : index
    %c16_113 = arith.constant 16 : index
    %169 = vector.load %arg25[%c2_111, %c0_112, %c16_113] : memref<4x8x32xf32, #tpu.memory_space<vmem>>, vector<1x8x8xf32>
    %170 = vector.shape_cast %169 : vector<1x8x8xf32> to vector<8x8xf32>
    %171 = vector.shape_cast %168 : vector<8x8xf32> to vector<1x8x8xf32>
    tpu.vector_store %arg25[%c2_111, %c0_112, %c16_113], %171 {strides = array<i32>} : memref<4x8x32xf32, #tpu.memory_space<vmem>>, vector<1x8x8xf32>,
    %172 = vector.extract_strided_slice %37 {offsets = [24, 16], sizes = [8, 8], strides = [1, 1]} : vector<32x32xf32> to vector<8x8xf32>
    %c2_114 = arith.constant 2 : index
    %c0_115 = arith.constant 0 : index
    %c24_116 = arith.constant 24 : index
    %173 = vector.load %arg23[%c2_114, %c0_115, %c24_116] : memref<4x8x32xf32, #tpu.memory_space<vmem>>, vector<1x8x8xf32>
    %174 = vector.shape_cast %173 : vector<1x8x8xf32> to vector<8x8xf32>
    %175 = vector.shape_cast %172 : vector<8x8xf32> to vector<1x8x8xf32>
    tpu.vector_store %arg23[%c2_114, %c0_115, %c24_116], %175 {strides = array<i32>} : memref<4x8x32xf32, #tpu.memory_space<vmem>>, vector<1x8x8xf32>,
    %176 = vector.extract_strided_slice %38 {offsets = [24, 16], sizes = [8, 8], strides = [1, 1]} : vector<32x32xf32> to vector<8x8xf32>
    %c2_117 = arith.constant 2 : index
    %c0_118 = arith.constant 0 : index
    %c24_119 = arith.constant 24 : index
    %177 = vector.load %arg24[%c2_117, %c0_118, %c24_119] : memref<4x8x32xf32, #tpu.memory_space<vmem>>, vector<1x8x8xf32>
    %178 = vector.shape_cast %177 : vector<1x8x8xf32> to vector<8x8xf32>
    %179 = vector.shape_cast %176 : vector<8x8xf32> to vector<1x8x8xf32>
    tpu.vector_store %arg24[%c2_117, %c0_118, %c24_119], %179 {strides = array<i32>} : memref<4x8x32xf32, #tpu.memory_space<vmem>>, vector<1x8x8xf32>,
    %180 = vector.extract_strided_slice %39 {offsets = [24, 16], sizes = [8, 8], strides = [1, 1]} : vector<32x32xf32> to vector<8x8xf32>
    %c2_120 = arith.constant 2 : index
    %c0_121 = arith.constant 0 : index
    %c24_122 = arith.constant 24 : index
    %181 = vector.load %arg25[%c2_120, %c0_121, %c24_122] : memref<4x8x32xf32, #tpu.memory_space<vmem>>, vector<1x8x8xf32>
    %182 = vector.shape_cast %181 : vector<1x8x8xf32> to vector<8x8xf32>
    %183 = vector.shape_cast %180 : vector<8x8xf32> to vector<1x8x8xf32>
    tpu.vector_store %arg25[%c2_120, %c0_121, %c24_122], %183 {strides = array<i32>} : memref<4x8x32xf32, #tpu.memory_space<vmem>>, vector<1x8x8xf32>,
    %184 = vector.extract_strided_slice %37 {offsets = [0, 24], sizes = [8, 8], strides = [1, 1]} : vector<32x32xf32> to vector<8x8xf32>
    %c3 = arith.constant 3 : index
    %c0_123 = arith.constant 0 : index
    %c0_124 = arith.constant 0 : index
    %185 = vector.load %arg23[%c3, %c0_123, %c0_124] : memref<4x8x32xf32, #tpu.memory_space<vmem>>, vector<1x8x8xf32>
    %186 = vector.shape_cast %185 : vector<1x8x8xf32> to vector<8x8xf32>
    %187 = vector.shape_cast %184 : vector<8x8xf32> to vector<1x8x8xf32>
    tpu.vector_store %arg23[%c3, %c0_123, %c0_124], %187 {strides = array<i32>} : memref<4x8x32xf32, #tpu.memory_space<vmem>>, vector<1x8x8xf32>,
    %188 = vector.extract_strided_slice %38 {offsets = [0, 24], sizes = [8, 8], strides = [1, 1]} : vector<32x32xf32> to vector<8x8xf32>
    %c3_125 = arith.constant 3 : index
    %c0_126 = arith.constant 0 : index
    %c0_127 = arith.constant 0 : index
    %189 = vector.load %arg24[%c3_125, %c0_126, %c0_127] : memref<4x8x32xf32, #tpu.memory_space<vmem>>, vector<1x8x8xf32>
    %190 = vector.shape_cast %189 : vector<1x8x8xf32> to vector<8x8xf32>
    %191 = vector.shape_cast %188 : vector<8x8xf32> to vector<1x8x8xf32>
    tpu.vector_store %arg24[%c3_125, %c0_126, %c0_127], %191 {strides = array<i32>} : memref<4x8x32xf32, #tpu.memory_space<vmem>>, vector<1x8x8xf32>,
    %192 = vector.extract_strided_slice %39 {offsets = [0, 24], sizes = [8, 8], strides = [1, 1]} : vector<32x32xf32> to vector<8x8xf32>
    %c3_128 = arith.constant 3 : index
    %c0_129 = arith.constant 0 : index
    %c0_130 = arith.constant 0 : index
    %193 = vector.load %arg25[%c3_128, %c0_129, %c0_130] : memref<4x8x32xf32, #tpu.memory_space<vmem>>, vector<1x8x8xf32>
    %194 = vector.shape_cast %193 : vector<1x8x8xf32> to vector<8x8xf32>
    %195 = vector.shape_cast %192 : vector<8x8xf32> to vector<1x8x8xf32>
    tpu.vector_store %arg25[%c3_128, %c0_129, %c0_130], %195 {strides = array<i32>} : memref<4x8x32xf32, #tpu.memory_space<vmem>>, vector<1x8x8xf32>,
    %196 = vector.extract_strided_slice %37 {offsets = [8, 24], sizes = [8, 8], strides = [1, 1]} : vector<32x32xf32> to vector<8x8xf32>
    %c3_131 = arith.constant 3 : index
    %c0_132 = arith.constant 0 : index
    %c8_133 = arith.constant 8 : index
    %197 = vector.load %arg23[%c3_131, %c0_132, %c8_133] : memref<4x8x32xf32, #tpu.memory_space<vmem>>, vector<1x8x8xf32>
    %198 = vector.shape_cast %197 : vector<1x8x8xf32> to vector<8x8xf32>
    %199 = vector.shape_cast %196 : vector<8x8xf32> to vector<1x8x8xf32>
    tpu.vector_store %arg23[%c3_131, %c0_132, %c8_133], %199 {strides = array<i32>} : memref<4x8x32xf32, #tpu.memory_space<vmem>>, vector<1x8x8xf32>,
    %200 = vector.extract_strided_slice %38 {offsets = [8, 24], sizes = [8, 8], strides = [1, 1]} : vector<32x32xf32> to vector<8x8xf32>
    %c3_134 = arith.constant 3 : index
    %c0_135 = arith.constant 0 : index
    %c8_136 = arith.constant 8 : index
    %201 = vector.load %arg24[%c3_134, %c0_135, %c8_136] : memref<4x8x32xf32, #tpu.memory_space<vmem>>, vector<1x8x8xf32>
    %202 = vector.shape_cast %201 : vector<1x8x8xf32> to vector<8x8xf32>
    %203 = vector.shape_cast %200 : vector<8x8xf32> to vector<1x8x8xf32>
    tpu.vector_store %arg24[%c3_134, %c0_135, %c8_136], %203 {strides = array<i32>} : memref<4x8x32xf32, #tpu.memory_space<vmem>>, vector<1x8x8xf32>,
    %204 = vector.extract_strided_slice %39 {offsets = [8, 24], sizes = [8, 8], strides = [1, 1]} : vector<32x32xf32> to vector<8x8xf32>
    %c3_137 = arith.constant 3 : index
    %c0_138 = arith.constant 0 : index
    %c8_139 = arith.constant 8 : index
    %205 = vector.load %arg25[%c3_137, %c0_138, %c8_139] : memref<4x8x32xf32, #tpu.memory_space<vmem>>, vector<1x8x8xf32>
    %206 = vector.shape_cast %205 : vector<1x8x8xf32> to vector<8x8xf32>
    %207 = vector.shape_cast %204 : vector<8x8xf32> to vector<1x8x8xf32>
    tpu.vector_store %arg25[%c3_137, %c0_138, %c8_139], %207 {strides = array<i32>} : memref<4x8x32xf32, #tpu.memory_space<vmem>>, vector<1x8x8xf32>,
    %208 = vector.extract_strided_slice %37 {offsets = [16, 24], sizes = [8, 8], strides = [1, 1]} : vector<32x32xf32> to vector<8x8xf32>
    %c3_140 = arith.constant 3 : index
    %c0_141 = arith.constant 0 : index
    %c16_142 = arith.constant 16 : index
    %209 = vector.load %arg23[%c3_140, %c0_141, %c16_142] : memref<4x8x32xf32, #tpu.memory_space<vmem>>, vector<1x8x8xf32>
    %210 = vector.shape_cast %209 : vector<1x8x8xf32> to vector<8x8xf32>
    %211 = vector.shape_cast %208 : vector<8x8xf32> to vector<1x8x8xf32>
    tpu.vector_store %arg23[%c3_140, %c0_141, %c16_142], %211 {strides = array<i32>} : memref<4x8x32xf32, #tpu.memory_space<vmem>>, vector<1x8x8xf32>,
    %212 = vector.extract_strided_slice %38 {offsets = [16, 24], sizes = [8, 8], strides = [1, 1]} : vector<32x32xf32> to vector<8x8xf32>
    %c3_143 = arith.constant 3 : index
    %c0_144 = arith.constant 0 : index
    %c16_145 = arith.constant 16 : index
    %213 = vector.load %arg24[%c3_143, %c0_144, %c16_145] : memref<4x8x32xf32, #tpu.memory_space<vmem>>, vector<1x8x8xf32>
    %214 = vector.shape_cast %213 : vector<1x8x8xf32> to vector<8x8xf32>
    %215 = vector.shape_cast %212 : vector<8x8xf32> to vector<1x8x8xf32>
    tpu.vector_store %arg24[%c3_143, %c0_144, %c16_145], %215 {strides = array<i32>} : memref<4x8x32xf32, #tpu.memory_space<vmem>>, vector<1x8x8xf32>,
    %216 = vector.extract_strided_slice %39 {offsets = [16, 24], sizes = [8, 8], strides = [1, 1]} : vector<32x32xf32> to vector<8x8xf32>
    %c3_146 = arith.constant 3 : index
    %c0_147 = arith.constant 0 : index
    %c16_148 = arith.constant 16 : index
    %217 = vector.load %arg25[%c3_146, %c0_147, %c16_148] : memref<4x8x32xf32, #tpu.memory_space<vmem>>, vector<1x8x8xf32>
    %218 = vector.shape_cast %217 : vector<1x8x8xf32> to vector<8x8xf32>
    %219 = vector.shape_cast %216 : vector<8x8xf32> to vector<1x8x8xf32>
    tpu.vector_store %arg25[%c3_146, %c0_147, %c16_148], %219 {strides = array<i32>} : memref<4x8x32xf32, #tpu.memory_space<vmem>>, vector<1x8x8xf32>,
    %220 = vector.extract_strided_slice %37 {offsets = [24, 24], sizes = [8, 8], strides = [1, 1]} : vector<32x32xf32> to vector<8x8xf32>
    %c3_149 = arith.constant 3 : index
    %c0_150 = arith.constant 0 : index
    %c24_151 = arith.constant 24 : index
    %221 = vector.load %arg23[%c3_149, %c0_150, %c24_151] : memref<4x8x32xf32, #tpu.memory_space<vmem>>, vector<1x8x8xf32>
    %222 = vector.shape_cast %221 : vector<1x8x8xf32> to vector<8x8xf32>
    %223 = vector.shape_cast %220 : vector<8x8xf32> to vector<1x8x8xf32>
    tpu.vector_store %arg23[%c3_149, %c0_150, %c24_151], %223 {strides = array<i32>} : memref<4x8x32xf32, #tpu.memory_space<vmem>>, vector<1x8x8xf32>,
    %224 = vector.extract_strided_slice %38 {offsets = [24, 24], sizes = [8, 8], strides = [1, 1]} : vector<32x32xf32> to vector<8x8xf32>
    %c3_152 = arith.constant 3 : index
    %c0_153 = arith.constant 0 : index
    %c24_154 = arith.constant 24 : index
    %225 = vector.load %arg24[%c3_152, %c0_153, %c24_154] : memref<4x8x32xf32, #tpu.memory_space<vmem>>, vector<1x8x8xf32>
    %226 = vector.shape_cast %225 : vector<1x8x8xf32> to vector<8x8xf32>
    %227 = vector.shape_cast %224 : vector<8x8xf32> to vector<1x8x8xf32>
    tpu.vector_store %arg24[%c3_152, %c0_153, %c24_154], %227 {strides = array<i32>} : memref<4x8x32xf32, #tpu.memory_space<vmem>>, vector<1x8x8xf32>,
    %228 = vector.extract_strided_slice %39 {offsets = [24, 24], sizes = [8, 8], strides = [1, 1]} : vector<32x32xf32> to vector<8x8xf32>
    %c3_155 = arith.constant 3 : index
    %c0_156 = arith.constant 0 : index
    %c24_157 = arith.constant 24 : index
    %229 = vector.load %arg25[%c3_155, %c0_156, %c24_157] : memref<4x8x32xf32, #tpu.memory_space<vmem>>, vector<1x8x8xf32>
    %230 = vector.shape_cast %229 : vector<1x8x8xf32> to vector<8x8xf32>
    %231 = vector.shape_cast %228 : vector<8x8xf32> to vector<1x8x8xf32>
    tpu.vector_store %arg25[%c3_155, %c0_156, %c24_157], %231 {strides = array<i32>} : memref<4x8x32xf32, #tpu.memory_space<vmem>>, vector<1x8x8xf32>,
    %c0_158 = arith.constant 0 : index
    %c0_159 = arith.constant 0 : index
    %c0_160 = arith.constant 0 : index
    %232 = vector.load %arg23[%c0_158, %c0_159, %c0_160] : memref<4x8x32xf32, #tpu.memory_space<vmem>>, vector<4x8x32xf32>
    %c0_161 = arith.constant 0 : index
    %c0_162 = arith.constant 0 : index
    %c0_163 = arith.constant 0 : index
    %233 = vector.load %arg24[%c0_161, %c0_162, %c0_163] : memref<4x8x32xf32, #tpu.memory_space<vmem>>, vector<4x8x32xf32>
    %c0_164 = arith.constant 0 : index
    %c0_165 = arith.constant 0 : index
    %c0_166 = arith.constant 0 : index
    %234 = vector.load %arg25[%c0_164, %c0_165, %c0_166] : memref<4x8x32xf32, #tpu.memory_space<vmem>>, vector<4x8x32xf32>
    "tpu.trace_start"() <{level = 10 : i32, message = "hck,hek->hce"}> : () -> ()
    %cst_167 = arith.constant dense<0.000000e+00> : vector<4x8x8xf32>
    %235 = tpu.matmul %232, %233, %cst_167 {dimension_numbers = #tpu.dot_dimension_numbers<[2], [2], [1], [1], [0, 0, 0, 1, 1, 1], [0], [0]>} : vector<4x8x32xf32>, vector<4x8x32xf32>, vector<4x8x8xf32> -> vector<4x8x8xf32>
    "tpu.trace_stop"() : () -> ()
    %c0_168 = arith.constant 0 : index
    %c0_169 = arith.constant 0 : index
    %c0_170 = arith.constant 0 : index
    %236 = vector.load %arg3[%c0_168, %c0_169, %c0_170] : memref<1x1x8xf32, #tpu.memory_space<vmem>>, vector<1x1x8xf32>
    %237 = vector.shape_cast %236 : vector<1x1x8xf32> to vector<1x8xf32>
    %cst_171 = arith.constant 5.000000e-01 : f32
    %238 = vector.broadcast %cst_171 : f32 to vector<1x8xf32>
    %239 = arith.cmpf ogt, %237, %238 : vector<1x8xf32>
    %cst_172 = arith.constant -1.000000e+04 : f32
    %240 = vector.shape_cast %239 : vector<1x8xi1> to vector<1x1x8xi1>
    %241 = vector.broadcast %240 : vector<1x1x8xi1> to vector<4x8x8xi1>
    %242 = vector.broadcast %cst_172 : f32 to vector<4x8x8xf32>
    %243 = arith.select %241, %242, %235 : vector<4x8x8xi1>, vector<4x8x8xf32>
    %cst_173 = arith.constant dense<0xFF800000> : vector<4x8xf32>
    %244 = vector.multi_reduction <maximumf>, %243, %cst_173 [2] : vector<4x8x8xf32> to vector<4x8xf32>
    %245 = vector.shape_cast %244 : vector<4x8xf32> to vector<4x8x1xf32>
    %246 = vector.broadcast %245 : vector<4x8x1xf32> to vector<4x8x8xf32>
    %247 = arith.subf %243, %246 : vector<4x8x8xf32>
    %248 = math.exp %247 : vector<4x8x8xf32>
    %cst_174 = arith.constant dense<0.000000e+00> : vector<4x8xf32>
    %249 = vector.multi_reduction <add>, %248, %cst_174 [2] : vector<4x8x8xf32> to vector<4x8xf32>
    %250 = vector.shape_cast %249 : vector<4x8xf32> to vector<4x8x1xf32>
    %251 = tpu.reciprocal %250 {approx = true} : vector<4x8x1xf32> -> vector<4x8x1xf32>
    %252 = vector.broadcast %251 : vector<4x8x1xf32> to vector<4x8x8xf32>
    %253 = arith.mulf %248, %252 : vector<4x8x8xf32>
    "tpu.trace_start"() <{level = 10 : i32, message = "hce,hek->hck"}> : () -> ()
    %cst_175 = arith.constant dense<0.000000e+00> : vector<4x8x32xf32>
    %254 = tpu.matmul %253, %234, %cst_175 {dimension_numbers = #tpu.dot_dimension_numbers<[2], [1], [1], [2], [0, 0, 0, 1, 1, 2], [0], [0]>} : vector<4x8x8xf32>, vector<4x8x32xf32>, vector<4x8x32xf32> -> vector<4x8x32xf32>
    "tpu.trace_stop"() : () -> ()
    %255 = vector.extract_strided_slice %254 {offsets = [0, 0, 0], sizes = [1, 8, 8], strides = [1, 1, 1]} : vector<4x8x32xf32> to vector<1x8x8xf32>
    %256 = vector.shape_cast %255 : vector<1x8x8xf32> to vector<8x8xf32>
    %c0_176 = arith.constant 0 : index
    %c0_177 = arith.constant 0 : index
    %257 = vector.load %arg26[%c0_176, %c0_177] : memref<32x32xf32, #tpu.memory_space<vmem>>, vector<8x8xf32>
    tpu.vector_store %arg26[%c0_176, %c0_177], %256 {strides = array<i32>} : memref<32x32xf32, #tpu.memory_space<vmem>>, vector<8x8xf32>,
    %258 = vector.extract_strided_slice %254 {offsets = [0, 0, 8], sizes = [1, 8, 8], strides = [1, 1, 1]} : vector<4x8x32xf32> to vector<1x8x8xf32>
    %259 = vector.shape_cast %258 : vector<1x8x8xf32> to vector<8x8xf32>
    %c8_178 = arith.constant 8 : index
    %c0_179 = arith.constant 0 : index
    %260 = vector.load %arg26[%c8_178, %c0_179] : memref<32x32xf32, #tpu.memory_space<vmem>>, vector<8x8xf32>
    tpu.vector_store %arg26[%c8_178, %c0_179], %259 {strides = array<i32>} : memref<32x32xf32, #tpu.memory_space<vmem>>, vector<8x8xf32>,
    %261 = vector.extract_strided_slice %254 {offsets = [0, 0, 16], sizes = [1, 8, 8], strides = [1, 1, 1]} : vector<4x8x32xf32> to vector<1x8x8xf32>
    %262 = vector.shape_cast %261 : vector<1x8x8xf32> to vector<8x8xf32>
    %c16_180 = arith.constant 16 : index
    %c0_181 = arith.constant 0 : index
    %263 = vector.load %arg26[%c16_180, %c0_181] : memref<32x32xf32, #tpu.memory_space<vmem>>, vector<8x8xf32>
    tpu.vector_store %arg26[%c16_180, %c0_181], %262 {strides = array<i32>} : memref<32x32xf32, #tpu.memory_space<vmem>>, vector<8x8xf32>,
    %264 = vector.extract_strided_slice %254 {offsets = [0, 0, 24], sizes = [1, 8, 8], strides = [1, 1, 1]} : vector<4x8x32xf32> to vector<1x8x8xf32>
    %265 = vector.shape_cast %264 : vector<1x8x8xf32> to vector<8x8xf32>
    %c24_182 = arith.constant 24 : index
    %c0_183 = arith.constant 0 : index
    %266 = vector.load %arg26[%c24_182, %c0_183] : memref<32x32xf32, #tpu.memory_space<vmem>>, vector<8x8xf32>
    tpu.vector_store %arg26[%c24_182, %c0_183], %265 {strides = array<i32>} : memref<32x32xf32, #tpu.memory_space<vmem>>, vector<8x8xf32>,
    %267 = vector.extract_strided_slice %254 {offsets = [1, 0, 0], sizes = [1, 8, 8], strides = [1, 1, 1]} : vector<4x8x32xf32> to vector<1x8x8xf32>
    %268 = vector.shape_cast %267 : vector<1x8x8xf32> to vector<8x8xf32>
    %c0_184 = arith.constant 0 : index
    %c8_185 = arith.constant 8 : index
    %269 = vector.load %arg26[%c0_184, %c8_185] : memref<32x32xf32, #tpu.memory_space<vmem>>, vector<8x8xf32>
    tpu.vector_store %arg26[%c0_184, %c8_185], %268 {strides = array<i32>} : memref<32x32xf32, #tpu.memory_space<vmem>>, vector<8x8xf32>,
    %270 = vector.extract_strided_slice %254 {offsets = [1, 0, 8], sizes = [1, 8, 8], strides = [1, 1, 1]} : vector<4x8x32xf32> to vector<1x8x8xf32>
    %271 = vector.shape_cast %270 : vector<1x8x8xf32> to vector<8x8xf32>
    %c8_186 = arith.constant 8 : index
    %c8_187 = arith.constant 8 : index
    %272 = vector.load %arg26[%c8_186, %c8_187] : memref<32x32xf32, #tpu.memory_space<vmem>>, vector<8x8xf32>
    tpu.vector_store %arg26[%c8_186, %c8_187], %271 {strides = array<i32>} : memref<32x32xf32, #tpu.memory_space<vmem>>, vector<8x8xf32>,
    %273 = vector.extract_strided_slice %254 {offsets = [1, 0, 16], sizes = [1, 8, 8], strides = [1, 1, 1]} : vector<4x8x32xf32> to vector<1x8x8xf32>
    %274 = vector.shape_cast %273 : vector<1x8x8xf32> to vector<8x8xf32>
    %c16_188 = arith.constant 16 : index
    %c8_189 = arith.constant 8 : index
    %275 = vector.load %arg26[%c16_188, %c8_189] : memref<32x32xf32, #tpu.memory_space<vmem>>, vector<8x8xf32>
    tpu.vector_store %arg26[%c16_188, %c8_189], %274 {strides = array<i32>} : memref<32x32xf32, #tpu.memory_space<vmem>>, vector<8x8xf32>,
    %276 = vector.extract_strided_slice %254 {offsets = [1, 0, 24], sizes = [1, 8, 8], strides = [1, 1, 1]} : vector<4x8x32xf32> to vector<1x8x8xf32>
    %277 = vector.shape_cast %276 : vector<1x8x8xf32> to vector<8x8xf32>
    %c24_190 = arith.constant 24 : index
    %c8_191 = arith.constant 8 : index
    %278 = vector.load %arg26[%c24_190, %c8_191] : memref<32x32xf32, #tpu.memory_space<vmem>>, vector<8x8xf32>
    tpu.vector_store %arg26[%c24_190, %c8_191], %277 {strides = array<i32>} : memref<32x32xf32, #tpu.memory_space<vmem>>, vector<8x8xf32>,
    %279 = vector.extract_strided_slice %254 {offsets = [2, 0, 0], sizes = [1, 8, 8], strides = [1, 1, 1]} : vector<4x8x32xf32> to vector<1x8x8xf32>
    %280 = vector.shape_cast %279 : vector<1x8x8xf32> to vector<8x8xf32>
    %c0_192 = arith.constant 0 : index
    %c16_193 = arith.constant 16 : index
    %281 = vector.load %arg26[%c0_192, %c16_193] : memref<32x32xf32, #tpu.memory_space<vmem>>, vector<8x8xf32>
    tpu.vector_store %arg26[%c0_192, %c16_193], %280 {strides = array<i32>} : memref<32x32xf32, #tpu.memory_space<vmem>>, vector<8x8xf32>,
    %282 = vector.extract_strided_slice %254 {offsets = [2, 0, 8], sizes = [1, 8, 8], strides = [1, 1, 1]} : vector<4x8x32xf32> to vector<1x8x8xf32>
    %283 = vector.shape_cast %282 : vector<1x8x8xf32> to vector<8x8xf32>
    %c8_194 = arith.constant 8 : index
    %c16_195 = arith.constant 16 : index
    %284 = vector.load %arg26[%c8_194, %c16_195] : memref<32x32xf32, #tpu.memory_space<vmem>>, vector<8x8xf32>
    tpu.vector_store %arg26[%c8_194, %c16_195], %283 {strides = array<i32>} : memref<32x32xf32, #tpu.memory_space<vmem>>, vector<8x8xf32>,
    %285 = vector.extract_strided_slice %254 {offsets = [2, 0, 16], sizes = [1, 8, 8], strides = [1, 1, 1]} : vector<4x8x32xf32> to vector<1x8x8xf32>
    %286 = vector.shape_cast %285 : vector<1x8x8xf32> to vector<8x8xf32>
    %c16_196 = arith.constant 16 : index
    %c16_197 = arith.constant 16 : index
    %287 = vector.load %arg26[%c16_196, %c16_197] : memref<32x32xf32, #tpu.memory_space<vmem>>, vector<8x8xf32>
    tpu.vector_store %arg26[%c16_196, %c16_197], %286 {strides = array<i32>} : memref<32x32xf32, #tpu.memory_space<vmem>>, vector<8x8xf32>,
    %288 = vector.extract_strided_slice %254 {offsets = [2, 0, 24], sizes = [1, 8, 8], strides = [1, 1, 1]} : vector<4x8x32xf32> to vector<1x8x8xf32>
    %289 = vector.shape_cast %288 : vector<1x8x8xf32> to vector<8x8xf32>
    %c24_198 = arith.constant 24 : index
    %c16_199 = arith.constant 16 : index
    %290 = vector.load %arg26[%c24_198, %c16_199] : memref<32x32xf32, #tpu.memory_space<vmem>>, vector<8x8xf32>
    tpu.vector_store %arg26[%c24_198, %c16_199], %289 {strides = array<i32>} : memref<32x32xf32, #tpu.memory_space<vmem>>, vector<8x8xf32>,
    %291 = vector.extract_strided_slice %254 {offsets = [3, 0, 0], sizes = [1, 8, 8], strides = [1, 1, 1]} : vector<4x8x32xf32> to vector<1x8x8xf32>
    %292 = vector.shape_cast %291 : vector<1x8x8xf32> to vector<8x8xf32>
    %c0_200 = arith.constant 0 : index
    %c24_201 = arith.constant 24 : index
    %293 = vector.load %arg26[%c0_200, %c24_201] : memref<32x32xf32, #tpu.memory_space<vmem>>, vector<8x8xf32>
    tpu.vector_store %arg26[%c0_200, %c24_201], %292 {strides = array<i32>} : memref<32x32xf32, #tpu.memory_space<vmem>>, vector<8x8xf32>,
    %294 = vector.extract_strided_slice %254 {offsets = [3, 0, 8], sizes = [1, 8, 8], strides = [1, 1, 1]} : vector<4x8x32xf32> to vector<1x8x8xf32>
    %295 = vector.shape_cast %294 : vector<1x8x8xf32> to vector<8x8xf32>
    %c8_202 = arith.constant 8 : index
    %c24_203 = arith.constant 24 : index
    %296 = vector.load %arg26[%c8_202, %c24_203] : memref<32x32xf32, #tpu.memory_space<vmem>>, vector<8x8xf32>
    tpu.vector_store %arg26[%c8_202, %c24_203], %295 {strides = array<i32>} : memref<32x32xf32, #tpu.memory_space<vmem>>, vector<8x8xf32>,
    %297 = vector.extract_strided_slice %254 {offsets = [3, 0, 16], sizes = [1, 8, 8], strides = [1, 1, 1]} : vector<4x8x32xf32> to vector<1x8x8xf32>
    %298 = vector.shape_cast %297 : vector<1x8x8xf32> to vector<8x8xf32>
    %c16_204 = arith.constant 16 : index
    %c24_205 = arith.constant 24 : index
    %299 = vector.load %arg26[%c16_204, %c24_205] : memref<32x32xf32, #tpu.memory_space<vmem>>, vector<8x8xf32>
    tpu.vector_store %arg26[%c16_204, %c24_205], %298 {strides = array<i32>} : memref<32x32xf32, #tpu.memory_space<vmem>>, vector<8x8xf32>,
    %300 = vector.extract_strided_slice %254 {offsets = [3, 0, 24], sizes = [1, 8, 8], strides = [1, 1, 1]} : vector<4x8x32xf32> to vector<1x8x8xf32>
    %301 = vector.shape_cast %300 : vector<1x8x8xf32> to vector<8x8xf32>
    %c24_206 = arith.constant 24 : index
    %c24_207 = arith.constant 24 : index
    %302 = vector.load %arg26[%c24_206, %c24_207] : memref<32x32xf32, #tpu.memory_space<vmem>>, vector<8x8xf32>
    tpu.vector_store %arg26[%c24_206, %c24_207], %301 {strides = array<i32>} : memref<32x32xf32, #tpu.memory_space<vmem>>, vector<8x8xf32>,
    %c0_208 = arith.constant 0 : index
    %c0_209 = arith.constant 0 : index
    %303 = vector.load %arg26[%c0_208, %c0_209] : memref<32x32xf32, #tpu.memory_space<vmem>>, vector<32x32xf32>
    %c0_210 = arith.constant 0 : index
    %c0_211 = arith.constant 0 : index
    %304 = vector.load %arg10[%c0_210, %c0_211] : memref<32x32xf32, #tpu.memory_space<vmem>>, vector<32x32xf32>
    %cst_212 = arith.constant dense<0.000000e+00> : vector<32x32xf32>
    %305 = tpu.matmul %303, %304, %cst_212 {dimension_numbers = #tpu.dot_dimension_numbers<[1], [0], [0], [1], [0, 0, 1, 1], [], []>} : vector<32x32xf32>, vector<32x32xf32>, vector<32x32xf32> -> vector<32x32xf32>
    %306 = arith.addf %1, %305 : vector<32x32xf32>
    %c0_213 = arith.constant 0 : index
    %c0_214 = arith.constant 0 : index
    %307 = vector.load %arg11[%c0_213, %c0_214] : memref<1x32xf32, #tpu.memory_space<vmem>>, vector<1x32xf32>
    %308 = vector.broadcast %307 : vector<1x32xf32> to vector<32x32xf32>
    %309 = arith.addf %306, %308 : vector<32x32xf32>
    %c0_215 = arith.constant 0 : index
    %c0_216 = arith.constant 0 : index
    %310 = vector.load %arg12[%c0_215, %c0_216] : memref<2x32xf32, #tpu.memory_space<vmem>>, vector<1x32xf32>
    %c1_217 = arith.constant 1 : index
    %c0_218 = arith.constant 0 : index
    %311 = vector.load %arg12[%c1_217, %c0_218] : memref<2x32xf32, #tpu.memory_space<vmem>>, vector<1x32xf32>
    %cst_219 = arith.constant dense<0.000000e+00> : vector<32xf32>
    %312 = vector.multi_reduction <add>, %309, %cst_219 [1] : vector<32x32xf32> to vector<32xf32>
    %313 = vector.shape_cast %312 : vector<32xf32> to vector<32x1xf32>
    %cst_220 = arith.constant 3.200000e+01 : f32
    %314 = vector.broadcast %cst_220 : f32 to vector<32x1xf32>
    %315 = arith.divf %313, %314 : vector<32x1xf32>
    %316 = vector.broadcast %315 : vector<32x1xf32> to vector<32x32xf32>
    %317 = arith.subf %309, %316 : vector<32x32xf32>
    %318 = arith.mulf %317, %317 : vector<32x32xf32>
    %cst_221 = arith.constant dense<0.000000e+00> : vector<32xf32>
    %319 = vector.multi_reduction <add>, %318, %cst_221 [1] : vector<32x32xf32> to vector<32xf32>
    %320 = vector.shape_cast %319 : vector<32xf32> to vector<32x1xf32>
    %cst_222 = arith.constant 3.200000e+01 : f32
    %321 = vector.broadcast %cst_222 : f32 to vector<32x1xf32>
    %322 = arith.divf %320, %321 : vector<32x1xf32>
    %cst_223 = arith.constant 9.99999996E-13 : f32
    %323 = vector.broadcast %cst_223 : f32 to vector<32x1xf32>
    %324 = arith.addf %322, %323 : vector<32x1xf32>
    %325 = math.rsqrt %324 : vector<32x1xf32>
    %326 = vector.broadcast %325 : vector<32x1xf32> to vector<32x32xf32>
    %327 = arith.mulf %317, %326 : vector<32x32xf32>
    %328 = vector.broadcast %310 : vector<1x32xf32> to vector<32x32xf32>
    %329 = arith.mulf %327, %328 : vector<32x32xf32>
    %330 = vector.broadcast %311 : vector<1x32xf32> to vector<32x32xf32>
    %331 = arith.addf %329, %330 : vector<32x32xf32>
    %c0_224 = arith.constant 0 : index
    %c0_225 = arith.constant 0 : index
    %332 = vector.load %arg5[%c0_224, %c0_225] : memref<32x32xf32, #tpu.memory_space<vmem>>, vector<32x32xf32>
    %cst_226 = arith.constant dense<0.000000e+00> : vector<32x32xf32>
    %333 = tpu.matmul %332, %331, %cst_226 {dimension_numbers = #tpu.dot_dimension_numbers<[1], [0], [0], [1], [0, 0, 1, 1], [], []>} : vector<32x32xf32>, vector<32x32xf32>, vector<32x32xf32> -> vector<32x32xf32>
    %c0_227 = arith.constant 0 : index
    %c0_228 = arith.constant 0 : index
    %334 = vector.load %arg13[%c0_227, %c0_228] : memref<32x96xf32, #tpu.memory_space<vmem>>, vector<32x96xf32>
    %cst_229 = arith.constant dense<0.000000e+00> : vector<32x96xf32>
    %335 = tpu.matmul %333, %334, %cst_229 {dimension_numbers = #tpu.dot_dimension_numbers<[1], [0], [0], [1], [0, 0, 1, 1], [], []>} : vector<32x32xf32>, vector<32x96xf32>, vector<32x96xf32> -> vector<32x96xf32>
    %c0_230 = arith.constant 0 : index
    %c0_231 = arith.constant 0 : index
    %336 = vector.load %arg14[%c0_230, %c0_231] : memref<1x96xf32, #tpu.memory_space<vmem>>, vector<1x96xf32>
    %337 = vector.broadcast %336 : vector<1x96xf32> to vector<32x96xf32>
    %338 = arith.addf %335, %337 : vector<32x96xf32>
    %339 = vector.extract_strided_slice %338 {offsets = [0, 0], sizes = [32, 32], strides = [1, 1]} : vector<32x96xf32> to vector<32x32xf32>
    %cst_232 = arith.constant 0.353553385 : f32
    %340 = vector.broadcast %cst_232 : f32 to vector<32x32xf32>
    %341 = arith.mulf %339, %340 : vector<32x32xf32>
    %342 = vector.extract_strided_slice %338 {offsets = [0, 32], sizes = [32, 32], strides = [1, 1]} : vector<32x96xf32> to vector<32x32xf32>
    %343 = vector.extract_strided_slice %338 {offsets = [0, 64], sizes = [32, 32], strides = [1, 1]} : vector<32x96xf32> to vector<32x32xf32>
    %344 = vector.extract_strided_slice %341 {offsets = [0, 0], sizes = [4, 32], strides = [1, 1]} : vector<32x32xf32> to vector<4x32xf32>
    %c0_233 = arith.constant 0 : index
    %c0_234 = arith.constant 0 : index
    %c0_235 = arith.constant 0 : index
    %345 = vector.load %arg27[%c0_233, %c0_234, %c0_235] : memref<8x4x32xf32, #tpu.memory_space<vmem>>, vector<1x4x32xf32>
    %346 = vector.shape_cast %345 : vector<1x4x32xf32> to vector<4x32xf32>
    %347 = vector.shape_cast %344 : vector<4x32xf32> to vector<1x4x32xf32>
    tpu.vector_store %arg27[%c0_233, %c0_234, %c0_235], %347 {strides = array<i32>} : memref<8x4x32xf32, #tpu.memory_space<vmem>>, vector<1x4x32xf32>,
    %348 = vector.extract_strided_slice %342 {offsets = [0, 0], sizes = [4, 32], strides = [1, 1]} : vector<32x32xf32> to vector<4x32xf32>
    %c0_236 = arith.constant 0 : index
    %c0_237 = arith.constant 0 : index
    %c0_238 = arith.constant 0 : index
    %349 = vector.load %arg28[%c0_236, %c0_237, %c0_238] : memref<8x4x32xf32, #tpu.memory_space<vmem>>, vector<1x4x32xf32>
    %350 = vector.shape_cast %349 : vector<1x4x32xf32> to vector<4x32xf32>
    %351 = vector.shape_cast %348 : vector<4x32xf32> to vector<1x4x32xf32>
    tpu.vector_store %arg28[%c0_236, %c0_237, %c0_238], %351 {strides = array<i32>} : memref<8x4x32xf32, #tpu.memory_space<vmem>>, vector<1x4x32xf32>,
    %352 = vector.extract_strided_slice %343 {offsets = [0, 0], sizes = [4, 32], strides = [1, 1]} : vector<32x32xf32> to vector<4x32xf32>
    %c0_239 = arith.constant 0 : index
    %c0_240 = arith.constant 0 : index
    %c0_241 = arith.constant 0 : index
    %353 = vector.load %arg29[%c0_239, %c0_240, %c0_241] : memref<8x4x32xf32, #tpu.memory_space<vmem>>, vector<1x4x32xf32>
    %354 = vector.shape_cast %353 : vector<1x4x32xf32> to vector<4x32xf32>
    %355 = vector.shape_cast %352 : vector<4x32xf32> to vector<1x4x32xf32>
    tpu.vector_store %arg29[%c0_239, %c0_240, %c0_241], %355 {strides = array<i32>} : memref<8x4x32xf32, #tpu.memory_space<vmem>>, vector<1x4x32xf32>,
    %356 = vector.extract_strided_slice %341 {offsets = [4, 0], sizes = [4, 32], strides = [1, 1]} : vector<32x32xf32> to vector<4x32xf32>
    %c1_242 = arith.constant 1 : index
    %c0_243 = arith.constant 0 : index
    %c0_244 = arith.constant 0 : index
    %357 = vector.load %arg27[%c1_242, %c0_243, %c0_244] : memref<8x4x32xf32, #tpu.memory_space<vmem>>, vector<1x4x32xf32>
    %358 = vector.shape_cast %357 : vector<1x4x32xf32> to vector<4x32xf32>
    %359 = vector.shape_cast %356 : vector<4x32xf32> to vector<1x4x32xf32>
    tpu.vector_store %arg27[%c1_242, %c0_243, %c0_244], %359 {strides = array<i32>} : memref<8x4x32xf32, #tpu.memory_space<vmem>>, vector<1x4x32xf32>,
    %360 = vector.extract_strided_slice %342 {offsets = [4, 0], sizes = [4, 32], strides = [1, 1]} : vector<32x32xf32> to vector<4x32xf32>
    %c1_245 = arith.constant 1 : index
    %c0_246 = arith.constant 0 : index
    %c0_247 = arith.constant 0 : index
    %361 = vector.load %arg28[%c1_245, %c0_246, %c0_247] : memref<8x4x32xf32, #tpu.memory_space<vmem>>, vector<1x4x32xf32>
    %362 = vector.shape_cast %361 : vector<1x4x32xf32> to vector<4x32xf32>
    %363 = vector.shape_cast %360 : vector<4x32xf32> to vector<1x4x32xf32>
    tpu.vector_store %arg28[%c1_245, %c0_246, %c0_247], %363 {strides = array<i32>} : memref<8x4x32xf32, #tpu.memory_space<vmem>>, vector<1x4x32xf32>,
    %364 = vector.extract_strided_slice %343 {offsets = [4, 0], sizes = [4, 32], strides = [1, 1]} : vector<32x32xf32> to vector<4x32xf32>
    %c1_248 = arith.constant 1 : index
    %c0_249 = arith.constant 0 : index
    %c0_250 = arith.constant 0 : index
    %365 = vector.load %arg29[%c1_248, %c0_249, %c0_250] : memref<8x4x32xf32, #tpu.memory_space<vmem>>, vector<1x4x32xf32>
    %366 = vector.shape_cast %365 : vector<1x4x32xf32> to vector<4x32xf32>
    %367 = vector.shape_cast %364 : vector<4x32xf32> to vector<1x4x32xf32>
    tpu.vector_store %arg29[%c1_248, %c0_249, %c0_250], %367 {strides = array<i32>} : memref<8x4x32xf32, #tpu.memory_space<vmem>>, vector<1x4x32xf32>,
    %368 = vector.extract_strided_slice %341 {offsets = [8, 0], sizes = [4, 32], strides = [1, 1]} : vector<32x32xf32> to vector<4x32xf32>
    %c2_251 = arith.constant 2 : index
    %c0_252 = arith.constant 0 : index
    %c0_253 = arith.constant 0 : index
    %369 = vector.load %arg27[%c2_251, %c0_252, %c0_253] : memref<8x4x32xf32, #tpu.memory_space<vmem>>, vector<1x4x32xf32>
    %370 = vector.shape_cast %369 : vector<1x4x32xf32> to vector<4x32xf32>
    %371 = vector.shape_cast %368 : vector<4x32xf32> to vector<1x4x32xf32>
    tpu.vector_store %arg27[%c2_251, %c0_252, %c0_253], %371 {strides = array<i32>} : memref<8x4x32xf32, #tpu.memory_space<vmem>>, vector<1x4x32xf32>,
    %372 = vector.extract_strided_slice %342 {offsets = [8, 0], sizes = [4, 32], strides = [1, 1]} : vector<32x32xf32> to vector<4x32xf32>
    %c2_254 = arith.constant 2 : index
    %c0_255 = arith.constant 0 : index
    %c0_256 = arith.constant 0 : index
    %373 = vector.load %arg28[%c2_254, %c0_255, %c0_256] : memref<8x4x32xf32, #tpu.memory_space<vmem>>, vector<1x4x32xf32>
    %374 = vector.shape_cast %373 : vector<1x4x32xf32> to vector<4x32xf32>
    %375 = vector.shape_cast %372 : vector<4x32xf32> to vector<1x4x32xf32>
    tpu.vector_store %arg28[%c2_254, %c0_255, %c0_256], %375 {strides = array<i32>} : memref<8x4x32xf32, #tpu.memory_space<vmem>>, vector<1x4x32xf32>,
    %376 = vector.extract_strided_slice %343 {offsets = [8, 0], sizes = [4, 32], strides = [1, 1]} : vector<32x32xf32> to vector<4x32xf32>
    %c2_257 = arith.constant 2 : index
    %c0_258 = arith.constant 0 : index
    %c0_259 = arith.constant 0 : index
    %377 = vector.load %arg29[%c2_257, %c0_258, %c0_259] : memref<8x4x32xf32, #tpu.memory_space<vmem>>, vector<1x4x32xf32>
    %378 = vector.shape_cast %377 : vector<1x4x32xf32> to vector<4x32xf32>
    %379 = vector.shape_cast %376 : vector<4x32xf32> to vector<1x4x32xf32>
    tpu.vector_store %arg29[%c2_257, %c0_258, %c0_259], %379 {strides = array<i32>} : memref<8x4x32xf32, #tpu.memory_space<vmem>>, vector<1x4x32xf32>,
    %380 = vector.extract_strided_slice %341 {offsets = [12, 0], sizes = [4, 32], strides = [1, 1]} : vector<32x32xf32> to vector<4x32xf32>
    %c3_260 = arith.constant 3 : index
    %c0_261 = arith.constant 0 : index
    %c0_262 = arith.constant 0 : index
    %381 = vector.load %arg27[%c3_260, %c0_261, %c0_262] : memref<8x4x32xf32, #tpu.memory_space<vmem>>, vector<1x4x32xf32>
    %382 = vector.shape_cast %381 : vector<1x4x32xf32> to vector<4x32xf32>
    %383 = vector.shape_cast %380 : vector<4x32xf32> to vector<1x4x32xf32>
    tpu.vector_store %arg27[%c3_260, %c0_261, %c0_262], %383 {strides = array<i32>} : memref<8x4x32xf32, #tpu.memory_space<vmem>>, vector<1x4x32xf32>,
    %384 = vector.extract_strided_slice %342 {offsets = [12, 0], sizes = [4, 32], strides = [1, 1]} : vector<32x32xf32> to vector<4x32xf32>
    %c3_263 = arith.constant 3 : index
    %c0_264 = arith.constant 0 : index
    %c0_265 = arith.constant 0 : index
    %385 = vector.load %arg28[%c3_263, %c0_264, %c0_265] : memref<8x4x32xf32, #tpu.memory_space<vmem>>, vector<1x4x32xf32>
    %386 = vector.shape_cast %385 : vector<1x4x32xf32> to vector<4x32xf32>
    %387 = vector.shape_cast %384 : vector<4x32xf32> to vector<1x4x32xf32>
    tpu.vector_store %arg28[%c3_263, %c0_264, %c0_265], %387 {strides = array<i32>} : memref<8x4x32xf32, #tpu.memory_space<vmem>>, vector<1x4x32xf32>,
    %388 = vector.extract_strided_slice %343 {offsets = [12, 0], sizes = [4, 32], strides = [1, 1]} : vector<32x32xf32> to vector<4x32xf32>
    %c3_266 = arith.constant 3 : index
    %c0_267 = arith.constant 0 : index
    %c0_268 = arith.constant 0 : index
    %389 = vector.load %arg29[%c3_266, %c0_267, %c0_268] : memref<8x4x32xf32, #tpu.memory_space<vmem>>, vector<1x4x32xf32>
    %390 = vector.shape_cast %389 : vector<1x4x32xf32> to vector<4x32xf32>
    %391 = vector.shape_cast %388 : vector<4x32xf32> to vector<1x4x32xf32>
    tpu.vector_store %arg29[%c3_266, %c0_267, %c0_268], %391 {strides = array<i32>} : memref<8x4x32xf32, #tpu.memory_space<vmem>>, vector<1x4x32xf32>,
    %392 = vector.extract_strided_slice %341 {offsets = [16, 0], sizes = [4, 32], strides = [1, 1]} : vector<32x32xf32> to vector<4x32xf32>
    %c4 = arith.constant 4 : index
    %c0_269 = arith.constant 0 : index
    %c0_270 = arith.constant 0 : index
    %393 = vector.load %arg27[%c4, %c0_269, %c0_270] : memref<8x4x32xf32, #tpu.memory_space<vmem>>, vector<1x4x32xf32>
    %394 = vector.shape_cast %393 : vector<1x4x32xf32> to vector<4x32xf32>
    %395 = vector.shape_cast %392 : vector<4x32xf32> to vector<1x4x32xf32>
    tpu.vector_store %arg27[%c4, %c0_269, %c0_270], %395 {strides = array<i32>} : memref<8x4x32xf32, #tpu.memory_space<vmem>>, vector<1x4x32xf32>,
    %396 = vector.extract_strided_slice %342 {offsets = [16, 0], sizes = [4, 32], strides = [1, 1]} : vector<32x32xf32> to vector<4x32xf32>
    %c4_271 = arith.constant 4 : index
    %c0_272 = arith.constant 0 : index
    %c0_273 = arith.constant 0 : index
    %397 = vector.load %arg28[%c4_271, %c0_272, %c0_273] : memref<8x4x32xf32, #tpu.memory_space<vmem>>, vector<1x4x32xf32>
    %398 = vector.shape_cast %397 : vector<1x4x32xf32> to vector<4x32xf32>
    %399 = vector.shape_cast %396 : vector<4x32xf32> to vector<1x4x32xf32>
    tpu.vector_store %arg28[%c4_271, %c0_272, %c0_273], %399 {strides = array<i32>} : memref<8x4x32xf32, #tpu.memory_space<vmem>>, vector<1x4x32xf32>,
    %400 = vector.extract_strided_slice %343 {offsets = [16, 0], sizes = [4, 32], strides = [1, 1]} : vector<32x32xf32> to vector<4x32xf32>
    %c4_274 = arith.constant 4 : index
    %c0_275 = arith.constant 0 : index
    %c0_276 = arith.constant 0 : index
    %401 = vector.load %arg29[%c4_274, %c0_275, %c0_276] : memref<8x4x32xf32, #tpu.memory_space<vmem>>, vector<1x4x32xf32>
    %402 = vector.shape_cast %401 : vector<1x4x32xf32> to vector<4x32xf32>
    %403 = vector.shape_cast %400 : vector<4x32xf32> to vector<1x4x32xf32>
    tpu.vector_store %arg29[%c4_274, %c0_275, %c0_276], %403 {strides = array<i32>} : memref<8x4x32xf32, #tpu.memory_space<vmem>>, vector<1x4x32xf32>,
    %404 = vector.extract_strided_slice %341 {offsets = [20, 0], sizes = [4, 32], strides = [1, 1]} : vector<32x32xf32> to vector<4x32xf32>
    %c5 = arith.constant 5 : index
    %c0_277 = arith.constant 0 : index
    %c0_278 = arith.constant 0 : index
    %405 = vector.load %arg27[%c5, %c0_277, %c0_278] : memref<8x4x32xf32, #tpu.memory_space<vmem>>, vector<1x4x32xf32>
    %406 = vector.shape_cast %405 : vector<1x4x32xf32> to vector<4x32xf32>
    %407 = vector.shape_cast %404 : vector<4x32xf32> to vector<1x4x32xf32>
    tpu.vector_store %arg27[%c5, %c0_277, %c0_278], %407 {strides = array<i32>} : memref<8x4x32xf32, #tpu.memory_space<vmem>>, vector<1x4x32xf32>,
    %408 = vector.extract_strided_slice %342 {offsets = [20, 0], sizes = [4, 32], strides = [1, 1]} : vector<32x32xf32> to vector<4x32xf32>
    %c5_279 = arith.constant 5 : index
    %c0_280 = arith.constant 0 : index
    %c0_281 = arith.constant 0 : index
    %409 = vector.load %arg28[%c5_279, %c0_280, %c0_281] : memref<8x4x32xf32, #tpu.memory_space<vmem>>, vector<1x4x32xf32>
    %410 = vector.shape_cast %409 : vector<1x4x32xf32> to vector<4x32xf32>
    %411 = vector.shape_cast %408 : vector<4x32xf32> to vector<1x4x32xf32>
    tpu.vector_store %arg28[%c5_279, %c0_280, %c0_281], %411 {strides = array<i32>} : memref<8x4x32xf32, #tpu.memory_space<vmem>>, vector<1x4x32xf32>,
    %412 = vector.extract_strided_slice %343 {offsets = [20, 0], sizes = [4, 32], strides = [1, 1]} : vector<32x32xf32> to vector<4x32xf32>
    %c5_282 = arith.constant 5 : index
    %c0_283 = arith.constant 0 : index
    %c0_284 = arith.constant 0 : index
    %413 = vector.load %arg29[%c5_282, %c0_283, %c0_284] : memref<8x4x32xf32, #tpu.memory_space<vmem>>, vector<1x4x32xf32>
    %414 = vector.shape_cast %413 : vector<1x4x32xf32> to vector<4x32xf32>
    %415 = vector.shape_cast %412 : vector<4x32xf32> to vector<1x4x32xf32>
    tpu.vector_store %arg29[%c5_282, %c0_283, %c0_284], %415 {strides = array<i32>} : memref<8x4x32xf32, #tpu.memory_space<vmem>>, vector<1x4x32xf32>,
    %416 = vector.extract_strided_slice %341 {offsets = [24, 0], sizes = [4, 32], strides = [1, 1]} : vector<32x32xf32> to vector<4x32xf32>
    %c6 = arith.constant 6 : index
    %c0_285 = arith.constant 0 : index
    %c0_286 = arith.constant 0 : index
    %417 = vector.load %arg27[%c6, %c0_285, %c0_286] : memref<8x4x32xf32, #tpu.memory_space<vmem>>, vector<1x4x32xf32>
    %418 = vector.shape_cast %417 : vector<1x4x32xf32> to vector<4x32xf32>
    %419 = vector.shape_cast %416 : vector<4x32xf32> to vector<1x4x32xf32>
    tpu.vector_store %arg27[%c6, %c0_285, %c0_286], %419 {strides = array<i32>} : memref<8x4x32xf32, #tpu.memory_space<vmem>>, vector<1x4x32xf32>,
    %420 = vector.extract_strided_slice %342 {offsets = [24, 0], sizes = [4, 32], strides = [1, 1]} : vector<32x32xf32> to vector<4x32xf32>
    %c6_287 = arith.constant 6 : index
    %c0_288 = arith.constant 0 : index
    %c0_289 = arith.constant 0 : index
    %421 = vector.load %arg28[%c6_287, %c0_288, %c0_289] : memref<8x4x32xf32, #tpu.memory_space<vmem>>, vector<1x4x32xf32>
    %422 = vector.shape_cast %421 : vector<1x4x32xf32> to vector<4x32xf32>
    %423 = vector.shape_cast %420 : vector<4x32xf32> to vector<1x4x32xf32>
    tpu.vector_store %arg28[%c6_287, %c0_288, %c0_289], %423 {strides = array<i32>} : memref<8x4x32xf32, #tpu.memory_space<vmem>>, vector<1x4x32xf32>,
    %424 = vector.extract_strided_slice %343 {offsets = [24, 0], sizes = [4, 32], strides = [1, 1]} : vector<32x32xf32> to vector<4x32xf32>
    %c6_290 = arith.constant 6 : index
    %c0_291 = arith.constant 0 : index
    %c0_292 = arith.constant 0 : index
    %425 = vector.load %arg29[%c6_290, %c0_291, %c0_292] : memref<8x4x32xf32, #tpu.memory_space<vmem>>, vector<1x4x32xf32>
    %426 = vector.shape_cast %425 : vector<1x4x32xf32> to vector<4x32xf32>
    %427 = vector.shape_cast %424 : vector<4x32xf32> to vector<1x4x32xf32>
    tpu.vector_store %arg29[%c6_290, %c0_291, %c0_292], %427 {strides = array<i32>} : memref<8x4x32xf32, #tpu.memory_space<vmem>>, vector<1x4x32xf32>,
    %428 = vector.extract_strided_slice %341 {offsets = [28, 0], sizes = [4, 32], strides = [1, 1]} : vector<32x32xf32> to vector<4x32xf32>
    %c7 = arith.constant 7 : index
    %c0_293 = arith.constant 0 : index
    %c0_294 = arith.constant 0 : index
    %429 = vector.load %arg27[%c7, %c0_293, %c0_294] : memref<8x4x32xf32, #tpu.memory_space<vmem>>, vector<1x4x32xf32>
    %430 = vector.shape_cast %429 : vector<1x4x32xf32> to vector<4x32xf32>
    %431 = vector.shape_cast %428 : vector<4x32xf32> to vector<1x4x32xf32>
    tpu.vector_store %arg27[%c7, %c0_293, %c0_294], %431 {strides = array<i32>} : memref<8x4x32xf32, #tpu.memory_space<vmem>>, vector<1x4x32xf32>,
    %432 = vector.extract_strided_slice %342 {offsets = [28, 0], sizes = [4, 32], strides = [1, 1]} : vector<32x32xf32> to vector<4x32xf32>
    %c7_295 = arith.constant 7 : index
    %c0_296 = arith.constant 0 : index
    %c0_297 = arith.constant 0 : index
    %433 = vector.load %arg28[%c7_295, %c0_296, %c0_297] : memref<8x4x32xf32, #tpu.memory_space<vmem>>, vector<1x4x32xf32>
    %434 = vector.shape_cast %433 : vector<1x4x32xf32> to vector<4x32xf32>
    %435 = vector.shape_cast %432 : vector<4x32xf32> to vector<1x4x32xf32>
    tpu.vector_store %arg28[%c7_295, %c0_296, %c0_297], %435 {strides = array<i32>} : memref<8x4x32xf32, #tpu.memory_space<vmem>>, vector<1x4x32xf32>,
    %436 = vector.extract_strided_slice %343 {offsets = [28, 0], sizes = [4, 32], strides = [1, 1]} : vector<32x32xf32> to vector<4x32xf32>
    %c7_298 = arith.constant 7 : index
    %c0_299 = arith.constant 0 : index
    %c0_300 = arith.constant 0 : index
    %437 = vector.load %arg29[%c7_298, %c0_299, %c0_300] : memref<8x4x32xf32, #tpu.memory_space<vmem>>, vector<1x4x32xf32>
    %438 = vector.shape_cast %437 : vector<1x4x32xf32> to vector<4x32xf32>
    %439 = vector.shape_cast %436 : vector<4x32xf32> to vector<1x4x32xf32>
    tpu.vector_store %arg29[%c7_298, %c0_299, %c0_300], %439 {strides = array<i32>} : memref<8x4x32xf32, #tpu.memory_space<vmem>>, vector<1x4x32xf32>,
    %c0_301 = arith.constant 0 : index
    %c0_302 = arith.constant 0 : index
    %c0_303 = arith.constant 0 : index
    %440 = vector.load %arg27[%c0_301, %c0_302, %c0_303] : memref<8x4x32xf32, #tpu.memory_space<vmem>>, vector<8x4x32xf32>
    %c0_304 = arith.constant 0 : index
    %c0_305 = arith.constant 0 : index
    %c0_306 = arith.constant 0 : index
    %441 = vector.load %arg28[%c0_304, %c0_305, %c0_306] : memref<8x4x32xf32, #tpu.memory_space<vmem>>, vector<8x4x32xf32>
    %c0_307 = arith.constant 0 : index
    %c0_308 = arith.constant 0 : index
    %c0_309 = arith.constant 0 : index
    %442 = vector.load %arg29[%c0_307, %c0_308, %c0_309] : memref<8x4x32xf32, #tpu.memory_space<vmem>>, vector<8x4x32xf32>
    %c0_310 = arith.constant 0 : index
    %c0_311 = arith.constant 0 : index
    %c0_312 = arith.constant 0 : index
    %c0_313 = arith.constant 0 : index
    %443 = vector.load %arg4[%c0_310, %c0_311, %c0_312, %c0_313] : memref<1x8x1x4xf32, #tpu.memory_space<vmem>>, vector<1x8x1x4xf32>
    %444 = vector.shape_cast %443 : vector<1x8x1x4xf32> to vector<8x1x4xf32>
    %445 = vector.extract_strided_slice %440 {offsets = [0, 0, 0], sizes = [8, 4, 8], strides = [1, 1, 1]} : vector<8x4x32xf32> to vector<8x4x8xf32>
    %446 = vector.extract_strided_slice %441 {offsets = [0, 0, 0], sizes = [8, 4, 8], strides = [1, 1, 1]} : vector<8x4x32xf32> to vector<8x4x8xf32>
    "tpu.trace_start"() <{level = 10 : i32, message = "crd,csd->crs"}> : () -> ()
    %cst_314 = arith.constant dense<0.000000e+00> : vector<8x4x4xf32>
    %447 = tpu.matmul %445, %446, %cst_314 {dimension_numbers = #tpu.dot_dimension_numbers<[2], [2], [1], [1], [0, 0, 0, 1, 1, 1], [0], [0]>} : vector<8x4x8xf32>, vector<8x4x8xf32>, vector<8x4x4xf32> -> vector<8x4x4xf32>
    %cst_315 = arith.constant 5.000000e-01 : f32
    "tpu.trace_stop"() : () -> ()
    %448 = vector.broadcast %cst_315 : f32 to vector<8x1x4xf32>
    %449 = arith.cmpf ogt, %444, %448 : vector<8x1x4xf32>
    %cst_316 = arith.constant -1.000000e+04 : f32
    %450 = vector.shape_cast %449 : vector<8x1x4xi1> to vector<8x1x4xi1>
    %451 = vector.broadcast %450 : vector<8x1x4xi1> to vector<8x4x4xi1>
    %452 = vector.broadcast %cst_316 : f32 to vector<8x4x4xf32>
    %453 = arith.select %451, %452, %447 : vector<8x4x4xi1>, vector<8x4x4xf32>
    %cst_317 = arith.constant dense<0xFF800000> : vector<8x4xf32>
    %454 = vector.multi_reduction <maximumf>, %453, %cst_317 [2] : vector<8x4x4xf32> to vector<8x4xf32>
    %455 = vector.shape_cast %454 : vector<8x4xf32> to vector<8x4x1xf32>
    %456 = vector.broadcast %455 : vector<8x4x1xf32> to vector<8x4x4xf32>
    %457 = arith.subf %453, %456 : vector<8x4x4xf32>
    %458 = math.exp %457 : vector<8x4x4xf32>
    %cst_318 = arith.constant dense<0.000000e+00> : vector<8x4xf32>
    %459 = vector.multi_reduction <add>, %458, %cst_318 [2] : vector<8x4x4xf32> to vector<8x4xf32>
    %460 = vector.shape_cast %459 : vector<8x4xf32> to vector<8x4x1xf32>
    %461 = tpu.reciprocal %460 {approx = true} : vector<8x4x1xf32> -> vector<8x4x1xf32>
    %462 = vector.broadcast %461 : vector<8x4x1xf32> to vector<8x4x4xf32>
    %463 = arith.mulf %458, %462 : vector<8x4x4xf32>
    %464 = vector.extract_strided_slice %442 {offsets = [0, 0, 0], sizes = [8, 4, 8], strides = [1, 1, 1]} : vector<8x4x32xf32> to vector<8x4x8xf32>
    "tpu.trace_start"() <{level = 10 : i32, message = "crs,csd->crd"}> : () -> ()
    %cst_319 = arith.constant dense<0.000000e+00> : vector<8x4x8xf32>
    %465 = tpu.matmul %463, %464, %cst_319 {dimension_numbers = #tpu.dot_dimension_numbers<[2], [1], [1], [2], [0, 0, 0, 1, 1, 2], [0], [0]>} : vector<8x4x4xf32>, vector<8x4x8xf32>, vector<8x4x8xf32> -> vector<8x4x8xf32>
    "tpu.trace_stop"() : () -> ()
    %c0_320 = arith.constant 0 : index
    %c0_321 = arith.constant 0 : index
    %c0_322 = arith.constant 0 : index
    %466 = vector.load %arg30[%c0_320, %c0_321, %c0_322] : memref<8x4x32xf32, #tpu.memory_space<vmem>>, vector<8x4x8xf32>
    tpu.vector_store %arg30[%c0_320, %c0_321, %c0_322], %465 {strides = array<i32>} : memref<8x4x32xf32, #tpu.memory_space<vmem>>, vector<8x4x8xf32>,
    %467 = vector.extract_strided_slice %440 {offsets = [0, 0, 8], sizes = [8, 4, 8], strides = [1, 1, 1]} : vector<8x4x32xf32> to vector<8x4x8xf32>
    %468 = vector.extract_strided_slice %441 {offsets = [0, 0, 8], sizes = [8, 4, 8], strides = [1, 1, 1]} : vector<8x4x32xf32> to vector<8x4x8xf32>
    "tpu.trace_start"() <{level = 10 : i32, message = "crd,csd->crs"}> : () -> ()
    %cst_323 = arith.constant dense<0.000000e+00> : vector<8x4x4xf32>
    %469 = tpu.matmul %467, %468, %cst_323 {dimension_numbers = #tpu.dot_dimension_numbers<[2], [2], [1], [1], [0, 0, 0, 1, 1, 1], [0], [0]>} : vector<8x4x8xf32>, vector<8x4x8xf32>, vector<8x4x4xf32> -> vector<8x4x4xf32>
    %cst_324 = arith.constant 5.000000e-01 : f32
    "tpu.trace_stop"() : () -> ()
    %470 = vector.broadcast %cst_324 : f32 to vector<8x1x4xf32>
    %471 = arith.cmpf ogt, %444, %470 : vector<8x1x4xf32>
    %cst_325 = arith.constant -1.000000e+04 : f32
    %472 = vector.shape_cast %471 : vector<8x1x4xi1> to vector<8x1x4xi1>
    %473 = vector.broadcast %472 : vector<8x1x4xi1> to vector<8x4x4xi1>
    %474 = vector.broadcast %cst_325 : f32 to vector<8x4x4xf32>
    %475 = arith.select %473, %474, %469 : vector<8x4x4xi1>, vector<8x4x4xf32>
    %cst_326 = arith.constant dense<0xFF800000> : vector<8x4xf32>
    %476 = vector.multi_reduction <maximumf>, %475, %cst_326 [2] : vector<8x4x4xf32> to vector<8x4xf32>
    %477 = vector.shape_cast %476 : vector<8x4xf32> to vector<8x4x1xf32>
    %478 = vector.broadcast %477 : vector<8x4x1xf32> to vector<8x4x4xf32>
    %479 = arith.subf %475, %478 : vector<8x4x4xf32>
    %480 = math.exp %479 : vector<8x4x4xf32>
    %cst_327 = arith.constant dense<0.000000e+00> : vector<8x4xf32>
    %481 = vector.multi_reduction <add>, %480, %cst_327 [2] : vector<8x4x4xf32> to vector<8x4xf32>
    %482 = vector.shape_cast %481 : vector<8x4xf32> to vector<8x4x1xf32>
    %483 = tpu.reciprocal %482 {approx = true} : vector<8x4x1xf32> -> vector<8x4x1xf32>
    %484 = vector.broadcast %483 : vector<8x4x1xf32> to vector<8x4x4xf32>
    %485 = arith.mulf %480, %484 : vector<8x4x4xf32>
    %486 = vector.extract_strided_slice %442 {offsets = [0, 0, 8], sizes = [8, 4, 8], strides = [1, 1, 1]} : vector<8x4x32xf32> to vector<8x4x8xf32>
    "tpu.trace_start"() <{level = 10 : i32, message = "crs,csd->crd"}> : () -> ()
    %cst_328 = arith.constant dense<0.000000e+00> : vector<8x4x8xf32>
    %487 = tpu.matmul %485, %486, %cst_328 {dimension_numbers = #tpu.dot_dimension_numbers<[2], [1], [1], [2], [0, 0, 0, 1, 1, 2], [0], [0]>} : vector<8x4x4xf32>, vector<8x4x8xf32>, vector<8x4x8xf32> -> vector<8x4x8xf32>
    "tpu.trace_stop"() : () -> ()
    %c0_329 = arith.constant 0 : index
    %c0_330 = arith.constant 0 : index
    %c8_331 = arith.constant 8 : index
    %488 = vector.load %arg30[%c0_329, %c0_330, %c8_331] : memref<8x4x32xf32, #tpu.memory_space<vmem>>, vector<8x4x8xf32>
    tpu.vector_store %arg30[%c0_329, %c0_330, %c8_331], %487 {strides = array<i32>} : memref<8x4x32xf32, #tpu.memory_space<vmem>>, vector<8x4x8xf32>,
    %489 = vector.extract_strided_slice %440 {offsets = [0, 0, 16], sizes = [8, 4, 8], strides = [1, 1, 1]} : vector<8x4x32xf32> to vector<8x4x8xf32>
    %490 = vector.extract_strided_slice %441 {offsets = [0, 0, 16], sizes = [8, 4, 8], strides = [1, 1, 1]} : vector<8x4x32xf32> to vector<8x4x8xf32>
    "tpu.trace_start"() <{level = 10 : i32, message = "crd,csd->crs"}> : () -> ()
    %cst_332 = arith.constant dense<0.000000e+00> : vector<8x4x4xf32>
    %491 = tpu.matmul %489, %490, %cst_332 {dimension_numbers = #tpu.dot_dimension_numbers<[2], [2], [1], [1], [0, 0, 0, 1, 1, 1], [0], [0]>} : vector<8x4x8xf32>, vector<8x4x8xf32>, vector<8x4x4xf32> -> vector<8x4x4xf32>
    %cst_333 = arith.constant 5.000000e-01 : f32
    "tpu.trace_stop"() : () -> ()
    %492 = vector.broadcast %cst_333 : f32 to vector<8x1x4xf32>
    %493 = arith.cmpf ogt, %444, %492 : vector<8x1x4xf32>
    %cst_334 = arith.constant -1.000000e+04 : f32
    %494 = vector.shape_cast %493 : vector<8x1x4xi1> to vector<8x1x4xi1>
    %495 = vector.broadcast %494 : vector<8x1x4xi1> to vector<8x4x4xi1>
    %496 = vector.broadcast %cst_334 : f32 to vector<8x4x4xf32>
    %497 = arith.select %495, %496, %491 : vector<8x4x4xi1>, vector<8x4x4xf32>
    %cst_335 = arith.constant dense<0xFF800000> : vector<8x4xf32>
    %498 = vector.multi_reduction <maximumf>, %497, %cst_335 [2] : vector<8x4x4xf32> to vector<8x4xf32>
    %499 = vector.shape_cast %498 : vector<8x4xf32> to vector<8x4x1xf32>
    %500 = vector.broadcast %499 : vector<8x4x1xf32> to vector<8x4x4xf32>
    %501 = arith.subf %497, %500 : vector<8x4x4xf32>
    %502 = math.exp %501 : vector<8x4x4xf32>
    %cst_336 = arith.constant dense<0.000000e+00> : vector<8x4xf32>
    %503 = vector.multi_reduction <add>, %502, %cst_336 [2] : vector<8x4x4xf32> to vector<8x4xf32>
    %504 = vector.shape_cast %503 : vector<8x4xf32> to vector<8x4x1xf32>
    %505 = tpu.reciprocal %504 {approx = true} : vector<8x4x1xf32> -> vector<8x4x1xf32>
    %506 = vector.broadcast %505 : vector<8x4x1xf32> to vector<8x4x4xf32>
    %507 = arith.mulf %502, %506 : vector<8x4x4xf32>
    %508 = vector.extract_strided_slice %442 {offsets = [0, 0, 16], sizes = [8, 4, 8], strides = [1, 1, 1]} : vector<8x4x32xf32> to vector<8x4x8xf32>
    "tpu.trace_start"() <{level = 10 : i32, message = "crs,csd->crd"}> : () -> ()
    %cst_337 = arith.constant dense<0.000000e+00> : vector<8x4x8xf32>
    %509 = tpu.matmul %507, %508, %cst_337 {dimension_numbers = #tpu.dot_dimension_numbers<[2], [1], [1], [2], [0, 0, 0, 1, 1, 2], [0], [0]>} : vector<8x4x4xf32>, vector<8x4x8xf32>, vector<8x4x8xf32> -> vector<8x4x8xf32>
    "tpu.trace_stop"() : () -> ()
    %c0_338 = arith.constant 0 : index
    %c0_339 = arith.constant 0 : index
    %c16_340 = arith.constant 16 : index
    %510 = vector.load %arg30[%c0_338, %c0_339, %c16_340] : memref<8x4x32xf32, #tpu.memory_space<vmem>>, vector<8x4x8xf32>
    tpu.vector_store %arg30[%c0_338, %c0_339, %c16_340], %509 {strides = array<i32>} : memref<8x4x32xf32, #tpu.memory_space<vmem>>, vector<8x4x8xf32>,
    %511 = vector.extract_strided_slice %440 {offsets = [0, 0, 24], sizes = [8, 4, 8], strides = [1, 1, 1]} : vector<8x4x32xf32> to vector<8x4x8xf32>
    %512 = vector.extract_strided_slice %441 {offsets = [0, 0, 24], sizes = [8, 4, 8], strides = [1, 1, 1]} : vector<8x4x32xf32> to vector<8x4x8xf32>
    "tpu.trace_start"() <{level = 10 : i32, message = "crd,csd->crs"}> : () -> ()
    %cst_341 = arith.constant dense<0.000000e+00> : vector<8x4x4xf32>
    %513 = tpu.matmul %511, %512, %cst_341 {dimension_numbers = #tpu.dot_dimension_numbers<[2], [2], [1], [1], [0, 0, 0, 1, 1, 1], [0], [0]>} : vector<8x4x8xf32>, vector<8x4x8xf32>, vector<8x4x4xf32> -> vector<8x4x4xf32>
    %cst_342 = arith.constant 5.000000e-01 : f32
    "tpu.trace_stop"() : () -> ()
    %514 = vector.broadcast %cst_342 : f32 to vector<8x1x4xf32>
    %515 = arith.cmpf ogt, %444, %514 : vector<8x1x4xf32>
    %cst_343 = arith.constant -1.000000e+04 : f32
    %516 = vector.shape_cast %515 : vector<8x1x4xi1> to vector<8x1x4xi1>
    %517 = vector.broadcast %516 : vector<8x1x4xi1> to vector<8x4x4xi1>
    %518 = vector.broadcast %cst_343 : f32 to vector<8x4x4xf32>
    %519 = arith.select %517, %518, %513 : vector<8x4x4xi1>, vector<8x4x4xf32>
    %cst_344 = arith.constant dense<0xFF800000> : vector<8x4xf32>
    %520 = vector.multi_reduction <maximumf>, %519, %cst_344 [2] : vector<8x4x4xf32> to vector<8x4xf32>
    %521 = vector.shape_cast %520 : vector<8x4xf32> to vector<8x4x1xf32>
    %522 = vector.broadcast %521 : vector<8x4x1xf32> to vector<8x4x4xf32>
    %523 = arith.subf %519, %522 : vector<8x4x4xf32>
    %524 = math.exp %523 : vector<8x4x4xf32>
    %cst_345 = arith.constant dense<0.000000e+00> : vector<8x4xf32>
    %525 = vector.multi_reduction <add>, %524, %cst_345 [2] : vector<8x4x4xf32> to vector<8x4xf32>
    %526 = vector.shape_cast %525 : vector<8x4xf32> to vector<8x4x1xf32>
    %527 = tpu.reciprocal %526 {approx = true} : vector<8x4x1xf32> -> vector<8x4x1xf32>
    %528 = vector.broadcast %527 : vector<8x4x1xf32> to vector<8x4x4xf32>
    %529 = arith.mulf %524, %528 : vector<8x4x4xf32>
    %530 = vector.extract_strided_slice %442 {offsets = [0, 0, 24], sizes = [8, 4, 8], strides = [1, 1, 1]} : vector<8x4x32xf32> to vector<8x4x8xf32>
    "tpu.trace_start"() <{level = 10 : i32, message = "crs,csd->crd"}> : () -> ()
    %cst_346 = arith.constant dense<0.000000e+00> : vector<8x4x8xf32>
    %531 = tpu.matmul %529, %530, %cst_346 {dimension_numbers = #tpu.dot_dimension_numbers<[2], [1], [1], [2], [0, 0, 0, 1, 1, 2], [0], [0]>} : vector<8x4x4xf32>, vector<8x4x8xf32>, vector<8x4x8xf32> -> vector<8x4x8xf32>
    "tpu.trace_stop"() : () -> ()
    %c0_347 = arith.constant 0 : index
    %c0_348 = arith.constant 0 : index
    %c24_349 = arith.constant 24 : index
    %532 = vector.load %arg30[%c0_347, %c0_348, %c24_349] : memref<8x4x32xf32, #tpu.memory_space<vmem>>, vector<8x4x8xf32>
    tpu.vector_store %arg30[%c0_347, %c0_348, %c24_349], %531 {strides = array<i32>} : memref<8x4x32xf32, #tpu.memory_space<vmem>>, vector<8x4x8xf32>,
    %c0_350 = arith.constant 0 : index
    %c0_351 = arith.constant 0 : index
    %c0_352 = arith.constant 0 : index
    %533 = vector.load %arg30[%c0_350, %c0_351, %c0_352] : memref<8x4x32xf32, #tpu.memory_space<vmem>>, vector<8x4x32xf32>
    %534 = vector.extract_strided_slice %533 {offsets = [0, 0, 0], sizes = [1, 4, 32], strides = [1, 1, 1]} : vector<8x4x32xf32> to vector<1x4x32xf32>
    %535 = vector.shape_cast %534 : vector<1x4x32xf32> to vector<4x32xf32>
    %c0_353 = arith.constant 0 : index
    %c0_354 = arith.constant 0 : index
    %536 = vector.load %arg31[%c0_353, %c0_354] : memref<32x32xf32, #tpu.memory_space<vmem>>, vector<4x32xf32>
    tpu.vector_store %arg31[%c0_353, %c0_354], %535 {strides = array<i32>} : memref<32x32xf32, #tpu.memory_space<vmem>>, vector<4x32xf32>,
    %537 = vector.extract_strided_slice %533 {offsets = [1, 0, 0], sizes = [1, 4, 32], strides = [1, 1, 1]} : vector<8x4x32xf32> to vector<1x4x32xf32>
    %538 = vector.shape_cast %537 : vector<1x4x32xf32> to vector<4x32xf32>
    %c4_355 = arith.constant 4 : index
    %c0_356 = arith.constant 0 : index
    %539 = vector.load %arg31[%c4_355, %c0_356] : memref<32x32xf32, #tpu.memory_space<vmem>>, vector<4x32xf32>
    tpu.vector_store %arg31[%c4_355, %c0_356], %538 {strides = array<i32>} : memref<32x32xf32, #tpu.memory_space<vmem>>, vector<4x32xf32>,
    %540 = vector.extract_strided_slice %533 {offsets = [2, 0, 0], sizes = [1, 4, 32], strides = [1, 1, 1]} : vector<8x4x32xf32> to vector<1x4x32xf32>
    %541 = vector.shape_cast %540 : vector<1x4x32xf32> to vector<4x32xf32>
    %c8_357 = arith.constant 8 : index
    %c0_358 = arith.constant 0 : index
    %542 = vector.load %arg31[%c8_357, %c0_358] : memref<32x32xf32, #tpu.memory_space<vmem>>, vector<4x32xf32>
    tpu.vector_store %arg31[%c8_357, %c0_358], %541 {strides = array<i32>} : memref<32x32xf32, #tpu.memory_space<vmem>>, vector<4x32xf32>,
    %543 = vector.extract_strided_slice %533 {offsets = [3, 0, 0], sizes = [1, 4, 32], strides = [1, 1, 1]} : vector<8x4x32xf32> to vector<1x4x32xf32>
    %544 = vector.shape_cast %543 : vector<1x4x32xf32> to vector<4x32xf32>
    %c12 = arith.constant 12 : index
    %c0_359 = arith.constant 0 : index
    %545 = vector.load %arg31[%c12, %c0_359] : memref<32x32xf32, #tpu.memory_space<vmem>>, vector<4x32xf32>
    tpu.vector_store %arg31[%c12, %c0_359], %544 {strides = array<i32>} : memref<32x32xf32, #tpu.memory_space<vmem>>, vector<4x32xf32>,
    %546 = vector.extract_strided_slice %533 {offsets = [4, 0, 0], sizes = [1, 4, 32], strides = [1, 1, 1]} : vector<8x4x32xf32> to vector<1x4x32xf32>
    %547 = vector.shape_cast %546 : vector<1x4x32xf32> to vector<4x32xf32>
    %c16_360 = arith.constant 16 : index
    %c0_361 = arith.constant 0 : index
    %548 = vector.load %arg31[%c16_360, %c0_361] : memref<32x32xf32, #tpu.memory_space<vmem>>, vector<4x32xf32>
    tpu.vector_store %arg31[%c16_360, %c0_361], %547 {strides = array<i32>} : memref<32x32xf32, #tpu.memory_space<vmem>>, vector<4x32xf32>,
    %549 = vector.extract_strided_slice %533 {offsets = [5, 0, 0], sizes = [1, 4, 32], strides = [1, 1, 1]} : vector<8x4x32xf32> to vector<1x4x32xf32>
    %550 = vector.shape_cast %549 : vector<1x4x32xf32> to vector<4x32xf32>
    %c20 = arith.constant 20 : index
    %c0_362 = arith.constant 0 : index
    %551 = vector.load %arg31[%c20, %c0_362] : memref<32x32xf32, #tpu.memory_space<vmem>>, vector<4x32xf32>
    tpu.vector_store %arg31[%c20, %c0_362], %550 {strides = array<i32>} : memref<32x32xf32, #tpu.memory_space<vmem>>, vector<4x32xf32>,
    %552 = vector.extract_strided_slice %533 {offsets = [6, 0, 0], sizes = [1, 4, 32], strides = [1, 1, 1]} : vector<8x4x32xf32> to vector<1x4x32xf32>
    %553 = vector.shape_cast %552 : vector<1x4x32xf32> to vector<4x32xf32>
    %c24_363 = arith.constant 24 : index
    %c0_364 = arith.constant 0 : index
    %554 = vector.load %arg31[%c24_363, %c0_364] : memref<32x32xf32, #tpu.memory_space<vmem>>, vector<4x32xf32>
    tpu.vector_store %arg31[%c24_363, %c0_364], %553 {strides = array<i32>} : memref<32x32xf32, #tpu.memory_space<vmem>>, vector<4x32xf32>,
    %555 = vector.extract_strided_slice %533 {offsets = [7, 0, 0], sizes = [1, 4, 32], strides = [1, 1, 1]} : vector<8x4x32xf32> to vector<1x4x32xf32>
    %556 = vector.shape_cast %555 : vector<1x4x32xf32> to vector<4x32xf32>
    %c28 = arith.constant 28 : index
    %c0_365 = arith.constant 0 : index
    %557 = vector.load %arg31[%c28, %c0_365] : memref<32x32xf32, #tpu.memory_space<vmem>>, vector<4x32xf32>
    tpu.vector_store %arg31[%c28, %c0_365], %556 {strides = array<i32>} : memref<32x32xf32, #tpu.memory_space<vmem>>, vector<4x32xf32>,
    %c0_366 = arith.constant 0 : index
    %c0_367 = arith.constant 0 : index
    %558 = vector.load %arg31[%c0_366, %c0_367] : memref<32x32xf32, #tpu.memory_space<vmem>>, vector<32x32xf32>
    %c0_368 = arith.constant 0 : index
    %c0_369 = arith.constant 0 : index
    %559 = vector.load %arg15[%c0_368, %c0_369] : memref<32x32xf32, #tpu.memory_space<vmem>>, vector<32x32xf32>
    %cst_370 = arith.constant dense<0.000000e+00> : vector<32x32xf32>
    %560 = tpu.matmul %558, %559, %cst_370 {dimension_numbers = #tpu.dot_dimension_numbers<[1], [0], [0], [1], [0, 0, 1, 1], [], []>} : vector<32x32xf32>, vector<32x32xf32>, vector<32x32xf32> -> vector<32x32xf32>
    %c0_371 = arith.constant 0 : index
    %c0_372 = arith.constant 0 : index
    %561 = vector.load %arg16[%c0_371, %c0_372] : memref<1x32xf32, #tpu.memory_space<vmem>>, vector<1x32xf32>
    %562 = vector.broadcast %561 : vector<1x32xf32> to vector<32x32xf32>
    %563 = arith.addf %560, %562 : vector<32x32xf32>
    %c0_373 = arith.constant 0 : index
    %c0_374 = arith.constant 0 : index
    %564 = vector.load %arg6[%c0_373, %c0_374] : memref<32x32xf32, #tpu.memory_space<vmem>>, vector<32x32xf32>
    %cst_375 = arith.constant dense<0.000000e+00> : vector<32x32xf32>
    %565 = tpu.matmul %564, %563, %cst_375 {dimension_numbers = #tpu.dot_dimension_numbers<[1], [0], [0], [1], [0, 0, 1, 1], [], []>} : vector<32x32xf32>, vector<32x32xf32>, vector<32x32xf32> -> vector<32x32xf32>
    %566 = arith.addf %309, %565 : vector<32x32xf32>
    %c0_376 = arith.constant 0 : index
    %c0_377 = arith.constant 0 : index
    %567 = vector.load %arg17[%c0_376, %c0_377] : memref<2x32xf32, #tpu.memory_space<vmem>>, vector<1x32xf32>
    %c1_378 = arith.constant 1 : index
    %c0_379 = arith.constant 0 : index
    %568 = vector.load %arg17[%c1_378, %c0_379] : memref<2x32xf32, #tpu.memory_space<vmem>>, vector<1x32xf32>
    %cst_380 = arith.constant dense<0.000000e+00> : vector<32xf32>
    %569 = vector.multi_reduction <add>, %566, %cst_380 [1] : vector<32x32xf32> to vector<32xf32>
    %570 = vector.shape_cast %569 : vector<32xf32> to vector<32x1xf32>
    %cst_381 = arith.constant 3.200000e+01 : f32
    %571 = vector.broadcast %cst_381 : f32 to vector<32x1xf32>
    %572 = arith.divf %570, %571 : vector<32x1xf32>
    %573 = vector.broadcast %572 : vector<32x1xf32> to vector<32x32xf32>
    %574 = arith.subf %566, %573 : vector<32x32xf32>
    %575 = arith.mulf %574, %574 : vector<32x32xf32>
    %cst_382 = arith.constant dense<0.000000e+00> : vector<32xf32>
    %576 = vector.multi_reduction <add>, %575, %cst_382 [1] : vector<32x32xf32> to vector<32xf32>
    %577 = vector.shape_cast %576 : vector<32xf32> to vector<32x1xf32>
    %cst_383 = arith.constant 3.200000e+01 : f32
    %578 = vector.broadcast %cst_383 : f32 to vector<32x1xf32>
    %579 = arith.divf %577, %578 : vector<32x1xf32>
    %cst_384 = arith.constant 9.99999996E-13 : f32
    %580 = vector.broadcast %cst_384 : f32 to vector<32x1xf32>
    %581 = arith.addf %579, %580 : vector<32x1xf32>
    %582 = math.rsqrt %581 : vector<32x1xf32>
    %583 = vector.broadcast %582 : vector<32x1xf32> to vector<32x32xf32>
    %584 = arith.mulf %574, %583 : vector<32x32xf32>
    %585 = vector.broadcast %567 : vector<1x32xf32> to vector<32x32xf32>
    %586 = arith.mulf %584, %585 : vector<32x32xf32>
    %587 = vector.broadcast %568 : vector<1x32xf32> to vector<32x32xf32>
    %588 = arith.addf %586, %587 : vector<32x32xf32>
    %c0_385 = arith.constant 0 : index
    %c0_386 = arith.constant 0 : index
    %589 = vector.load %arg18[%c0_385, %c0_386] : memref<32x64xf32, #tpu.memory_space<vmem>>, vector<32x64xf32>
    %cst_387 = arith.constant dense<0.000000e+00> : vector<32x64xf32>
    %590 = tpu.matmul %588, %589, %cst_387 {dimension_numbers = #tpu.dot_dimension_numbers<[1], [0], [0], [1], [0, 0, 1, 1], [], []>} : vector<32x32xf32>, vector<32x64xf32>, vector<32x64xf32> -> vector<32x64xf32>
    %c0_388 = arith.constant 0 : index
    %c0_389 = arith.constant 0 : index
    %591 = vector.load %arg19[%c0_388, %c0_389] : memref<1x64xf32, #tpu.memory_space<vmem>>, vector<1x64xf32>
    %592 = vector.broadcast %591 : vector<1x64xf32> to vector<32x64xf32>
    %593 = arith.addf %590, %592 : vector<32x64xf32>
    %cst_390 = arith.constant 0.707106769 : f32
    %594 = vector.broadcast %cst_390 : f32 to vector<32x64xf32>
    %595 = arith.mulf %593, %594 : vector<32x64xf32>
    %596 = math.absf %595 : vector<32x64xf32>
    %cst_391 = arith.constant 0.327591091 : f32
    %597 = vector.broadcast %cst_391 : f32 to vector<32x64xf32>
    %598 = arith.mulf %597, %596 : vector<32x64xf32>
    %cst_392 = arith.constant 1.000000e+00 : f32
    %599 = vector.broadcast %cst_392 : f32 to vector<32x64xf32>
    %600 = arith.addf %599, %598 : vector<32x64xf32>
    %cst_393 = arith.constant 1.000000e+00 : f32
    %601 = vector.broadcast %cst_393 : f32 to vector<32x64xf32>
    %602 = arith.divf %601, %600 : vector<32x64xf32>
    %cst_394 = arith.constant 1.06140542 : f32
    %603 = vector.broadcast %cst_394 : f32 to vector<32x64xf32>
    %604 = arith.mulf %602, %603 : vector<32x64xf32>
    %cst_395 = arith.constant -1.45315206 : f32
    %605 = vector.broadcast %cst_395 : f32 to vector<32x64xf32>
    %606 = arith.addf %605, %604 : vector<32x64xf32>
    %607 = arith.mulf %602, %606 : vector<32x64xf32>
    %cst_396 = arith.constant 1.42141378 : f32
    %608 = vector.broadcast %cst_396 : f32 to vector<32x64xf32>
    %609 = arith.addf %608, %607 : vector<32x64xf32>
    %610 = arith.mulf %602, %609 : vector<32x64xf32>
    %cst_397 = arith.constant -0.284496725 : f32
    %611 = vector.broadcast %cst_397 : f32 to vector<32x64xf32>
    %612 = arith.addf %611, %610 : vector<32x64xf32>
    %613 = arith.mulf %602, %612 : vector<32x64xf32>
    %cst_398 = arith.constant 0.254829586 : f32
    %614 = vector.broadcast %cst_398 : f32 to vector<32x64xf32>
    %615 = arith.addf %614, %613 : vector<32x64xf32>
    %616 = arith.mulf %602, %615 : vector<32x64xf32>
    %cst_399 = arith.constant 0.000000e+00 : f32
    %617 = vector.broadcast %cst_399 : f32 to vector<32x64xf32>
    %618 = arith.subf %617, %596 : vector<32x64xf32>
    %619 = arith.mulf %618, %596 : vector<32x64xf32>
    %620 = math.exp %619 : vector<32x64xf32>
    %621 = arith.mulf %616, %620 : vector<32x64xf32>
    %cst_400 = arith.constant 1.000000e+00 : f32
    %622 = vector.broadcast %cst_400 : f32 to vector<32x64xf32>
    %623 = arith.subf %622, %621 : vector<32x64xf32>
    %cst_401 = arith.constant 0.000000e+00 : f32
    %624 = vector.broadcast %cst_401 : f32 to vector<32x64xf32>
    %625 = arith.cmpf oge, %595, %624 : vector<32x64xf32>
    %cst_402 = arith.constant 0.000000e+00 : f32
    %626 = vector.broadcast %cst_402 : f32 to vector<32x64xf32>
    %627 = arith.subf %626, %623 : vector<32x64xf32>
    %628 = arith.select %625, %623, %627 : vector<32x64xi1>, vector<32x64xf32>
    %cst_403 = arith.constant 5.000000e-01 : f32
    %629 = vector.broadcast %cst_403 : f32 to vector<32x64xf32>
    %630 = arith.mulf %593, %629 : vector<32x64xf32>
    %cst_404 = arith.constant 1.000000e+00 : f32
    %631 = vector.broadcast %cst_404 : f32 to vector<32x64xf32>
    %632 = arith.addf %631, %628 : vector<32x64xf32>
    %633 = arith.mulf %630, %632 : vector<32x64xf32>
    %c0_405 = arith.constant 0 : index
    %c0_406 = arith.constant 0 : index
    %634 = vector.load %arg20[%c0_405, %c0_406] : memref<64x32xf32, #tpu.memory_space<vmem>>, vector<64x32xf32>
    %cst_407 = arith.constant dense<0.000000e+00> : vector<32x32xf32>
    %635 = tpu.matmul %633, %634, %cst_407 {dimension_numbers = #tpu.dot_dimension_numbers<[1], [0], [0], [1], [0, 0, 1, 1], [], []>} : vector<32x64xf32>, vector<64x32xf32>, vector<32x32xf32> -> vector<32x32xf32>
    %c0_408 = arith.constant 0 : index
    %c0_409 = arith.constant 0 : index
    %636 = vector.load %arg21[%c0_408, %c0_409] : memref<1x32xf32, #tpu.memory_space<vmem>>, vector<1x32xf32>
    %637 = vector.broadcast %636 : vector<1x32xf32> to vector<32x32xf32>
    %638 = arith.addf %635, %637 : vector<32x32xf32>
    %639 = arith.addf %566, %638 : vector<32x32xf32>
    %c0_410 = arith.constant 0 : index
    %c0_411 = arith.constant 0 : index
    %c0_412 = arith.constant 0 : index
    %640 = vector.load %arg22[%c0_410, %c0_411, %c0_412] : memref<1x32x32xf32, #tpu.memory_space<vmem>>, vector<1x32x32xf32>
    %641 = vector.shape_cast %640 : vector<1x32x32xf32> to vector<32x32xf32>
    %642 = vector.shape_cast %639 : vector<32x32xf32> to vector<1x32x32xf32>
    tpu.vector_store %arg22[%c0_410, %c0_411, %c0_412], %642 {strides = array<i32>} : memref<1x32x32xf32, #tpu.memory_space<vmem>>, vector<1x32x32xf32>,
    return
  }
  func.func @transform_0(%arg0: i32) -> (i32, i32, i32) {
    %c0_i32 = arith.constant 0 : i32
    %c0_i32_0 = arith.constant 0 : i32
    %c0_i32_1 = arith.constant 0 : i32
    return %arg0, %c0_i32, %c0_i32_0 : i32, i32, i32
  }
  func.func @transform_1(%arg0: i32) -> (i32, i32, i32) {
    %c0_i32 = arith.constant 0 : i32
    %c0_i32_0 = arith.constant 0 : i32
    %c0_i32_1 = arith.constant 0 : i32
    return %arg0, %c0_i32, %c0_i32_0 : i32, i32, i32
  }
  func.func @transform_2(%arg0: i32) -> (i32, i32, i32) {
    %c0_i32 = arith.constant 0 : i32
    %c0_i32_0 = arith.constant 0 : i32
    %c0_i32_1 = arith.constant 0 : i32
    return %arg0, %c0_i32, %c0_i32_0 : i32, i32, i32
  }
  func.func @transform_3(%arg0: i32) -> (i32, i32, i32, i32) {
    %c0_i32 = arith.constant 0 : i32
    %c0_i32_0 = arith.constant 0 : i32
    %c0_i32_1 = arith.constant 0 : i32
    %c0_i32_2 = arith.constant 0 : i32
    return %arg0, %c0_i32, %c0_i32_0, %c0_i32_1 : i32, i32, i32, i32
  }
  func.func @transform_4(%arg0: i32) -> (i32, i32) {
    %c0_i32 = arith.constant 0 : i32
    %c0_i32_0 = arith.constant 0 : i32
    %c0_i32_1 = arith.constant 0 : i32
    return %c0_i32, %c0_i32_0 : i32, i32
  }
  func.func @transform_5(%arg0: i32) -> (i32, i32) {
    %c0_i32 = arith.constant 0 : i32
    %c0_i32_0 = arith.constant 0 : i32
    %c0_i32_1 = arith.constant 0 : i32
    return %c0_i32, %c0_i32_0 : i32, i32
  }
  func.func @transform_6(%arg0: i32) -> (i32, i32) {
    %c0_i32 = arith.constant 0 : i32
    %c0_i32_0 = arith.constant 0 : i32
    %c0_i32_1 = arith.constant 0 : i32
    return %c0_i32, %c0_i32_0 : i32, i32
  }
  func.func @transform_7(%arg0: i32) -> (i32, i32) {
    %c0_i32 = arith.constant 0 : i32
    %c0_i32_0 = arith.constant 0 : i32
    %c0_i32_1 = arith.constant 0 : i32
    return %c0_i32, %c0_i32_0 : i32, i32
  }
  func.func @transform_8(%arg0: i32) -> (i32, i32) {
    %c0_i32 = arith.constant 0 : i32
    %c0_i32_0 = arith.constant 0 : i32
    %c0_i32_1 = arith.constant 0 : i32
    return %c0_i32, %c0_i32_0 : i32, i32
  }
  func.func @transform_9(%arg0: i32) -> (i32, i32) {
    %c0_i32 = arith.constant 0 : i32
    %c0_i32_0 = arith.constant 0 : i32
    %c0_i32_1 = arith.constant 0 : i32
    return %c0_i32, %c0_i32_0 : i32, i32
  }
  func.func @transform_10(%arg0: i32) -> (i32, i32) {
    %c0_i32 = arith.constant 0 : i32
    %c0_i32_0 = arith.constant 0 : i32
    %c0_i32_1 = arith.constant 0 : i32
    return %c0_i32, %c0_i32_0 : i32, i32
  }
  func.func @transform_11(%arg0: i32) -> (i32, i32) {
    %c0_i32 = arith.constant 0 : i32
    %c0_i32_0 = arith.constant 0 : i32
    %c0_i32_1 = arith.constant 0 : i32
    return %c0_i32, %c0_i32_0 : i32, i32
  }
  func.func @transform_12(%arg0: i32) -> (i32, i32) {
    %c0_i32 = arith.constant 0 : i32
    %c0_i32_0 = arith.constant 0 : i32
    %c0_i32_1 = arith.constant 0 : i32
    return %c0_i32, %c0_i32_0 : i32, i32
  }
  func.func @transform_13(%arg0: i32) -> (i32, i32) {
    %c0_i32 = arith.constant 0 : i32
    %c0_i32_0 = arith.constant 0 : i32
    %c0_i32_1 = arith.constant 0 : i32
    return %c0_i32, %c0_i32_0 : i32, i32
  }
  func.func @transform_14(%arg0: i32) -> (i32, i32) {
    %c0_i32 = arith.constant 0 : i32
    %c0_i32_0 = arith.constant 0 : i32
    %c0_i32_1 = arith.constant 0 : i32
    return %c0_i32, %c0_i32_0 : i32, i32
  }
  func.func @transform_15(%arg0: i32) -> (i32, i32) {
    %c0_i32 = arith.constant 0 : i32
    %c0_i32_0 = arith.constant 0 : i32
    %c0_i32_1 = arith.constant 0 : i32
    return %c0_i32, %c0_i32_0 : i32, i32
  }
  func.func @transform_16(%arg0: i32) -> (i32, i32) {
    %c0_i32 = arith.constant 0 : i32
    %c0_i32_0 = arith.constant 0 : i32
    %c0_i32_1 = arith.constant 0 : i32
    return %c0_i32, %c0_i32_0 : i32, i32
  }
  func.func @transform_17(%arg0: i32) -> (i32, i32) {
    %c0_i32 = arith.constant 0 : i32
    %c0_i32_0 = arith.constant 0 : i32
    %c0_i32_1 = arith.constant 0 : i32
    return %c0_i32, %c0_i32_0 : i32, i32
  }
  func.func @transform_18(%arg0: i32) -> (i32, i32) {
    %c0_i32 = arith.constant 0 : i32
    %c0_i32_0 = arith.constant 0 : i32
    %c0_i32_1 = arith.constant 0 : i32
    return %c0_i32, %c0_i32_0 : i32, i32
  }
  func.func @transform_19(%arg0: i32) -> (i32, i32) {
    %c0_i32 = arith.constant 0 : i32
    %c0_i32_0 = arith.constant 0 : i32
    %c0_i32_1 = arith.constant 0 : i32
    return %c0_i32, %c0_i32_0 : i32, i32
  }
  func.func @transform_20(%arg0: i32) -> (i32, i32) {
    %c0_i32 = arith.constant 0 : i32
    %c0_i32_0 = arith.constant 0 : i32
    %c0_i32_1 = arith.constant 0 : i32
    return %c0_i32, %c0_i32_0 : i32, i32
  }
  func.func @transform_21(%arg0: i32) -> (i32, i32, i32) {
    %c0_i32 = arith.constant 0 : i32
    %c0_i32_0 = arith.constant 0 : i32
    %c0_i32_1 = arith.constant 0 : i32
    return %arg0, %c0_i32, %c0_i32_0 : i32, i32, i32
  }
}

</mosaic_0001>

<bundles_post_ra>
// kernel: msa_transformer_time_forward.4
= control target key start
LH: loop header
LB: loop body
LE: loop exit
PB: predicated region body
PF: predicated region fallthrough
CT: control target
= control target key end

     0   :  { %s543_s18 = smov 0   ;;  %s605_s0 = inlined_call_operand.vmem [shape: f32[2,32,32], index: 0, kind: input, shape index: {}]   ;;  %s606_s1 = inlined_call_operand.vmem [shape: f32[2,32,1], index: 1, kind: input, shape index: {}]   ;;  %s607_s2 = inlined_call_operand.vmem [shape: f32[2,1,32], index: 2, kind: input, shape index: {}]   ;;  %s608_s3 = inlined_call_operand.vmem [shape: f32[32,32], index: 3, kind: input, shape index: {}]   ;;  %s609_s4 = inlined_call_operand.vmem [shape: f32[2,32], index: 4, kind: input, shape index: {}]   ;;  %s610_s5 = inlined_call_operand.vmem [shape: f32[2,32,32], index: 5, kind: output, shape index: {}]  }
   0x1 LB: > { %s466_s19 = sadd.s32 4294967295, %s510_s18   ;;  %p470_p0 = scmp.ge.s32.totalorder %s510_s18, 1  ;;  %s510_s18 = sphi %s543_s18, %s15_s18  }
   0x2   : > { %p205_p1 = scmp.lt.s32.totalorder %s510_s18, 3 }
   0x4   : > { %p206_p2 = pnand %p470_p0, %p205_p1 }
   0x5   : > { %p241_p3 = scmp.lt.s32.totalorder (!%p206_p2), %s466_s19, 1  ;;  %vm265_vm0 = vcmask (!%p206_p2), 261120   ;;  %v512_v8 = vmov (!%p206_p2), 0   ;;  %v477_v47 = vld [vmem:[%s609_s4] ss:$0 sm:$0xff] (!%p206_p2) }
   0x6   : > { %209 = sbr.rel (%p206_p2) target bundleno = 398 (0x18e), region = 40  ;;  %495 = vset.pattern.permute.xlu1 (!%p206_p2), %v512_v8  ;;  %494 = vset.pattern.permute.xlu0 (!%p206_p2), %v512_v8  ;;  %v478_v49 = vld [vmem:[%s609_s4 + $0x1] ss:$0 sm:$0xff] (!%p206_p2)  ;;  %v380_v8 = vld [vmem:[%s608_s3 + $0x10] sm:$0xff] (!%p206_p2) }
   0x7   : > { %v378_v62 = vld [vmem:[%s608_s3] sm:$0xff] (!%p206_p2) }
   0xd   : > { %s612_s19 = smov (!%p241_p3, %s466_s19), 1 }
   0xe   : > { %s554_s20 = sshll.u32 %s612_s19, 5  ;;  %s253_s8 = scalar_lea.vmem %s607_s2, %s612_s19 }
   0xf   : > { %s245_s23 = scalar_lea.vmem %s605_s0, %s554_s20  ;;  %s250_s26 = scalar_lea.vmem %s606_s1, %s554_s20  ;;  %v479_v57 = vld [vmem:[%s253_s8] ss:$0 sm:$0xff] }
  0x10   : > { %v259_v0 = vld [vmem:[%s245_s23] sm:$0xff]  ;;  %v261_v1 = vld [vmem:[%s245_s23 + $0x10] sm:$0xff]  ;;  %v260_v2 = vld [vmem:[%s245_s23 + $0x8] sm:$0xff]  ;;  %s258_s13 = scalar_lea.vmem %s610_s5, %s554_s20 }
  0x11   : > { %v266_v3 = vsel %vm265_vm0, %v259_v0, 0.0  ;;  %v272_v4 = vsel %vm265_vm0, %v261_v1, 0.0  ;;  %v262_v5 = vld [vmem:[%s245_s23 + $0x18] sm:$0xff]  ;;  %v269_v6 = vsel %vm265_vm0, %v260_v2, 0.0  ;;  %v336_v24 = vld [vmem:[%s250_s26 + $0x8] sm:$0xff]  ;;  %v337_v26 = vld [vmem:[%s250_s26 + $0x10] sm:$0xff] }
  0x12   : > { %267 = vadd.xlane.f32.xlu0 %v266_v3  ;;  %273 = vadd.xlane.f32.xlu1 %v272_v4  ;;  %v275_v7 = vsel %vm265_vm0, %v262_v5, 0.0  ;;  %v340_v25 = vsub.f32 1.0, %v336_v24  ;;  %v335_v27 = vld [vmem:[%s250_s26] sm:$0xff]  ;;  %v341_v28 = vsub.f32 1.0, %v337_v26  ;;  %v338_v35 = vld [vmem:[%s250_s26 + $0x18] sm:$0xff] }
  0x13   : > { %v339_v29 = vsub.f32 1.0, %v335_v27  ;;  %v342_v36 = vsub.f32 1.0, %v338_v35 }
  0x16   : > { %270 = vadd.xlane.f32.xlu0 %v269_v6  ;;  %276 = vadd.xlane.f32.xlu1 %v275_v7 }
  0x9f   : > { %v268_v9 = vpop.xlane.xlu0 %267  ;;  %v274_v10 = vpop.xlane.xlu1 %273 }
  0xa0   : > { %v279_v11 = vmul.f32 0.03125, %v268_v9  ;;  %v281_v12 = vmul.f32 0.03125, %v274_v10 }
  0xa2   : > { %v283_v13 = vsub.f32 %v259_v0, %v279_v11  ;;  %v285_v14 = vsub.f32 %v261_v1, %v281_v12 }
  0xa3   : > { %v271_v15 = vpop.xlane.xlu0 %270  ;;  %v277_v30 = vpop.xlane.xlu1 %276 }
  0xa4   : > { %v280_v16 = vmul.f32 0.03125, %v271_v15  ;;  %v287_v17 = vmul.f32 %v283_v13, %v283_v13  ;;  %v289_v18 = vmul.f32 %v285_v14, %v285_v14  ;;  %v282_v31 = vmul.f32 0.03125, %v277_v30 }
  0xa6   : > { %v284_v19 = vsub.f32 %v260_v2, %v280_v16  ;;  %v291_v20 = vsel %vm265_vm0, %v287_v17, 0.0  ;;  %v297_v21 = vsel %vm265_vm0, %v289_v18, 0.0  ;;  %v286_v32 = vsub.f32 %v262_v5, %v282_v31  ;;  %v379_v5 = vld [vmem:[%s608_s3 + $0x8] sm:$0xff] }
  0xa7   : > { %292 = vadd.xlane.f32.xlu0 %v291_v20 }
  0xa8   : > { %v288_v22 = vmul.f32 %v284_v19, %v284_v19  ;;  %v290_v33 = vmul.f32 %v286_v32, %v286_v32 }
  0xaa   : > { %v294_v23 = vsel %vm265_vm0, %v288_v22, 0.0  ;;  %v300_v34 = vsel %vm265_vm0, %v290_v33, 0.0 }
  0xab   : > { %298 = vadd.xlane.f32.xlu0 %v297_v21  ;;  %295 = vadd.xlane.f32.xlu1 %v294_v23  ;;  %v381_v21 = vld [vmem:[%s608_s3 + $0x18] sm:$0xff] }
  0xbc   : > { %350 = vperm.xlu1 %495, %v340_v25  }
  0xc0   : > { %355 = vperm.xlu1 %495, %v341_v28  }
  0xc1   : > { %345 = vperm.xlu0 %494, %v339_v29  }
  0xe4   : > { %301 = vadd.xlane.f32.xlu1 %v300_v34 }
  0xf5   : > { %360 = vperm.xlu1 %495, %v342_v36  }
 0x134   : > { %v293_v37 = vpop.xlane.xlu0 %292 }
 0x135   : > { %v303_v38 = vmul.f32 0.03125, %v293_v37 }
 0x137   : > { %v307_v39 = vadd.f32 1e-05, %v303_v38 }
 0x138   : > { %v296_v40 = vpop.xlane.xlu1 %295  ;;  %v299_v41 = vpop.xlane.xlu0 %298 }
 0x139   : > { %496 = vrsqrt.f32 %v307_v39  ;;  %v304_v42 = vmul.f32 0.03125, %v296_v40  ;;  %v305_v43 = vmul.f32 0.03125, %v299_v41 }
 0x13b   : > { %v308_v44 = vadd.f32 1e-05, %v304_v42  ;;  %v309_v45 = vadd.f32 1e-05, %v305_v43 }
 0x13c   : > { %v351_v55 = vpop.permute.xlu1 %350 }
 0x13d   : > { %498 = vrsqrt.f32 %v308_v44 }
 0x13e   : > { %500 = vrsqrt.f32 %v309_v45 }
 0x140   : > { %v346_v52 = vpop.permute.xlu0 %345  ;;  %v356_v3 = vpop.permute.xlu1 %355 }
 0x143   : > { %v497_v46 = vpop.eup %496 }
 0x144   : > { %v315_v48 = vmul.f32 %v497_v46, %v283_v13 }
 0x146   : > { %v323_v50 = vmul.f32 %v477_v47, %v315_v48 }
 0x147   : > { %v499_v51 = vpop.eup %498 }
 0x148   : > { %v501_v53 = vpop.eup %500  ;;  %v316_v54 = vmul.f32 %v499_v51, %v284_v19  ;;  %v331_v56 = vadd.f32 %v478_v49, %v323_v50 }
 0x149   : > { %v317_v58 = vmul.f32 %v501_v53, %v285_v14 }
 0x14a   : > { %v324_v59 = vmul.f32 %v477_v47, %v316_v54  ;;  %v363_v60 = vmul.f32 %v346_v52, %v331_v56 }
 0x14b   : > { %v325_v61 = vmul.f32 %v477_v47, %v317_v58 }
 0x14c   : > { %v332_v63 = vadd.f32 %v478_v49, %v324_v59  ;;  %v374_v0 = vadd.f32 %v479_v57, %v363_v60 }
 0x14d   : > { %v333_v1 = vadd.f32 %v478_v49, %v325_v61 }
 0x14e   : > { %v364_v2 = vmul.f32 %v351_v55, %v332_v63  ;;  %v382_v4 = vadd.f32 %v378_v62, %v374_v0 }
 0x14f   : > { %v365_v6 = vmul.f32 %v356_v3, %v333_v1 }
 0x150   : > { %v375_v7 = vadd.f32 %v479_v57, %v364_v2  ;;  %386 = vst.msk [vmem:[%s258_s13] sm:$0xff] %vm265_vm0, %v382_v4 }
 0x151   : > { %v376_v9 = vadd.f32 %v479_v57, %v365_v6 }
 0x152   : > { %v383_v10 = vadd.f32 %v379_v5, %v375_v7 }
 0x153   : > { %v384_v11 = vadd.f32 %v380_v8, %v376_v9 }
 0x154   : > { %387 = vst.msk [vmem:[%s258_s13 + $0x8] sm:$0xff] %vm265_vm0, %v383_v10 }
 0x155   : > { %388 = vst.msk [vmem:[%s258_s13 + $0x10] sm:$0xff] %vm265_vm0, %v384_v11 }
 0x171   : > { %v302_v12 = vpop.xlane.xlu1 %301 }
 0x172   : > { %v306_v13 = vmul.f32 0.03125, %v302_v12 }
 0x174   : > { %v310_v14 = vadd.f32 1e-05, %v306_v13 }
 0x175   : > { %v361_v19 = vpop.permute.xlu1 %360 }
 0x176   : > { %502 = vrsqrt.f32 %v310_v14 }
 0x180   : > { %v503_v15 = vpop.eup %502 }
 0x181   : > { %v318_v16 = vmul.f32 %v503_v15, %v286_v32 }
 0x183   : > { %v326_v17 = vmul.f32 %v477_v47, %v318_v16 }
 0x185   : > { %v334_v18 = vadd.f32 %v478_v49, %v326_v17 }
 0x187   : > { %v366_v20 = vmul.f32 %v361_v19, %v334_v18 }
 0x189   : > { %v377_v22 = vadd.f32 %v479_v57, %v366_v20 }
 0x18b   : > { %v385_v23 = vadd.f32 %v381_v21, %v377_v22 }
 0x18d   : > { %389 = vst.msk [vmem:[%s258_s13 + $0x18] sm:$0xff] %vm265_vm0, %v385_v23 }
 0x18e PF: > { %s15_s18 = sadd.s32 1, %s510_s18  }
 0x18f   : > { %p12_p4 = scmp.ge.s32.totalorder %s15_s18, 4  }
 0x191   :  { %14 = sbr.rel (!%p12_p4) target bundleno = 1 (0x1), region = 76 }

// kernel: msa_transformer_time_forward.7
= control target key start
LH: loop header
LB: loop body
LE: loop exit
PB: predicated region body
PF: predicated region fallthrough
CT: control target
= control target key end

     0   :  { %s983_s24 = smov 0   ;;  %s1105_s0 = inlined_call_operand.vmem [shape: f32[2,32,32], index: 0, kind: input, shape index: {}]   ;;  %s1106_s1 = inlined_call_operand.vmem [shape: f32[2,32], index: 1, kind: input, shape index: {}]   ;;  %s1107_s2 = inlined_call_operand.vmem [shape: f32[32,32], index: 2, kind: input, shape index: {}]   ;;  %s1108_s3 = inlined_call_operand.vmem [shape: f32[1,32], index: 3, kind: input, shape index: {}]   ;;  %s1109_s4 = inlined_call_operand.vmem [shape: f32[2,32], index: 4, kind: input, shape index: {}]   ;;  %s1110_s5 = inlined_call_operand.vmem [shape: f32[32,128], index: 5, kind: input, shape index: {}]   ;;  %s1111_s6 = inlined_call_operand.vmem [shape: f32[1,128], index: 6, kind: input, shape index: {}]   ;;  %s1112_s7 = inlined_call_operand.vmem [shape: f32[2,32,128], index: 7, kind: output, shape index: {}]  }
   0x1 LB: > { %s808_s25 = sadd.s32 4294967295, %s941_s24   ;;  %p812_p0 = scmp.ge.s32.totalorder %s941_s24, 1  ;;  %s941_s24 = sphi %s983_s24, %s17_s24  }
   0x2   : > { %p237_p1 = scmp.lt.s32.totalorder %s941_s24, 3 }
   0x4   : > { %p238_p2 = pnand %p812_p0, %p237_p1 }
   0x5   : > { %p269_p3 = scmp.lt.s32.totalorder (!%p238_p2), %s808_s25, 1  ;;  %vm285_vm0 = vcmask (!%p238_p2), 261120   ;;  %v355_v28 = vld [vmem:[%s1107_s2] sm:$0xff] (!%p238_p2)  ;;  %v356_v29 = vld [vmem:[%s1107_s2 + $0x8] sm:$0xff] (!%p238_p2)  ;;  %v357_v30 = vld [vmem:[%s1107_s2 + $0x10] sm:$0xff] (!%p238_p2) }
   0x6   : > { %241 = sbr.rel (%p238_p2) target bundleno = 1131 (0x46b), region = 48  ;;  %v879_v31 = vpack.c.bf16 (!%p238_p2), %v356_v29, %v355_v28  ;;  %v358_v32 = vld [vmem:[%s1107_s2 + $0x18] sm:$0xff] (!%p238_p2)  ;;  %v817_v47 = vld [vmem:[%s1106_s1] ss:$0 sm:$0xff] (!%p238_p2)  ;;  %v818_v49 = vld [vmem:[%s1106_s1 + $0x1] ss:$0 sm:$0xff] (!%p238_p2) }
   0x7   : > { %v883_v33 = vpack.c.bf16 (!%p238_p2), %v358_v32, %v357_v30 }
   0x8   : > { %880 = vmatprep.subr.bf16.mxu0 (!%p238_p2), %v879_v31 }
   0x9   : > { %882 = vmatpush3.bf16.msra.mxu0 (!%p238_p2), %v879_v31 }
   0xa   : > { %884 = vmatprep.subr.bf16.mxu0 (!%p238_p2), %v883_v33 }
   0xd   : > { %s1114_s25 = smov (!%p269_p3, %s808_s25), 1  ;;  %886 = vmatpush3.bf16.msra.mxu0 %v883_v33 }
   0xe   : > { %s833_s26 = sshll.u32 %s1114_s25, 5 }
   0xf   : > { %s273_s29 = scalar_lea.vmem %s1105_s0, %s833_s26  ;;  %s278_s17 = scalar_lea.vmem %s1112_s7, %s833_s26 }
  0x10   : > { %v279_v0 = vld [vmem:[%s273_s29] sm:$0xff]  ;;  %v281_v1 = vld [vmem:[%s273_s29 + $0x10] sm:$0xff]  ;;  %v280_v2 = vld [vmem:[%s273_s29 + $0x8] sm:$0xff] }
  0x11   : > { %v286_v3 = vsel %vm285_vm0, %v279_v0, 0.0  ;;  %v292_v4 = vsel %vm285_vm0, %v281_v1, 0.0  ;;  %v282_v5 = vld [vmem:[%s273_s29 + $0x18] sm:$0xff]  ;;  %v289_v6 = vsel %vm285_vm0, %v280_v2, 0.0 }
  0x12   : > { %287 = vadd.xlane.f32.xlu0 %v286_v3  ;;  %293 = vadd.xlane.f32.xlu1 %v292_v4  ;;  %v295_v7 = vsel %vm285_vm0, %v282_v5, 0.0 }
  0x16   : > { %290 = vadd.xlane.f32.xlu0 %v289_v6  ;;  %296 = vadd.xlane.f32.xlu1 %v295_v7 }
  0x9f   : > { %v288_v8 = vpop.xlane.xlu0 %287  ;;  %v294_v9 = vpop.xlane.xlu1 %293 }
  0xa0   : > { %v299_v10 = vmul.f32 0.03125, %v288_v8  ;;  %v301_v11 = vmul.f32 0.03125, %v294_v9 }
  0xa2   : > { %v303_v12 = vsub.f32 %v279_v0, %v299_v10  ;;  %v305_v13 = vsub.f32 %v281_v1, %v301_v11  ;;  %v819_v0 = vld [vmem:[%s1108_s3] ss:$0 sm:$0xff] }
  0xa3   : > { %v291_v14 = vpop.xlane.xlu0 %290  ;;  %v297_v15 = vpop.xlane.xlu1 %296 }
  0xa4   : > { %v300_v16 = vmul.f32 0.03125, %v291_v14  ;;  %v302_v17 = vmul.f32 0.03125, %v297_v15  ;;  %v307_v18 = vmul.f32 %v303_v12, %v303_v12  ;;  %v309_v19 = vmul.f32 %v305_v13, %v305_v13 }
  0xa6   : > { %v304_v20 = vsub.f32 %v280_v2, %v300_v16  ;;  %v306_v21 = vsub.f32 %v282_v5, %v302_v17  ;;  %v311_v22 = vsel %vm285_vm0, %v307_v18, 0.0  ;;  %v317_v23 = vsel %vm285_vm0, %v309_v19, 0.0 }
  0xa7   : > { %312 = vadd.xlane.f32.xlu0 %v311_v22 }
  0xa8   : > { %v308_v24 = vmul.f32 %v304_v20, %v304_v20  ;;  %v310_v25 = vmul.f32 %v306_v21, %v306_v21 }
  0xaa   : > { %v314_v26 = vsel %vm285_vm0, %v308_v24, 0.0  ;;  %v320_v27 = vsel %vm285_vm0, %v310_v25, 0.0 }
  0xab   : > { %318 = vadd.xlane.f32.xlu0 %v317_v23  ;;  %315 = vadd.xlane.f32.xlu1 %v314_v26 }
  0xaf   : > { %321 = vadd.xlane.f32.xlu1 %v320_v27 }
 0x134   : > { %v313_v34 = vpop.xlane.xlu0 %312 }
 0x135   : > { %v323_v35 = vmul.f32 0.03125, %v313_v34 }
 0x137   : > { %v327_v36 = vadd.f32 1e-05, %v323_v35 }
 0x138   : > { %v316_v37 = vpop.xlane.xlu1 %315  ;;  %v319_v38 = vpop.xlane.xlu0 %318 }
 0x139   : > { %903 = vrsqrt.f32 %v327_v36  ;;  %v324_v39 = vmul.f32 0.03125, %v316_v37  ;;  %v325_v40 = vmul.f32 0.03125, %v319_v38 }
 0x13b   : > { %v328_v41 = vadd.f32 1e-05, %v324_v39  ;;  %v329_v42 = vadd.f32 1e-05, %v325_v40 }
 0x13c   : > { %v322_v43 = vpop.xlane.xlu1 %321 }
 0x13d   : > { %905 = vrsqrt.f32 %v328_v41  ;;  %v326_v44 = vmul.f32 0.03125, %v322_v43 }
 0x13e   : > { %907 = vrsqrt.f32 %v329_v42 }
 0x13f   : > { %v330_v45 = vadd.f32 1e-05, %v326_v44 }
 0x141   : > { %909 = vrsqrt.f32 %v330_v45 }
 0x143   : > { %v904_v46 = vpop.eup %903 }
 0x144   : > { %v335_v48 = vmul.f32 %v904_v46, %v303_v12 }
 0x146   : > { %v343_v50 = vmul.f32 %v817_v47, %v335_v48 }
 0x147   : > { %v906_v51 = vpop.eup %905 }
 0x148   : > { %v908_v52 = vpop.eup %907  ;;  %v351_v53 = vadd.f32 %v818_v49, %v343_v50  ;;  %v336_v54 = vmul.f32 %v906_v51, %v304_v20 }
 0x149   : > { %v337_v55 = vmul.f32 %v908_v52, %v305_v13 }
 0x14a   : > { %859 = vmatprep.mubr.msk.f32.mxu0 %vm285_vm0, %v351_v53  ;;  %v344_v56 = vmul.f32 %v817_v47, %v336_v54 }
 0x14b   : > { %v910_v57 = vpop.eup %909  ;;  %v345_v58 = vmul.f32 %v817_v47, %v337_v55 }
 0x14c   : > { %v352_v59 = vadd.f32 %v818_v49, %v344_v56  ;;  %v338_v60 = vmul.f32 %v910_v57, %v306_v21 }
 0x14d   : > { %v353_v61 = vadd.f32 %v818_v49, %v345_v58 }
 0x14e   : > { %860 = vmatmul.mubr.msk.f32.vlgmr.msra.gmra.mrb[0].mxu0 %vm285_vm0, %v352_v59  ;;  %v346_v62 = vmul.f32 %v817_v47, %v338_v60 }
 0x14f   : > { %862 = vmatprep.mubr.msk.f32.mxu0 %vm285_vm0, %v353_v61 }
 0x150   : > { %v354_v63 = vadd.f32 %v818_v49, %v346_v62 }
 0x152   : > { %863 = vmatmul.mubr.msk.f32.gmra.mrb[2].mxu0 %vm285_vm0, %v354_v63 }
 0x221   : > { %v861_v1 = vpop.f32.mrb[0].mxu0 }
 0x222   : > { %v1032_v2 = vadd.f32 %v861_v1, %v819_v0  ;;  %v444_v3 = vpop.f32.mrb[1].mxu0 }
 0x223   : > { %v1034_v4 = vadd.f32 %v819_v0, %v444_v3 }
 0x224   : > { %v1037_v5 = vmul.f32 0.70710677, %v1032_v2 }
 0x225   : > { %v1040_v6 = vmul.f32 0.70710677, %v1034_v4  ;;  %v864_v7 = vpop.f32.mrb[2].mxu0 }
 0x226   : > { %v468_v8 = vand.u32 2147483647, %v1037_v5  ;;  %v1043_v9 = vadd.f32 %v864_v7, %v819_v0  ;;  %v454_v10 = vpop.f32.mrb[3].mxu0  ;;  %vm548_vm1 = vcmp.ge.f32.partialorder %v1037_v5, 0.0 }
 0x227   : > { %v467_v11 = vand.u32 2147483647, %v1040_v6  ;;  %v1046_v12 = vadd.f32 %v819_v0, %v454_v10  ;;  %vm547_vm2 = vcmp.ge.f32.partialorder %v1040_v6, 0.0 }
 0x228   : > { %v472_v13 = vmul.f32 0.3275911, %v468_v8  ;;  %v1049_v14 = vmul.f32 0.70710677, %v1043_v9  ;;  %v524_v25 = vsub.f32 0.0, %v468_v8  ;;  %v562_v6 = vmul.f32 0.5, %v1043_v9 }
 0x229   : > { %v471_v15 = vmul.f32 0.3275911, %v467_v11  ;;  %v1052_v16 = vmul.f32 0.70710677, %v1046_v12  ;;  %v523_v26 = vsub.f32 0.0, %v467_v11 }
 0x22a   : > { %v476_v17 = vadd.f32 1.0, %v472_v13  ;;  %v470_v18 = vand.u32 2147483647, %v1049_v14  ;;  %v528_v28 = vmul.f32 %v524_v25, %v468_v8  ;;  %vm550_vm3 = vcmp.ge.f32.partialorder %v1049_v14, 0.0 }
 0x22b   : > { %v475_v19 = vadd.f32 1.0, %v471_v15  ;;  %v469_v20 = vand.u32 2147483647, %v1052_v16  ;;  %v527_v31 = vmul.f32 %v523_v26, %v467_v11  ;;  %vm549_vm4 = vcmp.ge.f32.partialorder %v1052_v16, 0.0 }
 0x22c   : > { %911 = vrcp.f32 %v476_v17  ;;  %v474_v21 = vmul.f32 0.3275911, %v470_v18  ;;  %v526_v29 = vsub.f32 0.0, %v470_v18  ;;  %v533_v37 = vmul.f32 1.442695, %v528_v28 }
 0x22d   : > { %913 = vrcp.f32 %v475_v19  ;;  %v473_v22 = vmul.f32 0.3275911, %v469_v20  ;;  %v525_v32 = vsub.f32 0.0, %v469_v20  ;;  %v531_v41 = vmul.f32 1.442695, %v527_v31 }
 0x22e   : > { %v478_v23 = vadd.f32 1.0, %v474_v21  ;;  %v530_v38 = vmul.f32 %v526_v29, %v470_v18 }
 0x22f   : > { %v477_v24 = vadd.f32 1.0, %v473_v22  ;;  %v529_v42 = vmul.f32 %v525_v32, %v469_v20 }
 0x230   : > { %915 = vrcp.f32 %v478_v23  ;;  %v537_v49 = vmul.f32 1.442695, %v530_v38 }
 0x231   : > { %917 = vrcp.f32 %v477_v24  ;;  %v535_v52 = vmul.f32 1.442695, %v529_v42 }
 0x232   : > { %919 = vpow2.f32 %v533_v37 }
 0x233   : > { %921 = vpow2.f32 %v531_v41 }
 0x234   : > { %923 = vpow2.f32 %v537_v49 }
 0x235   : > { %925 = vpow2.f32 %v535_v52 }
 0x236   : > { %v912_v27 = vpop.eup %911 }
 0x237   : > { %v914_v30 = vpop.eup %913  ;;  %v488_v33 = vmul.f32 1.0614054, %v912_v27 }
 0x238   : > { %v487_v34 = vmul.f32 1.0614054, %v914_v30 }
 0x239   : > { %v492_v35 = vadd.f32 -1.4531521, %v488_v33 }
 0x23a   : > { %v916_v36 = vpop.eup %915  ;;  %v491_v39 = vadd.f32 -1.4531521, %v487_v34 }
 0x23b   : > { %v918_v40 = vpop.eup %917  ;;  %v496_v43 = vmul.f32 %v912_v27, %v492_v35  ;;  %v490_v44 = vmul.f32 1.0614054, %v916_v36  ;;  %v560_v35 = vmul.f32 0.5, %v1032_v2 }
 0x23c   : > { %v495_v45 = vmul.f32 %v914_v30, %v491_v39  ;;  %v489_v46 = vmul.f32 1.0614054, %v918_v40  ;;  %v920_v13 = vpop.eup %919 }
 0x23d   : > { %v500_v47 = vadd.f32 1.4214138, %v496_v43  ;;  %v494_v48 = vadd.f32 -1.4531521, %v490_v44  ;;  %v922_v18 = vpop.eup %921 }
 0x23e   : > { %v499_v50 = vadd.f32 1.4214138, %v495_v45  ;;  %v493_v51 = vadd.f32 -1.4531521, %v489_v46  ;;  %v924_v25 = vpop.eup %923 }
 0x23f   : > { %v504_v53 = vmul.f32 %v912_v27, %v500_v47  ;;  %v498_v54 = vmul.f32 %v916_v36, %v494_v48  ;;  %v926_v29 = vpop.eup %925  ;;  %v561_v47 = vmul.f32 0.5, %v1046_v12 }
 0x240   : > { %v503_v55 = vmul.f32 %v914_v30, %v499_v50  ;;  %v497_v56 = vmul.f32 %v918_v40, %v493_v51 }
 0x241   : > { %v508_v57 = vadd.f32 -0.28449672, %v504_v53  ;;  %v502_v58 = vadd.f32 1.4214138, %v498_v54 }
 0x242   : > { %v507_v59 = vadd.f32 -0.28449672, %v503_v55  ;;  %v501_v60 = vadd.f32 1.4214138, %v497_v56 }
 0x243   : > { %v512_v61 = vmul.f32 %v912_v27, %v508_v57  ;;  %v506_v62 = vmul.f32 %v916_v36, %v502_v58 }
 0x244   : > { %v511_v63 = vmul.f32 %v914_v30, %v507_v59  ;;  %v505_v0 = vmul.f32 %v918_v40, %v501_v60 }
 0x245   : > { %v516_v1 = vadd.f32 0.2548296, %v512_v61  ;;  %v510_v3 = vadd.f32 -0.28449672, %v506_v62 }
 0x246   : > { %v515_v7 = vadd.f32 0.2548296, %v511_v63  ;;  %v509_v8 = vadd.f32 -0.28449672, %v505_v0 }
 0x247   : > { %v520_v10 = vmul.f32 %v912_v27, %v516_v1  ;;  %v514_v11 = vmul.f32 %v916_v36, %v510_v3 }
 0x248   : > { %v519_v15 = vmul.f32 %v914_v30, %v515_v7  ;;  %v513_v17 = vmul.f32 %v918_v40, %v509_v8 }
 0x249   : > { %v540_v19 = vmul.f32 %v920_v13, %v520_v10  ;;  %v518_v20 = vadd.f32 0.2548296, %v514_v11  ;;  %v641_v10 = vld [vmem:[%s1110_s5] sm:$0xff]  ;;  %v642_v11 = vld [vmem:[%s1110_s5 + $0x8] sm:$0xff]  ;;  %v643_v13 = vld [vmem:[%s1110_s5 + $0x10] sm:$0xff] }
 0x24a   : > { %v539_v21 = vmul.f32 %v922_v18, %v519_v15  ;;  %v517_v22 = vadd.f32 0.2548296, %v513_v17  ;;  %v887_v15 = vpack.c.bf16 %v642_v11, %v641_v10  ;;  %v644_v17 = vld [vmem:[%s1110_s5 + $0x18] sm:$0xff] }
 0x24b   : > { %v544_v23 = vsub.f32 1.0, %v540_v19  ;;  %v522_v24 = vmul.f32 %v916_v36, %v518_v20  ;;  %v559_v36 = vmul.f32 0.5, %v1034_v4  ;;  %v891_v18 = vpack.c.bf16 %v644_v17, %v643_v13 }
 0x24c   : > { %v543_v26 = vsub.f32 1.0, %v539_v21  ;;  %v521_v28 = vmul.f32 %v918_v40, %v517_v22  ;;  %888 = vmatprep.subr.bf16.mxu1 %v887_v15 }
 0x24d   : > { %v552_v31 = vsub.f32 0.0, %v544_v23  ;;  %v542_v32 = vmul.f32 %v924_v25, %v522_v24  ;;  %890 = vmatpush3.bf16.msra.mxu1 %v887_v15 }
 0x24e   : > { %v551_v27 = vsub.f32 0.0, %v543_v26  ;;  %v541_v33 = vmul.f32 %v926_v29, %v521_v28  ;;  %892 = vmatprep.subr.bf16.mxu1 %v891_v18 }
 0x24f   : > { %v556_v30 = vsel %vm548_vm1, %v544_v23, %v552_v31  ;;  %v546_v34 = vsub.f32 1.0, %v542_v32 }
 0x250   : > { %v564_v37 = vadd.f32 1.0, %v556_v30  ;;  %v555_v38 = vsel %vm547_vm2, %v543_v26, %v551_v27  ;;  %v545_v39 = vsub.f32 1.0, %v541_v33  ;;  %v824_v33 = vld [vmem:[%s1109_s4] ss:$0 sm:$0xff] }
 0x251   : > { %v563_v41 = vadd.f32 1.0, %v555_v38  ;;  %v554_v40 = vsub.f32 0.0, %v546_v34  ;;  %894 = vmatpush3.bf16.msra.mxu1 %v891_v18 }
 0x252   : > { %v568_v42 = vmul.f32 %v564_v37, %v560_v35  ;;  %v553_v43 = vsub.f32 0.0, %v545_v39  ;;  %v825_v37 = vld [vmem:[%s1109_s4 + $0x1] ss:$0 sm:$0xff] }
 0x253   : > { %v567_v5 = vmul.f32 %v563_v41, %v559_v36  ;;  %v558_v44 = vsel %vm550_vm3, %v546_v34, %v554_v40 }
 0x254   : > { %v576_v45 = vsel %vm285_vm0, %v568_v42, 0.0  ;;  %v566_v2 = vadd.f32 1.0, %v558_v44  ;;  %v557_v46 = vsel %vm549_vm4, %v545_v39, %v553_v43 }
 0x255   : > { %577 = vadd.xlane.f32.xlu1 %v576_v45  ;;  %v573_v4 = vsel %vm285_vm0, %v567_v5, 0.0  ;;  %v565_v48 = vadd.f32 1.0, %v557_v46  ;;  %v826_v46 = vld [vmem:[%s1111_s6] ss:$0 sm:$0xff] }
 0x256   : > { %574 = vadd.xlane.f32.xlu0 %v573_v4  ;;  %v570_v14 = vmul.f32 %v566_v2, %v562_v6 }
 0x257   : > { %v569_v49 = vmul.f32 %v565_v48, %v561_v47 }
 0x258   : > { %v582_v50 = vsel %vm285_vm0, %v570_v14, 0.0 }
 0x259   : > { %583 = vadd.xlane.f32.xlu1 %v582_v50  ;;  %v579_v16 = vsel %vm285_vm0, %v569_v49, 0.0 }
 0x25a   : > { %580 = vadd.xlane.f32.xlu0 %v579_v16 }
 0x2e2   : > { %v578_v9 = vpop.xlane.xlu1 %577 }
 0x2e3   : > { %v586_v51 = vmul.f32 0.03125, %v578_v9  ;;  %v575_v52 = vpop.xlane.xlu0 %574 }
 0x2e4   : > { %v585_v53 = vmul.f32 0.03125, %v575_v52 }
 0x2e5   : > { %v590_v54 = vsub.f32 %v568_v42, %v586_v51 }
 0x2e6   : > { %v589_v55 = vsub.f32 %v567_v5, %v585_v53  ;;  %v584_v12 = vpop.xlane.xlu1 %583 }
 0x2e7   : > { %v588_v56 = vmul.f32 0.03125, %v584_v12  ;;  %v581_v57 = vpop.xlane.xlu0 %580  ;;  %v594_v58 = vmul.f32 %v590_v54, %v590_v54 }
 0x2e8   : > { %v587_v59 = vmul.f32 0.03125, %v581_v57  ;;  %v593_v60 = vmul.f32 %v589_v55, %v589_v55 }
 0x2e9   : > { %v592_v61 = vsub.f32 %v570_v14, %v588_v56  ;;  %v600_v62 = vsel %vm285_vm0, %v594_v58, 0.0 }
 0x2ea   : > { %v591_v63 = vsub.f32 %v569_v49, %v587_v59  ;;  %601 = vadd.xlane.f32.xlu1 %v600_v62  ;;  %v597_v0 = vsel %vm285_vm0, %v593_v60, 0.0 }
 0x2eb   : > { %598 = vadd.xlane.f32.xlu0 %v597_v0  ;;  %v596_v1 = vmul.f32 %v592_v61, %v592_v61 }
 0x2ec   : > { %v595_v3 = vmul.f32 %v591_v63, %v591_v63 }
 0x2ed   : > { %v606_v7 = vsel %vm285_vm0, %v596_v1, 0.0 }
 0x2ee   : > { %607 = vadd.xlane.f32.xlu1 %v606_v7  ;;  %v603_v8 = vsel %vm285_vm0, %v595_v3, 0.0 }
 0x2ef   : > { %604 = vadd.xlane.f32.xlu0 %v603_v8 }
 0x377   : > { %v602_v19 = vpop.xlane.xlu1 %601 }
 0x378   : > { %v610_v20 = vmul.f32 0.03125, %v602_v19  ;;  %v599_v21 = vpop.xlane.xlu0 %598 }
 0x379   : > { %v609_v22 = vmul.f32 0.03125, %v599_v21 }
 0x37a   : > { %v614_v23 = vadd.f32 1e-12, %v610_v20 }
 0x37b   : > { %v613_v24 = vadd.f32 1e-12, %v609_v22  ;;  %v608_v25 = vpop.xlane.xlu1 %607 }
 0x37c   : > { %927 = vrsqrt.f32 %v614_v23  ;;  %v612_v26 = vmul.f32 0.03125, %v608_v25  ;;  %v605_v28 = vpop.xlane.xlu0 %604 }
 0x37d   : > { %929 = vrsqrt.f32 %v613_v24  ;;  %v611_v29 = vmul.f32 0.03125, %v605_v28 }
 0x37e   : > { %v616_v31 = vadd.f32 1e-12, %v612_v26 }
 0x37f   : > { %v615_v32 = vadd.f32 1e-12, %v611_v29 }
 0x380   : > { %931 = vrsqrt.f32 %v616_v31 }
 0x381   : > { %933 = vrsqrt.f32 %v615_v32 }
 0x386   : > { %v928_v27 = vpop.eup %927 }
 0x387   : > { %v930_v30 = vpop.eup %929  ;;  %v622_v34 = vmul.f32 %v928_v27, %v590_v54 }
 0x388   : > { %v621_v35 = vmul.f32 %v930_v30, %v589_v55 }
 0x389   : > { %v630_v38 = vmul.f32 %v824_v33, %v622_v34 }
 0x38a   : > { %v932_v39 = vpop.eup %931  ;;  %v629_v36 = vmul.f32 %v824_v33, %v621_v35 }
 0x38b   : > { %v934_v41 = vpop.eup %933  ;;  %v624_v40 = vmul.f32 %v932_v39, %v592_v61  ;;  %v638_v5 = vadd.f32 %v825_v37, %v630_v38 }
 0x38c   : > { %v637_v42 = vadd.f32 %v825_v37, %v629_v36  ;;  %v623_v43 = vmul.f32 %v934_v41, %v591_v63 }
 0x38d   : > { %v632_v44 = vmul.f32 %v824_v33, %v624_v40 }
 0x38e   : > { %873 = vmatprep.mubr.msk.f32.mxu1 %vm285_vm0, %v637_v42  ;;  %v631_v6 = vmul.f32 %v824_v33, %v623_v43 }
 0x38f   : > { %874 = vmatmul.mubr.msk.f32.vlgmr.msra.gmra.mrb[0].mxu1 %vm285_vm0, %v638_v5  ;;  %v640_v2 = vadd.f32 %v825_v37, %v632_v44 }
 0x390   : > { %v639_v45 = vadd.f32 %v825_v37, %v631_v6 }
 0x392   : > { %876 = vmatprep.mubr.msk.f32.mxu1 %vm285_vm0, %v639_v45 }
 0x393   : > { %877 = vmatmul.mubr.msk.f32.gmra.mrb[2].mxu1 %vm285_vm0, %v640_v2 }
 0x462   : > { %v875_v47 = vpop.f32.mrb[0].mxu1 }
 0x463   : > { %v736_v4 = vadd.f32 %v875_v47, %v826_v46  ;;  %v730_v48 = vpop.f32.mrb[1].mxu1 }
 0x464   : > { %v731_v14 = vadd.f32 %v826_v46, %v730_v48 }
 0x465   : > { %750 = vst [vmem:[%s278_s17 + $0x8] sm:$0xff] %v736_v4 }
 0x466   : > { %749 = vst [vmem:[%s278_s17] sm:$0xff] %v731_v14  ;;  %v878_v49 = vpop.f32.mrb[2].mxu1 }
 0x467   : > { %v746_v50 = vadd.f32 %v878_v49, %v826_v46  ;;  %v740_v16 = vpop.f32.mrb[3].mxu1 }
 0x468   : > { %v741_v9 = vadd.f32 %v826_v46, %v740_v16 }
 0x469   : > { %752 = vst [vmem:[%s278_s17 + $0x18] sm:$0xff] %v746_v50 }
 0x46a   : > { %751 = vst [vmem:[%s278_s17 + $0x10] sm:$0xff] %v741_v9 }
 0x46b PF: > { %s17_s24 = sadd.s32 1, %s941_s24  }
 0x46c   : > { %p14_p4 = scmp.ge.s32.totalorder %s17_s24, 4  }
 0x46e   :  { %16 = sbr.rel (!%p14_p4) target bundleno = 1 (0x1), region = 78 }

// kernel: msa_transformer_time_forward.5
= control target key start
LH: loop header
LB: loop body
LE: loop exit
PB: predicated region body
PF: predicated region fallthrough
CT: control target
= control target key end

     0   :  { %s11614_s0 = inlined_call_operand.vmem [shape: f32[2,32,32], index: 0, kind: input, shape index: {}]   ;;  %s11615_s1 = inlined_call_operand.vmem [shape: f32[2,32,1], index: 1, kind: input, shape index: {}]   ;;  %s11616_s2 = inlined_call_operand.vmem [shape: f32[2,1,8], index: 2, kind: input, shape index: {}]   ;;  %s11617_s3 = inlined_call_operand.vmem [shape: f32[2,8,1,4], index: 3, kind: input, shape index: {}]   ;;  %s11618_s4 = inlined_call_operand.vmem [shape: f32[32,32], index: 4, kind: input, shape index: {}]   ;;  %s11619_s5 = inlined_call_operand.vmem [shape: f32[32,32], index: 5, kind: input, shape index: {}]   ;;  %s11620_s6 = inlined_call_operand.vmem [shape: f32[2,32], index: 6, kind: input, shape index: {}]   ;;  %s11621_s7 = inlined_call_operand.vmem [shape: f32[32,96], index: 7, kind: input, shape index: {}]   ;;  %s11622_s8 = inlined_call_operand.vmem [shape: f32[1,96], index: 8, kind: input, shape index: {}]   ;;  %s11623_s9 = inlined_call_operand.vmem [shape: f32[32,32], index: 9, kind: input, shape index: {}]   ;;  %s11624_s10 = inlined_call_operand.vmem [shape: f32[1,32], index: 10, kind: input, shape index: {}]   ;;  %s11625_s11 = inlined_call_operand.vmem [shape: f32[2,32], index: 11, kind: input, shape index: {}]   ;;  %s11626_s12 = inlined_call_operand.vmem [shape: f32[32,96], index: 12, kind: input, shape index: {}]   ;;  %s11627_s13 = inlined_call_operand.vmem [shape: f32[1,96], index: 13, kind: input, shape index: {}]   ;;  %s11628_s14 = inlined_call_operand.vmem [shape: f32[32,32], index: 14, kind: input, shape index: {}]   ;;  %s11629_s15 = inlined_call_operand.vmem [shape: f32[1,32], index: 15, kind: input, shape index: {}]   ;;  %s11630_s16 = inlined_call_operand.vmem [shape: f32[2,32], index: 16, kind: input, shape index: {}]   ;;  %s11631_s17 = inlined_call_operand.vmem [shape: f32[32,64], index: 17, kind: input, shape index: {}]   ;;  %s11632_s18 = inlined_call_operand.vmem [shape: f32[1,64], index: 18, kind: input, shape index: {}]   ;;  %s11633_s19 = inlined_call_operand.vmem [shape: f32[64,32], index: 19, kind: input, shape index: {}]   ;;  %s11634_s20 = inlined_call_operand.vmem [shape: f32[1,32], index: 20, kind: input, shape index: {}]   ;;  %s11635_s21 = inlined_call_operand.vmem [shape: f32[2,32,32], index: 21, kind: output, shape index: {}]  }
   0x1   :  { %11654 = sst [smem:[#allocation11_spill]] %s11614_s0 }
   0x2   :  { %11655 = sst [smem:[#allocation12_spill]] %s11615_s1 }
   0x3   :  { %11656 = sst [smem:[#allocation13_spill]] %s11616_s2  ;;  %s9933_s2 = smov 0  }
   0x4   :  { %11657 = sst [smem:[#allocation14_spill]] %s11617_s3 }
   0x5   :  { %11658 = sst [smem:[#allocation15_spill]] %s11618_s4 }
   0x6   :  { %11659 = sst [smem:[#allocation16_spill]] %s11619_s5 }
   0x7   :  { %11660 = sst [smem:[#allocation17_spill]] %s11620_s6 }
   0x8   :  { %11661 = sst [smem:[#allocation18_spill]] %s11621_s7 }
   0x9 LB: > { %s8598_s25 = sadd.s32 4294967295, %s9804_s2   ;;  %p8602_p0 = scmp.ge.s32.totalorder %s9804_s2, 1  ;;  %s9804_s2 = sphi %s9933_s2, %s31_s2  }
   0xa   : > { %p614_p1 = scmp.lt.s32.totalorder %s9804_s2, 3 }
   0xc   : > { %p615_p2 = pnand %p8602_p0, %p614_p1 }
   0xd   : > { %p686_p3 = scmp.lt.s32.totalorder (!%p615_p2), %s8598_s25, 1  ;;  %vm714_vm0 = vcmask (!%p615_p2), 261120   ;;  %s11662_s28 = sld [smem:[#allocation11_spill]] (!%p615_p2)  ;;  %v9806_v34 = vmov (!%p615_p2), 0   ;;  %vm928_vm1 = vcmask (!%p615_p2), 64512   ;;  %vm9818_vm2 = vmmov (!%p615_p2), 0  }
   0xe   : > { %618 = sbr.rel (%p615_p2) target bundleno = 6615 (0x19d7), region = 104  ;;  %s11663_s7 = sld [smem:[#allocation18_spill]] (!%p615_p2)  ;;  %9593 = vset.pattern.permute.xlu1 (!%p615_p2), %v9806_v34  ;;  %9592 = vset.pattern.permute.xlu0 (!%p615_p2), %v9806_v34  ;;  %vm943_vm3 = vcmask (!%p615_p2), 130112   ;;  %vm958_vm4 = vcmask (!%p615_p2), 195712   ;;  %vm973_vm5 = vcmask (!%p615_p2), 261312   ;;  %vm2252_vm8 = vcmask (!%p615_p2), 257024  }
   0xf   : > { %s11665_s6 = sld [smem:[#allocation17_spill]] (!%p615_p2)  ;;  %s11638_s1 = smov (!%p615_p2), 96   ;;  %vm2264_vm9 = vcmask (!%p615_p2), 261124  }
  0x10   : > { %s11646_s24 = smov (!%p615_p2), 104   ;;  %s11648_s27 = smov (!%p615_p2), 112  }
  0x11   : > { %s11650_s3 = smov (!%p615_p2), 120   ;;  %s9813_s0 = smov (!%p615_p2), 72  }
  0x12   : > { %s11644_s4 = smov (!%p615_p2), 8   ;;  %s11640_s30 = smov (!%p615_p2), 24  }
  0x13   : > { %s11642_s5 = smov (!%p615_p2), 16   ;;  %s11652_s22 = smov (!%p615_p2), 64  }
  0x14   : > { %v784_v28 = vld [vmem:[%s11663_s7] sm:$0xff] (!%p615_p2)  ;;  %v785_v29 = vld [vmem:[%s11663_s7 + $0x8] sm:$0xff] (!%p615_p2)  ;;  %v786_v30 = vld [vmem:[%s11663_s7 + $0x10] sm:$0xff] (!%p615_p2)  ;;  %s9820_s23 = smov (!%p615_p2), 56  }
  0x15   : > { %s11695_s25 = smov (!%p686_p3, %s8598_s25), 1  ;;  %v9491_v31 = vpack.c.bf16 %v785_v29, %v784_v28  ;;  %v787_v32 = vld [vmem:[%s11663_s7 + $0x18] sm:$0xff]  ;;  %v8610_v56 = vld [vmem:[%s11665_s6] ss:$0 sm:$0xff]  ;;  %v8611_v58 = vld [vmem:[%s11665_s6 + $0x1] ss:$0 sm:$0xff] }
  0x16   : > { %s9944_s26 = sshll.u32 %s11695_s25, 5  ;;  %v9495_v33 = vpack.c.bf16 %v787_v32, %v786_v30  ;;  %s11692_s6 = smov 104  }
  0x17   : > { %s690_s29 = scalar_lea.vmem %s11662_s28, %s9944_s26  ;;  %9492 = vmatprep.subr.bf16.mxu0 %v9491_v31  ;;  %9563 = vmatprep.subr.bf16.mxu1 %v9491_v31  ;;  %s11664_s28 = sld [smem:[#allocation12_spill]] }
  0x18   : > { %v9950_v0 = vld [vmem:[%s690_s29] sm:$0xff]  ;;  %v9952_v1 = vld [vmem:[%s690_s29 + $0x10] sm:$0xff]  ;;  %v9954_v2 = vld [vmem:[%s690_s29 + $0x8] sm:$0xff]  ;;  %9494 = vmatpush3.bf16.msra.mxu0 %v9491_v31  ;;  %9565 = vmatpush3.bf16.msra.mxu1 %v9491_v31 }
  0x19   : > { %v715_v3 = vsel %vm714_vm0, %v9950_v0, 0.0  ;;  %v721_v4 = vsel %vm714_vm0, %v9952_v1, 0.0  ;;  %v9960_v5 = vld [vmem:[%s690_s29 + $0x18] sm:$0xff]  ;;  %v718_v6 = vsel %vm714_vm0, %v9954_v2, 0.0  ;;  %9496 = vmatprep.subr.bf16.mxu0 %v9495_v33  ;;  %9564 = vmatprep.subr.bf16.mxu1 %v9495_v33 }
  0x1a   : > { %716 = vadd.xlane.f32.xlu0 %v715_v3  ;;  %722 = vadd.xlane.f32.xlu1 %v721_v4  ;;  %v724_v7 = vsel %vm714_vm0, %v9960_v5, 0.0 }
  0x1c   : > { %9498 = vmatpush3.bf16.msra.mxu0 %v9495_v33  ;;  %9566 = vmatpush3.bf16.msra.mxu1 %v9495_v33 }
  0x1d   : > { %s695_s29 = scalar_lea.vmem %s11664_s28, %s9944_s26  ;;  %s9811_s28 = smov 88  }
  0x1e   : > { %719 = vadd.xlane.f32.xlu0 %v718_v6  ;;  %725 = vadd.xlane.f32.xlu1 %v724_v7  ;;  %v898_v35 = vld [vmem:[%s695_s29 + $0x10] sm:$0xff]  ;;  %v899_v36 = vld [vmem:[%s695_s29 + $0x18] sm:$0xff]  ;;  %v897_v37 = vld [vmem:[%s695_s29 + $0x8] sm:$0xff] }
  0x1f   : > { %v902_v38 = vsub.f32 1.0, %v898_v35  ;;  %v901_v39 = vsub.f32 1.0, %v897_v37  ;;  %v903_v40 = vsub.f32 1.0, %v899_v36  ;;  %v896_v41 = vld [vmem:[%s695_s29] sm:$0xff]  ;;  %s9812_s29 = smov 80  }
  0x20   : > { %v900_v42 = vsub.f32 1.0, %v896_v41 }
  0xa7   : > { %v717_v8 = vpop.xlane.xlu0 %716  ;;  %v723_v9 = vpop.xlane.xlu1 %722 }
  0xa8   : > { %v728_v10 = vmul.f32 0.03125, %v717_v8  ;;  %v730_v11 = vmul.f32 0.03125, %v723_v9 }
  0xaa   : > { %v9967_v12 = vsub.f32 %v9950_v0, %v728_v10  ;;  %v9970_v13 = vsub.f32 %v9952_v1, %v730_v11 }
  0xab   : > { %v720_v14 = vpop.xlane.xlu0 %719  ;;  %v726_v15 = vpop.xlane.xlu1 %725 }
  0xac   : > { %v729_v16 = vmul.f32 0.03125, %v720_v14  ;;  %v731_v17 = vmul.f32 0.03125, %v726_v15  ;;  %v736_v18 = vmul.f32 %v9967_v12, %v9967_v12  ;;  %v738_v19 = vmul.f32 %v9970_v13, %v9970_v13 }
  0xae   : > { %v9977_v20 = vsub.f32 %v9954_v2, %v729_v16  ;;  %v9980_v21 = vsub.f32 %v9960_v5, %v731_v17  ;;  %v740_v22 = vsel %vm714_vm0, %v736_v18, 0.0  ;;  %v746_v23 = vsel %vm714_vm0, %v738_v19, 0.0 }
  0xaf   : > { %741 = vadd.xlane.f32.xlu0 %v740_v22 }
  0xb0   : > { %v737_v24 = vmul.f32 %v9977_v20, %v9977_v20  ;;  %v739_v25 = vmul.f32 %v9980_v21, %v9980_v21 }
  0xb2   : > { %v743_v26 = vsel %vm714_vm0, %v737_v24, 0.0  ;;  %v749_v27 = vsel %vm714_vm0, %v739_v25, 0.0 }
  0xb3   : > { %747 = vadd.xlane.f32.xlu0 %v746_v23  ;;  %744 = vadd.xlane.f32.xlu1 %v743_v26 }
  0xb7   : > { %750 = vadd.xlane.f32.xlu1 %v749_v27  ;;  %v9814_v27 = vmov 0.0  }
  0xb8   : > { %9025 = vmatprep.subr.mxu1 %v9814_v27  ;;  %9040 = vmatprep.subr.mxu0 %v9814_v27 }
  0xc8   : > { %916 = vperm.xlu1 %9593, %v902_v38  }
  0xc9   : > { %911 = vperm.xlu0 %9592, %v901_v39  }
  0xcc   : > { %921 = vperm.xlu1 %9593, %v903_v40  }
  0xd0   : > { %906 = vperm.xlu1 %9593, %v900_v42  }
 0x13c   : > { %v742_v43 = vpop.xlane.xlu0 %741 }
 0x13d   : > { %v752_v44 = vmul.f32 0.03125, %v742_v43 }
 0x13f   : > { %v756_v45 = vadd.f32 1e-12, %v752_v44 }
 0x140   : > { %v745_v46 = vpop.xlane.xlu1 %744  ;;  %v748_v47 = vpop.xlane.xlu0 %747 }
 0x141   : > { %9594 = vrsqrt.f32 %v756_v45  ;;  %v753_v48 = vmul.f32 0.03125, %v745_v46  ;;  %v754_v49 = vmul.f32 0.03125, %v748_v47 }
 0x143   : > { %v757_v50 = vadd.f32 1e-12, %v753_v48  ;;  %v758_v51 = vadd.f32 1e-12, %v754_v49 }
 0x144   : > { %v751_v52 = vpop.xlane.xlu1 %750 }
 0x145   : > { %9596 = vrsqrt.f32 %v757_v50  ;;  %v755_v53 = vmul.f32 0.03125, %v751_v52 }
 0x146   : > { %9598 = vrsqrt.f32 %v758_v51 }
 0x147   : > { %v759_v54 = vadd.f32 1e-12, %v755_v53 }
 0x148   : > { %v917_v14 = vpop.permute.xlu1 %916  ;;  %v912_v29 = vpop.permute.xlu0 %911 }
 0x149   : > { %9600 = vrsqrt.f32 %v759_v54 }
 0x14b   : > { %v9595_v55 = vpop.eup %9594 }
 0x14c   : > { %v764_v57 = vmul.f32 %v9595_v55, %v9967_v12  ;;  %v922_v15 = vpop.permute.xlu1 %921 }
 0x14e   : > { %v772_v59 = vmul.f32 %v8610_v56, %v764_v57 }
 0x14f   : > { %v9597_v60 = vpop.eup %9596 }
 0x150   : > { %v9599_v61 = vpop.eup %9598  ;;  %v780_v62 = vadd.f32 %v8611_v58, %v772_v59  ;;  %v765_v63 = vmul.f32 %v9597_v60, %v9977_v20  ;;  %v907_v20 = vpop.permute.xlu1 %906 }
 0x151   : > { %v766_v3 = vmul.f32 %v9599_v61, %v9970_v13  ;;  %v8612_v13 = vld [vmem:[%s11622_s8] ss:$0 sm:$0xff] }
 0x152   : > { %9019 = vmatprep.mubr.msk.f32.mxu0 %vm714_vm0, %v780_v62  ;;  %v773_v4 = vmul.f32 %v8610_v56, %v765_v63 }
 0x153   : > { %v9601_v6 = vpop.eup %9600  ;;  %v774_v7 = vmul.f32 %v8610_v56, %v766_v3 }
 0x154   : > { %v781_v8 = vadd.f32 %v8611_v58, %v773_v4  ;;  %v767_v9 = vmul.f32 %v9601_v6, %v9980_v21 }
 0x155   : > { %v782_v10 = vadd.f32 %v8611_v58, %v774_v7 }
 0x156   : > { %9020 = vmatmul.mubr.msk.f32.vlgmr.msra.gmra.mrb[0].mxu0 %vm714_vm0, %v781_v8  ;;  %v775_v11 = vmul.f32 %v8610_v56, %v767_v9 }
 0x157   : > { %9022 = vmatprep.mubr.msk.f32.mxu1 %vm714_vm0, %v782_v10  ;;  %9042 = vmatprep.mubr.msk.f32.mxu0 %vm9818_vm2, %v9814_v27 }
 0x158   : > { %v783_v12 = vadd.f32 %v8611_v58, %v775_v11 }
 0x15a   : > { %9023 = vmatmul.mubr.msk.f32.vlgmr.msra.gmra.mrb[0].mxu1 %vm714_vm0, %v783_v12 }
 0x15b   : > { %9027 = vmatprep.mubr.msk.f32.mxu1 %vm9818_vm2, %v9814_v27 }
 0x229   : > { %v9021_v16 = vpop.f32.mrb[0].mxu0 }
 0x22a   : > { %v10025_v17 = vadd.f32 %v9021_v16, %v8612_v13  ;;  %v873_v18 = vpop.f32.mrb[1].mxu0 }
 0x22b   : > { %v10027_v19 = vadd.f32 %v8612_v13, %v873_v18 }
 0x22c   : > { %1001 = vrot.lane.b32.xlu0 %v10025_v17, %s11638_s1  ;;  %946 = vrot.lane.b32.xlu1 %v10025_v17, %s11646_s24  ;;  %v893_v28 = vmul.f32 0.17677669, %v10025_v17 }
 0x22d   : > { %v9024_v21 = vpop.f32.mrb[0].mxu1  ;;  %v892_v22 = vmul.f32 0.17677669, %v10027_v19 }
 0x22e   : > { %v10034_v23 = vadd.f32 %v9024_v21, %v8612_v13  ;;  %v883_v24 = vpop.f32.mrb[1].mxu1  ;;  %v10066_v30 = vmul.f32 %v912_v29, %v893_v28 }
 0x22f   : > { %v924_v25 = vmul.f32 %v907_v20, %v892_v22  ;;  %v10045_v26 = vadd.f32 %v8612_v13, %v883_v24  ;;  %v1448_v13 = vlaneseq }
 0x230   : > { %1025 = vrot.lane.b32.xlu0 %v10034_v23, %s11648_s27  ;;  %976 = vrot.lane.b32.xlu1 %v10034_v23, %s11650_s3  ;;  %v895_v33 = vmul.f32 0.17677669, %v10034_v23 }
 0x231   : > { %929 = vst.msk [vmem:[#allocation2] sm:$0xff] %vm928_vm1, %v924_v25  ;;  %v894_v31 = vmul.f32 0.17677669, %v10045_v26  ;;  %v1449_v18 = vshrl.u32 %v1448_v13, 7 }
 0x232   : > { %v10080_v35 = vmul.f32 %v922_v15, %v895_v33 }
 0x233   : > { %v10073_v32 = vmul.f32 %v917_v14, %v894_v31  ;;  %v10170_v20 = vsub.s32 0, %v1449_v18 }
 0x234   : > { %990 = vrot.lane.b32.xlu0 %v10027_v19, %s9811_s28  ;;  %1052 = vrot.lane.b32.xlu1 %v10025_v17, %s9811_s28 }
 0x238   : > { %1100 = vrot.lane.b32.xlu1 %v10025_v17, %s9812_s29  ;;  %1013 = vrot.lane.b32.xlu0 %v10045_v26, %s11646_s24 }
 0x23c   : > { %1073 = vrot.lane.b32.xlu1 %v10034_v23, %s11646_s24  ;;  %1086 = vrot.lane.b32.xlu0 %v10027_v19, %s9813_s0 }
 0x240   : > { %931 = vrot.lane.b32.xlu1 %v10027_v19, %s11638_s1  ;;  %1061 = vrot.lane.b32.xlu0 %v10045_v26, %s11638_s1 }
 0x244   : > { %1112 = vrot.lane.b32.xlu0 %v10045_v26, %s9811_s28  ;;  %961 = vrot.lane.b32.xlu1 %v10045_v26, %s11648_s27 }
 0x248   : > { %1038 = vrot.lane.b32.xlu1 %v10027_v19, %s9812_s29  ;;  %1096 = vrot.lane.b32.xlu0 %v10066_v30, %s11648_s27 }
 0x24c   : > { %1009 = vrot.lane.b32.xlu0 %v10073_v32, %s11644_s4  ;;  %940 = vrot.lane.b32.xlu1 %v10066_v30, %s11644_s4 }
 0x250   : > { %1033 = vrot.lane.b32.xlu0 %v924_v25, %s11648_s27  ;;  %970 = vrot.lane.b32.xlu1 %v10080_v35, %s11640_s30 }
 0x254   : > { %1081 = vrot.lane.b32.xlu0 %v924_v25, %s11646_s24  ;;  %1021 = vrot.lane.b32.xlu1 %v10080_v35, %s11642_s5 }
 0x258   : > { %1108 = vrot.lane.b32.xlu0 %v10073_v32, %s11650_s3  ;;  %1048 = vrot.lane.b32.xlu1 %v10066_v30, %s11650_s3 }
 0x25c   : > { %935 = vrot.lane.b32.xlu0 %v10027_v19, %s11652_s22  ;;  %955 = vrot.lane.b32.xlu1 %v10073_v32, %s11642_s5  ;;  %s11666_s5 = sld [smem:[#allocation13_spill]] }
 0x260   : > { %985 = vrot.lane.b32.xlu1 %v924_v25, %s11650_s3 }
 0x264   : > { %1121 = vrot.lane.b32.xlu1 %v10034_v23, %s11638_s1  ;;  %s9821_s1 = smov 48  }
 0x268   : > { %1069 = vrot.lane.b32.xlu1 %v10080_v35, %s11644_s4  ;;  %s698_s4 = scalar_lea.vmem %s11666_s5, %s11695_s25  ;;  %s11667_s5 = smov 8  }
 0x269   : > { %v1445_v16 = vld [vmem:[%s698_s4] sm:$0x1]  ;;  %s9822_s4 = smov 40  }
 0x26a   : > { %vm1446_vm6 = vcmp.gt.f32.partialorder %v1445_v16, 0.5 }
 0x26b   : > { %v1447_v21 = vsel %vm1446_vm6, 1, %v9806_v34 }
 0x26c   : > { %950 = vrot.lane.b32.xlu1 %v10025_v17, %s9813_s0  ;;  %v1451_v22 = vrot.slane %v1447_v21, %v10170_v20 }
 0x26e   : > { %vm1452_vm7 = vcmp.eq.s32.totalorder %v1451_v22, 1 }
 0x270   : > { %995 = vrot.lane.b32.xlu1 %v10027_v19, %s9820_s23 }
 0x29e   : > { %v947_v36 = vpop.permute.xlu1 %946  ;;  %v1002_v37 = vpop.permute.xlu0 %1001 }
 0x2a2   : > { %v977_v38 = vpop.permute.xlu1 %976  ;;  %v1026_v39 = vpop.permute.xlu0 %1025 }
 0x2a6   : > { %v1053_v40 = vpop.permute.xlu1 %1052  ;;  %v991_v41 = vpop.permute.xlu0 %990 }
 0x2a7   : > { %994 = vst.msk [vmem:[#allocation3 + $0x8] sm:$0xff] %vm928_vm1, %v991_v41 }
 0x2a8   : > { %1004 = vst.msk [vmem:[#allocation3 + $0x8] sm:$0xff] %vm943_vm3, %v1002_v37 }
 0x2aa   : > { %v1101_v42 = vpop.permute.xlu1 %1100  ;;  %v1014_v43 = vpop.permute.xlu0 %1013 }
 0x2ab   : > { %1016 = vst.msk [vmem:[#allocation3 + $0x8] sm:$0xff] %vm958_vm4, %v1014_v43 }
 0x2ac   : > { %1028 = vst.msk [vmem:[#allocation3 + $0x8] sm:$0xff] %vm973_vm5, %v1026_v39 }
 0x2ae   : > { %v1074_v44 = vpop.permute.xlu1 %1073  ;;  %v1087_v45 = vpop.permute.xlu0 %1086 }
 0x2af   : > { %1090 = vst.msk [vmem:[#allocation3 + $0x18] sm:$0xff] %vm928_vm1, %v1087_v45 }
 0x2b0   : > { %1103 = vst.msk [vmem:[#allocation3 + $0x18] sm:$0xff] %vm943_vm3, %v1101_v42 }
 0x2b2   : > { %v932_v46 = vpop.permute.xlu1 %931  ;;  %v1062_v47 = vpop.permute.xlu0 %1061 }
 0x2b3   : > { %934 = vst.msk [vmem:[#allocation3] sm:$0xff] %vm928_vm1, %v932_v46  ;;  %v1134_v6 = vld [vmem:[#allocation3 + $0x8] sm:$0xff] }
 0x2b4   : > { %949 = vst.msk [vmem:[#allocation3] sm:$0xff] %vm943_vm3, %v947_v36 }
 0x2b6   : > { %v962_v48 = vpop.permute.xlu1 %961  ;;  %v1113_v49 = vpop.permute.xlu0 %1112 }
 0x2b7   : > { %964 = vst.msk [vmem:[#allocation3] sm:$0xff] %vm958_vm4, %v962_v48  ;;  %1115 = vst.msk [vmem:[#allocation3 + $0x18] sm:$0xff] %vm958_vm4, %v1113_v49 }
 0x2b8   : > { %979 = vst.msk [vmem:[#allocation3] sm:$0xff] %vm973_vm5, %v977_v38 }
 0x2ba   : > { %v1039_v50 = vpop.permute.xlu1 %1038  ;;  %v1097_v51 = vpop.permute.xlu0 %1096 }
 0x2bb   : > { %1042 = vst.msk [vmem:[#allocation3 + $0x10] sm:$0xff] %vm928_vm1, %v1039_v50 }
 0x2bc   : > { %1055 = vst.msk [vmem:[#allocation3 + $0x10] sm:$0xff] %vm943_vm3, %v1053_v40 }
 0x2bd   : > { %1064 = vst.msk [vmem:[#allocation3 + $0x10] sm:$0xff] %vm958_vm4, %v1062_v47 }
 0x2be   : > { %1076 = vst.msk [vmem:[#allocation3 + $0x10] sm:$0xff] %vm973_vm5, %v1074_v44  ;;  %v941_v52 = vpop.permute.xlu1 %940  ;;  %v1010_v53 = vpop.permute.xlu0 %1009 }
 0x2bf   : > { %944 = vst.msk [vmem:[#allocation2] sm:$0xff] %vm943_vm3, %v941_v52  ;;  %v1133_v54 = vld [vmem:[#allocation3] sm:$0xff] }
 0x2c0   : > { %9026 = vmatpush3.xpose.msk.msra.mxu1 %vm714_vm0, %v1133_v54 }
 0x2c1   : > { %9030 = vmatprep.subr.mxu1 %v9814_v27 }
 0x2c2   : > { %v971_v55 = vpop.permute.xlu1 %970  ;;  %v1034_v56 = vpop.permute.xlu0 %1033 }
 0x2c3   : > { %1037 = vst.msk [vmem:[#allocation2 + $0x10] sm:$0xff] %vm928_vm1, %v1034_v56 }
 0x2c5   : > { %v1135_v10 = vld [vmem:[#allocation3 + $0x10] sm:$0xff] }
 0x2c6   : > { %v1022_v57 = vpop.permute.xlu1 %1021  ;;  %v1082_v58 = vpop.permute.xlu0 %1081 }
 0x2c7   : > { %1085 = vst.msk [vmem:[#allocation2 + $0x18] sm:$0xff] %vm928_vm1, %v1082_v58 }
 0x2c8   : > { %1099 = vst.msk [vmem:[#allocation2 + $0x18] sm:$0xff] %vm943_vm3, %v1097_v51 }
 0x2ca   : > { %v1049_v59 = vpop.permute.xlu1 %1048  ;;  %v1109_v60 = vpop.permute.xlu0 %1108 }
 0x2cb   : > { %1051 = vst.msk [vmem:[#allocation2 + $0x10] sm:$0xff] %vm943_vm3, %v1049_v59 }
 0x2cc   : > { %1111 = vst.msk [vmem:[#allocation2 + $0x18] sm:$0xff] %vm958_vm4, %v1109_v60  ;;  %1060 = vst.msk [vmem:[#allocation2 + $0x10] sm:$0xff] %vm958_vm4, %v10073_v32 }
 0x2cd   : > { %1120 = vst.msk [vmem:[#allocation2 + $0x18] sm:$0xff] %vm973_vm5, %v10080_v35 }
 0x2ce   : > { %v956_v61 = vpop.permute.xlu1 %955  ;;  %v936_v62 = vpop.permute.xlu0 %935 }
 0x2cf   : > { %959 = vst.msk [vmem:[#allocation2] sm:$0xff] %vm958_vm4, %v956_v61 }
 0x2d0   : > { %938 = vst.msk [vmem:[#allocation4] sm:$0xff] %vm928_vm1, %v936_v62 }
 0x2d1   : > { %974 = vst.msk [vmem:[#allocation2] sm:$0xff] %vm973_vm5, %v971_v55 }
 0x2d2   : > { %v986_v63 = vpop.permute.xlu1 %985 }
 0x2d3   : > { %989 = vst.msk [vmem:[#allocation2 + $0x8] sm:$0xff] %vm928_vm1, %v986_v63 }
 0x2d4   : > { %1000 = vst.msk [vmem:[#allocation2 + $0x8] sm:$0xff] %vm943_vm3, %v10066_v30  ;;  %v1132_v12 = vld [vmem:[#allocation2 + $0x18] sm:$0xff] }
 0x2d5   : > { %1012 = vst.msk [vmem:[#allocation2 + $0x8] sm:$0xff] %vm958_vm4, %v1010_v53 }
 0x2d6   : > { %1024 = vst.msk [vmem:[#allocation2 + $0x8] sm:$0xff] %vm973_vm5, %v1022_v57  ;;  %v1122_v3 = vpop.permute.xlu1 %1121 }
 0x2d7   : > { %1124 = vst.msk [vmem:[#allocation3 + $0x18] sm:$0xff] %vm973_vm5, %v1122_v3 }
 0x2d8   : > { %v1129_v4 = vld [vmem:[#allocation2] sm:$0xff] }
 0x2d9   : > { %9028 = vmatmul.mubr.msk.f32.vlgmr.msra.gmra.mrb[2].mxu1 %vm714_vm0, %v1129_v4 }
 0x2da   : > { %9031 = vmatpush3.xpose.msk.msra.mxu1 %vm714_vm0, %v1134_v6  ;;  %9032 = vmatprep.mubr.msk.f32.mxu1 %vm9818_vm2, %v9814_v27  ;;  %v1070_v7 = vpop.permute.xlu1 %1069 }
 0x2db   : > { %9035 = vmatprep.subr.mxu1 %v9814_v27  ;;  %1072 = vst.msk [vmem:[#allocation2 + $0x10] sm:$0xff] %vm973_vm5, %v1070_v7 }
 0x2dd   : > { %v1130_v8 = vld [vmem:[#allocation2 + $0x8] sm:$0xff] }
 0x2de   : > { %v951_v9 = vpop.permute.xlu1 %950  ;;  %9033 = vmatmul.mubr.msk.f32.vlgmr.msra.gmra.mrb[4].mxu1 %vm714_vm0, %v1130_v8  ;;  %v1136_v11 = vld [vmem:[#allocation3 + $0x18] sm:$0xff] }
 0x2df   : > { %953 = vst.msk [vmem:[#allocation4] sm:$0xff] %vm943_vm3, %v951_v9  ;;  %9036 = vmatpush3.xpose.msk.msra.mxu1 %vm714_vm0, %v1135_v10  ;;  %9041 = vmatpush3.xpose.msk.msra.mxu0 %vm714_vm0, %v1136_v11 }
 0x2e0   : > { %9037 = vmatprep.mubr.msk.f32.mxu1 %vm9818_vm2, %v9814_v27  ;;  %9045 = vmatprep.subr.mxu1 %v9814_v27 }
 0x2e1   : > { %9050 = vmatprep.subr.mxu0 %v9814_v27 }
 0x2e2   : > { %v996_v14 = vpop.permute.xlu1 %995  ;;  %9043 = vmatmul.mubr.msk.f32.vlgmr.msra.gmra.mrb[2].mxu0 %vm714_vm0, %v1132_v12  ;;  %v1131_v15 = vld [vmem:[#allocation2 + $0x10] sm:$0xff] }
 0x2e3   : > { %999 = vst.msk [vmem:[#allocation4 + $0x8] sm:$0xff] %vm928_vm1, %v996_v14  ;;  %9038 = vmatmul.mubr.msk.f32.vlgmr.msra.gmra.mrb[6].mxu1 %vm714_vm0, %v1131_v15  ;;  %9052 = vmatprep.mubr.msk.f32.mxu0 %vm9818_vm2, %v9814_v27 }
 0x2e4   : > { %9047 = vmatprep.mubr.msk.f32.mxu1 %vm9818_vm2, %v9814_v27 }
 0x3ac   : > { %v1213_v24 = vpop.f32.mrb[2].mxu1 }
 0x3ad   : > { %v1453_v25 = vsel %vm1452_vm7, -10000.0, %v1213_v24  ;;  %v9029_v28 = vpop.f32.mrb[3].mxu1 }
 0x3ae   : > { %v1457_v29 = vsel %vm928_vm1, %v1453_v25, -inf }
 0x3af   : > { %1458 = vmax.xlane.f32.xlu1 %v1457_v29 }
 0x3b1   : > { %v1289_v30 = vpop.f32.mrb[4].mxu1 }
 0x3b2   : > { %v1454_v31 = vsel %vm1452_vm7, -10000.0, %v1289_v30  ;;  %v9034_v32 = vpop.f32.mrb[5].mxu1 }
 0x3b3   : > { %v1460_v33 = vsel %vm928_vm1, %v1454_v31, -inf }
 0x3b4   : > { %1461 = vmax.xlane.f32.xlu0 %v1460_v33 }
 0x3b5   : > { %v1441_v35 = vpop.f32.mrb[2].mxu0 }
 0x3b6   : > { %v1456_v36 = vsel %vm1452_vm7, -10000.0, %v1441_v35  ;;  %v1365_v37 = vpop.f32.mrb[6].mxu1  ;;  %v9044_v38 = vpop.f32.mrb[3].mxu0 }
 0x3b7   : > { %v1455_v39 = vsel %vm1452_vm7, -10000.0, %v1365_v37  ;;  %v9039_v40 = vpop.f32.mrb[7].mxu1  ;;  %v1466_v41 = vsel %vm928_vm1, %v1456_v36, -inf }
 0x3b8   : > { %1467 = vmax.xlane.f32.xlu1 %v1466_v41  ;;  %v1463_v42 = vsel %vm928_vm1, %v1455_v39, -inf  ;;  %v1854_v40 = vld [vmem:[%s11623_s9 + $0x8] sm:$0xff] }
 0x3b9   : > { %1464 = vmax.xlane.f32.xlu0 %v1463_v42 }
 0x3c9   : > { %1005 = vrot.lane.b32.xlu1 %v10025_v17, %s11652_s22 }
 0x3cd   : > { %1017 = vrot.lane.b32.xlu1 %v10045_v26, %s9813_s0 }
 0x3cf   : > { %965 = vrot.lane.b32.xlu0 %v10045_v26, %s9812_s29 }
 0x3d1   : > { %1043 = vrot.lane.b32.xlu1 %v10027_v19, %s9821_s1 }
 0x3d3   : > { %980 = vrot.lane.b32.xlu0 %v10034_v23, %s9811_s28  ;;  %s11668_s28 = smov 16  }
 0x3d5   : > { %1091 = vrot.lane.b32.xlu1 %v10027_v19, %s9822_s4 }
 0x3d7   : > { %1029 = vrot.lane.b32.xlu0 %v10034_v23, %s9812_s29  ;;  %s11669_s29 = smov 24  }
 0x3d9   : > { %1104 = vrot.lane.b32.xlu1 %v10025_v17, %s9821_s1  ;;  %s11670_s1 = sld [smem:[#allocation15_spill]] }
 0x3db   : > { %1056 = vrot.lane.b32.xlu0 %v10025_v17, %s9820_s23 }
 0x3df   : > { %1065 = vrot.lane.b32.xlu0 %v10045_v26, %s11652_s22 }
 0x3e3   : > { %1077 = vrot.lane.b32.xlu0 %v10034_v23, %s9813_s0  ;;  %s11691_s0 = smov 112  }
 0x43c   : > { %v1459_v43 = vpop.xlane.xlu1 %1458 }
 0x43d   : > { %v1469_v44 = vsub.f32 %v1453_v25, %v1459_v43 }
 0x43f   : > { %v1473_v45 = vmul.f32 1.442695, %v1469_v44  ;;  %v1855_v44 = vld [vmem:[%s11623_s9 + $0x10] sm:$0xff] }
 0x441   : > { %9602 = vpow2.f32 %v1473_v45  ;;  %v1462_v46 = vpop.xlane.xlu0 %1461  ;;  %v1856_v45 = vld [vmem:[%s11623_s9 + $0x18] sm:$0xff] }
 0x442   : > { %v1470_v19 = vsub.f32 %v1454_v31, %v1462_v46  ;;  %v9503_v46 = vpack.c.bf16 %v1856_v45, %v1855_v44  ;;  %v2142_v44 = vld [vmem:[%s11626_s12 + $0x10] sm:$0xff] }
 0x444   : > { %v1475_v51 = vmul.f32 1.442695, %v1470_v19 }
 0x445   : > { %v1468_v47 = vpop.xlane.xlu1 %1467 }
 0x446   : > { %v1472_v48 = vsub.f32 %v1456_v36, %v1468_v47  ;;  %v1465_v49 = vpop.xlane.xlu0 %1464 }
 0x447   : > { %v1471_v50 = vsub.f32 %v1455_v39, %v1465_v49  ;;  %v1853_v39 = vld [vmem:[%s11623_s9] sm:$0xff] }
 0x448   : > { %v1479_v52 = vmul.f32 1.442695, %v1472_v48  ;;  %v9499_v41 = vpack.c.bf16 %v1854_v40, %v1853_v39 }
 0x449   : > { %v1477_v53 = vmul.f32 1.442695, %v1471_v50  ;;  %v1006_v17 = vpop.permute.xlu1 %1005 }
 0x44a   : > { %9604 = vpow2.f32 %v1479_v52  ;;  %1008 = vst.msk [vmem:[#allocation4 + $0x8] sm:$0xff] %vm943_vm3, %v1006_v17  ;;  %v966_v55 = vpop.permute.xlu0 %965 }
 0x44b   : > { %v9603_v54 = vpop.eup %9602  ;;  %9606 = vpow2.f32 %v1477_v53  ;;  %968 = vst.msk [vmem:[#allocation4] sm:$0xff] %vm958_vm4, %v966_v55 }
 0x44c   : > { %v1481_v56 = vsel %vm928_vm1, %v9603_v54, 0.0  ;;  %9608 = vpow2.f32 %v1475_v51 }
 0x44d   : > { %1482 = vadd.xlane.f32.xlu0 %v1481_v56  ;;  %v1018_v57 = vpop.permute.xlu1 %1017 }
 0x44e   : > { %1020 = vst.msk [vmem:[#allocation4 + $0x8] sm:$0xff] %vm958_vm4, %v1018_v57  ;;  %v981_v58 = vpop.permute.xlu0 %980 }
 0x44f   : > { %983 = vst.msk [vmem:[#allocation4] sm:$0xff] %vm973_vm5, %v981_v58 }
 0x451   : > { %v1044_v59 = vpop.permute.xlu1 %1043 }
 0x452   : > { %1047 = vst.msk [vmem:[#allocation4 + $0x10] sm:$0xff] %vm928_vm1, %v1044_v59  ;;  %v1030_v60 = vpop.permute.xlu0 %1029 }
 0x453   : > { %1032 = vst.msk [vmem:[#allocation4 + $0x8] sm:$0xff] %vm973_vm5, %v1030_v60 }
 0x454   : > { %v9605_v61 = vpop.eup %9604 }
 0x455   : > { %v9607_v62 = vpop.eup %9606  ;;  %v1092_v63 = vpop.permute.xlu1 %1091  ;;  %v1490_v3 = vsel %vm928_vm1, %v9605_v61, 0.0 }
 0x456   : > { %v9609_v4 = vpop.eup %9608  ;;  %1095 = vst.msk [vmem:[#allocation4 + $0x18] sm:$0xff] %vm928_vm1, %v1092_v63  ;;  %1491 = vadd.xlane.f32.xlu1 %v1490_v3  ;;  %v1057_v6 = vpop.permute.xlu0 %1056  ;;  %v1487_v7 = vsel %vm928_vm1, %v9607_v62, 0.0  ;;  %v1137_v8 = vld [vmem:[#allocation4] sm:$0xff] }
 0x457   : > { %1059 = vst.msk [vmem:[#allocation4 + $0x10] sm:$0xff] %vm943_vm3, %v1057_v6  ;;  %1488 = vadd.xlane.f32.xlu0 %v1487_v7  ;;  %9046 = vmatpush3.msra.mxu1 %v1137_v8  ;;  %v1484_v10 = vsel %vm928_vm1, %v9609_v4, 0.0  ;;  %v8633_v3 = vld [vmem:[%s11624_s10] ss:$0 sm:$0xff] }
 0x458   : > { %9055 = vmatprep.subr.mxu1 %v9814_v27 }
 0x459   : > { %v1105_v9 = vpop.permute.xlu1 %1104 }
 0x45a   : > { %1107 = vst.msk [vmem:[#allocation4 + $0x18] sm:$0xff] %vm943_vm3, %v1105_v9  ;;  %1485 = vadd.xlane.f32.xlu1 %v1484_v10  ;;  %v1066_v11 = vpop.permute.xlu0 %1065  ;;  %v1138_v12 = vld [vmem:[#allocation4 + $0x8] sm:$0xff] }
 0x45b   : > { %1068 = vst.msk [vmem:[#allocation4 + $0x10] sm:$0xff] %vm958_vm4, %v1066_v11  ;;  %9051 = vmatpush3.msra.mxu0 %v1138_v12 }
 0x45c   : > { %9060 = vmatprep.subr.mxu0 %v9814_v27 }
 0x45e   : > { %v1078_v14 = vpop.permute.xlu0 %1077 }
 0x45f   : > { %1080 = vst.msk [vmem:[#allocation4 + $0x10] sm:$0xff] %vm973_vm5, %v1078_v14 }
 0x466   : > { %v1139_v24 = vld [vmem:[#allocation4 + $0x10] sm:$0xff] }
 0x46b   : > { %1116 = vrot.lane.b32.xlu1 %v10045_v26, %s9820_s23  ;;  %s11672_s23 = sld [smem:[#allocation14_spill]] }
 0x46d   : > { %1125 = vrot.lane.b32.xlu0 %v10034_v23, %s11652_s22 }
 0x4da   : > { %v1483_v15 = vpop.xlane.xlu0 %1482 }
 0x4db   : > { %9610 = vrcp.f32 %v1483_v15 }
 0x4e3   : > { %v1492_v13 = vpop.xlane.xlu1 %1491 }
 0x4e4   : > { %v1489_v18 = vpop.xlane.xlu0 %1488 }
 0x4e5   : > { %v9611_v16 = vpop.eup %9610  ;;  %9612 = vrcp.f32 %v1489_v18 }
 0x4e6   : > { %v1497_v21 = vmul.f32 %v9611_v16, %v9603_v54 }
 0x4e7   : > { %v1486_v22 = vpop.xlane.xlu1 %1485 }
 0x4e8   : > { %9048 = vmatmul.mubr.msk.f32.vlgmr.msra.gmra.mrb[8].mxu1 %vm928_vm1, %v1497_v21  ;;  %9614 = vrcp.f32 %v1486_v22  ;;  %v1126_v25 = vpop.permute.xlu0 %1125 }
 0x4e9   : > { %9056 = vmatpush3.msra.mxu1 %v1139_v24  ;;  %9057 = vmatprep.mubr.msk.f32.mxu1 %vm9818_vm2, %v9814_v27  ;;  %9616 = vrcp.f32 %v1492_v13 }
 0x4ea   : > { %9500 = vmatprep.subr.bf16.mxu1 %v9499_v41 }
 0x4eb   : > { %v1117_v26 = vpop.permute.xlu1 %1116 }
 0x4ec   : > { %1119 = vst.msk [vmem:[#allocation4 + $0x18] sm:$0xff] %vm958_vm4, %v1117_v26 }
 0x4ed   : > { %1128 = vst.msk [vmem:[#allocation4 + $0x18] sm:$0xff] %vm973_vm5, %v1126_v25 }
 0x4ef   : > { %v9613_v23 = vpop.eup %9612 }
 0x4f0   : > { %v1499_v28 = vmul.f32 %v9613_v23, %v9607_v62 }
 0x4f2   : > { %v9615_v29 = vpop.eup %9614  ;;  %9058 = vmatmul.mubr.msk.f32.vlgmr.msra.gmra.mrb[10].mxu1 %vm928_vm1, %v1499_v28 }
 0x4f3   : > { %v1498_v30 = vmul.f32 %v9615_v29, %v9609_v4  ;;  %v9617_v31 = vpop.eup %9616  ;;  %9502 = vmatpush3.bf16.msra.mxu1 %v9499_v41  ;;  %v2039_v41 = vld [vmem:[%s11670_s1] sm:$0xff] }
 0x4f4   : > { %v1140_v32 = vld [vmem:[#allocation4 + $0x18] sm:$0xff]  ;;  %v1500_v33 = vmul.f32 %v9617_v31, %v9605_v61  ;;  %9504 = vmatprep.subr.bf16.mxu1 %v9503_v46 }
 0x4f5   : > { %9053 = vmatmul.mubr.msk.f32.vlgmr.msra.gmra.mrb[4].mxu0 %vm928_vm1, %v1498_v30 }
 0x4f6   : > { %9061 = vmatpush3.msra.mxu0 %v1140_v32  ;;  %9062 = vmatprep.mubr.msk.f32.mxu0 %vm9818_vm2, %v9814_v27 }
 0x4f7   : > { %9506 = vmatpush3.bf16.msra.mxu1 %v9503_v46  ;;  %v2143_v46 = vld [vmem:[%s11626_s12 + $0x18] sm:$0xff] }
 0x4f9   : > { %9063 = vmatmul.mubr.msk.f32.vlgmr.msra.gmra.mrb[6].mxu0 %vm928_vm1, %v1500_v33 }
 0x4fa   : > { %9087 = vmatprep.mubr.msk.f32.mxu0 %vm714_vm0, %v2039_v41 }
 0x5bb   : > { %v1570_v35 = vpop.f32.mrb[8].mxu1 }
 0x5bc   : > { %1793 = vst.msk [vmem:[#allocation5] sm:$0xff] %vm928_vm1, %v1570_v35  ;;  %1799 = vrot.lane.b32.xlu0 %v1570_v35, %s11648_s27  ;;  %1795 = vrot.lane.b32.xlu1 %v1570_v35, %s11650_s3  ;;  %v9049_v36 = vpop.f32.mrb[9].mxu1 }
 0x5c0   : > { %1803 = vrot.lane.b32.xlu0 %v1570_v35, %s11646_s24  ;;  %s11690_s24 = smov 120  }
 0x5c5   : > { %v1716_v37 = vpop.f32.mrb[10].mxu1 }
 0x5c6   : > { %v9059_v38 = vpop.f32.mrb[11].mxu1 }
 0x5c8   : > { %v1643_v42 = vpop.f32.mrb[4].mxu0 }
 0x5c9   : > { %v9054_v43 = vpop.f32.mrb[5].mxu0  ;;  %1808 = vrot.lane.b32.xlu0 %v1643_v42, %s11667_s5  ;;  %1813 = vrot.lane.b32.xlu1 %v1643_v42, %s11650_s3 }
 0x5ca   : > { %v2141_v43 = vld [vmem:[%s11626_s12 + $0x8] sm:$0xff] }
 0x5cc   : > { %v1789_v19 = vpop.f32.mrb[6].mxu0 }
 0x5cd   : > { %1817 = vrot.lane.b32.xlu0 %v1643_v42, %s11648_s27  ;;  %1822 = vrot.lane.b32.xlu1 %v1716_v37, %s11668_s28  ;;  %v9064_v47 = vpop.f32.mrb[7].mxu0  ;;  %s11671_s27 = smov 96  }
 0x5d1   : > { %1826 = vrot.lane.b32.xlu0 %v1716_v37, %s11667_s5  ;;  %1836 = vrot.lane.b32.xlu1 %v1789_v19, %s11669_s29 }
 0x5d5   : > { %1844 = vrot.lane.b32.xlu0 %v1789_v19, %s11667_s5  ;;  %1840 = vrot.lane.b32.xlu1 %v1789_v19, %s11668_s28 }
 0x5d9   : > { %1831 = vrot.lane.b32.xlu1 %v1716_v37, %s11650_s3  ;;  %s8607_s3 = sshll.u32 %s11695_s25, 3  ;;  %s11689_s25 = smov 64  }
 0x5da   : > { %s10478_s4 = scalar_lea.vmem %s11672_s23, %s8607_s3 }
 0x62e   : > { %v1796_v48 = vpop.permute.xlu1 %1795  ;;  %v1800_v49 = vpop.permute.xlu0 %1799 }
 0x62f   : > { %1798 = vst.msk [vmem:[#allocation5 + $0x8] sm:$0xff] %vm928_vm1, %v1796_v48  ;;  %1802 = vst.msk [vmem:[#allocation5 + $0x10] sm:$0xff] %vm928_vm1, %v1800_v49 }
 0x630   : > { %1812 = vst.msk [vmem:[#allocation5 + $0x8] sm:$0xff] %vm943_vm3, %v1643_v42  ;;  %v2140_v42 = vld [vmem:[%s11626_s12] sm:$0xff] }
 0x631   : > { %v9515_v45 = vpack.c.bf16 %v2141_v43, %v2140_v42 }
 0x632   : > { %v1804_v50 = vpop.permute.xlu0 %1803 }
 0x633   : > { %1806 = vst.msk [vmem:[#allocation5 + $0x18] sm:$0xff] %vm928_vm1, %v1804_v50  ;;  %9516 = vmatprep.subr.bf16.mxu1 %v9515_v45 }
 0x63b   : > { %v1814_v51 = vpop.permute.xlu1 %1813  ;;  %v1809_v52 = vpop.permute.xlu0 %1808 }
 0x63c   : > { %1816 = vst.msk [vmem:[#allocation5 + $0x10] sm:$0xff] %vm943_vm3, %v1814_v51  ;;  %1811 = vst.msk [vmem:[#allocation5] sm:$0xff] %vm943_vm3, %v1809_v52 }
 0x63d   : > { %1830 = vst.msk [vmem:[#allocation5 + $0x10] sm:$0xff] %vm958_vm4, %v1716_v37 }
 0x63f   : > { %v1823_v53 = vpop.permute.xlu1 %1822  ;;  %v1818_v17 = vpop.permute.xlu0 %1817 }
 0x640   : > { %1825 = vst.msk [vmem:[#allocation5] sm:$0xff] %vm958_vm4, %v1823_v53 }
 0x641   : > { %1820 = vst.msk [vmem:[#allocation5 + $0x18] sm:$0xff] %vm943_vm3, %v1818_v17 }
 0x643   : > { %v1837_v54 = vpop.permute.xlu1 %1836  ;;  %v1827_v55 = vpop.permute.xlu0 %1826 }
 0x644   : > { %1839 = vst.msk [vmem:[#allocation5] sm:$0xff] %vm973_vm5, %v1837_v54 }
 0x645   : > { %1829 = vst.msk [vmem:[#allocation5 + $0x8] sm:$0xff] %vm958_vm4, %v1827_v55 }
 0x647   : > { %v1841_v56 = vpop.permute.xlu1 %1840  ;;  %v1845_v57 = vpop.permute.xlu0 %1844 }
 0x648   : > { %1843 = vst.msk [vmem:[#allocation5 + $0x8] sm:$0xff] %vm973_vm5, %v1841_v56  ;;  %1847 = vst.msk [vmem:[#allocation5 + $0x10] sm:$0xff] %vm973_vm5, %v1845_v57 }
 0x64b   : > { %v1832_v58 = vpop.permute.xlu1 %1831  ;;  %v1849_v59 = vld [vmem:[#allocation5] sm:$0xff] }
 0x64c   : > { %1834 = vst.msk [vmem:[#allocation5 + $0x18] sm:$0xff] %vm958_vm4, %v1832_v58  ;;  %9073 = vmatprep.mubr.msk.f32.mxu1 %vm714_vm0, %v1849_v59  ;;  %v8634_v59 = vld [vmem:[%s11625_s11] ss:$0 sm:$0xff]  ;;  %vm3031_vm4 = vcmask 27648  }
 0x64d   : > { %1848 = vst.msk [vmem:[#allocation5 + $0x18] sm:$0xff] %vm973_vm5, %v1789_v19  ;;  %v9519_v19 = vpack.c.bf16 %v2143_v46, %v2142_v44 }
 0x64f   : > { %v1850_v60 = vld [vmem:[#allocation5 + $0x8] sm:$0xff]  ;;  %v1851_v61 = vld [vmem:[#allocation5 + $0x10] sm:$0xff] }
 0x650   : > { %9074 = vmatmul.mubr.msk.f32.vlgmr.msra.gmra.mrb[12].mxu1 %vm714_vm0, %v1850_v60 }
 0x651   : > { %9076 = vmatprep.mubr.msk.f32.mxu1 %vm714_vm0, %v1851_v61  ;;  %9518 = vmatpush3.bf16.msra.mxu1 %v9515_v45 }
 0x652   : > { %9520 = vmatprep.subr.bf16.mxu1 %v9519_v19 }
 0x654   : > { %v1852_v62 = vld [vmem:[#allocation5 + $0x18] sm:$0xff] }
 0x655   : > { %9077 = vmatmul.mubr.msk.f32.gmra.mrb[14].mxu1 %vm714_vm0, %v1852_v62  ;;  %v8635_v62 = vld [vmem:[%s11625_s11 + $0x1] ss:$0 sm:$0xff] }
 0x656   : > { %9522 = vmatpush3.bf16.msra.mxu1 %v9519_v19 }
 0x657   : > { %9117 = vmatprep.subr.mxu1 %v9814_v27 }
 0x723   : > { %v9075_v63 = vpop.f32.mrb[12].mxu1 }
 0x724   : > { %v1955_v4 = vadd.f32 %v9075_v63, %v9954_v2  ;;  %v1935_v6 = vpop.f32.mrb[13].mxu1 }
 0x725   : > { %v1954_v7 = vadd.f32 %v1935_v6, %v9950_v0 }
 0x726   : > { %v10277_v8 = vadd.f32 %v8633_v3, %v1955_v4 }
 0x727   : > { %v10279_v9 = vadd.f32 %v8633_v3, %v1954_v7 }
 0x728   : > { %v9078_v10 = vpop.f32.mrb[14].mxu1  ;;  %v1974_v11 = vsel %vm714_vm0, %v10277_v8, 0.0 }
 0x729   : > { %v1957_v12 = vadd.f32 %v9078_v10, %v9960_v5  ;;  %1975 = vadd.xlane.f32.xlu0 %v1974_v11  ;;  %v1945_v14 = vpop.f32.mrb[15].mxu1  ;;  %v1971_v15 = vsel %vm714_vm0, %v10279_v9, 0.0 }
 0x72a   : > { %v1956_v2 = vadd.f32 %v1945_v14, %v9952_v1  ;;  %1972 = vadd.xlane.f32.xlu1 %v1971_v15 }
 0x72b   : > { %v10287_v13 = vadd.f32 %v8633_v3, %v1957_v12 }
 0x72c   : > { %v10289_v0 = vadd.f32 %v8633_v3, %v1956_v2 }
 0x72d   : > { %v1980_v16 = vsel %vm714_vm0, %v10287_v13, 0.0 }
 0x72e   : > { %1981 = vadd.xlane.f32.xlu1 %v1980_v16  ;;  %v1977_v18 = vsel %vm714_vm0, %v10289_v0, 0.0 }
 0x72f   : > { %1978 = vadd.xlane.f32.xlu0 %v1977_v18 }
 0x7b6   : > { %v1976_v5 = vpop.xlane.xlu0 %1975 }
 0x7b7   : > { %v1984_v21 = vmul.f32 0.03125, %v1976_v5  ;;  %v1973_v22 = vpop.xlane.xlu1 %1972 }
 0x7b8   : > { %v1983_v24 = vmul.f32 0.03125, %v1973_v22  ;;  %v2040_v22 = vld [vmem:[%s11670_s1 + $0x8] sm:$0xff] }
 0x7b9   : > { %v1988_v26 = vsub.f32 %v10277_v8, %v1984_v21 }
 0x7ba   : > { %v1987_v1 = vsub.f32 %v10279_v9, %v1983_v24  ;;  %v2041_v24 = vld [vmem:[%s11670_s1 + $0x10] sm:$0xff] }
 0x7bb   : > { %v1982_v25 = vpop.xlane.xlu1 %1981  ;;  %v1992_v23 = vmul.f32 %v1988_v26, %v1988_v26 }
 0x7bc   : > { %v1986_v28 = vmul.f32 0.03125, %v1982_v25  ;;  %v1979_v29 = vpop.xlane.xlu0 %1978  ;;  %v1991_v30 = vmul.f32 %v1987_v1, %v1987_v1 }
 0x7bd   : > { %v1985_v31 = vmul.f32 0.03125, %v1979_v29  ;;  %v1998_v32 = vsel %vm714_vm0, %v1992_v23, 0.0  ;;  %v8640_v29 = vld [vmem:[%s11627_s13] ss:$0 sm:$0xff] }
 0x7be   : > { %v1990_v33 = vsub.f32 %v10287_v13, %v1986_v28  ;;  %1999 = vadd.xlane.f32.xlu1 %v1998_v32  ;;  %v1995_v35 = vsel %vm714_vm0, %v1991_v30, 0.0 }
 0x7bf   : > { %v1989_v36 = vsub.f32 %v10289_v0, %v1985_v31  ;;  %1996 = vadd.xlane.f32.xlu0 %v1995_v35 }
 0x7c0   : > { %v1994_v37 = vmul.f32 %v1990_v33, %v1990_v33 }
 0x7c1   : > { %v1993_v38 = vmul.f32 %v1989_v36, %v1989_v36 }
 0x7c2   : > { %v2004_v39 = vsel %vm714_vm0, %v1994_v37, 0.0 }
 0x7c3   : > { %2005 = vadd.xlane.f32.xlu1 %v2004_v39  ;;  %v2001_v40 = vsel %vm714_vm0, %v1993_v38, 0.0 }
 0x7c4   : > { %2002 = vadd.xlane.f32.xlu0 %v2001_v40 }
 0x84b   : > { %v2000_v47 = vpop.xlane.xlu1 %1999 }
 0x84c   : > { %v2008_v48 = vmul.f32 0.03125, %v2000_v47  ;;  %v1997_v49 = vpop.xlane.xlu0 %1996 }
 0x84d   : > { %v2007_v50 = vmul.f32 0.03125, %v1997_v49 }
 0x84e   : > { %v2012_v51 = vadd.f32 1e-12, %v2008_v48 }
 0x84f   : > { %v2011_v52 = vadd.f32 1e-12, %v2007_v50 }
 0x850   : > { %9618 = vrsqrt.f32 %v2012_v51  ;;  %v2006_v53 = vpop.xlane.xlu1 %2005 }
 0x851   : > { %9620 = vrsqrt.f32 %v2011_v52  ;;  %v2010_v17 = vmul.f32 0.03125, %v2006_v53  ;;  %v2003_v54 = vpop.xlane.xlu0 %2002 }
 0x852   : > { %v2009_v55 = vmul.f32 0.03125, %v2003_v54 }
 0x853   : > { %v2014_v56 = vadd.f32 1e-12, %v2010_v17 }
 0x854   : > { %v2013_v57 = vadd.f32 1e-12, %v2009_v55 }
 0x855   : > { %9622 = vrsqrt.f32 %v2014_v56 }
 0x856   : > { %9624 = vrsqrt.f32 %v2013_v57 }
 0x85a   : > { %v9619_v58 = vpop.eup %9618 }
 0x85b   : > { %v9621_v60 = vpop.eup %9620  ;;  %v2020_v61 = vmul.f32 %v9619_v58, %v1988_v26  ;;  %v2042_v26 = vld [vmem:[%s11670_s1 + $0x18] sm:$0xff] }
 0x85c   : > { %v2019_v63 = vmul.f32 %v9621_v60, %v1987_v1 }
 0x85d   : > { %v2028_v3 = vmul.f32 %v8634_v59, %v2020_v61  ;;  %v2353_v61 = vld [vmem:[%s10478_s4 + $0x2] sm:$0x1] }
 0x85e   : > { %v2027_v4 = vmul.f32 %v8634_v59, %v2019_v63  ;;  %vm2969_vm10 = vcmp.gt.f32.partialorder %v2353_v61, 0.5  ;;  %v2352_v63 = vld [vmem:[%s10478_s4 + $0x1] sm:$0x1] }
 0x85f   : > { %v9623_v6 = vpop.eup %9622  ;;  %v2036_v7 = vadd.f32 %v8635_v62, %v2028_v3  ;;  %v2977_v3 = vsel %vm2969_vm10, 1, %v9806_v34  ;;  %vm2968_vm12 = vcmp.gt.f32.partialorder %v2352_v63, 0.5 }
 0x860   : > { %v9625_v10 = vpop.eup %9624  ;;  %v2035_v11 = vadd.f32 %v8635_v62, %v2027_v4  ;;  %v2022_v12 = vmul.f32 %v9623_v6, %v1990_v33  ;;  %v2355_v6 = vld [vmem:[%s10478_s4 + $0x4] sm:$0x1] }
 0x861   : > { %v2021_v14 = vmul.f32 %v9625_v10, %v1989_v36  ;;  %v2354_v10 = vld [vmem:[%s10478_s4 + $0x3] sm:$0x1]  ;;  %vm2971_vm13 = vcmp.gt.f32.partialorder %v2355_v6, 0.5 }
 0x862   : > { %v9507_v15 = vpack.c.bf16 %v2036_v7, %v2035_v11  ;;  %v2030_v2 = vmul.f32 %v8634_v59, %v2022_v12  ;;  %v2994_v7 = vrot.slane %v2977_v3, %v10170_v20  ;;  %v2976_v12 = vsel %vm2968_vm12, 1, %v9806_v34 }
 0x863   : > { %v2029_v16 = vmul.f32 %v8634_v59, %v2021_v14  ;;  %v2357_v14 = vld [vmem:[%s10478_s4 + $0x6] sm:$0x1]  ;;  %vm2970_vm14 = vcmp.gt.f32.partialorder %v2354_v10, 0.5 }
 0x864   : > { %9508 = vmatprep.subr.bf16.mxu0 %v9507_v15  ;;  %v2038_v18 = vadd.f32 %v8635_v62, %v2030_v2  ;;  %vm10491_vm15 = vcmp.eq.s32.totalorder %v2994_v7, 1  ;;  %v2979_v2 = vsel %vm2971_vm13, 1, %v9806_v34  ;;  %vm2973_vm5 = vcmp.gt.f32.partialorder %v2357_v14, 0.5 }
 0x865   : > { %9510 = vmatpush3.bf16.msra.mxu0 %v9507_v15  ;;  %v2037_v5 = vadd.f32 %v8635_v62, %v2029_v16  ;;  %v2351_v62 = vld [vmem:[%s10478_s4] sm:$0x1]  ;;  %v2356_v16 = vld [vmem:[%s10478_s4 + $0x5] sm:$0x1] }
 0x866   : > { %vm2967_vm11 = vcmp.gt.f32.partialorder %v2351_v62, 0.5  ;;  %vm2972_vm6 = vcmp.gt.f32.partialorder %v2356_v16, 0.5 }
 0x867   : > { %v9511_v21 = vpack.c.bf16 %v2038_v18, %v2037_v5  ;;  %v2975_v4 = vsel %vm2967_vm11, 1, %v9806_v34  ;;  %v2990_v5 = vrot.slane %v2976_v12, %v10170_v20 }
 0x868   : > { %v2986_v11 = vrot.slane %v2975_v4, %v10170_v20 }
 0x869   : > { %9512 = vmatprep.subr.bf16.mxu0 %v9511_v21  ;;  %vm10518_vm7 = vcmp.eq.s32.totalorder %v2990_v5, 1 }
 0x86a   : > { %9514 = vmatpush3.bf16.msra.mxu0 %v9511_v21  ;;  %vm10497_vm3 = vcmp.eq.s32.totalorder %v2986_v11, 1 }
 0x86b   : > { %9107 = vmatprep.subr.mxu0 %v9814_v27 }
 0x86d   : > { %9088 = vmatmul.mubr.msk.f32.vlgmr.msra.gmra.mrb[8].mxu0 %vm714_vm0, %v2040_v22  ;;  %v2978_v22 = vsel %vm2970_vm14, 1, %v9806_v34 }
 0x86e   : > { %9090 = vmatprep.mubr.msk.f32.mxu0 %vm714_vm0, %v2041_v24 }
 0x871   : > { %9091 = vmatmul.mubr.msk.f32.gmra.mrb[10].mxu0 %vm714_vm0, %v2042_v26 }
 0x872   : > { %9109 = vmatprep.mubr.msk.f32.mxu0 %vm9818_vm2, %v9814_v27 }
 0x940   : > { %v9089_v1 = vpop.f32.mrb[8].mxu0 }
 0x941   : > { %v2121_v25 = vpop.f32.mrb[9].mxu0 }
 0x942   : > { %9101 = vmatprep.mubr.msk.f32.mxu1 %vm714_vm0, %v2121_v25  ;;  %v3002_v25 = vrot.slane %v2979_v2, %v10170_v20 }
 0x943   : > { %9102 = vmatmul.mubr.msk.f32.vlgmr.msra.gmra.mrb[16].mxu1 %vm714_vm0, %v9089_v1 }
 0x944   : > { %v9092_v23 = vpop.f32.mrb[10].mxu0  ;;  %vm10524_vm10 = vcmp.eq.s32.totalorder %v3002_v25, 1 }
 0x945   : > { %v2131_v28 = vpop.f32.mrb[11].mxu0 }
 0x946   : > { %9104 = vmatprep.mubr.msk.f32.mxu1 %vm714_vm0, %v2131_v28 }
 0x947   : > { %9105 = vmatmul.mubr.msk.f32.gmra.mrb[18].mxu1 %vm714_vm0, %v9092_v23 }
 0x948   : > { %9119 = vmatprep.mubr.msk.f32.mxu1 %vm9818_vm2, %v9814_v27 }
 0xa16   : > { %v9103_v30 = vpop.f32.mrb[16].mxu1 }
 0xa17   : > { %v10350_v31 = vadd.f32 %v9103_v30, %v8640_v29  ;;  %v2229_v32 = vpop.f32.mrb[17].mxu1  ;;  %v2981_v30 = vsel %vm2973_vm5, 1, %v9806_v34 }
 0xa18   : > { %v10352_v33 = vadd.f32 %v8640_v29, %v2229_v32  ;;  %v2358_v32 = vld [vmem:[%s10478_s4 + $0x7] sm:$0x1] }
 0xa19   : > { %v2249_v35 = vmul.f32 0.35355338, %v10350_v31  ;;  %2273 = vrot.lane.b32.xlu1 %v10350_v31, %s11671_s27  ;;  %vm2974_vm11 = vcmp.gt.f32.partialorder %v2358_v32, 0.5 }
 0xa1a   : > { %v2248_v36 = vmul.f32 0.35355338, %v10352_v33  ;;  %2255 = vrot.lane.b32.xlu0 %v10352_v33, %s11671_s27  ;;  %v9106_v37 = vpop.f32.mrb[18].mxu1  ;;  %v2982_v6 = vsel %vm2974_vm11, 1, %v9806_v34  ;;  %vm3730_vm11 = vcmask 60416  }
 0xa1b   : > { %2271 = vst.msk [vmem:[#allocation6 + $0x8] sm:$0xf] %vm2252_vm8, %v2249_v35  ;;  %v10362_v38 = vadd.f32 %v9106_v37, %v8640_v29  ;;  %v2239_v39 = vpop.f32.mrb[19].mxu1  ;;  %v2998_v37 = vrot.slane %v2978_v22, %v10170_v20 }
 0xa1c   : > { %2284 = vst.msk [vmem:[#allocation6 + $0x8] sm:$0xf0] %vm2264_vm9, %v2249_v35  ;;  %2265 = vst.msk [vmem:[#allocation6] sm:$0xf0] %vm2264_vm9, %v2248_v36  ;;  %v10366_v40 = vadd.f32 %v8640_v29, %v2239_v39  ;;  %v2980_v39 = vsel %vm2972_vm6, 1, %v9806_v34  ;;  %v3014_v34 = vrot.slane %v2982_v6, %v10170_v20  ;;  %vm3124_vm6 = vcmask 1043456  }
 0xa1d   : > { %2253 = vst.msk [vmem:[#allocation6] sm:$0xf] %vm2252_vm8, %v2248_v36  ;;  %v2251_v41 = vmul.f32 0.35355338, %v10362_v38  ;;  %vm10532_vm12 = vcmp.eq.s32.totalorder %v2998_v37, 1  ;;  %v3006_v3 = vrot.slane %v2980_v39, %v10170_v20 }
 0xa1e   : > { %v2250_v42 = vmul.f32 0.35355338, %v10366_v40  ;;  %2292 = vrot.lane.b32.xlu1 %v10366_v40, %s11671_s27  ;;  %2311 = vrot.lane.b32.xlu0 %v10362_v38, %s11671_s27  ;;  %vm10565_vm5 = vcmp.eq.s32.totalorder %v3014_v34, 1 }
 0xa1f   : > { %2309 = vst.msk [vmem:[#allocation6 + $0x18] sm:$0xf] %vm2252_vm8, %v2251_v41  ;;  %vm10551_vm14 = vcmp.eq.s32.totalorder %v3006_v3, 1 }
 0xa20   : > { %2322 = vst.msk [vmem:[#allocation6 + $0x18] sm:$0xf0] %vm2264_vm9, %v2251_v41  ;;  %2303 = vst.msk [vmem:[#allocation6 + $0x10] sm:$0xf0] %vm2264_vm9, %v2250_v42 }
 0xa21   : > { %2290 = vst.msk [vmem:[#allocation6 + $0x10] sm:$0xf] %vm2252_vm8, %v2250_v42 }
 0xa22   : > { %v10395_v48 = vld [vmem:[#allocation6 + $0x8] sm:$0xf] }
 0xa23   : > { %v10419_v53 = vld [vmem:[#allocation6 + $0x4] sm:$0xf]  ;;  %v10440_v56 = vld [vmem:[#allocation6 + $0xc] sm:$0xf] }
 0xa24   : > { %v10400_v49 = vld [vmem:[#allocation6] sm:$0xf] }
 0xa26   : > { %v10443_v57 = vld [vmem:[#allocation6 + $0x18] sm:$0xf] }
 0xa27   : > { %v10459_v59 = vld [vmem:[#allocation6 + $0x14] sm:$0xf]  ;;  %v10468_v60 = vld [vmem:[#allocation6 + $0x1c] sm:$0xf] }
 0xa28   : > { %v10421_v17 = vld [vmem:[#allocation6 + $0x10] sm:$0xf] }
 0xa8b   : > { %v2274_v43 = vpop.permute.xlu1 %2273 }
 0xa8c   : > { %2277 = vst.msk [vmem:[#allocation7 + $0x8] sm:$0xf] %vm2252_vm8, %v2274_v43  ;;  %v2256_v44 = vpop.permute.xlu0 %2255 }
 0xa8d   : > { %2286 = vst.msk [vmem:[#allocation7 + $0x8] sm:$0xf0] %vm2264_vm9, %v2274_v43  ;;  %2267 = vst.msk [vmem:[#allocation7] sm:$0xf0] %vm2264_vm9, %v2256_v44 }
 0xa8e   : > { %2258 = vst.msk [vmem:[#allocation7] sm:$0xf] %vm2252_vm8, %v2256_v44  ;;  %v3010_v44 = vrot.slane %v2981_v30, %v10170_v20 }
 0xa90   : > { %v2293_v45 = vpop.permute.xlu1 %2292  ;;  %v2312_v46 = vpop.permute.xlu0 %2311  ;;  %vm10542_vm13 = vcmp.eq.s32.totalorder %v3010_v44, 1 }
 0xa91   : > { %2296 = vst.msk [vmem:[#allocation7 + $0x10] sm:$0xf] %vm2252_vm8, %v2293_v45  ;;  %2315 = vst.msk [vmem:[#allocation7 + $0x18] sm:$0xf] %vm2252_vm8, %v2312_v46 }
 0xa92   : > { %2305 = vst.msk [vmem:[#allocation7 + $0x10] sm:$0xf0] %vm2264_vm9, %v2293_v45  ;;  %2324 = vst.msk [vmem:[#allocation7 + $0x18] sm:$0xf0] %vm2264_vm9, %v2312_v46 }
 0xa93   : > { %v10386_v19 = vld [vmem:[#allocation7 + $0x8] sm:$0xf] }
 0xa94   : > { %9118 = vmatpush3.xpose.msk.msra.mxu1 %vm928_vm1, %v10386_v19  ;;  %v10404_v50 = vld [vmem:[#allocation7 + $0x4] sm:$0xf]  ;;  %v10428_v54 = vld [vmem:[#allocation7 + $0xc] sm:$0xf] }
 0xa95   : > { %v10390_v47 = vld [vmem:[#allocation7] sm:$0xf]  ;;  %9127 = vmatprep.subr.mxu1 %v9814_v27 }
 0xa96   : > { %9108 = vmatpush3.xpose.msk.msra.mxu0 %vm928_vm1, %v10390_v47 }
 0xa97   : > { %9112 = vmatprep.subr.mxu0 %v9814_v27  ;;  %9120 = vmatmul.mubr.msk.f32.vlgmr.msra.gmra.mrb[20].mxu1 %vm928_vm1, %v10395_v48 }
 0xa98   : > { %v10406_v51 = vld [vmem:[#allocation7 + $0x10] sm:$0xf]  ;;  %9129 = vmatprep.mubr.msk.f32.mxu1 %vm9818_vm2, %v9814_v27  ;;  %v10417_v52 = vld [vmem:[#allocation7 + $0x18] sm:$0xf] }
 0xa99   : > { %9110 = vmatmul.mubr.msk.f32.vlgmr.msra.gmra.mrb[12].mxu0 %vm928_vm1, %v10400_v49  ;;  %9128 = vmatpush3.xpose.msk.msra.mxu1 %vm928_vm1, %v10406_v51  ;;  %v10438_v55 = vld [vmem:[#allocation7 + $0x14] sm:$0xf]  ;;  %v10455_v58 = vld [vmem:[#allocation7 + $0x1c] sm:$0xf] }
 0xa9a   : > { %9113 = vmatpush3.xpose.msk.msra.mxu0 %vm928_vm1, %v10404_v50  ;;  %9114 = vmatprep.mubr.msk.f32.mxu0 %vm9818_vm2, %v9814_v27 }
 0xa9b   : > { %9122 = vmatprep.subr.mxu0 %v9814_v27  ;;  %9137 = vmatprep.subr.mxu1 %v9814_v27 }
 0xa9c   : > { %9130 = vmatmul.mubr.msk.f32.vlgmr.msra.gmra.mrb[22].mxu1 %vm928_vm1, %v10421_v17 }
 0xa9d   : > { %9115 = vmatmul.mubr.msk.f32.vlgmr.msra.gmra.mrb[14].mxu0 %vm928_vm1, %v10419_v53  ;;  %9138 = vmatpush3.xpose.msk.msra.mxu1 %vm928_vm1, %v10417_v52 }
 0xa9e   : > { %9123 = vmatpush3.xpose.msk.msra.mxu0 %vm928_vm1, %v10428_v54  ;;  %9124 = vmatprep.mubr.msk.f32.mxu0 %vm9818_vm2, %v9814_v27 }
 0xa9f   : > { %9139 = vmatprep.mubr.msk.f32.mxu1 %vm9818_vm2, %v9814_v27  ;;  %9132 = vmatprep.subr.mxu0 %v9814_v27 }
 0xaa0   : > { %9147 = vmatprep.subr.mxu1 %v9814_v27  ;;  %9140 = vmatmul.mubr.msk.f32.vlgmr.msra.gmra.mrb[24].mxu1 %vm928_vm1, %v10443_v57 }
 0xaa1   : > { %9125 = vmatmul.mubr.msk.f32.vlgmr.msra.gmra.mrb[16].mxu0 %vm928_vm1, %v10440_v56  ;;  %9149 = vmatprep.mubr.msk.f32.mxu1 %vm9818_vm2, %v9814_v27 }
 0xaa2   : > { %9133 = vmatpush3.xpose.msk.msra.mxu0 %vm928_vm1, %v10438_v55  ;;  %9134 = vmatprep.mubr.msk.f32.mxu0 %vm9818_vm2, %v9814_v27 }
 0xaa3   : > { %9142 = vmatprep.subr.mxu0 %v9814_v27 }
 0xaa5   : > { %9135 = vmatmul.mubr.msk.f32.vlgmr.msra.gmra.mrb[18].mxu0 %vm928_vm1, %v10459_v59 }
 0xaa6   : > { %9143 = vmatpush3.xpose.msk.msra.mxu0 %vm928_vm1, %v10455_v58  ;;  %9144 = vmatprep.mubr.msk.f32.mxu0 %vm9818_vm2, %v9814_v27 }
 0xaa7   : > { %9152 = vmatprep.subr.mxu0 %v9814_v27 }
 0xaa9   : > { %9145 = vmatmul.mubr.msk.f32.vlgmr.msra.gmra.mrb[20].mxu0 %vm928_vm1, %v10468_v60 }
 0xaaa   : > { %9154 = vmatprep.mubr.msk.f32.mxu0 %vm9818_vm2, %v9814_v27 }
 0xb6a   : > { %v2583_v21 = vpop.f32.mrb[20].mxu1 }
 0xb6b   : > { %v10505_v24 = vsel %vm10491_vm15, -10000.0, %v2583_v21  ;;  %v9121_v1 = vpop.f32.mrb[21].mxu1 }
 0xb6c   : > { %v2431_v26 = vpop.f32.mrb[12].mxu0  ;;  %v3038_v29 = vsel %vm3031_vm4, %v10505_v24, -inf }
 0xb6d   : > { %v10510_v23 = vsel %vm10497_vm3, -10000.0, %v2431_v26  ;;  %v9111_v28 = vpop.f32.mrb[13].mxu0  ;;  %3039 = vmax.xlane.f32.xlu0 %v3038_v29 }
 0xb6e   : > { %v3032_v35 = vsel %vm3031_vm4, %v10510_v23, -inf }
 0xb6f   : > { %3033 = vmax.xlane.f32.xlu1 %v3032_v35  ;;  %v2735_v42 = vpop.f32.mrb[22].mxu1 }
 0xb70   : > { %v2507_v41 = vpop.f32.mrb[14].mxu0  ;;  %v9131_v61 = vpop.f32.mrb[23].mxu1  ;;  %v10539_v4 = vsel %vm10524_vm10, -10000.0, %v2735_v42 }
 0xb71   : > { %v3024_v45 = vsel %vm10518_vm7, -10000.0, %v2507_v41  ;;  %v9116_v46 = vpop.f32.mrb[15].mxu0  ;;  %v3044_v5 = vsel %vm3031_vm4, %v10539_v4, -inf }
 0xb72   : > { %v3035_v62 = vsel %vm3031_vm4, %v3024_v45, -inf }
 0xb73   : > { %3036 = vmax.xlane.f32.xlu0 %v3035_v62  ;;  %v2887_v10 = vpop.f32.mrb[24].mxu1 }
 0xb74   : > { %v2659_v7 = vpop.f32.mrb[16].mxu0  ;;  %v9141_v2 = vpop.f32.mrb[25].mxu1  ;;  %v10558_v22 = vsel %vm10542_vm13, -10000.0, %v2887_v10 }
 0xb75   : > { %v3026_v12 = vsel %vm10532_vm12, -10000.0, %v2659_v7  ;;  %v9126_v14 = vpop.f32.mrb[17].mxu0  ;;  %v3050_v29 = vsel %vm3031_vm4, %v10558_v22, -inf }
 0xb76   : > { %v3041_v16 = vsel %vm3031_vm4, %v3026_v12, -inf }
 0xb77   : > { %3042 = vmax.xlane.f32.xlu1 %v3041_v16  ;;  %3045 = vmax.xlane.f32.xlu0 %v3044_v5 }
 0xb78   : > { %v2811_v26 = vpop.f32.mrb[18].mxu0 }
 0xb79   : > { %v3028_v1 = vsel %vm10551_vm14, -10000.0, %v2811_v26  ;;  %v9136_v25 = vpop.f32.mrb[19].mxu0 }
 0xb7a   : > { %v3047_v28 = vsel %vm3031_vm4, %v3028_v1, -inf }
 0xb7b   : > { %3048 = vmax.xlane.f32.xlu1 %v3047_v28  ;;  %3051 = vmax.xlane.f32.xlu0 %v3050_v29 }
 0xb7c   : > { %v2963_v20 = vpop.f32.mrb[20].mxu0 }
 0xb7d   : > { %v3030_v32 = vsel %vm10565_vm5, -10000.0, %v2963_v20  ;;  %v9146_v35 = vpop.f32.mrb[21].mxu0 }
 0xb7e   : > { %v3053_v37 = vsel %vm3031_vm4, %v3030_v32, -inf }
 0xb7f   : > { %3054 = vmax.xlane.f32.xlu1 %v3053_v37 }
 0xb90   : > { %2278 = vrot.lane.b32.xlu1 %v10350_v31, %s11689_s25 }
 0xb91   : > { %2259 = vrot.lane.b32.xlu0 %v10352_v33, %s11689_s25 }
 0xb94   : > { %2297 = vrot.lane.b32.xlu1 %v10366_v40, %s11689_s25 }
 0xb95   : > { %2316 = vrot.lane.b32.xlu0 %v10362_v38, %s11689_s25  ;;  %s11693_s25 = sld [smem:[#allocation16_spill]] }
 0xb98   : > { %3741 = vrot.lane.b32.xlu1 %v10390_v47, %s11690_s24 }
 0xb99   : > { %3819 = vrot.lane.b32.xlu0 %v10404_v50, %s11690_s24 }
 0xb9c   : > { %3739 = vrot.lane.b32.xlu1 %v10400_v49, %s11690_s24 }
 0xb9d   : > { %3817 = vrot.lane.b32.xlu0 %v10419_v53, %s11690_s24 }
 0xba0   : > { %3897 = vrot.lane.b32.xlu1 %v10386_v19, %s11690_s24 }
 0xba4   : > { %3895 = vrot.lane.b32.xlu1 %v10395_v48, %s11690_s24 }
 0xbfa   : > { %v3040_v31 = vpop.xlane.xlu0 %3039 }
 0xbfb   : > { %v3058_v33 = vsub.f32 %v10505_v24, %v3040_v31 }
 0xbfc   : > { %v3034_v38 = vpop.xlane.xlu1 %3033 }
 0xbfd   : > { %v3056_v40 = vsub.f32 %v10510_v23, %v3034_v38  ;;  %v3068_v39 = vmul.f32 1.442695, %v3058_v33 }
 0xbff   : > { %v3064_v41 = vmul.f32 1.442695, %v3056_v40  ;;  %9626 = vpow2.f32 %v3068_v39 }
 0xc00   : > { %v3037_v42 = vpop.xlane.xlu0 %3036 }
 0xc01   : > { %v3057_v44 = vsub.f32 %v3024_v45, %v3037_v42  ;;  %9628 = vpow2.f32 %v3064_v41 }
 0xc03   : > { %v3066_v46 = vmul.f32 1.442695, %v3057_v44 }
 0xc04   : > { %v3043_v61 = vpop.xlane.xlu1 %3042  ;;  %v3046_v62 = vpop.xlane.xlu0 %3045 }
 0xc05   : > { %9630 = vpow2.f32 %v3066_v46  ;;  %v3059_v3 = vsub.f32 %v3026_v12, %v3043_v61  ;;  %v3060_v41 = vsub.f32 %v10539_v4, %v3046_v62 }
 0xc07   : > { %v3070_v6 = vmul.f32 1.442695, %v3059_v3  ;;  %v3072_v42 = vmul.f32 1.442695, %v3060_v41 }
 0xc08   : > { %v3049_v7 = vpop.xlane.xlu1 %3048  ;;  %v3052_v10 = vpop.xlane.xlu0 %3051 }
 0xc09   : > { %9632 = vpow2.f32 %v3070_v6  ;;  %v3061_v14 = vsub.f32 %v3028_v1, %v3049_v7  ;;  %v10594_v24 = vpop.eup %9626  ;;  %v3062_v44 = vsub.f32 %v10558_v22, %v3052_v10 }
 0xc0a   : > { %v3086_v23 = vsel %vm3031_vm4, %v10594_v24, 0.0 }
 0xc0b   : > { %v3074_v2 = vmul.f32 1.442695, %v3061_v14  ;;  %v10598_v16 = vpop.eup %9628  ;;  %3087 = vadd.xlane.f32.xlu0 %v3086_v23  ;;  %v3076_v46 = vmul.f32 1.442695, %v3062_v44 }
 0xc0c   : > { %v3055_v45 = vpop.xlane.xlu1 %3054  ;;  %v2260_v5 = vpop.permute.xlu0 %2259  ;;  %v3080_v1 = vsel %vm3031_vm4, %v10598_v16, 0.0 }
 0xc0d   : > { %9634 = vpow2.f32 %v3074_v2  ;;  %v3063_v34 = vsub.f32 %v3030_v32, %v3055_v45  ;;  %2262 = vst.msk [vmem:[#allocation8] sm:$0xf] %vm2252_vm8, %v2260_v5 }
 0xc0e   : > { %2269 = vst.msk [vmem:[#allocation8] sm:$0xf0] %vm2264_vm9, %v2260_v5 }
 0xc0f   : > { %v10602_v12 = vpop.eup %9630  ;;  %v3078_v26 = vmul.f32 1.442695, %v3063_v34  ;;  %3081 = vadd.xlane.f32.xlu0 %v3080_v1 }
 0xc10   : > { %v2279_v25 = vpop.permute.xlu1 %2278  ;;  %v2317_v28 = vpop.permute.xlu0 %2316  ;;  %v3083_v29 = vsel %vm3031_vm4, %v10602_v12, 0.0 }
 0xc11   : > { %9636 = vpow2.f32 %v3078_v26  ;;  %2282 = vst.msk [vmem:[#allocation8 + $0x8] sm:$0xf] %vm2252_vm8, %v2279_v25  ;;  %2320 = vst.msk [vmem:[#allocation8 + $0x18] sm:$0xf] %vm2252_vm8, %v2317_v28  ;;  %3084 = vadd.xlane.f32.xlu1 %v3083_v29 }
 0xc12   : > { %2288 = vst.msk [vmem:[#allocation8 + $0x8] sm:$0xf0] %vm2264_vm9, %v2279_v25  ;;  %2326 = vst.msk [vmem:[#allocation8 + $0x18] sm:$0xf0] %vm2264_vm9, %v2317_v28  ;;  %9638 = vpow2.f32 %v3072_v42 }
 0xc13   : > { %v10612_v20 = vpop.eup %9632  ;;  %9640 = vpow2.f32 %v3076_v46 }
 0xc14   : > { %v2298_v32 = vpop.permute.xlu1 %2297  ;;  %v3089_v35 = vsel %vm3031_vm4, %v10612_v20, 0.0  ;;  %v10616_v37 = vld [vmem:[#allocation8] sm:$0xf]  ;;  %v3820_v7 = vpop.permute.xlu0 %3819 }
 0xc15   : > { %v10618_v31 = vld [vmem:[#allocation8 + $0x4] sm:$0xf]  ;;  %2301 = vst.msk [vmem:[#allocation8 + $0x10] sm:$0xf] %vm2252_vm8, %v2298_v32  ;;  %3090 = vadd.xlane.f32.xlu1 %v3089_v35  ;;  %9148 = vmatpush3.msk.msra.mxu1 %vm3124_vm6, %v10616_v37 }
 0xc16   : > { %2307 = vst.msk [vmem:[#allocation8 + $0x10] sm:$0xf0] %vm2264_vm9, %v2298_v32  ;;  %9153 = vmatpush3.msk.msra.mxu0 %vm3124_vm6, %v10618_v31  ;;  %9157 = vmatprep.subr.mxu1 %v9814_v27  ;;  %vm3120_vm9 = vcmask 31744  }
 0xc17   : > { %v10627_v33 = vpop.eup %9634  ;;  %9162 = vmatprep.subr.mxu0 %v9814_v27 }
 0xc18   : > { %v3095_v38 = vsel %vm3031_vm4, %v10627_v33, 0.0  ;;  %v10666_v3 = vpop.permute.xlu1 %3741  ;;  %v3818_v14 = vpop.permute.xlu0 %3817 }
 0xc19   : > { %3096 = vadd.xlane.f32.xlu1 %v3095_v38  ;;  %v10677_v38 = vld [vmem:[#allocation8 + $0x8] sm:$0xf]  ;;  %v10712_v46 = vld [vmem:[#allocation8 + $0x1c] sm:$0xf]  ;;  %v9794_v11 = vld [vmem:[#allocation8 + $0xc] sm:$0xf] }
 0xc1b   : > { %v10632_v40 = vpop.eup %9636 }
 0xc1c   : > { %v3101_v39 = vsel %vm3031_vm4, %v10632_v40, 0.0  ;;  %v10648_v61 = vpop.eup %9638  ;;  %v10668_v6 = vpop.permute.xlu1 %3739  ;;  %v10694_v42 = vld [vmem:[#allocation8 + $0x10] sm:$0xf] }
 0xc1d   : > { %3102 = vadd.xlane.f32.xlu1 %v3101_v39  ;;  %v3092_v4 = vsel %vm3031_vm4, %v10648_v61, 0.0  ;;  %v10652_v62 = vpop.eup %9640  ;;  %v10682_v39 = vld [vmem:[#allocation8 + $0xc] sm:$0xf]  ;;  %v10700_v44 = vld [vmem:[#allocation8 + $0x14] sm:$0xf] }
 0xc1e   : > { %v3098_v22 = vsel %vm3031_vm4, %v10652_v62, 0.0  ;;  %v9793_v30 = vld [vmem:[#allocation8 + $0x10] sm:$0xf] }
 0xc20   : > { %v10670_v10 = vpop.permute.xlu1 %3897 }
 0xc24   : > { %v10672_v23 = vpop.permute.xlu1 %3895 }
 0xc25   : > { %3975 = vrot.lane.b32.xlu0 %v10428_v54, %s11690_s24 }
 0xc2e   : > { %4053 = vrot.lane.b32.xlu1 %v10406_v51, %s11690_s24 }
 0xc32   : > { %4051 = vrot.lane.b32.xlu1 %v10421_v17, %s11690_s24 }
 0xc36   : > { %4209 = vrot.lane.b32.xlu1 %v10417_v52, %s11690_s24 }
 0xc3a   : > { %4207 = vrot.lane.b32.xlu1 %v10443_v57, %s11690_s24 }
 0xc44   : > { %3093 = vadd.xlane.f32.xlu0 %v3092_v4 }
 0xc48   : > { %3099 = vadd.xlane.f32.xlu0 %v3098_v22 }
 0xc5e   : > { %3973 = vrot.lane.b32.xlu0 %v10440_v56, %s11690_s24 }
 0xc62   : > { %4131 = vrot.lane.b32.xlu0 %v10438_v55, %s11690_s24 }
 0xc66   : > { %4129 = vrot.lane.b32.xlu0 %v10459_v59, %s11690_s24 }
 0xc6a   : > { %4287 = vrot.lane.b32.xlu0 %v10455_v58, %s11690_s24 }
 0xc6e   : > { %4285 = vrot.lane.b32.xlu0 %v10468_v60, %s11690_s24 }
 0xc98   : > { %v3088_v2 = vpop.xlane.xlu0 %3087 }
 0xc9c   : > { %v3082_v45 = vpop.xlane.xlu0 %3081 }
 0xc9d   : > { %9642 = vrcp.f32 %v3082_v45 }
 0xc9e   : > { %v3085_v5 = vpop.xlane.xlu1 %3084 }
 0xc9f   : > { %9644 = vrcp.f32 %v3085_v5 }
 0xca0   : > { %9646 = vrcp.f32 %v3088_v2 }
 0xca2   : > { %v3091_v34 = vpop.xlane.xlu1 %3090 }
 0xca3   : > { %9648 = vrcp.f32 %v3091_v34  ;;  %v10736_v34 = vld [vmem:[#allocation8 + $0x18] sm:$0xf] }
 0xca6   : > { %v3097_v26 = vpop.xlane.xlu1 %3096 }
 0xca7   : > { %9650 = vrcp.f32 %v3097_v26  ;;  %v9643_v1 = vpop.eup %9642 }
 0xca8   : > { %v3112_v28 = vmul.f32 %v9643_v1, %v10598_v16 }
 0xca9   : > { %v9645_v25 = vpop.eup %9644 }
 0xcaa   : > { %v9647_v29 = vpop.eup %9646  ;;  %v3103_v32 = vpop.xlane.xlu1 %3102  ;;  %v3113_v35 = vmul.f32 %v9645_v25, %v10602_v12  ;;  %9150 = vmatmul.mubr.msk.f32.vlgmr.msra.gmra.mrb[26].mxu1 %vm3120_vm9, %v3112_v28 }
 0xcab   : > { %9652 = vrcp.f32 %v3103_v32  ;;  %9158 = vmatpush3.msk.msra.mxu1 %vm3124_vm6, %v10677_v38  ;;  %9159 = vmatprep.mubr.msk.f32.mxu1 %vm9818_vm2, %v9814_v27  ;;  %v3114_v16 = vmul.f32 %v9647_v29, %v10594_v24 }
 0xcac   : > { %9155 = vmatmul.mubr.msk.f32.vlgmr.msra.gmra.mrb[22].mxu0 %vm3120_vm9, %v3113_v35  ;;  %9167 = vmatprep.subr.mxu1 %v9814_v27 }
 0xcad   : > { %v9649_v41 = vpop.eup %9648  ;;  %9163 = vmatpush3.msk.msra.mxu0 %vm3124_vm6, %v10682_v39  ;;  %9164 = vmatprep.mubr.msk.f32.mxu0 %vm9818_vm2, %v9814_v27 }
 0xcae   : > { %v3115_v12 = vmul.f32 %v9649_v41, %v10612_v20  ;;  %9160 = vmatmul.mubr.msk.f32.vlgmr.msra.gmra.mrb[28].mxu1 %vm3120_vm9, %v3114_v16  ;;  %9172 = vmatprep.subr.mxu0 %v9814_v27 }
 0xcaf   : > { %9168 = vmatpush3.msk.msra.mxu1 %vm3124_vm6, %v10694_v42  ;;  %9169 = vmatprep.mubr.msk.f32.mxu1 %vm9818_vm2, %v9814_v27 }
 0xcb0   : > { %9165 = vmatmul.mubr.msk.f32.vlgmr.msra.gmra.mrb[24].mxu0 %vm3120_vm9, %v3115_v12  ;;  %9177 = vmatprep.subr.mxu1 %v9814_v27 }
 0xcb1   : > { %v9651_v24 = vpop.eup %9650  ;;  %9173 = vmatpush3.msk.msra.mxu0 %vm3124_vm6, %v10700_v44  ;;  %9174 = vmatprep.mubr.msk.f32.mxu0 %vm9818_vm2, %v9814_v27 }
 0xcb2   : > { %9182 = vmatprep.subr.mxu0 %v9814_v27  ;;  %v3117_v20 = vmul.f32 %v9651_v24, %v10627_v33  ;;  %v3976_v33 = vpop.permute.xlu0 %3975 }
 0xcb4   : > { %9175 = vmatmul.mubr.msk.f32.vlgmr.msra.gmra.mrb[26].mxu0 %vm3120_vm9, %v3117_v20 }
 0xcb5   : > { %v9653_v4 = vpop.eup %9652  ;;  %9183 = vmatpush3.msk.msra.mxu0 %vm3124_vm6, %v10712_v46  ;;  %9184 = vmatprep.mubr.msk.f32.mxu0 %vm9818_vm2, %v9814_v27 }
 0xcb6   : > { %v3119_v22 = vmul.f32 %v9653_v4, %v10632_v40  ;;  %9192 = vmatprep.subr.mxu0 %v9814_v27 }
 0xcb8   : > { %9185 = vmatmul.mubr.msk.f32.vlgmr.msra.gmra.mrb[28].mxu0 %vm3120_vm9, %v3119_v22 }
 0xcb9   : > { %9194 = vmatprep.mubr.msk.f32.mxu0 %vm9818_vm2, %v9814_v27 }
 0xcbc   : > { %9193 = vmatpush3.xpose.msk.msra.mxu0 %vm928_vm1, %v3820_v7 }
 0xcbd   : > { %9202 = vmatprep.subr.mxu0 %v9814_v27 }
 0xcbf   : > { %9195 = vmatmul.mubr.msk.f32.vlgmr.msra.gmra.mrb[30].mxu0 %vm928_vm1, %v3818_v14 }
 0xcc0   : > { %9203 = vmatpush3.xpose.msk.msra.mxu0 %vm928_vm1, %v3976_v33  ;;  %9204 = vmatprep.mubr.msk.f32.mxu0 %vm9818_vm2, %v9814_v27 }
 0xcc1   : > { %9212 = vmatprep.subr.mxu0 %v9814_v27 }
 0xcd1   : > { %v3094_v40 = vpop.xlane.xlu0 %3093 }
 0xcd2   : > { %9654 = vrcp.f32 %v3094_v40 }
 0xcd5   : > { %v3100_v2 = vpop.xlane.xlu0 %3099 }
 0xcd6   : > { %9656 = vrcp.f32 %v3100_v2 }
 0xcd9   : > { %v3974_v45 = vpop.permute.xlu0 %3973 }
 0xcda   : > { %9205 = vmatmul.mubr.msk.f32.vlgmr.msra.gmra.mrb[32].mxu0 %vm928_vm1, %v3974_v45 }
 0xcdb   : > { %9214 = vmatprep.mubr.msk.f32.mxu0 %vm9818_vm2, %v9814_v27 }
 0xcdc   : > { %v9655_v7 = vpop.eup %9654 }
 0xcdd   : > { %v4132_v5 = vpop.permute.xlu0 %4131  ;;  %v3116_v14 = vmul.f32 %v9655_v7, %v10648_v61  ;;  %v4054_v61 = vpop.permute.xlu1 %4053 }
 0xcde   : > { %9213 = vmatpush3.xpose.msk.msra.mxu0 %vm928_vm1, %v4132_v5 }
 0xcdf   : > { %9170 = vmatmul.mubr.msk.f32.vlgmr.msra.gmra.mrb[30].mxu1 %vm3120_vm9, %v3116_v14  ;;  %9222 = vmatprep.subr.mxu0 %v9814_v27 }
 0xce0   : > { %v9657_v26 = vpop.eup %9656  ;;  %9178 = vmatpush3.msk.msra.mxu1 %vm3124_vm6, %v10736_v34  ;;  %9179 = vmatprep.mubr.msk.f32.mxu1 %vm9818_vm2, %v9814_v27 }
 0xce1   : > { %v4130_v1 = vpop.permute.xlu0 %4129  ;;  %v3118_v25 = vmul.f32 %v9657_v26, %v10652_v62  ;;  %9187 = vmatprep.subr.mxu1 %v9814_v27  ;;  %v4052_v62 = vpop.permute.xlu1 %4051 }
 0xce2   : > { %9215 = vmatmul.mubr.msk.f32.vlgmr.msra.gmra.mrb[34].mxu0 %vm928_vm1, %v4130_v1 }
 0xce3   : > { %9180 = vmatmul.mubr.msk.f32.vlgmr.msra.gmra.mrb[32].mxu1 %vm3120_vm9, %v3118_v25  ;;  %9224 = vmatprep.mubr.msk.f32.mxu0 %vm9818_vm2, %v9814_v27 }
 0xce4   : > { %9189 = vmatprep.mubr.msk.f32.mxu1 %vm9818_vm2, %v9814_v27 }
 0xce5   : > { %v4288_v28 = vpop.permute.xlu0 %4287 }
 0xce6   : > { %9223 = vmatpush3.xpose.msk.msra.mxu0 %vm928_vm1, %v4288_v28 }
 0xce7   : > { %9188 = vmatpush3.xpose.msk.msra.mxu1 %vm928_vm1, %v10666_v3  ;;  %9232 = vmatprep.subr.mxu0 %v9814_v27  ;;  %v4210_v3 = vpop.permute.xlu1 %4209 }
 0xce8   : > { %9197 = vmatprep.subr.mxu1 %v9814_v27 }
 0xce9   : > { %v4286_v29 = vpop.permute.xlu0 %4285 }
 0xcea   : > { %9190 = vmatmul.mubr.msk.f32.vlgmr.msra.gmra.mrb[34].mxu1 %vm928_vm1, %v10668_v6  ;;  %9225 = vmatmul.mubr.msk.f32.vlgmr.msra.gmra.mrb[36].mxu0 %vm928_vm1, %v4286_v29 }
 0xceb   : > { %9198 = vmatpush3.xpose.msk.msra.mxu1 %vm928_vm1, %v10670_v10  ;;  %9199 = vmatprep.mubr.msk.f32.mxu1 %vm9818_vm2, %v9814_v27  ;;  %v4208_v6 = vpop.permute.xlu1 %4207 }
 0xcec   : > { %9207 = vmatprep.subr.mxu1 %v9814_v27  ;;  %9234 = vmatprep.mubr.msk.f32.mxu0 %vm9818_vm2, %v9814_v27 }
 0xcee   : > { %9200 = vmatmul.mubr.msk.f32.vlgmr.msra.gmra.mrb[36].mxu1 %vm928_vm1, %v10672_v23 }
 0xcef   : > { %9208 = vmatpush3.xpose.msk.msra.mxu1 %vm928_vm1, %v4054_v61  ;;  %9209 = vmatprep.mubr.msk.f32.mxu1 %vm9818_vm2, %v9814_v27 }
 0xcf0   : > { %9217 = vmatprep.subr.mxu1 %v9814_v27 }
 0xcf2   : > { %9210 = vmatmul.mubr.msk.f32.vlgmr.msra.gmra.mrb[38].mxu1 %vm928_vm1, %v4052_v62 }
 0xcf3   : > { %9218 = vmatpush3.xpose.msk.msra.mxu1 %vm928_vm1, %v4210_v3  ;;  %9219 = vmatprep.mubr.msk.f32.mxu1 %vm9818_vm2, %v9814_v27 }
 0xcf4   : > { %9227 = vmatprep.subr.mxu1 %v9814_v27 }
 0xcf6   : > { %9220 = vmatmul.mubr.msk.f32.vlgmr.msra.gmra.mrb[40].mxu1 %vm928_vm1, %v4208_v6 }
 0xcf7   : > { %9229 = vmatprep.mubr.msk.f32.mxu1 %vm9818_vm2, %v9814_v27 }
 0xd7d   : > { %v3194_v10 = vpop.f32.mrb[26].mxu1 }
 0xd7e   : > { %3731 = vst.msk [vmem:[#allocation9] sm:$0xf] %vm3730_vm11, %v3194_v10  ;;  %v9151_v23 = vpop.f32.mrb[27].mxu1 }
 0xd7f   : > { %v3270_v32 = vpop.f32.mrb[22].mxu0 }
 0xd80   : > { %3732 = vst.msk [vmem:[#allocation9 + $0x4] sm:$0xf] %vm3730_vm11, %v3270_v32  ;;  %v9156_v35 = vpop.f32.mrb[23].mxu0 }
 0xd81   : > { %v3346_v41 = vpop.f32.mrb[28].mxu1 }
 0xd82   : > { %3733 = vst.msk [vmem:[#allocation9 + $0x8] sm:$0xf] %vm3730_vm11, %v3346_v41  ;;  %v9161_v16 = vpop.f32.mrb[29].mxu1 }
 0xd83   : > { %v3422_v12 = vpop.f32.mrb[24].mxu0 }
 0xd84   : > { %3734 = vst.msk [vmem:[#allocation9 + $0xc] sm:$0xf] %vm3730_vm11, %v3422_v12  ;;  %v9166_v24 = vpop.f32.mrb[25].mxu0 }
 0xd87   : > { %v3574_v20 = vpop.f32.mrb[26].mxu0 }
 0xd88   : > { %3736 = vst.msk [vmem:[#allocation9 + $0x14] sm:$0xf] %vm3730_vm11, %v3574_v20  ;;  %v9176_v4 = vpop.f32.mrb[27].mxu0 }
 0xd8b   : > { %v3726_v22 = vpop.f32.mrb[28].mxu0 }
 0xd8c   : > { %3738 = vst.msk [vmem:[#allocation9 + $0x1c] sm:$0xf] %vm3730_vm11, %v3726_v22  ;;  %v9186_v33 = vpop.f32.mrb[29].mxu0 }
 0xd92   : > { %v3891_v40 = vpop.f32.mrb[30].mxu0 }
 0xd93   : > { %v4364_v2 = vsel %vm10518_vm7, -10000.0, %v3891_v40  ;;  %v9196_v45 = vpop.f32.mrb[31].mxu0 }
 0xd94   : > { %v4374_v7 = vsel %vm3031_vm4, %v4364_v2, -inf }
 0xd95   : > { %4375 = vmax.xlane.f32.xlu0 %v4374_v7 }
 0xdad   : > { %v4047_v5 = vpop.f32.mrb[32].mxu0 }
 0xdae   : > { %v9206_v14 = vpop.f32.mrb[33].mxu0  ;;  %v4366_v35 = vsel %vm10532_vm12, -10000.0, %v4047_v5 }
 0xdaf   : > { %v4380_v24 = vsel %vm3031_vm4, %v4366_v35, -inf }
 0xdb2   : > { %v3498_v26 = vpop.f32.mrb[30].mxu1 }
 0xdb3   : > { %3735 = vst.msk [vmem:[#allocation9 + $0x10] sm:$0xf] %vm3730_vm11, %v3498_v26  ;;  %v9171_v1 = vpop.f32.mrb[31].mxu1 }
 0xdb5   : > { %v4203_v25 = vpop.f32.mrb[34].mxu0 }
 0xdb6   : > { %v3650_v61 = vpop.f32.mrb[32].mxu1  ;;  %v9216_v28 = vpop.f32.mrb[35].mxu0  ;;  %v4368_v4 = vsel %vm10551_vm14, -10000.0, %v4203_v25 }
 0xdb7   : > { %3737 = vst.msk [vmem:[#allocation9 + $0x18] sm:$0xf] %vm3730_vm11, %v3650_v61  ;;  %v9181_v62 = vpop.f32.mrb[33].mxu1  ;;  %v4386_v45 = vsel %vm3031_vm4, %v4368_v4, -inf }
 0xdbd   : > { %v3813_v29 = vpop.f32.mrb[34].mxu1  ;;  %v4359_v3 = vpop.f32.mrb[36].mxu0 }
 0xdbe   : > { %v4363_v6 = vsel %vm10497_vm3, -10000.0, %v3813_v29  ;;  %v9191_v10 = vpop.f32.mrb[35].mxu1  ;;  %v9226_v23 = vpop.f32.mrb[37].mxu0  ;;  %v10829_v25 = vsel %vm10565_vm5, -10000.0, %v4359_v3 }
 0xdbf   : > { %v4371_v32 = vsel %vm3031_vm4, %v4363_v6, -inf  ;;  %v4392_v61 = vsel %vm3031_vm4, %v10829_v25, -inf }
 0xdc0   : > { %4372 = vmax.xlane.f32.xlu1 %v4371_v32 }
 0xdc1   : > { %v3969_v41 = vpop.f32.mrb[36].mxu1 }
 0xdc2   : > { %v4365_v16 = vsel %vm10491_vm15, -10000.0, %v3969_v41  ;;  %v9201_v12 = vpop.f32.mrb[37].mxu1 }
 0xdc3   : > { %v4377_v20 = vsel %vm3031_vm4, %v4365_v16, -inf }
 0xdc4   : > { %4381 = vmax.xlane.f32.xlu1 %v4380_v24  ;;  %4378 = vmax.xlane.f32.xlu0 %v4377_v20 }
 0xdc5   : > { %v4125_v22 = vpop.f32.mrb[38].mxu1 }
 0xdc6   : > { %v4367_v33 = vsel %vm10524_vm10, -10000.0, %v4125_v22  ;;  %v9211_v40 = vpop.f32.mrb[39].mxu1 }
 0xdc7   : > { %v4383_v7 = vsel %vm3031_vm4, %v4367_v33, -inf }
 0xdc8   : > { %4387 = vmax.xlane.f32.xlu1 %v4386_v45  ;;  %4384 = vmax.xlane.f32.xlu0 %v4383_v7 }
 0xdc9   : > { %v4281_v5 = vpop.f32.mrb[40].mxu1 }
 0xdca   : > { %v4369_v14 = vsel %vm10542_vm13, -10000.0, %v4281_v5  ;;  %v9221_v26 = vpop.f32.mrb[41].mxu1 }
 0xdcb   : > { %v4389_v1 = vsel %vm3031_vm4, %v4369_v14, -inf }
 0xdcc   : > { %4390 = vmax.xlane.f32.xlu0 %v4389_v1 }
 0xdd9   : > { %4536 = vrot.lane.b32.xlu1 %v10618_v31, %s11690_s24 }
 0xddd   : > { %4613 = vrot.lane.b32.xlu1 %v10677_v38, %s11690_s24 }
 0xde2   : > { %4459 = vrot.lane.b32.xlu0 %v10616_v37, %s11690_s24 }
 0xde6   : > { %4690 = vrot.lane.b32.xlu0 %v10682_v39, %s11690_s24 }
 0xdea   : > { %4844 = vrot.lane.b32.xlu0 %v10700_v44, %s11690_s24 }
 0xdee   : > { %4998 = vrot.lane.b32.xlu0 %v10712_v46, %s11690_s24 }
 0xdf2   : > { %5196 = vrot.lane.b32.xlu0 %v10404_v50, %s11691_s0 }
 0xdf6   : > { %5194 = vrot.lane.b32.xlu0 %v10419_v53, %s11691_s0 }
 0xdfa   : > { %5352 = vrot.lane.b32.xlu0 %v10428_v54, %s11691_s0 }
 0xe01   : > { %4393 = vmax.xlane.f32.xlu1 %v4392_v61 }
 0xe12   : > { %4767 = vrot.lane.b32.xlu1 %v10694_v42, %s11690_s24 }
 0xe16   : > { %4921 = vrot.lane.b32.xlu1 %v10736_v34, %s11690_s24 }
 0xe1a   : > { %5118 = vrot.lane.b32.xlu1 %v10390_v47, %s11691_s0 }
 0xe1e   : > { %5116 = vrot.lane.b32.xlu1 %v10400_v49, %s11691_s0 }
 0xe22   : > { %5274 = vrot.lane.b32.xlu1 %v10386_v19, %s11691_s0  ;;  %v4376_v54 = vpop.xlane.xlu0 %4375 }
 0xe23   : > { %v4396_v28 = vsub.f32 %v4364_v2, %v4376_v54 }
 0xe25   : > { %v4405_v62 = vmul.f32 1.442695, %v4396_v28 }
 0xe26   : > { %5272 = vrot.lane.b32.xlu1 %v10395_v48, %s11691_s0 }
 0xe27   : > { %9658 = vpow2.f32 %v4405_v62 }
 0xe31   : > { %v10845_v29 = vpop.eup %9658 }
 0xe32   : > { %v4422_v3 = vsel %vm3031_vm4, %v10845_v29, 0.0 }
 0xe4a   : > { %4423 = vadd.xlane.f32.xlu1 %v4422_v3 }
 0xe4d   : > { %v4373_v10 = vpop.xlane.xlu1 %4372 }
 0xe4e   : > { %v4395_v23 = vsub.f32 %v4363_v6, %v4373_v10 }
 0xe50   : > { %v4403_v32 = vmul.f32 1.442695, %v4395_v23 }
 0xe51   : > { %v4382_v41 = vpop.xlane.xlu1 %4381  ;;  %v4379_v12 = vpop.xlane.xlu0 %4378 }
 0xe52   : > { %9660 = vpow2.f32 %v4403_v32  ;;  %v4398_v19 = vsub.f32 %v4366_v35, %v4382_v41  ;;  %v4397_v24 = vsub.f32 %v4365_v16, %v4379_v12 }
 0xe54   : > { %v4409_v20 = vmul.f32 1.442695, %v4398_v19  ;;  %v4407_v48 = vmul.f32 1.442695, %v4397_v24 }
 0xe55   : > { %v4388_v22 = vpop.xlane.xlu1 %4387  ;;  %v4385_v2 = vpop.xlane.xlu0 %4384 }
 0xe56   : > { %9662 = vpow2.f32 %v4409_v20  ;;  %v4400_v40 = vsub.f32 %v4368_v4, %v4388_v22  ;;  %v4399_v45 = vsub.f32 %v4367_v33, %v4385_v2 }
 0xe57   : > { %9664 = vpow2.f32 %v4407_v48 }
 0xe58   : > { %v4413_v7 = vmul.f32 1.442695, %v4400_v40  ;;  %v4411_v5 = vmul.f32 1.442695, %v4399_v45 }
 0xe59   : > { %v4537_v26 = vpop.permute.xlu1 %4536  ;;  %v4391_v1 = vpop.xlane.xlu0 %4390 }
 0xe5a   : > { %9666 = vpow2.f32 %v4413_v7  ;;  %v4401_v6 = vsub.f32 %v4369_v14, %v4391_v1  ;;  %9233 = vmatpush3.msk.msra.mxu0 %vm3124_vm6, %v4537_v26 }
 0xe5b   : > { %9668 = vpow2.f32 %v4411_v5  ;;  %9242 = vmatprep.subr.mxu0 %v9814_v27 }
 0xe5c   : > { %v10851_v35 = vpop.eup %9660  ;;  %v4415_v16 = vmul.f32 1.442695, %v4401_v6 }
 0xe5d   : > { %v4460_v61 = vpop.permute.xlu0 %4459  ;;  %v4419_v4 = vsel %vm3031_vm4, %v10851_v35, 0.0  ;;  %v10883_v12 = vpop.permute.xlu1 %4613 }
 0xe5e   : > { %9670 = vpow2.f32 %v4415_v16  ;;  %4420 = vadd.xlane.f32.xlu0 %v4419_v4  ;;  %9228 = vmatpush3.msk.msra.mxu1 %vm3124_vm6, %v4460_v61 }
 0xe5f   : > { %9237 = vmatprep.subr.mxu1 %v9814_v27 }
 0xe60   : > { %v10857_v33 = vpop.eup %9662 }
 0xe61   : > { %v10859_v14 = vpop.eup %9664  ;;  %v4428_v54 = vsel %vm3031_vm4, %v10857_v33, 0.0 }
 0xe62   : > { %4429 = vadd.xlane.f32.xlu1 %v4428_v54  ;;  %v4425_v28 = vsel %vm3031_vm4, %v10859_v14, 0.0 }
 0xe63   : > { %4426 = vadd.xlane.f32.xlu0 %v4425_v28 }
 0xe64   : > { %v10865_v62 = vpop.eup %9666 }
 0xe65   : > { %v10867_v3 = vpop.eup %9668  ;;  %v4434_v10 = vsel %vm3031_vm4, %v10865_v62, 0.0 }
 0xe66   : > { %4435 = vadd.xlane.f32.xlu1 %v4434_v10  ;;  %v4431_v23 = vsel %vm3031_vm4, %v10867_v3, 0.0 }
 0xe67   : > { %4432 = vadd.xlane.f32.xlu0 %v4431_v23 }
 0xe68   : > { %v10873_v32 = vpop.eup %9670 }
 0xe69   : > { %v4437_v41 = vsel %vm3031_vm4, %v10873_v32, 0.0 }
 0xe6b   : > { %4438 = vadd.xlane.f32.xlu0 %v4437_v41 }
 0xe81   : > { %5350 = vrot.lane.b32.xlu0 %v10440_v56, %s11691_s0 }
 0xe85   : > { %5508 = vrot.lane.b32.xlu0 %v10438_v55, %s11691_s0 }
 0xe89   : > { %5506 = vrot.lane.b32.xlu0 %v10459_v59, %s11691_s0 }
 0xe8d   : > { %5664 = vrot.lane.b32.xlu0 %v10455_v58, %s11691_s0 }
 0xe8e   : > { %v4394_v19 = vpop.xlane.xlu1 %4393 }
 0xe8f   : > { %v4402_v24 = vsub.f32 %v10829_v25, %v4394_v19 }
 0xe91   : > { %v4417_v20 = vmul.f32 1.442695, %v4402_v24  ;;  %5662 = vrot.lane.b32.xlu0 %v10468_v60, %s11691_s0 }
 0xe92   : > { %v4768_v58 = vpop.permute.xlu1 %4767 }
 0xe93   : > { %9672 = vpow2.f32 %v4417_v20 }
 0xe95   : > { %5836 = vrot.lane.b32.xlu0 %v10616_v37, %s11691_s0 }
 0xe96   : > { %v10912_v59 = vpop.permute.xlu1 %4921 }
 0xe99   : > { %6067 = vrot.lane.b32.xlu0 %v10682_v39, %s11691_s0 }
 0xe9d   : > { %v10894_v55 = vpop.eup %9672  ;;  %6221 = vrot.lane.b32.xlu0 %v10700_v44, %s11691_s0 }
 0xe9e   : > { %v4440_v56 = vsel %vm3031_vm4, %v10894_v55, 0.0 }
 0xe9f   : > { %4441 = vadd.xlane.f32.xlu1 %v4440_v56 }
 0xea1   : > { %6375 = vrot.lane.b32.xlu0 %v10712_v46, %s11691_s0 }
 0xea5   : > { %6573 = vrot.lane.b32.xlu0 %v10404_v50, %s11692_s6  ;;  %v10918_v50 = vpop.permute.xlu1 %5118 }
 0xea9   : > { %6571 = vrot.lane.b32.xlu0 %v10419_v53, %s11692_s6  ;;  %v4691_v53 = vpop.permute.xlu0 %4690 }
 0xeb0   : > { %5430 = vrot.lane.b32.xlu1 %v10406_v51, %s11691_s0  ;;  %v10922_v51 = vpop.permute.xlu1 %5116 }
 0xeb4   : > { %5428 = vrot.lane.b32.xlu1 %v10421_v17, %s11691_s0  ;;  %v4845_v17 = vpop.permute.xlu0 %4844 }
 0xeb8   : > { %5586 = vrot.lane.b32.xlu1 %v10417_v52, %s11691_s0  ;;  %v10928_v52 = vpop.permute.xlu1 %5274  ;;  %v4999_v60 = vpop.permute.xlu0 %4998 }
 0xebc   : > { %5584 = vrot.lane.b32.xlu1 %v10443_v57, %s11691_s0  ;;  %v10932_v57 = vpop.permute.xlu1 %5272 }
 0xec0   : > { %5913 = vrot.lane.b32.xlu1 %v10618_v31, %s11691_s0  ;;  %v9778_v31 = vld [vmem:[#allocation7 + $0x8] sm:$0xf] }
 0xec4   : > { %5990 = vrot.lane.b32.xlu1 %v10677_v38, %s11691_s0  ;;  %v10937_v38 = vpop.permute.xlu0 %5196 }
 0xec8   : > { %6144 = vrot.lane.b32.xlu1 %v10694_v42, %s11691_s0  ;;  %v10939_v39 = vpop.permute.xlu0 %5194 }
 0xecc   : > { %6298 = vrot.lane.b32.xlu1 %v10736_v34, %s11691_s0 }
 0xed0   : > { %6495 = vrot.lane.b32.xlu1 %v10390_v47, %s11692_s6  ;;  %v10946_v47 = vpop.permute.xlu0 %5352 }
 0xed4   : > { %6493 = vrot.lane.b32.xlu1 %v10400_v49, %s11692_s6 }
 0xed7   : > { %v4424_v37 = vpop.xlane.xlu1 %4423 }
 0xed8   : > { %9674 = vrcp.f32 %v4424_v37  ;;  %6651 = vrot.lane.b32.xlu1 %v9778_v31, %s11692_s6 }
 0xee2   : > { %v9675_v42 = vpop.eup %9674 }
 0xee3   : > { %v4452_v44 = vmul.f32 %v9675_v42, %v10845_v29 }
 0xee5   : > { %9235 = vmatmul.mubr.msk.f32.vlgmr.msra.gmra.mrb[38].mxu0 %vm3120_vm9, %v4452_v44 }
 0xee6   : > { %9243 = vmatpush3.msk.msra.mxu0 %vm3124_vm6, %v4691_v53  ;;  %9244 = vmatprep.mubr.msk.f32.mxu0 %vm9818_vm2, %v9814_v27 }
 0xee7   : > { %9252 = vmatprep.subr.mxu0 %v9814_v27 }
 0xeeb   : > { %v4421_v49 = vpop.xlane.xlu0 %4420 }
 0xeec   : > { %9676 = vrcp.f32 %v4421_v49 }
 0xeef   : > { %v4430_v46 = vpop.xlane.xlu1 %4429 }
 0xef0   : > { %9678 = vrcp.f32 %v4430_v46  ;;  %v4427_v34 = vpop.xlane.xlu0 %4426 }
 0xef1   : > { %9680 = vrcp.f32 %v4427_v34 }
 0xef3   : > { %v4436_v25 = vpop.xlane.xlu1 %4435 }
 0xef4   : > { %9682 = vrcp.f32 %v4436_v25  ;;  %v4433_v29 = vpop.xlane.xlu0 %4432 }
 0xef5   : > { %9684 = vrcp.f32 %v4433_v29 }
 0xef6   : > { %v9677_v48 = vpop.eup %9676 }
 0xef7   : > { %v4451_v22 = vmul.f32 %v9677_v48, %v10851_v35 }
 0xef8   : > { %v4439_v2 = vpop.xlane.xlu0 %4438 }
 0xef9   : > { %9686 = vrcp.f32 %v4439_v2  ;;  %9230 = vmatmul.mubr.msk.f32.vlgmr.msra.gmra.mrb[42].mxu1 %vm3120_vm9, %v4451_v22 }
 0xefa   : > { %v9679_v40 = vpop.eup %9678  ;;  %9238 = vmatpush3.msk.msra.mxu1 %vm3124_vm6, %v10883_v12  ;;  %9239 = vmatprep.mubr.msk.f32.mxu1 %vm9818_vm2, %v9814_v27 }
 0xefb   : > { %v9681_v45 = vpop.eup %9680  ;;  %9247 = vmatprep.subr.mxu1 %v9814_v27  ;;  %v4454_v7 = vmul.f32 %v9679_v40, %v10857_v33 }
 0xefc   : > { %v4453_v5 = vmul.f32 %v9681_v45, %v10859_v14  ;;  %v5351_v4 = vpop.permute.xlu0 %5350 }
 0xefd   : > { %9245 = vmatmul.mubr.msk.f32.vlgmr.msra.gmra.mrb[40].mxu0 %vm3120_vm9, %v4454_v7 }
 0xefe   : > { %v9683_v26 = vpop.eup %9682  ;;  %9240 = vmatmul.mubr.msk.f32.vlgmr.msra.gmra.mrb[44].mxu1 %vm3120_vm9, %v4453_v5  ;;  %9253 = vmatpush3.msk.msra.mxu0 %vm3124_vm6, %v4845_v17 }
 0xeff   : > { %v9685_v1 = vpop.eup %9684  ;;  %9248 = vmatpush3.msk.msra.mxu1 %vm3124_vm6, %v4768_v58  ;;  %9249 = vmatprep.mubr.msk.f32.mxu1 %vm9818_vm2, %v9814_v27  ;;  %v4456_v6 = vmul.f32 %v9683_v26, %v10865_v62 }
 0xf00   : > { %9254 = vmatprep.mubr.msk.f32.mxu0 %vm9818_vm2, %v9814_v27  ;;  %9257 = vmatprep.subr.mxu1 %v9814_v27  ;;  %v4455_v35 = vmul.f32 %v9685_v1, %v10867_v3  ;;  %v5509_v33 = vpop.permute.xlu0 %5508 }
 0xf01   : > { %9262 = vmatprep.subr.mxu0 %v9814_v27  ;;  %9255 = vmatmul.mubr.msk.f32.vlgmr.msra.gmra.mrb[42].mxu0 %vm3120_vm9, %v4456_v6 }
 0xf02   : > { %9250 = vmatmul.mubr.msk.f32.vlgmr.msra.gmra.mrb[46].mxu1 %vm3120_vm9, %v4455_v35  ;;  %9263 = vmatpush3.msk.msra.mxu0 %vm3124_vm6, %v4999_v60 }
 0xf03   : > { %v9687_v16 = vpop.eup %9686  ;;  %9258 = vmatpush3.msk.msra.mxu1 %vm3124_vm6, %v10912_v59  ;;  %9259 = vmatprep.mubr.msk.f32.mxu1 %vm9818_vm2, %v9814_v27 }
 0xf04   : > { %v4457_v61 = vmul.f32 %v9687_v16, %v10873_v32  ;;  %9267 = vmatprep.subr.mxu1 %v9814_v27  ;;  %9264 = vmatprep.mubr.msk.f32.mxu0 %vm9818_vm2, %v9814_v27  ;;  %v5507_v14 = vpop.permute.xlu0 %5506 }
 0xf05   : > { %9272 = vmatprep.subr.mxu0 %v9814_v27 }
 0xf06   : > { %9260 = vmatmul.mubr.msk.f32.vlgmr.msra.gmra.mrb[48].mxu1 %vm3120_vm9, %v4457_v61 }
 0xf07   : > { %9269 = vmatprep.mubr.msk.f32.mxu1 %vm9818_vm2, %v9814_v27 }
 0xf08   : > { %v5665_v62 = vpop.permute.xlu0 %5664 }
 0xf0a   : > { %9268 = vmatpush3.xpose.msk.msra.mxu1 %vm928_vm1, %v10918_v50 }
 0xf0b   : > { %9277 = vmatprep.subr.mxu1 %v9814_v27 }
 0xf0c   : > { %v5663_v23 = vpop.permute.xlu0 %5662 }
 0xf0d   : > { %9270 = vmatmul.mubr.msk.f32.vlgmr.msra.gmra.mrb[50].mxu1 %vm928_vm1, %v10922_v51 }
 0xf0e   : > { %9278 = vmatpush3.xpose.msk.msra.mxu1 %vm928_vm1, %v10928_v52  ;;  %9279 = vmatprep.mubr.msk.f32.mxu1 %vm9818_vm2, %v9814_v27 }
 0xf0f   : > { %9287 = vmatprep.subr.mxu1 %v9814_v27 }
 0xf10   : > { %v5837_v19 = vpop.permute.xlu0 %5836 }
 0xf11   : > { %9280 = vmatmul.mubr.msk.f32.vlgmr.msra.gmra.mrb[52].mxu1 %vm928_vm1, %v10932_v57 }
 0xf12   : > { %9289 = vmatprep.mubr.msk.f32.mxu1 %vm9818_vm2, %v9814_v27 }
 0xf2c   : > { %v4442_v54 = vpop.xlane.xlu1 %4441 }
 0xf2d   : > { %9688 = vrcp.f32 %v4442_v54 }
 0xf30   : > { %v5431_v28 = vpop.permute.xlu1 %5430 }
 0xf31   : > { %9288 = vmatpush3.xpose.msk.msra.mxu1 %vm928_vm1, %v5431_v28 }
 0xf32   : > { %9297 = vmatprep.subr.mxu1 %v9814_v27 }
 0xf34   : > { %v5429_v3 = vpop.permute.xlu1 %5428 }
 0xf35   : > { %9290 = vmatmul.mubr.msk.f32.vlgmr.msra.gmra.mrb[54].mxu1 %vm928_vm1, %v5429_v3 }
 0xf36   : > { %9299 = vmatprep.mubr.msk.f32.mxu1 %vm9818_vm2, %v9814_v27 }
 0xf37   : > { %v9689_v10 = vpop.eup %9688 }
 0xf38   : > { %v5587_v32 = vpop.permute.xlu1 %5586  ;;  %v4458_v41 = vmul.f32 %v9689_v10, %v10894_v55 }
 0xf39   : > { %9298 = vmatpush3.xpose.msk.msra.mxu1 %vm928_vm1, %v5587_v32 }
 0xf3a   : > { %9265 = vmatmul.mubr.msk.f32.vlgmr.msra.gmra.mrb[44].mxu0 %vm3120_vm9, %v4458_v41  ;;  %9307 = vmatprep.subr.mxu1 %v9814_v27 }
 0xf3b   : > { %9273 = vmatpush3.xpose.msk.msra.mxu0 %vm928_vm1, %v10937_v38  ;;  %9274 = vmatprep.mubr.msk.f32.mxu0 %vm9818_vm2, %v9814_v27 }
 0xf3c   : > { %v5585_v12 = vpop.permute.xlu1 %5584  ;;  %9282 = vmatprep.subr.mxu0 %v9814_v27 }
 0xf3d   : > { %9300 = vmatmul.mubr.msk.f32.vlgmr.msra.gmra.mrb[56].mxu1 %vm928_vm1, %v5585_v12  ;;  %v9779_v12 = vld [vmem:[#allocation6 + $0x8] sm:$0xf] }
 0xf3e   : > { %9308 = vmatpush3.msk.msra.mxu1 %vm3124_vm6, %v5837_v19  ;;  %9275 = vmatmul.mubr.msk.f32.vlgmr.msra.gmra.mrb[46].mxu0 %vm928_vm1, %v10939_v39  ;;  %v9780_v19 = vld [vmem:[#allocation7 + $0xc] sm:$0xf] }
 0xf3f   : > { %9283 = vmatpush3.xpose.msk.msra.mxu0 %vm928_vm1, %v10946_v47  ;;  %9284 = vmatprep.mubr.msk.f32.mxu0 %vm9818_vm2, %v9814_v27 }
 0xf40   : > { %9292 = vmatprep.subr.mxu0 %v9814_v27  ;;  %9309 = vmatprep.mubr.msk.f32.mxu1 %vm9818_vm2, %v9814_v27  ;;  %v5914_v24 = vpop.permute.xlu1 %5913 }
 0xf41   : > { %9317 = vmatprep.subr.mxu1 %v9814_v27 }
 0xf42   : > { %9285 = vmatmul.mubr.msk.f32.vlgmr.msra.gmra.mrb[48].mxu0 %vm928_vm1, %v5351_v4 }
 0xf43   : > { %9293 = vmatpush3.xpose.msk.msra.mxu0 %vm928_vm1, %v5509_v33  ;;  %9294 = vmatprep.mubr.msk.f32.mxu0 %vm9818_vm2, %v9814_v27 }
 0xf44   : > { %9302 = vmatprep.subr.mxu0 %v9814_v27 }
 0xf46   : > { %9295 = vmatmul.mubr.msk.f32.vlgmr.msra.gmra.mrb[50].mxu0 %vm928_vm1, %v5507_v14 }
 0xf47   : > { %9303 = vmatpush3.xpose.msk.msra.mxu0 %vm928_vm1, %v5665_v62  ;;  %9304 = vmatprep.mubr.msk.f32.mxu0 %vm9818_vm2, %v9814_v27 }
 0xf48   : > { %9312 = vmatprep.subr.mxu0 %v9814_v27 }
 0xf4a   : > { %9305 = vmatmul.mubr.msk.f32.vlgmr.msra.gmra.mrb[52].mxu0 %vm928_vm1, %v5663_v23 }
 0xf4b   : > { %9313 = vmatpush3.msk.msra.mxu0 %vm3124_vm6, %v5914_v24  ;;  %9314 = vmatprep.mubr.msk.f32.mxu0 %vm9818_vm2, %v9814_v27  ;;  %v11088_v24 = vpop.permute.xlu1 %5990 }
 0xf4c   : > { %9322 = vmatprep.subr.mxu0 %v9814_v27 }
 0xfb8   : > { %v11040_v20 = vpop.f32.mrb[38].mxu0 }
 0xfb9   : > { %v9236_v55 = vpop.f32.mrb[39].mxu0 }
 0xfba   : > { %v11090_v55 = vpop.permute.xlu1 %6144 }
 0xfcc   : > { %v11042_v56 = vpop.f32.mrb[42].mxu1 }
 0xfcd   : > { %v9231_v58 = vpop.f32.mrb[43].mxu1 }
 0xfce   : > { %v11092_v58 = vpop.permute.xlu1 %6298 }
 0xfd0   : > { %v11044_v59 = vpop.f32.mrb[40].mxu0 }
 0xfd1   : > { %v11046_v50 = vpop.f32.mrb[44].mxu1  ;;  %v9246_v51 = vpop.f32.mrb[41].mxu0 }
 0xfd2   : > { %v9241_v53 = vpop.f32.mrb[45].mxu1  ;;  %v11094_v51 = vpop.permute.xlu1 %6495 }
 0xfd4   : > { %v11048_v52 = vpop.f32.mrb[42].mxu0 }
 0xfd5   : > { %v11050_v17 = vpop.f32.mrb[46].mxu1  ;;  %v9256_v57 = vpop.f32.mrb[43].mxu0 }
 0xfd6   : > { %v9251_v60 = vpop.f32.mrb[47].mxu1  ;;  %v11096_v53 = vpop.permute.xlu1 %6493 }
 0xfd9   : > { %v11052_v37 = vpop.f32.mrb[48].mxu1 }
 0xfda   : > { %v9261_v31 = vpop.f32.mrb[49].mxu1  ;;  %v11098_v57 = vpop.permute.xlu1 %6651 }
 0xfe0   : > { %v5190_v38 = vpop.f32.mrb[50].mxu1 }
 0xfe1   : > { %v5740_v39 = vsel %vm10497_vm3, -10000.0, %v5190_v38  ;;  %v9271_v42 = vpop.f32.mrb[51].mxu1 }
 0xfe2   : > { %v5748_v44 = vsel %vm3031_vm4, %v5740_v39, -inf }
 0xfe3   : > { %5749 = vmax.xlane.f32.xlu1 %v5748_v44 }
 0xfe4   : > { %v5346_v47 = vpop.f32.mrb[52].mxu1 }
 0xfe5   : > { %v9281_v49 = vpop.f32.mrb[53].mxu1  ;;  %v5742_v5 = vsel %vm10491_vm15, -10000.0, %v5346_v47  ;;  %v11104_v47 = vpop.permute.xlu0 %6067 }
 0xfe6   : > { %v5754_v35 = vsel %vm3031_vm4, %v5742_v5, -inf }
 0xfe9   : > { %v11106_v49 = vpop.permute.xlu0 %6221 }
0x1008   : > { %v5502_v46 = vpop.f32.mrb[54].mxu1 }
0x1009   : > { %v9291_v34 = vpop.f32.mrb[55].mxu1  ;;  %v5744_v61 = vsel %vm10524_vm10, -10000.0, %v5502_v46  ;;  %v11108_v46 = vpop.permute.xlu0 %6375 }
0x100a   : > { %v5760_v54 = vsel %vm3031_vm4, %v5744_v61, -inf }
0x100d   : > { %v11057_v25 = vpop.f32.mrb[44].mxu0  ;;  %v11110_v34 = vpop.permute.xlu0 %6573 }
0x100e   : > { %v9266_v29 = vpop.f32.mrb[45].mxu0 }
0x1010   : > { %v5658_v48 = vpop.f32.mrb[56].mxu1 }
0x1011   : > { %v5268_v22 = vpop.f32.mrb[46].mxu0  ;;  %v9301_v2 = vpop.f32.mrb[57].mxu1  ;;  %v11076_v62 = vsel %vm10542_vm13, -10000.0, %v5658_v48 }
0x1012   : > { %v5741_v40 = vsel %vm10518_vm7, -10000.0, %v5268_v22  ;;  %v9276_v45 = vpop.f32.mrb[47].mxu0  ;;  %v5766_v32 = vsel %vm3031_vm4, %v11076_v62, -inf  ;;  %v11112_v29 = vpop.permute.xlu0 %6571 }
0x1013   : > { %v5751_v7 = vsel %vm3031_vm4, %v5741_v40, -inf }
0x1014   : > { %5752 = vmax.xlane.f32.xlu0 %v5751_v7 }
0x1015   : > { %v5424_v26 = vpop.f32.mrb[48].mxu0 }
0x1016   : > { %v5743_v1 = vsel %vm10532_vm12, -10000.0, %v5424_v26  ;;  %v9286_v6 = vpop.f32.mrb[49].mxu0 }
0x1017   : > { %v5757_v16 = vsel %vm3031_vm4, %v5743_v1, -inf }
0x1018   : > { %5758 = vmax.xlane.f32.xlu1 %v5757_v16  ;;  %5755 = vmax.xlane.f32.xlu0 %v5754_v35 }
0x1019   : > { %v5580_v4 = vpop.f32.mrb[50].mxu0 }
0x101a   : > { %v5745_v33 = vsel %vm10551_vm14, -10000.0, %v5580_v4  ;;  %v9296_v14 = vpop.f32.mrb[51].mxu0 }
0x101b   : > { %v5763_v28 = vsel %vm3031_vm4, %v5745_v33, -inf }
0x101c   : > { %5764 = vmax.xlane.f32.xlu1 %v5763_v28  ;;  %5761 = vmax.xlane.f32.xlu0 %v5760_v54 }
0x101d   : > { %v5736_v3 = vpop.f32.mrb[52].mxu0 }
0x101e   : > { %v11080_v10 = vsel %vm10565_vm5, -10000.0, %v5736_v3  ;;  %v9306_v23 = vpop.f32.mrb[53].mxu0 }
0x101f   : > { %v5769_v41 = vsel %vm3031_vm4, %v11080_v10, -inf }
0x1020   : > { %5770 = vmax.xlane.f32.xlu1 %v5769_v41  ;;  %5767 = vmax.xlane.f32.xlu0 %v5766_v32 }
0x1031   : > { %6649 = vrot.lane.b32.xlu1 %v9779_v12, %s11692_s6 }
0x1036   : > { %6729 = vrot.lane.b32.xlu0 %v9780_v19, %s11692_s6 }
0x1070   : > { %v5750_v60 = vpop.xlane.xlu1 %5749 }
0x1071   : > { %v5772_v31 = vsub.f32 %v5740_v39, %v5750_v60  ;;  %v9781_v60 = vld [vmem:[#allocation7 + $0x10] sm:$0xf] }
0x1073   : > { %v5780_v38 = vmul.f32 1.442695, %v5772_v31  ;;  %v9782_v31 = vld [vmem:[#allocation6 + $0xc] sm:$0xf] }
0x1075   : > { %9690 = vpow2.f32 %v5780_v38 }
0x107f   : > { %v11100_v42 = vpop.eup %9690 }
0x1080   : > { %v5796_v44 = vsel %vm3031_vm4, %v11100_v42, 0.0 }
0x1081   : > { %5797 = vadd.xlane.f32.xlu0 %v5796_v44 }
0x10a1   : > { %v5753_v48 = vpop.xlane.xlu0 %5752 }
0x10a2   : > { %v5773_v39 = vsub.f32 %v5741_v40, %v5753_v48 }
0x10a4   : > { %v5782_v22 = vmul.f32 1.442695, %v5773_v39 }
0x10a5   : > { %v5759_v2 = vpop.xlane.xlu1 %5758  ;;  %v5756_v45 = vpop.xlane.xlu0 %5755 }
0x10a6   : > { %9692 = vpow2.f32 %v5782_v22  ;;  %v5775_v7 = vsub.f32 %v5743_v1, %v5759_v2  ;;  %v5774_v26 = vsub.f32 %v5742_v5, %v5756_v45 }
0x10a8   : > { %v5786_v6 = vmul.f32 1.442695, %v5775_v7  ;;  %v5784_v35 = vmul.f32 1.442695, %v5774_v26 }
0x10a9   : > { %v5765_v16 = vpop.xlane.xlu1 %5764  ;;  %v5762_v4 = vpop.xlane.xlu0 %5761 }
0x10aa   : > { %9694 = vpow2.f32 %v5786_v6  ;;  %v5777_v14 = vsub.f32 %v5745_v33, %v5765_v16  ;;  %v5776_v54 = vsub.f32 %v5744_v61, %v5762_v4  ;;  %v9786_v16 = vld [vmem:[#allocation6 + $0x18] sm:$0xf] }
0x10ab   : > { %9696 = vpow2.f32 %v5784_v35  ;;  %v9783_v35 = vld [vmem:[#allocation6 + $0x10] sm:$0xf] }
0x10ac   : > { %v5790_v28 = vmul.f32 1.442695, %v5777_v14  ;;  %v5788_v3 = vmul.f32 1.442695, %v5776_v54  ;;  %v9787_v14 = vld [vmem:[#allocation6 + $0x14] sm:$0xf] }
0x10ad   : > { %v5771_v38 = vpop.xlane.xlu1 %5770  ;;  %v5768_v44 = vpop.xlane.xlu0 %5767 }
0x10ae   : > { %9698 = vpow2.f32 %v5790_v28  ;;  %v5779_v48 = vsub.f32 %v11080_v10, %v5771_v38  ;;  %v5778_v39 = vsub.f32 %v11076_v62, %v5768_v44  ;;  %v9784_v62 = vld [vmem:[#allocation7 + $0x18] sm:$0xf]  ;;  %v9785_v10 = vld [vmem:[#allocation7 + $0x14] sm:$0xf]  ;;  %v9788_v28 = vld [vmem:[#allocation7 + $0x1c] sm:$0xf] }
0x10af   : > { %9700 = vpow2.f32 %v5788_v3  ;;  %v9789_v3 = vld [vmem:[#allocation6 + $0x1c] sm:$0xf] }
0x10b0   : > { %v11114_v23 = vpop.eup %9692  ;;  %v5794_v22 = vmul.f32 1.442695, %v5779_v48  ;;  %v5792_v2 = vmul.f32 1.442695, %v5778_v39 }
0x10b1   : > { %v5799_v40 = vsel %vm3031_vm4, %v11114_v23, 0.0  ;;  %v11150_v4 = vpop.permute.xlu0 %6729 }
0x10b2   : > { %5800 = vadd.xlane.f32.xlu1 %v5799_v40  ;;  %9702 = vpow2.f32 %v5794_v22 }
0x10b3   : > { %9704 = vpow2.f32 %v5792_v2 }
0x10b4   : > { %v11118_v1 = vpop.eup %9694 }
0x10b5   : > { %v11120_v5 = vpop.eup %9696  ;;  %v5805_v32 = vsel %vm3031_vm4, %v11118_v1, 0.0 }
0x10b6   : > { %5806 = vadd.xlane.f32.xlu1 %v5805_v32  ;;  %v5802_v61 = vsel %vm3031_vm4, %v11120_v5, 0.0 }
0x10b7   : > { %5803 = vadd.xlane.f32.xlu0 %v5802_v61  ;;  %v11162_v61 = vpop.permute.xlu1 %6649 }
0x10b8   : > { %v11126_v33 = vpop.eup %9698 }
0x10b9   : > { %v11128_v41 = vpop.eup %9700  ;;  %v5811_v12 = vsel %vm3031_vm4, %v11126_v33, 0.0 }
0x10ba   : > { %5812 = vadd.xlane.f32.xlu1 %v5811_v12  ;;  %v5808_v19 = vsel %vm3031_vm4, %v11128_v41, 0.0 }
0x10bb   : > { %5809 = vadd.xlane.f32.xlu0 %v5808_v19 }
0x10bc   : > { %v11138_v45 = vpop.eup %9702 }
0x10bd   : > { %v11140_v7 = vpop.eup %9704  ;;  %v5817_v26 = vsel %vm3031_vm4, %v11138_v45, 0.0 }
0x10be   : > { %v5814_v6 = vsel %vm3031_vm4, %v11140_v7, 0.0 }
0x10cb   : > { %6807 = vrot.lane.b32.xlu1 %v9781_v60, %s11692_s6 }
0x10d1   : > { %6727 = vrot.lane.b32.xlu0 %v9782_v31, %s11692_s6 }
0x10ef   : > { %5818 = vadd.xlane.f32.xlu1 %v5817_v26 }
0x10f0   : > { %5815 = vadd.xlane.f32.xlu0 %v5814_v6 }
0x1100   : > { %6805 = vrot.lane.b32.xlu1 %v9783_v35, %s11692_s6 }
0x1104   : > { %6963 = vrot.lane.b32.xlu1 %v9784_v62, %s11692_s6 }
0x1106   : > { %6885 = vrot.lane.b32.xlu0 %v9785_v10, %s11692_s6 }
0x1108   : > { %6961 = vrot.lane.b32.xlu1 %v9786_v16, %s11692_s6 }
0x110a   : > { %6883 = vrot.lane.b32.xlu0 %v9787_v14, %s11692_s6 }
0x110e   : > { %v5798_v54 = vpop.xlane.xlu0 %5797  ;;  %7041 = vrot.lane.b32.xlu0 %v9788_v28, %s11692_s6 }
0x110f   : > { %9706 = vrcp.f32 %v5798_v54 }
0x1112   : > { %7039 = vrot.lane.b32.xlu0 %v9789_v3, %s11692_s6 }
0x1119   : > { %v9707_v40 = vpop.eup %9706 }
0x111a   : > { %v5828_v32 = vmul.f32 %v9707_v40, %v11100_v42 }
0x111c   : > { %9310 = vmatmul.mubr.msk.f32.vlgmr.msra.gmra.mrb[58].mxu1 %vm3120_vm9, %v5828_v32 }
0x111d   : > { %9318 = vmatpush3.msk.msra.mxu1 %vm3124_vm6, %v11088_v24  ;;  %9319 = vmatprep.mubr.msk.f32.mxu1 %vm9818_vm2, %v9814_v27 }
0x111e   : > { %9327 = vmatprep.subr.mxu1 %v9814_v27 }
0x113f   : > { %v5801_v12 = vpop.xlane.xlu1 %5800 }
0x1140   : > { %9708 = vrcp.f32 %v5801_v12 }
0x1143   : > { %v5807_v19 = vpop.xlane.xlu1 %5806 }
0x1144   : > { %9710 = vrcp.f32 %v5807_v19  ;;  %v5804_v60 = vpop.xlane.xlu0 %5803 }
0x1145   : > { %9712 = vrcp.f32 %v5804_v60 }
0x1147   : > { %v5813_v31 = vpop.xlane.xlu1 %5812 }
0x1148   : > { %9714 = vrcp.f32 %v5813_v31  ;;  %v5810_v42 = vpop.xlane.xlu0 %5809 }
0x1149   : > { %9716 = vrcp.f32 %v5810_v42 }
0x114a   : > { %v9709_v38 = vpop.eup %9708 }
0x114b   : > { %v5829_v24 = vmul.f32 %v9709_v38, %v11114_v23 }
0x114d   : > { %9315 = vmatmul.mubr.msk.f32.vlgmr.msra.gmra.mrb[54].mxu0 %vm3120_vm9, %v5829_v24 }
0x114e   : > { %v9711_v44 = vpop.eup %9710  ;;  %9323 = vmatpush3.msk.msra.mxu0 %vm3124_vm6, %v11104_v47  ;;  %9324 = vmatprep.mubr.msk.f32.mxu0 %vm9818_vm2, %v9814_v27 }
0x114f   : > { %v9713_v48 = vpop.eup %9712  ;;  %v5831_v39 = vmul.f32 %v9711_v44, %v11118_v1  ;;  %9332 = vmatprep.subr.mxu0 %v9814_v27 }
0x1150   : > { %v5830_v22 = vmul.f32 %v9713_v48, %v11120_v5 }
0x1151   : > { %9325 = vmatmul.mubr.msk.f32.vlgmr.msra.gmra.mrb[56].mxu0 %vm3120_vm9, %v5831_v39 }
0x1152   : > { %v9715_v2 = vpop.eup %9714  ;;  %9320 = vmatmul.mubr.msk.f32.vlgmr.msra.gmra.mrb[60].mxu1 %vm3120_vm9, %v5830_v22  ;;  %9333 = vmatpush3.msk.msra.mxu0 %vm3124_vm6, %v11106_v49  ;;  %v6728_v49 = vpop.permute.xlu0 %6727 }
0x1153   : > { %v9717_v23 = vpop.eup %9716  ;;  %v5833_v47 = vmul.f32 %v9715_v2, %v11126_v33  ;;  %9328 = vmatpush3.msk.msra.mxu1 %vm3124_vm6, %v11090_v55  ;;  %9329 = vmatprep.mubr.msk.f32.mxu1 %vm9818_vm2, %v9814_v27  ;;  %v6808_v55 = vpop.permute.xlu1 %6807 }
0x1154   : > { %v5832_v1 = vmul.f32 %v9717_v23, %v11128_v41  ;;  %9334 = vmatprep.mubr.msk.f32.mxu0 %vm9818_vm2, %v9814_v27  ;;  %9337 = vmatprep.subr.mxu1 %v9814_v27 }
0x1155   : > { %9342 = vmatprep.subr.mxu0 %v9814_v27  ;;  %9335 = vmatmul.mubr.msk.f32.vlgmr.msra.gmra.mrb[58].mxu0 %vm3120_vm9, %v5833_v47 }
0x1156   : > { %9330 = vmatmul.mubr.msk.f32.vlgmr.msra.gmra.mrb[62].mxu1 %vm3120_vm9, %v5832_v1  ;;  %9343 = vmatpush3.msk.msra.mxu0 %vm3124_vm6, %v11108_v46 }
0x1157   : > { %9338 = vmatpush3.msk.msra.mxu1 %vm3124_vm6, %v11092_v58  ;;  %9339 = vmatprep.mubr.msk.f32.mxu1 %vm9818_vm2, %v9814_v27 }
0x1158   : > { %9344 = vmatprep.mubr.msk.f32.mxu0 %vm9818_vm2, %v9814_v27  ;;  %9347 = vmatprep.subr.mxu1 %v9814_v27 }
0x1159   : > { %9352 = vmatprep.subr.mxu0 %v9814_v27 }
0x117c   : > { %v5819_v5 = vpop.xlane.xlu1 %5818 }
0x117d   : > { %9718 = vrcp.f32 %v5819_v5  ;;  %v5816_v33 = vpop.xlane.xlu0 %5815 }
0x117e   : > { %9720 = vrcp.f32 %v5816_v33 }
0x1181   : > { %v6886_v41 = vpop.permute.xlu0 %6885 }
0x1185   : > { %v6884_v35 = vpop.permute.xlu0 %6883 }
0x1187   : > { %v9719_v46 = vpop.eup %9718 }
0x1188   : > { %v9721_v26 = vpop.eup %9720  ;;  %v5835_v58 = vmul.f32 %v9719_v46, %v11138_v45  ;;  %v6806_v45 = vpop.permute.xlu1 %6805 }
0x1189   : > { %v5834_v6 = vmul.f32 %v9721_v26, %v11140_v7 }
0x118a   : > { %9345 = vmatmul.mubr.msk.f32.vlgmr.msra.gmra.mrb[60].mxu0 %vm3120_vm9, %v5835_v58 }
0x118b   : > { %9340 = vmatmul.mubr.msk.f32.vlgmr.msra.gmra.mrb[64].mxu1 %vm3120_vm9, %v5834_v6  ;;  %9353 = vmatpush3.xpose.msk.msra.mxu0 %vm928_vm1, %v11110_v34 }
0x118c   : > { %9348 = vmatpush3.xpose.msk.msra.mxu1 %vm928_vm1, %v11094_v51  ;;  %9349 = vmatprep.mubr.msk.f32.mxu1 %vm9818_vm2, %v9814_v27  ;;  %v7042_v51 = vpop.permute.xlu0 %7041 }
0x118d   : > { %9354 = vmatprep.mubr.msk.f32.mxu0 %vm9818_vm2, %v9814_v27  ;;  %9357 = vmatprep.subr.mxu1 %v9814_v27 }
0x118e   : > { %9362 = vmatprep.subr.mxu0 %v9814_v27  ;;  %9355 = vmatmul.mubr.msk.f32.vlgmr.msra.gmra.mrb[62].mxu0 %vm928_vm1, %v11112_v29 }
0x118f   : > { %9350 = vmatmul.mubr.msk.f32.vlgmr.msra.gmra.mrb[66].mxu1 %vm928_vm1, %v11096_v53  ;;  %9363 = vmatpush3.xpose.msk.msra.mxu0 %vm928_vm1, %v11150_v4  ;;  %v6964_v53 = vpop.permute.xlu1 %6963 }
0x1190   : > { %9358 = vmatpush3.xpose.msk.msra.mxu1 %vm928_vm1, %v11098_v57  ;;  %9359 = vmatprep.mubr.msk.f32.mxu1 %vm9818_vm2, %v9814_v27  ;;  %v7040_v57 = vpop.permute.xlu0 %7039 }
0x1191   : > { %9364 = vmatprep.mubr.msk.f32.mxu0 %vm9818_vm2, %v9814_v27  ;;  %9367 = vmatprep.subr.mxu1 %v9814_v27 }
0x1192   : > { %9372 = vmatprep.subr.mxu0 %v9814_v27  ;;  %9365 = vmatmul.mubr.msk.f32.vlgmr.msra.gmra.mrb[64].mxu0 %vm928_vm1, %v6728_v49 }
0x1193   : > { %9360 = vmatmul.mubr.msk.f32.vlgmr.msra.gmra.mrb[68].mxu1 %vm928_vm1, %v11162_v61  ;;  %9373 = vmatpush3.xpose.msk.msra.mxu0 %vm928_vm1, %v6886_v41  ;;  %v6962_v34 = vpop.permute.xlu1 %6961 }
0x1194   : > { %9368 = vmatpush3.xpose.msk.msra.mxu1 %vm928_vm1, %v6808_v55  ;;  %9369 = vmatprep.mubr.msk.f32.mxu1 %vm9818_vm2, %v9814_v27 }
0x1195   : > { %9374 = vmatprep.mubr.msk.f32.mxu0 %vm9818_vm2, %v9814_v27  ;;  %9377 = vmatprep.subr.mxu1 %v9814_v27 }
0x1196   : > { %9382 = vmatprep.subr.mxu0 %v9814_v27  ;;  %9375 = vmatmul.mubr.msk.f32.vlgmr.msra.gmra.mrb[66].mxu0 %vm928_vm1, %v6884_v35 }
0x1197   : > { %9370 = vmatmul.mubr.msk.f32.vlgmr.msra.gmra.mrb[70].mxu1 %vm928_vm1, %v6806_v45  ;;  %9383 = vmatpush3.xpose.msk.msra.mxu0 %vm928_vm1, %v7042_v51 }
0x1198   : > { %9378 = vmatpush3.xpose.msk.msra.mxu1 %vm928_vm1, %v6964_v53  ;;  %9379 = vmatprep.mubr.msk.f32.mxu1 %vm9818_vm2, %v9814_v27 }
0x1199   : > { %9384 = vmatprep.mubr.msk.f32.mxu0 %vm9818_vm2, %v9814_v27  ;;  %9387 = vmatprep.subr.mxu1 %v9814_v27 }
0x119a   : > { %9385 = vmatmul.mubr.msk.f32.vlgmr.msra.gmra.mrb[68].mxu0 %vm928_vm1, %v7040_v57  ;;  %9392 = vmatprep.subr.mxu0 %v9814_v27 }
0x119b   : > { %9380 = vmatmul.mubr.msk.f32.vlgmr.msra.gmra.mrb[72].mxu1 %vm928_vm1, %v6962_v34  ;;  %9394 = vmatprep.mubr.msk.f32.mxu0 %vm9818_vm2, %v9814_v27  ;;  %v9790_v34 = vld [vmem:[#allocation8 + $0x4] sm:$0xf]  ;;  %vm5107_vm1 = vcmask 126016  }
0x119c   : > { %9389 = vmatprep.mubr.msk.f32.mxu1 %vm9818_vm2, %v9814_v27 }
0x11ef   : > { %v11254_v29 = vpop.f32.mrb[58].mxu1 }
0x11f0   : > { %v9311_v7 = vpop.f32.mrb[59].mxu1 }
0x11f1   : > { %v9791_v7 = vld [vmem:[#allocation8 + $0x8] sm:$0xf] }
0x1220   : > { %v11256_v62 = vpop.f32.mrb[54].mxu0 }
0x1221   : > { %v9316_v10 = vpop.f32.mrb[55].mxu0 }
0x1222   : > { %v9792_v10 = vld [vmem:[#allocation8] sm:$0xf] }
0x1224   : > { %v11258_v16 = vpop.f32.mrb[56].mxu0 }
0x1225   : > { %v11260_v4 = vpop.f32.mrb[60].mxu1  ;;  %v9326_v14 = vpop.f32.mrb[57].mxu0 }
0x1226   : > { %v9321_v54 = vpop.f32.mrb[61].mxu1  ;;  %v9795_v14 = vld [vmem:[#allocation8 + $0x14] sm:$0xf] }
0x1228   : > { %v11262_v28 = vpop.f32.mrb[58].mxu0 }
0x1229   : > { %v11264_v3 = vpop.f32.mrb[62].mxu1  ;;  %v9336_v40 = vpop.f32.mrb[59].mxu0 }
0x122a   : > { %v9331_v32 = vpop.f32.mrb[63].mxu1 }
0x125d   : > { %v11266_v61 = vpop.f32.mrb[60].mxu0 }
0x125e   : > { %v11268_v12 = vpop.f32.mrb[64].mxu1  ;;  %v9346_v19 = vpop.f32.mrb[61].mxu0 }
0x125f   : > { %v9341_v60 = vpop.f32.mrb[65].mxu1 }
0x1261   : > { %v6645_v31 = vpop.f32.mrb[62].mxu0 }
0x1262   : > { %v6567_v42 = vpop.f32.mrb[66].mxu1  ;;  %v7118_v38 = vsel %vm10518_vm7, -10000.0, %v6645_v31  ;;  %v9356_v24 = vpop.f32.mrb[63].mxu0 }
0x1263   : > { %v7117_v44 = vsel %vm10497_vm3, -10000.0, %v6567_v42  ;;  %v7128_v48 = vsel %vm3031_vm4, %v7118_v38, -inf  ;;  %v9351_v39 = vpop.f32.mrb[67].mxu1 }
0x1264   : > { %v7125_v22 = vsel %vm3031_vm4, %v7117_v44, -inf  ;;  %7129 = vmax.xlane.f32.xlu0 %v7128_v48 }
0x1265   : > { %7126 = vmax.xlane.f32.xlu1 %v7125_v22  ;;  %v6801_v2 = vpop.f32.mrb[64].mxu0 }
0x1266   : > { %v6723_v23 = vpop.f32.mrb[68].mxu1  ;;  %v7120_v47 = vsel %vm10532_vm12, -10000.0, %v6801_v2  ;;  %v9366_v1 = vpop.f32.mrb[65].mxu0 }
0x1267   : > { %v7119_v36 = vsel %vm10491_vm15, -10000.0, %v6723_v23  ;;  %v7134_v55 = vsel %vm3031_vm4, %v7120_v47, -inf  ;;  %v9361_v18 = vpop.f32.mrb[69].mxu1  ;;  %vm6484_vm15 = vcmask 191616  }
0x1268   : > { %v7131_v49 = vsel %vm3031_vm4, %v7119_v36, -inf }
0x1269   : > { %7135 = vmax.xlane.f32.xlu1 %v7134_v55  ;;  %7132 = vmax.xlane.f32.xlu0 %v7131_v49  ;;  %v6957_v5 = vpop.f32.mrb[66].mxu0 }
0x126a   : > { %v6879_v33 = vpop.f32.mrb[70].mxu1  ;;  %v7122_v46 = vsel %vm10551_vm14, -10000.0, %v6957_v5  ;;  %v9376_v41 = vpop.f32.mrb[67].mxu0 }
0x126b   : > { %v7121_v63 = vsel %vm10524_vm10, -10000.0, %v6879_v33  ;;  %v7140_v26 = vsel %vm3031_vm4, %v7122_v46, -inf  ;;  %v9371_v15 = vpop.f32.mrb[71].mxu1 }
0x126c   : > { %v7137_v58 = vsel %vm3031_vm4, %v7121_v63, -inf }
0x126d   : > { %7141 = vmax.xlane.f32.xlu1 %v7140_v26  ;;  %7138 = vmax.xlane.f32.xlu0 %v7137_v58  ;;  %v7113_v6 = vpop.f32.mrb[68].mxu0 }
0x126e   : > { %v7035_v35 = vpop.f32.mrb[72].mxu1  ;;  %v7124_v45 = vsel %vm10565_vm5, -10000.0, %v7113_v6  ;;  %v9386_v51 = vpop.f32.mrb[69].mxu0 }
0x126f   : > { %v7123_v21 = vsel %vm10542_vm13, -10000.0, %v7035_v35  ;;  %v7146_v53 = vsel %vm3031_vm4, %v7124_v45, -inf  ;;  %v9381_v43 = vpop.f32.mrb[73].mxu1 }
0x1270   : > { %v7143_v57 = vsel %vm3031_vm4, %v7123_v21, -inf }
0x1271   : > { %7147 = vmax.xlane.f32.xlu1 %v7146_v53  ;;  %7144 = vmax.xlane.f32.xlu0 %v7143_v57 }
0x1282   : > { %7290 = vrot.lane.b32.xlu1 %v9790_v34, %s11692_s6 }
0x1286   : > { %7367 = vrot.lane.b32.xlu1 %v9791_v7, %s11692_s6 }
0x1287   : > { %7213 = vrot.lane.b32.xlu0 %v9792_v10, %s11692_s6 }
0x128a   : > { %7521 = vrot.lane.b32.xlu1 %v9793_v30, %s11692_s6 }
0x128b   : > { %7444 = vrot.lane.b32.xlu0 %v9794_v11, %s11692_s6 }
0x128f   : > { %7598 = vrot.lane.b32.xlu0 %v9795_v14, %s11692_s6  ;;  %v9796_v14 = vld [vmem:[#allocation8 + $0x18] sm:$0xf] }
0x12f1   : > { %v7130_v54 = vpop.xlane.xlu0 %7129 }
0x12f2   : > { %v7150_v40 = vsub.f32 %v7118_v38, %v7130_v54  ;;  %v7127_v32 = vpop.xlane.xlu1 %7126  ;;  %v9797_v54 = vld [vmem:[#allocation8 + $0x1c] sm:$0xf] }
0x12f3   : > { %v7149_v19 = vsub.f32 %v7117_v44, %v7127_v32 }
0x12f4   : > { %v7159_v60 = vmul.f32 1.442695, %v7150_v40 }
0x12f5   : > { %v7157_v31 = vmul.f32 1.442695, %v7149_v19 }
0x12f6   : > { %9722 = vpow2.f32 %v7159_v60  ;;  %v7136_v42 = vpop.xlane.xlu1 %7135  ;;  %v7133_v24 = vpop.xlane.xlu0 %7132 }
0x12f7   : > { %9724 = vpow2.f32 %v7157_v31  ;;  %v7152_v48 = vsub.f32 %v7120_v47, %v7136_v42  ;;  %v7151_v39 = vsub.f32 %v7119_v36, %v7133_v24 }
0x12f9   : > { %v7163_v22 = vmul.f32 1.442695, %v7152_v48  ;;  %v7161_v2 = vmul.f32 1.442695, %v7151_v39 }
0x12fa   : > { %v7142_v23 = vpop.xlane.xlu1 %7141  ;;  %v7139_v1 = vpop.xlane.xlu0 %7138 }
0x12fb   : > { %9726 = vpow2.f32 %v7163_v22  ;;  %v7154_v55 = vsub.f32 %v7122_v46, %v7142_v23  ;;  %v7153_v18 = vsub.f32 %v7121_v63, %v7139_v1 }
0x12fc   : > { %9728 = vpow2.f32 %v7161_v2 }
0x12fd   : > { %v7167_v49 = vmul.f32 1.442695, %v7154_v55  ;;  %v7165_v38 = vmul.f32 1.442695, %v7153_v18 }
0x12fe   : > { %v7148_v5 = vpop.xlane.xlu1 %7147  ;;  %v7145_v44 = vpop.xlane.xlu0 %7144 }
0x12ff   : > { %9730 = vpow2.f32 %v7167_v49  ;;  %v7156_v33 = vsub.f32 %v7124_v45, %v7148_v5  ;;  %v7155_v41 = vsub.f32 %v7123_v21, %v7145_v44 }
0x1300   : > { %v11300_v26 = vpop.eup %9722  ;;  %9732 = vpow2.f32 %v7165_v38 }
0x1301   : > { %v11302_v47 = vpop.eup %9724  ;;  %v7171_v36 = vmul.f32 1.442695, %v7156_v33  ;;  %v7169_v15 = vmul.f32 1.442695, %v7155_v41  ;;  %v7176_v58 = vsel %vm3031_vm4, %v11300_v26, 0.0 }
0x1302   : > { %v7291_v46 = vpop.permute.xlu1 %7290  ;;  %v7214_v63 = vpop.permute.xlu0 %7213  ;;  %7177 = vadd.xlane.f32.xlu1 %v7176_v58  ;;  %v7173_v6 = vsel %vm3031_vm4, %v11302_v47, 0.0 }
0x1303   : > { %9734 = vpow2.f32 %v7171_v36  ;;  %9393 = vmatpush3.msk.msra.mxu0 %vm3124_vm6, %v7291_v46  ;;  %7174 = vadd.xlane.f32.xlu0 %v7173_v6 }
0x1304   : > { %9736 = vpow2.f32 %v7169_v15  ;;  %9388 = vmatpush3.msk.msra.mxu1 %vm3124_vm6, %v7214_v63  ;;  %9402 = vmatprep.subr.mxu0 %v9814_v27 }
0x1305   : > { %v11311_v35 = vpop.eup %9726  ;;  %9397 = vmatprep.subr.mxu1 %v9814_v27 }
0x1306   : > { %v11314_v45 = vpop.eup %9728  ;;  %v7182_v51 = vsel %vm3031_vm4, %v11311_v35, 0.0 }
0x1307   : > { %7183 = vadd.xlane.f32.xlu1 %v7182_v51  ;;  %v7179_v21 = vsel %vm3031_vm4, %v11314_v45, 0.0  ;;  %v7891_v51 = vld [vmem:[%s11628_s14 + $0x8] sm:$0xff] }
0x1308   : > { %7180 = vadd.xlane.f32.xlu0 %v7179_v21 }
0x1309   : > { %v11320_v53 = vpop.eup %9730 }
0x130a   : > { %v11322_v43 = vpop.eup %9732  ;;  %v7188_v57 = vsel %vm3031_vm4, %v11320_v53, 0.0 }
0x130b   : > { %7189 = vadd.xlane.f32.xlu1 %v7188_v57  ;;  %v7185_v34 = vsel %vm3031_vm4, %v11322_v43, 0.0 }
0x130c   : > { %7186 = vadd.xlane.f32.xlu0 %v7185_v34  ;;  %v7892_v34 = vld [vmem:[%s11628_s14 + $0x10] sm:$0xff] }
0x130d   : > { %v11328_v7 = vpop.eup %9734 }
0x130e   : > { %v11330_v10 = vpop.eup %9736  ;;  %v7194_v30 = vsel %vm3031_vm4, %v11328_v7, 0.0 }
0x130f   : > { %7195 = vadd.xlane.f32.xlu1 %v7194_v30  ;;  %v7191_v11 = vsel %vm3031_vm4, %v11330_v10, 0.0  ;;  %vm8404_vm4 = vcmask 523264  }
0x1310   : > { %7192 = vadd.xlane.f32.xlu0 %v7191_v11 }
0x1320   : > { %7675 = vrot.lane.b32.xlu1 %v9796_v14, %s11692_s6 }
0x1324   : > { %5083 = vrot.lane.b32.xlu1 %v11042_v56, %s11667_s5  ;;  %v7445_v56 = vpop.permute.xlu0 %7444 }
0x1326   : > { %7752 = vrot.lane.b32.xlu0 %v9797_v54, %s11692_s6 }
0x1328   : > { %5087 = vrot.lane.b32.xlu1 %v11046_v50, %s11667_s5  ;;  %v7599_v50 = vpop.permute.xlu0 %7598 }
0x132a   : > { %5085 = vrot.lane.b32.xlu0 %v11040_v20, %s11667_s5  ;;  %v7368_v20 = vpop.permute.xlu1 %7367 }
0x132c   : > { %6460 = vrot.lane.b32.xlu1 %v11254_v29, %s11668_s28 }
0x132e   : > { %5089 = vrot.lane.b32.xlu0 %v11044_v59, %s11667_s5  ;;  %v7522_v59 = vpop.permute.xlu1 %7521 }
0x1330   : > { %6464 = vrot.lane.b32.xlu1 %v11260_v4, %s11668_s28 }
0x1332   : > { %6462 = vrot.lane.b32.xlu0 %v11256_v62, %s11668_s28 }
0x1334   : > { %5091 = vrot.lane.b32.xlu1 %v11050_v17, %s11667_s5 }
0x1336   : > { %6466 = vrot.lane.b32.xlu0 %v11258_v16, %s11668_s28 }
0x1338   : > { %5095 = vrot.lane.b32.xlu1 %v11052_v37, %s11667_s5 }
0x133a   : > { %5093 = vrot.lane.b32.xlu0 %v11048_v52, %s11667_s5 }
0x133c   : > { %6468 = vrot.lane.b32.xlu1 %v11264_v3, %s11668_s28 }
0x133e   : > { %5097 = vrot.lane.b32.xlu0 %v11057_v25, %s11667_s5  ;;  %s707_s5 = scalar_lea.vmem %s11635_s21, %s9944_s26 }
0x1340   : > { %6472 = vrot.lane.b32.xlu1 %v11268_v12, %s11668_s28 }
0x1342   : > { %6470 = vrot.lane.b32.xlu0 %v11262_v28, %s11668_s28 }
0x1346   : > { %6474 = vrot.lane.b32.xlu0 %v11266_v61, %s11668_s28 }
0x138f   : > { %v7178_v52 = vpop.xlane.xlu1 %7177 }
0x1390   : > { %9738 = vrcp.f32 %v7178_v52  ;;  %v7175_v17 = vpop.xlane.xlu0 %7174 }
0x1391   : > { %9740 = vrcp.f32 %v7175_v17 }
0x1394   : > { %v7184_v37 = vpop.xlane.xlu1 %7183 }
0x1395   : > { %9742 = vrcp.f32 %v7184_v37  ;;  %v7181_v25 = vpop.xlane.xlu0 %7180 }
0x1396   : > { %9744 = vrcp.f32 %v7181_v25 }
0x1398   : > { %v7190_v29 = vpop.xlane.xlu1 %7189 }
0x1399   : > { %9746 = vrcp.f32 %v7190_v29  ;;  %v7187_v62 = vpop.xlane.xlu0 %7186 }
0x139a   : > { %v9739_v16 = vpop.eup %9738  ;;  %9748 = vrcp.f32 %v7187_v62 }
0x139b   : > { %v9741_v4 = vpop.eup %9740  ;;  %v7206_v28 = vmul.f32 %v9739_v16, %v11300_v26 }
0x139c   : > { %v7205_v3 = vmul.f32 %v9741_v4, %v11302_v47  ;;  %v7196_v61 = vpop.xlane.xlu1 %7195 }
0x139d   : > { %9750 = vrcp.f32 %v7196_v61  ;;  %v7193_v12 = vpop.xlane.xlu0 %7192  ;;  %9395 = vmatmul.mubr.msk.f32.vlgmr.msra.gmra.mrb[70].mxu0 %vm3120_vm9, %v7206_v28 }
0x139e   : > { %9752 = vrcp.f32 %v7193_v12  ;;  %9390 = vmatmul.mubr.msk.f32.vlgmr.msra.gmra.mrb[74].mxu1 %vm3120_vm9, %v7205_v3  ;;  %9403 = vmatpush3.msk.msra.mxu0 %vm3124_vm6, %v7445_v56 }
0x139f   : > { %v9743_v40 = vpop.eup %9742  ;;  %9398 = vmatpush3.msk.msra.mxu1 %vm3124_vm6, %v7368_v20  ;;  %9399 = vmatprep.mubr.msk.f32.mxu1 %vm9818_vm2, %v9814_v27 }
0x13a0   : > { %v9745_v32 = vpop.eup %9744  ;;  %v7208_v19 = vmul.f32 %v9743_v40, %v11311_v35  ;;  %v7676_v60 = vpop.permute.xlu1 %7675  ;;  %9404 = vmatprep.mubr.msk.f32.mxu0 %vm9818_vm2, %v9814_v27  ;;  %9407 = vmatprep.subr.mxu1 %v9814_v27 }
0x13a1   : > { %v7207_v31 = vmul.f32 %v9745_v32, %v11314_v45  ;;  %v7753_v42 = vpop.permute.xlu0 %7752  ;;  %9412 = vmatprep.subr.mxu0 %v9814_v27  ;;  %v7890_v45 = vld [vmem:[%s11628_s14] sm:$0xff] }
0x13a2   : > { %9405 = vmatmul.mubr.msk.f32.vlgmr.msra.gmra.mrb[72].mxu0 %vm3120_vm9, %v7208_v19 }
0x13a3   : > { %v9747_v24 = vpop.eup %9746  ;;  %9400 = vmatmul.mubr.msk.f32.vlgmr.msra.gmra.mrb[76].mxu1 %vm3120_vm9, %v7207_v31  ;;  %9413 = vmatpush3.msk.msra.mxu0 %vm3124_vm6, %v7599_v50 }
0x13a4   : > { %v9749_v48 = vpop.eup %9748  ;;  %v7210_v39 = vmul.f32 %v9747_v24, %v11320_v53  ;;  %9408 = vmatpush3.msk.msra.mxu1 %vm3124_vm6, %v7522_v59  ;;  %v5084_v22 = vpop.permute.xlu1 %5083  ;;  %9409 = vmatprep.mubr.msk.f32.mxu1 %vm9818_vm2, %v9814_v27 }
0x13a5   : > { %v7209_v2 = vmul.f32 %v9749_v48, %v11322_v43  ;;  %5108 = vst.msk [vmem:[#allocation9] sm:$0xf] %vm5107_vm1, %v5084_v22  ;;  %v5086_v23 = vpop.permute.xlu0 %5085  ;;  %9414 = vmatprep.mubr.msk.f32.mxu0 %vm9818_vm2, %v9814_v27  ;;  %9417 = vmatprep.subr.mxu1 %v9814_v27  ;;  %v9523_v43 = vpack.c.bf16 %v7891_v51, %v7890_v45 }
0x13a6   : > { %5109 = vst.msk [vmem:[#allocation9 + $0x4] sm:$0xf] %vm5107_vm1, %v5086_v23  ;;  %9422 = vmatprep.subr.mxu0 %v9814_v27  ;;  %9415 = vmatmul.mubr.msk.f32.vlgmr.msra.gmra.mrb[74].mxu0 %vm3120_vm9, %v7210_v39 }
0x13a7   : > { %v9751_v1 = vpop.eup %9750  ;;  %9410 = vmatmul.mubr.msk.f32.vlgmr.msra.gmra.mrb[78].mxu1 %vm3120_vm9, %v7209_v2  ;;  %9423 = vmatpush3.msk.msra.mxu0 %vm3124_vm6, %v7753_v42 }
0x13a8   : > { %v9753_v55 = vpop.eup %9752  ;;  %v7212_v18 = vmul.f32 %v9751_v1, %v11328_v7  ;;  %9418 = vmatpush3.msk.msra.mxu1 %vm3124_vm6, %v7676_v60  ;;  %v5088_v49 = vpop.permute.xlu1 %5087  ;;  %9419 = vmatprep.mubr.msk.f32.mxu1 %vm9818_vm2, %v9814_v27  ;;  %v7893_v7 = vld [vmem:[%s11628_s14 + $0x18] sm:$0xff]  ;;  %v7998_v1 = vld [vmem:[%s11693_s25] sm:$0xff] }
0x13a9   : > { %v7211_v38 = vmul.f32 %v9753_v55, %v11330_v10  ;;  %5110 = vst.msk [vmem:[#allocation9 + $0x8] sm:$0xf] %vm5107_vm1, %v5088_v49  ;;  %v5090_v5 = vpop.permute.xlu0 %5089  ;;  %9424 = vmatprep.mubr.msk.f32.mxu0 %vm9818_vm2, %v9814_v27  ;;  %9524 = vmatprep.subr.bf16.mxu1 %v9523_v43  ;;  %v9527_v30 = vpack.c.bf16 %v7893_v7, %v7892_v34  ;;  %vm7861_vm2 = vcmask 257216   ;;  %v8773_v55 = vld [vmem:[%s11629_s15] ss:$0 sm:$0xff] }
0x13aa   : > { %5111 = vst.msk [vmem:[#allocation9 + $0xc] sm:$0xf] %vm5107_vm1, %v5090_v5  ;;  %9425 = vmatmul.mubr.msk.f32.vlgmr.msra.gmra.mrb[76].mxu0 %vm3120_vm9, %v7212_v18 }
0x13ab   : > { %9420 = vmatmul.mubr.msk.f32.vlgmr.msra.gmra.mrb[80].mxu1 %vm3120_vm9, %v7211_v38  ;;  %9449 = vmatprep.mubr.msk.f32.mxu0 %vm714_vm0, %v7998_v1 }
0x13ac   : > { %v6461_v44 = vpop.permute.xlu1 %6460  ;;  %9526 = vmatpush3.bf16.msra.mxu1 %v9523_v43 }
0x13ad   : > { %6485 = vst.msk [vmem:[#allocation9] sm:$0xf] %vm6484_vm15, %v6461_v44  ;;  %v6463_v33 = vpop.permute.xlu0 %6462  ;;  %9528 = vmatprep.subr.bf16.mxu1 %v9527_v30 }
0x13ae   : > { %6486 = vst.msk [vmem:[#allocation9 + $0x4] sm:$0xf] %vm6484_vm15, %v6463_v33 }
0x13b0   : > { %v6465_v41 = vpop.permute.xlu1 %6464  ;;  %9530 = vmatpush3.bf16.msra.mxu1 %v9527_v30 }
0x13b1   : > { %6487 = vst.msk [vmem:[#allocation9 + $0x8] sm:$0xf] %vm6484_vm15, %v6465_v41  ;;  %v6467_v26 = vpop.permute.xlu0 %6466 }
0x13b2   : > { %6488 = vst.msk [vmem:[#allocation9 + $0xc] sm:$0xf] %vm6484_vm15, %v6467_v26 }
0x13b4   : > { %v5092_v27 = vpop.permute.xlu1 %5091 }
0x13b5   : > { %5112 = vst.msk [vmem:[#allocation9 + $0x10] sm:$0xf] %vm5107_vm1, %v5092_v27  ;;  %v5094_v47 = vpop.permute.xlu0 %5093 }
0x13b6   : > { %5113 = vst.msk [vmem:[#allocation9 + $0x14] sm:$0xf] %vm5107_vm1, %v5094_v47 }
0x13b8   : > { %v5096_v36 = vpop.permute.xlu1 %5095 }
0x13b9   : > { %5114 = vst.msk [vmem:[#allocation9 + $0x18] sm:$0xf] %vm5107_vm1, %v5096_v36  ;;  %v5098_v15 = vpop.permute.xlu0 %5097  ;;  %v7999_v36 = vld [vmem:[%s11693_s25 + $0x8] sm:$0xff] }
0x13ba   : > { %5115 = vst.msk [vmem:[#allocation9 + $0x1c] sm:$0xf] %vm5107_vm1, %v5098_v15  ;;  %v8000_v15 = vld [vmem:[%s11693_s25 + $0x10] sm:$0xff] }
0x13bc   : > { %v6469_v58 = vpop.permute.xlu1 %6468 }
0x13bd   : > { %6489 = vst.msk [vmem:[#allocation9 + $0x10] sm:$0xf] %vm6484_vm15, %v6469_v58  ;;  %v6471_v46 = vpop.permute.xlu0 %6470  ;;  %v8001_v58 = vld [vmem:[%s11693_s25 + $0x18] sm:$0xff] }
0x13be   : > { %6490 = vst.msk [vmem:[#allocation9 + $0x14] sm:$0xf] %vm6484_vm15, %v6471_v46 }
0x13c0   : > { %v6473_v63 = vpop.permute.xlu1 %6472 }
0x13c1   : > { %6491 = vst.msk [vmem:[#allocation9 + $0x18] sm:$0xf] %vm6484_vm15, %v6473_v63  ;;  %v6475_v6 = vpop.permute.xlu0 %6474 }
0x13c2   : > { %6492 = vst.msk [vmem:[#allocation9 + $0x1c] sm:$0xf] %vm6484_vm15, %v6475_v6 }
0x1470   : > { %v7363_v35 = vpop.f32.mrb[70].mxu0 }
0x1471   : > { %v7286_v21 = vpop.f32.mrb[74].mxu1  ;;  %v9396_v53 = vpop.f32.mrb[71].mxu0  ;;  %7839 = vrot.lane.b32.xlu0 %v7363_v35, %s11669_s29 }
0x1472   : > { %7837 = vrot.lane.b32.xlu1 %v7286_v21, %s11669_s29  ;;  %v9391_v57 = vpop.f32.mrb[75].mxu1 }
0x1475   : > { %v7517_v10 = vpop.f32.mrb[72].mxu0 }
0x1476   : > { %v7440_v11 = vpop.f32.mrb[76].mxu1  ;;  %7843 = vrot.lane.b32.xlu0 %v7517_v10, %s11669_s29  ;;  %v9406_v14 = vpop.f32.mrb[73].mxu0 }
0x1477   : > { %7841 = vrot.lane.b32.xlu1 %v7440_v11, %s11669_s29  ;;  %v9401_v54 = vpop.f32.mrb[77].mxu1 }
0x1479   : > { %v7671_v20 = vpop.f32.mrb[74].mxu0 }
0x147a   : > { %v7594_v56 = vpop.f32.mrb[78].mxu1  ;;  %7847 = vrot.lane.b32.xlu0 %v7671_v20, %s11669_s29  ;;  %v9416_v59 = vpop.f32.mrb[75].mxu0 }
0x147b   : > { %7845 = vrot.lane.b32.xlu1 %v7594_v56, %s11669_s29  ;;  %v9411_v50 = vpop.f32.mrb[79].mxu1 }
0x147d   : > { %v7825_v52 = vpop.f32.mrb[76].mxu0 }
0x147e   : > { %v7748_v17 = vpop.f32.mrb[80].mxu1  ;;  %7851 = vrot.lane.b32.xlu0 %v7825_v52, %s11669_s29  ;;  %v9426_v37 = vpop.f32.mrb[77].mxu0 }
0x147f   : > { %7849 = vrot.lane.b32.xlu1 %v7748_v17, %s11669_s29  ;;  %v9421_v25 = vpop.f32.mrb[81].mxu1 }
0x14e3   : > { %v7840_v29 = vpop.permute.xlu0 %7839 }
0x14e4   : > { %7863 = vst.msk [vmem:[#allocation9 + $0x4] sm:$0xf] %vm7861_vm2, %v7840_v29  ;;  %v7838_v62 = vpop.permute.xlu1 %7837 }
0x14e5   : > { %7862 = vst.msk [vmem:[#allocation9] sm:$0xf] %vm7861_vm2, %v7838_v62 }
0x14e8   : > { %v7844_v16 = vpop.permute.xlu0 %7843 }
0x14e9   : > { %7865 = vst.msk [vmem:[#allocation9 + $0xc] sm:$0xf] %vm7861_vm2, %v7844_v16  ;;  %v7842_v4 = vpop.permute.xlu1 %7841 }
0x14ea   : > { %7864 = vst.msk [vmem:[#allocation9 + $0x8] sm:$0xf] %vm7861_vm2, %v7842_v4  ;;  %v8173_v4 = vld [vmem:[%s11631_s17] sm:$0xff] }
0x14eb   : > { %v7871_v28 = vld [vmem:[#allocation9 + $0x4] sm:$0xf] }
0x14ec   : > { %7879 = vst.msk [vmem:[#allocation10 + $0x4] sm:$0xf] %vm2252_vm8, %v7871_v28  ;;  %v7870_v3 = vld [vmem:[#allocation9] sm:$0xf]  ;;  %v7848_v61 = vpop.permute.xlu0 %7847  ;;  %v8174_v28 = vld [vmem:[%s11631_s17 + $0x8] sm:$0xff] }
0x14ed   : > { %7878 = vst.msk [vmem:[#allocation10] sm:$0xf] %vm2252_vm8, %v7870_v3  ;;  %v7846_v12 = vpop.permute.xlu1 %7845  ;;  %v9539_v3 = vpack.c.bf16 %v8174_v28, %v8173_v4 }
0x14ee   : > { %7867 = vst.msk [vmem:[#allocation9 + $0x14] sm:$0xf] %vm7861_vm2, %v7848_v61  ;;  %7866 = vst.msk [vmem:[#allocation9 + $0x10] sm:$0xf] %vm7861_vm2, %v7846_v12  ;;  %v8175_v61 = vld [vmem:[%s11631_s17 + $0x10] sm:$0xff]  ;;  %v8176_v12 = vld [vmem:[%s11631_s17 + $0x18] sm:$0xff] }
0x14ef   : > { %9540 = vmatprep.subr.bf16.mxu1 %v9539_v3 }
0x14f0   : > { %v7873_v40 = vld [vmem:[#allocation9 + $0xc] sm:$0xf]  ;;  %v7852_v32 = vpop.permute.xlu0 %7851 }
0x14f1   : > { %7881 = vst.msk [vmem:[#allocation10 + $0xc] sm:$0xf] %vm2252_vm8, %v7873_v40  ;;  %v7872_v19 = vld [vmem:[#allocation9 + $0x8] sm:$0xf]  ;;  %v7850_v60 = vpop.permute.xlu1 %7849  ;;  %v9543_v40 = vpack.c.bf16 %v8176_v12, %v8175_v61 }
0x14f2   : > { %7869 = vst.msk [vmem:[#allocation9 + $0x1c] sm:$0xf] %vm7861_vm2, %v7852_v32  ;;  %7868 = vst.msk [vmem:[#allocation9 + $0x18] sm:$0xf] %vm7861_vm2, %v7850_v60 }
0x14f3   : > { %7880 = vst.msk [vmem:[#allocation10 + $0x8] sm:$0xf] %vm2252_vm8, %v7872_v19 }
0x14f4   : > { %v7886_v42 = vld [vmem:[#allocation10] sm:$0xff] }
0x14f5   : > { %v7875_v31 = vld [vmem:[#allocation9 + $0x14] sm:$0xf]  ;;  %v7874_v24 = vld [vmem:[#allocation9 + $0x10] sm:$0xf]  ;;  %9435 = vmatprep.mubr.msk.f32.mxu1 %vm714_vm0, %v7886_v42 }
0x14f6   : > { %7883 = vst.msk [vmem:[#allocation10 + $0x14] sm:$0xf] %vm2252_vm8, %v7875_v31  ;;  %7882 = vst.msk [vmem:[#allocation10 + $0x10] sm:$0xf] %vm2252_vm8, %v7874_v24 }
0x14f9   : > { %v7877_v48 = vld [vmem:[#allocation9 + $0x1c] sm:$0xf]  ;;  %v7876_v39 = vld [vmem:[#allocation9 + $0x18] sm:$0xf] }
0x14fa   : > { %7885 = vst.msk [vmem:[#allocation10 + $0x1c] sm:$0xf] %vm2252_vm8, %v7877_v48  ;;  %v7887_v22 = vld [vmem:[#allocation10 + $0x8] sm:$0xff]  ;;  %7884 = vst.msk [vmem:[#allocation10 + $0x18] sm:$0xf] %vm2252_vm8, %v7876_v39 }
0x14fb   : > { %9436 = vmatmul.mubr.msk.f32.vlgmr.msra.gmra.mrb[82].mxu1 %vm714_vm0, %v7887_v22 }
0x14fc   : > { %9542 = vmatpush3.bf16.msra.mxu1 %v9539_v3 }
0x14fd   : > { %v7888_v2 = vld [vmem:[#allocation10 + $0x10] sm:$0xff]  ;;  %9544 = vmatprep.subr.bf16.mxu1 %v9543_v40 }
0x14fe   : > { %9438 = vmatprep.mubr.msk.f32.mxu1 %vm714_vm0, %v7888_v2 }
0x1500   : > { %9546 = vmatpush3.bf16.msra.mxu1 %v9543_v40 }
0x1501   : > { %v7889_v23 = vld [vmem:[#allocation10 + $0x18] sm:$0xff] }
0x1502   : > { %9439 = vmatmul.mubr.msk.f32.gmra.mrb[84].mxu1 %vm714_vm0, %v7889_v23 }
0x15ce   : > { %v9437_v18 = vpop.f32.mrb[82].mxu1 }
0x15cf   : > { %v7985_v49 = vadd.f32 %v9437_v18, %v8773_v55  ;;  %v7979_v38 = vpop.f32.mrb[83].mxu1  ;;  %v8782_v18 = vld [vmem:[%s11630_s16] ss:$0 sm:$0xff] }
0x15d0   : > { %v7980_v5 = vadd.f32 %v8773_v55, %v7979_v38 }
0x15d2   : > { %v9531_v44 = vpack.c.bf16 %v7985_v49, %v7980_v5 }
0x15d4   : > { %9532 = vmatprep.subr.bf16.mxu0 %v9531_v44 }
0x15d5   : > { %9534 = vmatpush3.bf16.msra.mxu0 %v9531_v44  ;;  %v9440_v33 = vpop.f32.mrb[84].mxu1  ;;  %v8783_v44 = vld [vmem:[%s11630_s16 + $0x1] ss:$0 sm:$0xff] }
0x15d6   : > { %v7995_v41 = vadd.f32 %v9440_v33, %v8773_v55  ;;  %v7989_v26 = vpop.f32.mrb[85].mxu1 }
0x15d7   : > { %v7990_v27 = vadd.f32 %v8773_v55, %v7989_v26 }
0x15d9   : > { %v9535_v47 = vpack.c.bf16 %v7995_v41, %v7990_v27 }
0x15db   : > { %9536 = vmatprep.subr.bf16.mxu0 %v9535_v47 }
0x15dc   : > { %9538 = vmatpush3.bf16.msra.mxu0 %v9535_v47 }
0x15df   : > { %9450 = vmatmul.mubr.msk.f32.vlgmr.msra.gmra.mrb[78].mxu0 %vm714_vm0, %v7999_v36 }
0x15e0   : > { %9452 = vmatprep.mubr.msk.f32.mxu0 %vm714_vm0, %v8000_v15 }
0x15e3   : > { %9453 = vmatmul.mubr.msk.f32.gmra.mrb[80].mxu0 %vm714_vm0, %v8001_v58 }
0x16b2   : > { %v9451_v46 = vpop.f32.mrb[78].mxu0 }
0x16b3   : > { %v11484_v63 = vadd.f32 %v9451_v46, %v10277_v8  ;;  %v8080_v6 = vpop.f32.mrb[79].mxu0 }
0x16b4   : > { %v11487_v35 = vadd.f32 %v8080_v6, %v10279_v9 }
0x16b5   : > { %v8108_v45 = vsel %vm714_vm0, %v11484_v63, 0.0 }
0x16b6   : > { %8109 = vadd.xlane.f32.xlu0 %v8108_v45  ;;  %v9454_v51 = vpop.f32.mrb[80].mxu0  ;;  %v8105_v21 = vsel %vm714_vm0, %v11487_v35, 0.0 }
0x16b7   : > { %v11494_v53 = vadd.f32 %v9454_v51, %v10287_v13  ;;  %8106 = vadd.xlane.f32.xlu1 %v8105_v21  ;;  %v8090_v43 = vpop.f32.mrb[81].mxu0  ;;  %v8389_v21 = vld [vmem:[%s11633_s19] sm:$0xff] }
0x16b8   : > { %v11497_v8 = vadd.f32 %v8090_v43, %v10289_v0  ;;  %v8390_v43 = vld [vmem:[%s11633_s19 + $0x8] sm:$0xff] }
0x16b9   : > { %v8114_v9 = vsel %vm714_vm0, %v11494_v53, 0.0 }
0x16ba   : > { %v8111_v57 = vsel %vm714_vm0, %v11497_v8, 0.0 }
0x16bb   : > { %8115 = vadd.xlane.f32.xlu1 %v8114_v9  ;;  %8112 = vadd.xlane.f32.xlu0 %v8111_v57  ;;  %v9547_v9 = vpack.c.bf16 %v8390_v43, %v8389_v21  ;;  %v8391_v57 = vld [vmem:[%s11633_s19 + $0x10] sm:$0xff] }
0x16bd   : > { %9548 = vmatprep.subr.bf16.mxu0 %v9547_v9 }
0x16be   : > { %9550 = vmatpush3.bf16.msra.mxu0 %v9547_v9 }
0x1743   : > { %v8110_v34 = vpop.xlane.xlu0 %8109 }
0x1744   : > { %v8118_v7 = vmul.f32 0.03125, %v8110_v34  ;;  %v8107_v10 = vpop.xlane.xlu1 %8106  ;;  %v8392_v34 = vld [vmem:[%s11633_s19 + $0x18] sm:$0xff] }
0x1745   : > { %v8117_v30 = vmul.f32 0.03125, %v8107_v10  ;;  %v8393_v10 = vld [vmem:[%s11633_s19 + $0x20] sm:$0xff] }
0x1746   : > { %v8122_v13 = vsub.f32 %v11484_v63, %v8118_v7  ;;  %v9551_v7 = vpack.c.bf16 %v8392_v34, %v8391_v57 }
0x1747   : > { %v8121_v11 = vsub.f32 %v11487_v35, %v8117_v30  ;;  %v8394_v30 = vld [vmem:[%s11633_s19 + $0x28] sm:$0xff] }
0x1748   : > { %v8116_v14 = vpop.xlane.xlu1 %8115  ;;  %v8113_v54 = vpop.xlane.xlu0 %8112  ;;  %v8126_v0 = vmul.f32 %v8122_v13, %v8122_v13  ;;  %9552 = vmatprep.subr.bf16.mxu0 %v9551_v7 }
0x1749   : > { %v8120_v20 = vmul.f32 0.03125, %v8116_v14  ;;  %v8119_v56 = vmul.f32 0.03125, %v8113_v54  ;;  %v8125_v59 = vmul.f32 %v8121_v11, %v8121_v11  ;;  %9554 = vmatpush3.bf16.msra.mxu0 %v9551_v7  ;;  %v8396_v14 = vld [vmem:[%s11633_s19 + $0x38] sm:$0xff] }
0x174a   : > { %v8132_v50 = vsel %vm714_vm0, %v8126_v0, 0.0  ;;  %v8784_v0 = vld [vmem:[%s11632_s18] ss:$0 sm:$0xff] }
0x174b   : > { %v8124_v52 = vsub.f32 %v11494_v53, %v8120_v20  ;;  %v8123_v17 = vsub.f32 %v11497_v8, %v8119_v56  ;;  %8133 = vadd.xlane.f32.xlu1 %v8132_v50  ;;  %v8129_v37 = vsel %vm714_vm0, %v8125_v59, 0.0 }
0x174c   : > { %8130 = vadd.xlane.f32.xlu0 %v8129_v37 }
0x174d   : > { %v8128_v25 = vmul.f32 %v8124_v52, %v8124_v52  ;;  %v8127_v29 = vmul.f32 %v8123_v17, %v8123_v17 }
0x174f   : > { %v8138_v62 = vsel %vm714_vm0, %v8128_v25, 0.0  ;;  %v8135_v16 = vsel %vm714_vm0, %v8127_v29, 0.0 }
0x1750   : > { %8139 = vadd.xlane.f32.xlu1 %v8138_v62  ;;  %8136 = vadd.xlane.f32.xlu0 %v8135_v16 }
0x17d8   : > { %v8134_v32 = vpop.xlane.xlu1 %8133 }
0x17d9   : > { %v8142_v19 = vmul.f32 0.03125, %v8134_v32  ;;  %v8131_v60 = vpop.xlane.xlu0 %8130 }
0x17da   : > { %v8141_v31 = vmul.f32 0.03125, %v8131_v60 }
0x17db   : > { %v8146_v42 = vadd.f32 1e-12, %v8142_v19 }
0x17dc   : > { %v8145_v24 = vadd.f32 1e-12, %v8141_v31 }
0x17dd   : > { %9754 = vrsqrt.f32 %v8146_v42  ;;  %v8140_v48 = vpop.xlane.xlu1 %8139  ;;  %v8137_v39 = vpop.xlane.xlu0 %8136 }
0x17de   : > { %9756 = vrsqrt.f32 %v8145_v24  ;;  %v8144_v22 = vmul.f32 0.03125, %v8140_v48  ;;  %v8143_v2 = vmul.f32 0.03125, %v8137_v39 }
0x17e0   : > { %v8148_v23 = vadd.f32 1e-12, %v8144_v22  ;;  %v8147_v1 = vadd.f32 1e-12, %v8143_v2 }
0x17e2   : > { %9758 = vrsqrt.f32 %v8148_v23 }
0x17e3   : > { %9760 = vrsqrt.f32 %v8147_v1 }
0x17e7   : > { %v9755_v55 = vpop.eup %9754 }
0x17e8   : > { %v9757_v49 = vpop.eup %9756  ;;  %v8154_v38 = vmul.f32 %v9755_v55, %v8122_v13  ;;  %v9555_v13 = vpack.c.bf16 %v8394_v30, %v8393_v10 }
0x17e9   : > { %v8153_v5 = vmul.f32 %v9757_v49, %v8121_v11  ;;  %v8395_v11 = vld [vmem:[%s11633_s19 + $0x30] sm:$0xff] }
0x17ea   : > { %v8162_v33 = vmul.f32 %v8782_v18, %v8154_v38  ;;  %9556 = vmatprep.subr.bf16.mxu0 %v9555_v13  ;;  %v9559_v54 = vpack.c.bf16 %v8396_v14, %v8395_v11 }
0x17eb   : > { %v8161_v41 = vmul.f32 %v8782_v18, %v8153_v5  ;;  %9558 = vmatpush3.bf16.msra.mxu0 %v9555_v13 }
0x17ec   : > { %v9759_v26 = vpop.eup %9758  ;;  %v8170_v15 = vadd.f32 %v8783_v44, %v8162_v33  ;;  %9560 = vmatprep.subr.bf16.mxu0 %v9559_v54 }
0x17ed   : > { %v9761_v27 = vpop.eup %9760  ;;  %v8169_v47 = vadd.f32 %v8783_v44, %v8161_v41  ;;  %v8156_v36 = vmul.f32 %v9759_v26, %v8124_v52 }
0x17ee   : > { %v8155_v58 = vmul.f32 %v9761_v27, %v8123_v17 }
0x17ef   : > { %9463 = vmatprep.mubr.msk.f32.mxu1 %vm714_vm0, %v8169_v47  ;;  %v8164_v46 = vmul.f32 %v8782_v18, %v8156_v36  ;;  %9562 = vmatpush3.bf16.msra.mxu0 %v9559_v54 }
0x17f0   : > { %9464 = vmatmul.mubr.msk.f32.vlgmr.msra.gmra.mrb[86].mxu1 %vm714_vm0, %v8170_v15  ;;  %v8163_v6 = vmul.f32 %v8782_v18, %v8155_v58 }
0x17f1   : > { %v8172_v45 = vadd.f32 %v8783_v44, %v8164_v46 }
0x17f2   : > { %v8171_v51 = vadd.f32 %v8783_v44, %v8163_v6 }
0x17f4   : > { %9466 = vmatprep.mubr.msk.f32.mxu1 %vm714_vm0, %v8171_v51 }
0x17f5   : > { %9467 = vmatmul.mubr.msk.f32.gmra.mrb[88].mxu1 %vm714_vm0, %v8172_v45 }
0x18c3   : > { %v9465_v20 = vpop.f32.mrb[86].mxu1 }
0x18c4   : > { %v11560_v56 = vadd.f32 %v9465_v20, %v8784_v0  ;;  %v8262_v59 = vpop.f32.mrb[87].mxu1 }
0x18c5   : > { %v11562_v50 = vadd.f32 %v8784_v0, %v8262_v59 }
0x18c6   : > { %v11565_v52 = vmul.f32 0.70710677, %v11560_v56 }
0x18c7   : > { %v11568_v17 = vmul.f32 0.70710677, %v11562_v50 }
0x18c8   : > { %v8286_v37 = vand.u32 2147483647, %v11565_v52  ;;  %v9468_v25 = vpop.f32.mrb[88].mxu1  ;;  %vm8366_vm8 = vcmp.ge.f32.partialorder %v11565_v52, 0.0 }
0x18c9   : > { %v8285_v29 = vand.u32 2147483647, %v11568_v17  ;;  %v11572_v62 = vadd.f32 %v9468_v25, %v8784_v0  ;;  %v8272_v16 = vpop.f32.mrb[89].mxu1  ;;  %vm8365_vm3 = vcmp.ge.f32.partialorder %v11568_v17, 0.0 }
0x18ca   : > { %v8290_v4 = vmul.f32 0.3275911, %v8286_v37  ;;  %v11574_v28 = vadd.f32 %v8784_v0, %v8272_v16  ;;  %v8342_v39 = vsub.f32 0.0, %v8286_v37 }
0x18cb   : > { %v8289_v3 = vmul.f32 0.3275911, %v8285_v29  ;;  %v11577_v61 = vmul.f32 0.70710677, %v11572_v62  ;;  %v8341_v22 = vsub.f32 0.0, %v8285_v29 }
0x18cc   : > { %v8294_v12 = vadd.f32 1.0, %v8290_v4  ;;  %v11580_v40 = vmul.f32 0.70710677, %v11574_v28  ;;  %v8346_v23 = vmul.f32 %v8342_v39, %v8286_v37 }
0x18cd   : > { %v8293_v32 = vadd.f32 1.0, %v8289_v3  ;;  %v8288_v19 = vand.u32 2147483647, %v11577_v61  ;;  %v8345_v18 = vmul.f32 %v8341_v22, %v8285_v29  ;;  %vm8368_vm7 = vcmp.ge.f32.partialorder %v11577_v61, 0.0  ;;  %v8789_v61 = vld [vmem:[%s11634_s20] ss:$0 sm:$0xff] }
0x18ce   : > { %9762 = vrcp.f32 %v8294_v12  ;;  %v8287_v60 = vand.u32 2147483647, %v11580_v40  ;;  %v8351_v33 = vmul.f32 1.442695, %v8346_v23  ;;  %vm8367_vm10 = vcmp.ge.f32.partialorder %v11580_v40, 0.0 }
0x18cf   : > { %9764 = vrcp.f32 %v8293_v32  ;;  %v8292_v31 = vmul.f32 0.3275911, %v8288_v19  ;;  %v8344_v49 = vsub.f32 0.0, %v8288_v19  ;;  %v8349_v47 = vmul.f32 1.442695, %v8345_v18 }
0x18d0   : > { %v8291_v42 = vmul.f32 0.3275911, %v8287_v60  ;;  %v8343_v5 = vsub.f32 0.0, %v8287_v60 }
0x18d1   : > { %v8296_v24 = vadd.f32 1.0, %v8292_v31  ;;  %v8348_v36 = vmul.f32 %v8344_v49, %v8288_v19 }
0x18d2   : > { %v8295_v48 = vadd.f32 1.0, %v8291_v42  ;;  %v8347_v6 = vmul.f32 %v8343_v5, %v8287_v60 }
0x18d3   : > { %9766 = vrcp.f32 %v8296_v24  ;;  %v8355_v57 = vmul.f32 1.442695, %v8348_v36 }
0x18d4   : > { %9768 = vrcp.f32 %v8295_v48  ;;  %v8353_v30 = vmul.f32 1.442695, %v8347_v6 }
0x18d5   : > { %9770 = vpow2.f32 %v8351_v33 }
0x18d6   : > { %9772 = vpow2.f32 %v8349_v47 }
0x18d7   : > { %9774 = vpow2.f32 %v8355_v57 }
0x18d8   : > { %v9763_v2 = vpop.eup %9762  ;;  %9776 = vpow2.f32 %v8353_v30 }
0x18d9   : > { %v9765_v1 = vpop.eup %9764  ;;  %v8306_v55 = vmul.f32 1.0614054, %v9763_v2 }
0x18da   : > { %v8305_v38 = vmul.f32 1.0614054, %v9765_v1 }
0x18db   : > { %v8310_v44 = vadd.f32 -1.4531521, %v8306_v55 }
0x18dc   : > { %v8309_v41 = vadd.f32 -1.4531521, %v8305_v38 }
0x18dd   : > { %v9767_v26 = vpop.eup %9766  ;;  %v8314_v27 = vmul.f32 %v9763_v2, %v8310_v44 }
0x18de   : > { %v9769_v15 = vpop.eup %9768  ;;  %v8313_v58 = vmul.f32 %v9765_v1, %v8309_v41  ;;  %v8308_v46 = vmul.f32 1.0614054, %v9767_v26 }
0x18df   : > { %v8318_v45 = vadd.f32 1.4214138, %v8314_v27  ;;  %v8307_v51 = vmul.f32 1.0614054, %v9769_v15  ;;  %v9771_v32 = vpop.eup %9770 }
0x18e0   : > { %v8317_v21 = vadd.f32 1.4214138, %v8313_v58  ;;  %v8312_v43 = vadd.f32 -1.4531521, %v8308_v46  ;;  %v9773_v31 = vpop.eup %9772  ;;  %v8377_v58 = vmul.f32 0.5, %v11562_v50  ;;  %v8379_v50 = vmul.f32 0.5, %v11574_v28 }
0x18e1   : > { %v8322_v9 = vmul.f32 %v9763_v2, %v8318_v45  ;;  %v8311_v34 = vadd.f32 -1.4531521, %v8307_v51  ;;  %v9775_v49 = vpop.eup %9774 }
0x18e2   : > { %v8321_v7 = vmul.f32 %v9765_v1, %v8317_v21  ;;  %v8316_v10 = vmul.f32 %v9767_v26, %v8312_v43  ;;  %v9777_v44 = vpop.eup %9776 }
0x18e3   : > { %v8326_v13 = vadd.f32 -0.28449672, %v8322_v9  ;;  %v8315_v11 = vmul.f32 %v9769_v15, %v8311_v34 }
0x18e4   : > { %v8325_v14 = vadd.f32 -0.28449672, %v8321_v7  ;;  %v8320_v54 = vadd.f32 1.4214138, %v8316_v10 }
0x18e5   : > { %v8330_v0 = vmul.f32 %v9763_v2, %v8326_v13  ;;  %v8319_v20 = vadd.f32 1.4214138, %v8315_v11 }
0x18e6   : > { %v8329_v59 = vmul.f32 %v9765_v1, %v8325_v14  ;;  %v8324_v37 = vmul.f32 %v9767_v26, %v8320_v54 }
0x18e7   : > { %v8334_v25 = vadd.f32 0.2548296, %v8330_v0  ;;  %v8323_v29 = vmul.f32 %v9769_v15, %v8319_v20 }
0x18e8   : > { %v8333_v16 = vadd.f32 0.2548296, %v8329_v59  ;;  %v8328_v4 = vadd.f32 -0.28449672, %v8324_v37 }
0x18e9   : > { %v8338_v3 = vmul.f32 %v9763_v2, %v8334_v25  ;;  %v8327_v12 = vadd.f32 -0.28449672, %v8323_v29 }
0x18ea   : > { %v8337_v19 = vmul.f32 %v9765_v1, %v8333_v16  ;;  %v8332_v60 = vmul.f32 %v9767_v26, %v8328_v4 }
0x18eb   : > { %v8358_v42 = vmul.f32 %v9771_v32, %v8338_v3  ;;  %v8331_v24 = vmul.f32 %v9769_v15, %v8327_v12 }
0x18ec   : > { %v8357_v48 = vmul.f32 %v9773_v31, %v8337_v19  ;;  %v8336_v39 = vadd.f32 0.2548296, %v8332_v60 }
0x18ed   : > { %v8362_v22 = vsub.f32 1.0, %v8358_v42  ;;  %v8335_v23 = vadd.f32 0.2548296, %v8331_v24 }
0x18ee   : > { %v8361_v55 = vsub.f32 1.0, %v8357_v48  ;;  %v8340_v18 = vmul.f32 %v9767_v26, %v8336_v39  ;;  %v8378_v26 = vmul.f32 0.5, %v11560_v56  ;;  %v8380_v56 = vmul.f32 0.5, %v11572_v62 }
0x18ef   : > { %v8370_v38 = vsub.f32 0.0, %v8362_v22  ;;  %v8339_v5 = vmul.f32 %v9769_v15, %v8335_v23 }
0x18f0   : > { %v8369_v2 = vsub.f32 0.0, %v8361_v55  ;;  %v8360_v33 = vmul.f32 %v9775_v49, %v8340_v18 }
0x18f1   : > { %v8374_v41 = vsel %vm8366_vm8, %v8362_v22, %v8370_v38  ;;  %v8359_v1 = vmul.f32 %v9777_v44, %v8339_v5 }
0x18f2   : > { %v8382_v27 = vadd.f32 1.0, %v8374_v41  ;;  %v8373_v47 = vsel %vm8365_vm3, %v8361_v55, %v8369_v2  ;;  %v8364_v36 = vsub.f32 1.0, %v8360_v33 }
0x18f3   : > { %v8381_v46 = vadd.f32 1.0, %v8373_v47  ;;  %v8363_v6 = vsub.f32 1.0, %v8359_v1 }
0x18f4   : > { %v8372_v45 = vsub.f32 0.0, %v8364_v36  ;;  %v8386_v51 = vmul.f32 %v8382_v27, %v8378_v26 }
0x18f5   : > { %v8385_v15 = vmul.f32 %v8381_v46, %v8377_v58  ;;  %v8371_v52 = vsub.f32 0.0, %v8363_v6 }
0x18f6   : > { %v8376_v21 = vsel %vm8368_vm7, %v8364_v36, %v8372_v45 }
0x18f7   : > { %v8384_v17 = vadd.f32 1.0, %v8376_v21  ;;  %v8375_v43 = vsel %vm8367_vm10, %v8363_v6, %v8371_v52  ;;  %9485 = vmatprep.mubr.msk.f32.mxu0 %vm8404_vm4, %v8385_v15 }
0x18f8   : > { %v8383_v9 = vadd.f32 1.0, %v8375_v43  ;;  %9486 = vmatmul.mubr.msk.f32.vlgmr.msra.gmra.mrb[82].mxu0 %vm8404_vm4, %v8386_v51 }
0x18f9   : > { %v8388_v34 = vmul.f32 %v8384_v17, %v8380_v56 }
0x18fa   : > { %v8387_v57 = vmul.f32 %v8383_v9, %v8379_v50 }
0x18fc   : > { %9488 = vmatprep.mubr.msk.f32.mxu0 %vm8404_vm4, %v8387_v57 }
0x18fd   : > { %9489 = vmatmul.mubr.msk.f32.gmra.mrb[84].mxu0 %vm8404_vm4, %v8388_v34 }
0x19cb   : > { %v9487_v40 = vpop.f32.mrb[82].mxu0 }
0x19cc   : > { %v8489_v7 = vadd.f32 %v9487_v40, %v8789_v61  ;;  %v8483_v10 = vpop.f32.mrb[83].mxu0 }
0x19cd   : > { %v8484_v28 = vadd.f32 %v8789_v61, %v8483_v10 }
0x19ce   : > { %v8503_v62 = vadd.f32 %v8489_v7, %v11484_v63 }
0x19cf   : > { %v8502_v30 = vadd.f32 %v8484_v28, %v11487_v35 }
0x19d0   : > { %8507 = vst.msk [vmem:[%s707_s5 + $0x8] sm:$0xff] %vm714_vm0, %v8503_v62  ;;  %v9490_v13 = vpop.f32.mrb[84].mxu0 }
0x19d1   : > { %8506 = vst.msk [vmem:[%s707_s5] sm:$0xff] %vm714_vm0, %v8502_v30  ;;  %v8499_v11 = vadd.f32 %v9490_v13, %v8789_v61  ;;  %v8493_v14 = vpop.f32.mrb[85].mxu0 }
0x19d2   : > { %v8494_v54 = vadd.f32 %v8789_v61, %v8493_v14 }
0x19d3   : > { %v8505_v0 = vadd.f32 %v8499_v11, %v11494_v53 }
0x19d4   : > { %v8504_v20 = vadd.f32 %v8494_v54, %v11497_v8 }
0x19d5   : > { %8509 = vst.msk [vmem:[%s707_s5 + $0x18] sm:$0xff] %vm714_vm0, %v8505_v0 }
0x19d6   : > { %8508 = vst.msk [vmem:[%s707_s5 + $0x10] sm:$0xff] %vm714_vm0, %v8504_v20 }
0x19d7 PF: > { %s31_s2 = sadd.s32 1, %s9804_s2  }
0x19d8   : > { %p28_p4 = scmp.ge.s32.totalorder %s31_s2, 4  }
0x19da   :  { %30 = sbr.rel (!%p28_p4) target bundleno = 9 (0x9), region = 173 }

</bundles_post_ra>
